<compile_context>
chip_gen: v6e
topology: v6e:2x2x1
jax: 0.10.0
libtpu: 0.0.40
codegen_flags: <defaults>
</compile_context>

<pallas_src>
import math

import numpy as np
import jax
import jax.numpy as jnp
from jax import lax
from jax.experimental import pallas as pl
from jax.experimental.pallas import tpu as pltpu

# ----------------------------- model config ---------------------------------
LIGAND_FEATURES = 8
PROTEIN_FEATURES = 10
JOINT_FEATURES = 16
HIDDEN_FEATURES = 32
N_EGNN_LAYERS = 2
EDGE_CUTOFF = (5.0, 5.0, 5.0)           # (ligand, protein, cross)
EGNN_VELOCITY_PARAMETRIZATION = True

N_LIGAND = 8
N_PROTEIN = 8
N_NODES = N_LIGAND + N_PROTEIN
POS_PAD = 8                              # positions carried as (N, 8): xyz + 5 zero lanes
OUT_LANES = 128                          # lane-dense output slab width

N_HEAD_W = 15                            # packed head weight arrays (emb_out folded into decoder)
PER_LAYER_W = 13                         # packed weight arrays per EGNN layer


# ------------------------------- fused kernel --------------------------------
def _fused_estimator_kernel(*refs):
    # refs = [t(SMEM), x_ligand, x_protein, pos(N,8), batch(N,1), mask(Nl,1),
    #         15 packed head weights, 2*13 packed layer weights, out_ref]
    t_ref, xl_ref, xp_ref, pos_ref, batch_ref, mask_ref = refs[:6]
    w = refs[6:-1]
    out_ref = refs[-1]

    (elw1, elb1, elw2, elb2,
     rw1, rb1, rw2, rb2,
     eiwf, eiwt, eib,
     dw1f, db1f, dw2, db2) = w[:N_HEAD_W]
    layer_w = w[N_HEAD_W:]

    N, Nl, Np = N_NODES, N_LIGAND, N_PROTEIN
    H, J = HIDDEN_FEATURES, JOINT_FEATURES
    f32 = jnp.float32

    t = t_ref[0]

    # ---------------- encoders (merged dual ligand MLP + protein MLP) -------
    xl = xl_ref[...]                                                    # (Nl, Fl)
    h1 = jax.nn.silu(jnp.dot(xl, elw1[...], preferred_element_type=f32) + elb1[...])
    h2 = jnp.dot(h1, elw2[...], preferred_element_type=f32) + elb2[...]  # (Nl, 2J) block-diag
    lmask = mask_ref[...] > 0.0                                          # (Nl, 1)
    h_lig = jnp.where(lmask, h2[:, :J], h2[:, J:2 * J])                  # atom vs fg encoder

    xp = xp_ref[...]                                                     # (Np, Fp)
    hp = jax.nn.silu(jnp.dot(xp, rw1[...], preferred_element_type=f32) + rb1[...])
    h_prot = jnp.dot(hp, rw2[...], preferred_element_type=f32) + rb2[...]

    h_feat = jnp.concatenate([h_lig, h_prot], axis=0)                    # (N, J)

    # ---------------- adjacency (get_edges) on ORIGINAL positions -----------
    pos0 = pos_ref[...]                                                  # (N, 8) cols 3..7 zero
    b = batch_ref[...]                                                   # (N, 1) int32
    same_batch = b == jnp.transpose(b)

    row = lax.broadcasted_iota(jnp.int32, (N, 1), 0)
    isp = row >= Nl                                                      # protein rows
    isl = jnp.logical_not(isp)

    def pairwise_sqdist(p):
        # ||x_i - x_j||^2 = r2_i + r2_j - 2 x_i.x_j  (one small MXU dot, no sqrt,
        # no coordinate-column transposes).
        r2 = jnp.sum(p * p, axis=1, keepdims=True)                       # (N, 1)
        g = lax.dot_general(p, p, (((1,), (1,)), ((), ())),
                            preferred_element_type=f32)                  # (N, N)
        return jnp.maximum(r2 + jnp.transpose(r2) - 2.0 * g, 0.0)

    d2_0 = pairwise_sqdist(pos0)

    prot_adj = jnp.logical_and(isp, jnp.transpose(isp))
    lig_adj = jnp.logical_and(isl, jnp.transpose(isl))
    cross_adj = jnp.logical_or(jnp.logical_and(isp, jnp.transpose(isl)),
                               jnp.logical_and(isl, jnp.transpose(isp)))
    cut_l, cut_p, cut_c = EDGE_CUTOFF
    if cut_l is not None:
        lig_adj = jnp.logical_and(lig_adj, d2_0 < cut_l * cut_l)
    if cut_p is not None:
        prot_adj = jnp.logical_and(prot_adj, d2_0 < cut_p * cut_p)
    if cut_c is not None:
        cross_adj = jnp.logical_and(cross_adj, d2_0 < cut_c * cut_c)
    adj = jnp.logical_and(
        same_batch,
        jnp.logical_or(prot_adj, jnp.logical_or(lig_adj, cross_adj)),
    ).astype(f32)                                                        # (N, N); self loops kept
    #  ^ torch.where(adj) in the reference also keeps i==j edges, so this matches get_edges.

    # update_coords_mask = cat(ligand_mask, zeros_like(batch_protein))
    um = jnp.concatenate([mask_ref[...], jnp.zeros((Np, 1), f32)], axis=0)   # (N, 1)

    # ---------------- emb_in: time column folded into the weights -----------
    h = (jnp.dot(h_feat, eiwf[...], preferred_element_type=f32)
         + t * eiwt[...] + eib[...])                                     # (N, H)

    # ---------------- EGNN layers (canonical EGCL) ---------------------------
    pos = pos0
    for li in range(N_EGNN_LAYERS):
        (we1ij, we1d, be1, we2, be2,
         wx1, bx1, wx2v, bx2,
         wh1, bh1, wh2, bh2) = layer_w[li * PER_LAYER_W:(li + 1) * PER_LAYER_W]

        d2 = pairwise_sqdist(pos)                                        # (N, N)

        # edge MLP phi_e(h_i, h_j, d2_ij): first layer as ONE merged matmul
        hij = jnp.dot(h, we1ij[...], preferred_element_type=f32)         # (N, 2H)
        hi = hij[:, :H]
        hj = hij[:, H:2 * H]
        pre = (hi[:, None, :] + hj[None, :, :]
               + d2[:, :, None] * we1d[...].reshape(1, 1, H)
               + be1[...].reshape(1, 1, H))                              # (N, N, H)
        m = jax.nn.silu(pre).reshape(N * N, H)
        m2 = jax.nn.silu(
            jnp.dot(m, we2[...], preferred_element_type=f32) + be2[...])  # (N*N, H)

        # coordinate update phi_x: final (H -> 1) projection on the VPU/XLU,
        # not a 1-column MXU matmul.
        xw = jax.nn.silu(
            jnp.dot(m2, wx1[...], preferred_element_type=f32) + bx1[...])
        coef = jnp.sum(xw.reshape(N, N, H) * wx2v[...].reshape(1, 1, H),
                       axis=-1) + bx2[...]                               # (N, N)
        coef = coef * adj
        # sum_j coef_ij (x_i - x_j) = rowsum(coef) * x_i - coef @ x
        dpos = (jnp.sum(coef, axis=1, keepdims=True) * pos
                - jnp.dot(coef, pos, preferred_element_type=f32))        # (N, 8)
        pos = pos + um * dpos

        # node update phi_h(h_i, sum_j adj_ij m_ij): merged first-layer matmul
        magg = jnp.sum(m2.reshape(N, N, H) * adj[:, :, None], axis=1)    # (N, H)
        hm = jnp.concatenate([h, magg], axis=1)                          # (N, 2H)
        hh = jax.nn.silu(
            jnp.dot(hm, wh1[...], preferred_element_type=f32) + bh1[...])
        h = h + jnp.dot(hh, wh2[...], preferred_element_type=f32) + bh2[...]

    # ---------------- heads + epilogue (velocity, NaN reset, decoder) --------
    # emb_out (Linear, no activation) is pre-folded into the decoder's first Linear:
    #   silu((h @ eow + eob) @ dw1 + db1) == silu(h @ dw1f + db1f)
    hd = jax.nn.silu(jnp.dot(h, dw1f[...], preferred_element_type=f32) + db1f[...])
    x_dec = jnp.dot(hd, dw2[...], preferred_element_type=f32) + db2[...]      # (N, Fl)

    pos_out = pos - pos0 if EGNN_VELOCITY_PARAMETRIZATION else pos            # (N, 8)
    nan_mask = jnp.isnan(pos_out).astype(f32)
    nan_flag = jnp.max(jnp.max(nan_mask, axis=1, keepdims=True),
                       axis=0, keepdims=True)                                 # (1, 1)
    pos_out = jnp.where(nan_flag > 0.0, jnp.zeros_like(pos_out), pos_out)

    # single lane-dense (N, 128) store: [x_dec | pos_out(pad8) | zeros]
    out = jnp.concatenate(
        [x_dec, pos_out,
         jnp.zeros((N, OUT_LANES - LIGAND_FEATURES - POS_PAD), f32)], axis=1)
    out_ref[...] = out


# ---------------------------- param init (deterministic) --------------------
def _uniform(key, shape, bound):
    return jax.random.uniform(key, shape, jnp.float32, -bound, bound)


def linear_params(key, fin, fout):
    kw, kb = jax.random.split(key)
    bound = 1.0 / math.sqrt(fin)
    return _uniform(kw, (fin, fout), bound), _uniform(kb, (1, fout), bound)


def mlp2_params(key, fin, fhid, fout):
    k1, k2 = jax.random.split(key)
    return linear_params(k1, fin, fhid) + linear_params(k2, fhid, fout)


def egnn_layer_params(key, H):
    ks = jax.random.split(key, 12)
    be = 1.0 / math.sqrt(2 * H + 1)
    bh = 1.0 / math.sqrt(2 * H)
    we1i = _uniform(ks[0], (H, H), be)
    we1j = _uniform(ks[1], (H, H), be)
    we1d = _uniform(ks[2], (1, H), be)
    be1 = _uniform(ks[3], (1, H), be)
    we2, be2 = linear_params(ks[4], H, H)
    wx1, bx1 = linear_params(ks[5], H, H)
    wx2, bx2 = linear_params(ks[6], H, 1)
    wh1h = _uniform(ks[7], (H, H), bh)
    wh1m = _uniform(ks[8], (H, H), bh)
    bh1 = _uniform(ks[9], (1, H), bh)
    wh2, bh2 = linear_params(ks[10], H, H)
    return (we1i, we1j, we1d, be1, we2, be2, wx1, bx1, wx2, bx2,
            wh1h, wh1m, bh1, wh2, bh2)


def init_params(key):
    ks = jax.random.split(key, 8 + N_EGNN_LAYERS)
    Fl, Fp, J, H = LIGAND_FEATURES, PROTEIN_FEATURES, JOINT_FEATURES, HIDDEN_FEATURES
    return {
        "atom_enc": mlp2_params(ks[0], Fl, 2 * Fl, J),
        "fg_enc": mlp2_params(ks[1], Fl, 2 * Fl, J),
        "res_enc": mlp2_params(ks[2], Fp, 2 * Fp, J),
        "atom_dec": mlp2_params(ks[3], J, 2 * Fl, Fl),
        "emb_in": linear_params(ks[4], J + 1, H),
        "emb_out": linear_params(ks[5], H, J),
        "layers": [egnn_layer_params(ks[8 + i], H) for i in range(N_EGNN_LAYERS)],
    }


def pack_params(params):
    """One-time weight re-layout: merge same-input matmuls and fold consecutive linears
    (emb_out -> decoder first layer) so the fused kernel issues fewer, wider MXU ops.
    Done once outside the kernel, not per-call compute."""
    Fl, J, H = LIGAND_FEATURES, JOINT_FEATURES, HIDDEN_FEATURES
    wa1, ba1, wa2, ba2 = params["atom_enc"]
    wf1, bf1, wf2, bf2 = params["fg_enc"]
    z = jnp.zeros((2 * Fl, J), jnp.float32)
    packed = [
        jnp.concatenate([wa1, wf1], axis=1),                       # elw1 (Fl, 4Fl)
        jnp.concatenate([ba1, bf1], axis=1),                       # elb1 (1, 4Fl)
        jnp.concatenate([jnp.concatenate([wa2, z], axis=1),        # elw2 block-diag (4Fl, 2J)
                         jnp.concatenate([z, wf2], axis=1)], axis=0),
        jnp.concatenate([ba2, bf2], axis=1),                       # elb2 (1, 2J)
    ]
    packed += list(params["res_enc"])                              # rw1, rb1, rw2, rb2
    ew, ebias = params["emb_in"]
    packed += [ew[:J, :], ew[J:J + 1, :], ebias]                   # eiwf, eiwt, eib

    # fold emb_out (no activation) into atom_dec first linear
    eow, eob = params["emb_out"]
    dw1, db1, dw2, db2 = params["atom_dec"]
    dw1f = jnp.dot(eow, dw1)                                       # (H, 2Fl)
    db1f = jnp.dot(eob, dw1) + db1                                 # (1, 2Fl)
    packed += [dw1f, db1f, dw2, db2]

    for lp in params["layers"]:
        (we1i, we1j, we1d, be1, we2, be2, wx1, bx1, wx2, bx2,
         wh1h, wh1m, bh1, wh2, bh2) = lp
        packed += [
            jnp.concatenate([we1i, we1j], axis=1),                 # we1ij (H, 2H)
            we1d, be1, we2, be2,
            wx1, bx1,
            jnp.transpose(wx2), bx2,                               # wx2v (1, H), bx2 (1, 1)
            jnp.concatenate([wh1h, wh1m], axis=0),                 # wh1 (2H, H)
            bh1, wh2, bh2,
        ]
    return packed


# ------------------------------- forward ------------------------------------
@jax.jit
def estimator_forward(packed, x_ligand, x_protein, pos_ligand, pos_protein,
                      batch_ligand, batch_protein, t, ligand_mask):
    Nl, Np = x_ligand.shape[0], x_protein.shape[0]
    N = Nl + Np

    # tiny layout-only plumbing at the call boundary
    pos = jnp.concatenate([pos_ligand, pos_protein], axis=0)
    pos = jnp.concatenate([pos, jnp.zeros((N, POS_PAD - 3), jnp.float32)], axis=1)
    batch = jnp.concatenate([batch_ligand, batch_protein], axis=0).astype(jnp.int32)[:, None]
    mask_f = ligand_mask.astype(jnp.float32)[:, None]
    t_arr = jnp.asarray(t, jnp.float32).reshape(1)

    args = [t_arr, x_ligand, x_protein, pos, batch, mask_f] + list(packed)
    in_specs = ([pl.BlockSpec(memory_space=pltpu.MemorySpace.SMEM)]
                + [pl.BlockSpec(memory_space=pltpu.MemorySpace.VMEM)] * (len(args) - 1))

    out = pl.pallas_call(
        _fused_estimator_kernel,
        out_shape=jax.ShapeDtypeStruct((N, OUT_LANES), jnp.float32),
        in_specs=in_specs,
        out_specs=pl.BlockSpec(memory_space=pltpu.MemorySpace.VMEM),
    )(*args)

    x_final_ligand = out[:Nl, :LIGAND_FEATURES]
    pos_out_ligand = out[:Nl, LIGAND_FEATURES:LIGAND_FEATURES + 3]
    return x_final_ligand, pos_out_ligand


# --------------------------------- main --------------------------------------
if __name__ == "__main__":
    key = jax.random.PRNGKey(0)
    kp, kx1, kx2, kp1, kp2 = jax.random.split(key, 5)
    params = init_params(kp)
    packed = pack_params(params)

    x_ligand = jax.random.normal(kx1, (N_LIGAND, LIGAND_FEATURES), jnp.float32)
    x_protein = jax.random.normal(kx2, (N_PROTEIN, PROTEIN_FEATURES), jnp.float32)
    pos_ligand = 2.0 * jax.random.normal(kp1, (N_LIGAND, 3), jnp.float32)
    pos_protein = 2.0 * jax.random.normal(kp2, (N_PROTEIN, 3), jnp.float32)
    batch_ligand = jnp.array([0, 0, 0, 0, 1, 1, 1, 1], jnp.int32)
    batch_protein = jnp.array([0, 0, 0, 0, 1, 1, 1, 1], jnp.int32)
    ligand_mask = jnp.array([True, True, False, True, False, True, True, False])
    t = 0.5

    x_out, pos_out = estimator_forward(
        packed, x_ligand, x_protein, pos_ligand, pos_protein,
        batch_ligand, batch_protein, t, ligand_mask,
    )
    x_out = jax.block_until_ready(x_out)
    pos_out = jax.block_until_ready(pos_out)

    # final boolean-mask gather (dynamic output shape) done host-side, matching
    # x_final_ligand[ligand_mask], pos_out_ligand[ligand_mask]
    mask_np = np.asarray(ligand_mask)
    x_sel = np.asarray(x_out)[mask_np]
    pos_sel = np.asarray(pos_out)[mask_np]
    assert x_sel.shape == (int(mask_np.sum()), LIGAND_FEATURES)
    assert pos_sel.shape == (int(mask_np.sum()), 3)
    assert np.isfinite(x_sel).all() and np.isfinite(pos_sel).all()
    print("KERNEL_OK")
</pallas_src>

<mosaic_0001>
module attributes {stable_mosaic.version = 11 : i64} {
  func.func @_fused_estimator_kernel(%arg0: memref<1xf32, #tpu.memory_space<smem>>, %arg1: memref<8x8xf32, #tpu.memory_space<vmem>>, %arg2: memref<8x10xf32, #tpu.memory_space<vmem>>, %arg3: memref<16x8xf32, #tpu.memory_space<vmem>>, %arg4: memref<16x1xi32, #tpu.memory_space<vmem>>, %arg5: memref<8x1xf32, #tpu.memory_space<vmem>>, %arg6: memref<8x32xf32, #tpu.memory_space<vmem>>, %arg7: memref<1x32xf32, #tpu.memory_space<vmem>>, %arg8: memref<32x32xf32, #tpu.memory_space<vmem>>, %arg9: memref<1x32xf32, #tpu.memory_space<vmem>>, %arg10: memref<10x20xf32, #tpu.memory_space<vmem>>, %arg11: memref<1x20xf32, #tpu.memory_space<vmem>>, %arg12: memref<20x16xf32, #tpu.memory_space<vmem>>, %arg13: memref<1x16xf32, #tpu.memory_space<vmem>>, %arg14: memref<16x32xf32, #tpu.memory_space<vmem>>, %arg15: memref<1x32xf32, #tpu.memory_space<vmem>>, %arg16: memref<1x32xf32, #tpu.memory_space<vmem>>, %arg17: memref<32x16xf32, #tpu.memory_space<vmem>>, %arg18: memref<1x16xf32, #tpu.memory_space<vmem>>, %arg19: memref<16x8xf32, #tpu.memory_space<vmem>>, %arg20: memref<1x8xf32, #tpu.memory_space<vmem>>, %arg21: memref<32x64xf32, #tpu.memory_space<vmem>>, %arg22: memref<1x32xf32, #tpu.memory_space<vmem>>, %arg23: memref<1x32xf32, #tpu.memory_space<vmem>>, %arg24: memref<32x32xf32, #tpu.memory_space<vmem>>, %arg25: memref<1x32xf32, #tpu.memory_space<vmem>>, %arg26: memref<32x32xf32, #tpu.memory_space<vmem>>, %arg27: memref<1x32xf32, #tpu.memory_space<vmem>>, %arg28: memref<1x32xf32, #tpu.memory_space<vmem>>, %arg29: memref<1x1xf32, #tpu.memory_space<vmem>>, %arg30: memref<64x32xf32, #tpu.memory_space<vmem>>, %arg31: memref<1x32xf32, #tpu.memory_space<vmem>>, %arg32: memref<32x32xf32, #tpu.memory_space<vmem>>, %arg33: memref<1x32xf32, #tpu.memory_space<vmem>>, %arg34: memref<32x64xf32, #tpu.memory_space<vmem>>, %arg35: memref<1x32xf32, #tpu.memory_space<vmem>>, %arg36: memref<1x32xf32, #tpu.memory_space<vmem>>, %arg37: memref<32x32xf32, #tpu.memory_space<vmem>>, %arg38: memref<1x32xf32, #tpu.memory_space<vmem>>, %arg39: memref<32x32xf32, #tpu.memory_space<vmem>>, %arg40: memref<1x32xf32, #tpu.memory_space<vmem>>, %arg41: memref<1x32xf32, #tpu.memory_space<vmem>>, %arg42: memref<1x1xf32, #tpu.memory_space<vmem>>, %arg43: memref<64x32xf32, #tpu.memory_space<vmem>>, %arg44: memref<1x32xf32, #tpu.memory_space<vmem>>, %arg45: memref<32x32xf32, #tpu.memory_space<vmem>>, %arg46: memref<1x32xf32, #tpu.memory_space<vmem>>, %arg47: memref<16x128xf32, #tpu.memory_space<vmem>>) attributes {dimension_semantics = [], scalar_prefetch = 0 : i64, scratch_operands = 0 : i64, tpu.core_type = #tpu.core_type<tc>} {
    %c0 = arith.constant 0 : index
    %0 = memref.load %arg0[%c0] : memref<1xf32, #tpu.memory_space<smem>>
    %c0_0 = arith.constant 0 : index
    %c0_1 = arith.constant 0 : index
    %1 = vector.load %arg1[%c0_0, %c0_1] : memref<8x8xf32, #tpu.memory_space<vmem>>, vector<8x8xf32>
    %c0_2 = arith.constant 0 : index
    %c0_3 = arith.constant 0 : index
    %2 = vector.load %arg6[%c0_2, %c0_3] : memref<8x32xf32, #tpu.memory_space<vmem>>, vector<8x32xf32>
    %cst = arith.constant dense<0.000000e+00> : vector<8x32xf32>
    %3 = tpu.matmul %1, %2, %cst {dimension_numbers = #tpu.dot_dimension_numbers<[1], [0], [0], [1], [0, 0, 1, 1], [], []>} : vector<8x8xf32>, vector<8x32xf32>, vector<8x32xf32> -> vector<8x32xf32>
    %c0_4 = arith.constant 0 : index
    %c0_5 = arith.constant 0 : index
    %4 = vector.load %arg7[%c0_4, %c0_5] : memref<1x32xf32, #tpu.memory_space<vmem>>, vector<1x32xf32>
    %5 = vector.broadcast %4 : vector<1x32xf32> to vector<8x32xf32>
    %6 = arith.addf %3, %5 : vector<8x32xf32>
    %7 = arith.negf %6 : vector<8x32xf32>
    %8 = math.exp %7 : vector<8x32xf32>
    %cst_6 = arith.constant 1.000000e+00 : f32
    %9 = vector.broadcast %cst_6 : f32 to vector<8x32xf32>
    %10 = arith.addf %9, %8 : vector<8x32xf32>
    %11 = arith.divf %9, %10 : vector<8x32xf32>
    %12 = arith.mulf %6, %11 : vector<8x32xf32>
    %c0_7 = arith.constant 0 : index
    %c0_8 = arith.constant 0 : index
    %13 = vector.load %arg8[%c0_7, %c0_8] : memref<32x32xf32, #tpu.memory_space<vmem>>, vector<32x32xf32>
    %cst_9 = arith.constant dense<0.000000e+00> : vector<8x32xf32>
    %14 = tpu.matmul %12, %13, %cst_9 {dimension_numbers = #tpu.dot_dimension_numbers<[1], [0], [0], [1], [0, 0, 1, 1], [], []>} : vector<8x32xf32>, vector<32x32xf32>, vector<8x32xf32> -> vector<8x32xf32>
    %c0_10 = arith.constant 0 : index
    %c0_11 = arith.constant 0 : index
    %15 = vector.load %arg9[%c0_10, %c0_11] : memref<1x32xf32, #tpu.memory_space<vmem>>, vector<1x32xf32>
    %16 = vector.broadcast %15 : vector<1x32xf32> to vector<8x32xf32>
    %17 = arith.addf %14, %16 : vector<8x32xf32>
    %c0_12 = arith.constant 0 : index
    %c0_13 = arith.constant 0 : index
    %18 = vector.load %arg5[%c0_12, %c0_13] : memref<8x1xf32, #tpu.memory_space<vmem>>, vector<8x1xf32>
    %cst_14 = arith.constant 0.000000e+00 : f32
    %19 = vector.broadcast %cst_14 : f32 to vector<8x1xf32>
    %20 = arith.cmpf ogt, %18, %19 : vector<8x1xf32>
    %21 = vector.extract_strided_slice %17 {offsets = [0, 0], sizes = [8, 16], strides = [1, 1]} : vector<8x32xf32> to vector<8x16xf32>
    %22 = vector.extract_strided_slice %17 {offsets = [0, 16], sizes = [8, 16], strides = [1, 1]} : vector<8x32xf32> to vector<8x16xf32>
    %23 = vector.shape_cast %20 : vector<8x1xi1> to vector<8x1xi1>
    %24 = vector.broadcast %23 : vector<8x1xi1> to vector<8x16xi1>
    %25 = arith.select %24, %21, %22 : vector<8x16xi1>, vector<8x16xf32>
    %c0_15 = arith.constant 0 : index
    %c0_16 = arith.constant 0 : index
    %26 = vector.load %arg2[%c0_15, %c0_16] : memref<8x10xf32, #tpu.memory_space<vmem>>, vector<8x10xf32>
    %c0_17 = arith.constant 0 : index
    %c0_18 = arith.constant 0 : index
    %27 = vector.load %arg10[%c0_17, %c0_18] : memref<10x20xf32, #tpu.memory_space<vmem>>, vector<10x20xf32>
    %cst_19 = arith.constant dense<0.000000e+00> : vector<8x20xf32>
    %28 = tpu.matmul %26, %27, %cst_19 {dimension_numbers = #tpu.dot_dimension_numbers<[1], [0], [0], [1], [0, 0, 1, 1], [], []>} : vector<8x10xf32>, vector<10x20xf32>, vector<8x20xf32> -> vector<8x20xf32>
    %c0_20 = arith.constant 0 : index
    %c0_21 = arith.constant 0 : index
    %29 = vector.load %arg11[%c0_20, %c0_21] : memref<1x20xf32, #tpu.memory_space<vmem>>, vector<1x20xf32>
    %30 = vector.broadcast %29 : vector<1x20xf32> to vector<8x20xf32>
    %31 = arith.addf %28, %30 : vector<8x20xf32>
    %32 = arith.negf %31 : vector<8x20xf32>
    %33 = math.exp %32 : vector<8x20xf32>
    %cst_22 = arith.constant 1.000000e+00 : f32
    %34 = vector.broadcast %cst_22 : f32 to vector<8x20xf32>
    %35 = arith.addf %34, %33 : vector<8x20xf32>
    %36 = arith.divf %34, %35 : vector<8x20xf32>
    %37 = arith.mulf %31, %36 : vector<8x20xf32>
    %c0_23 = arith.constant 0 : index
    %c0_24 = arith.constant 0 : index
    %38 = vector.load %arg12[%c0_23, %c0_24] : memref<20x16xf32, #tpu.memory_space<vmem>>, vector<20x16xf32>
    %cst_25 = arith.constant dense<0.000000e+00> : vector<8x16xf32>
    %39 = tpu.matmul %37, %38, %cst_25 {dimension_numbers = #tpu.dot_dimension_numbers<[1], [0], [0], [1], [0, 0, 1, 1], [], []>} : vector<8x20xf32>, vector<20x16xf32>, vector<8x16xf32> -> vector<8x16xf32>
    %c0_26 = arith.constant 0 : index
    %c0_27 = arith.constant 0 : index
    %40 = vector.load %arg13[%c0_26, %c0_27] : memref<1x16xf32, #tpu.memory_space<vmem>>, vector<1x16xf32>
    %41 = vector.broadcast %40 : vector<1x16xf32> to vector<8x16xf32>
    %42 = arith.addf %39, %41 : vector<8x16xf32>
    %43 = tpu.concatenate %25, %42 in 0 : vector<8x16xf32>, vector<8x16xf32> -> vector<16x16xf32>
    %c0_28 = arith.constant 0 : index
    %c0_29 = arith.constant 0 : index
    %44 = vector.load %arg3[%c0_28, %c0_29] : memref<16x8xf32, #tpu.memory_space<vmem>>, vector<16x8xf32>
    %c0_30 = arith.constant 0 : index
    %c0_31 = arith.constant 0 : index
    %45 = vector.load %arg4[%c0_30, %c0_31] : memref<16x1xi32, #tpu.memory_space<vmem>>, vector<16x1xi32>
    %46 = tpu.transpose %45, [1, 0] : vector<16x1xi32> -> vector<1x16xi32>
    %47 = vector.broadcast %45 : vector<16x1xi32> to vector<16x16xi32>
    %48 = vector.broadcast %46 : vector<1x16xi32> to vector<16x16xi32>
    %49 = arith.cmpi eq, %47, %48 : vector<16x16xi32>
    %50 = tpu.iota {dimensions = array<i32: 0>} : vector<16x1xi32>
    %c8_i32 = arith.constant 8 : i32
    %51 = vector.broadcast %c8_i32 : i32 to vector<16x1xi32>
    %52 = arith.cmpi sge, %50, %51 : vector<16x1xi32>
    %cst_32 = arith.constant dense<true> : vector<16x1xi1>
    %53 = arith.xori %52, %cst_32 : vector<16x1xi1>
    %54 = arith.mulf %44, %44 : vector<16x8xf32>
    %cst_33 = arith.constant dense<0.000000e+00> : vector<16xf32>
    %55 = vector.multi_reduction <add>, %54, %cst_33 [1] : vector<16x8xf32> to vector<16xf32>
    %56 = vector.shape_cast %55 : vector<16xf32> to vector<16x1xf32>
    %cst_34 = arith.constant dense<0.000000e+00> : vector<16x16xf32>
    %57 = tpu.matmul %44, %44, %cst_34 {dimension_numbers = #tpu.dot_dimension_numbers<[1], [1], [0], [0], [0, 0, 1, 0], [], []>} : vector<16x8xf32>, vector<16x8xf32>, vector<16x16xf32> -> vector<16x16xf32>
    %58 = tpu.transpose %56, [1, 0] : vector<16x1xf32> -> vector<1x16xf32>
    %59 = vector.broadcast %56 : vector<16x1xf32> to vector<16x16xf32>
    %60 = vector.broadcast %58 : vector<1x16xf32> to vector<16x16xf32>
    %61 = arith.addf %59, %60 : vector<16x16xf32>
    %cst_35 = arith.constant 2.000000e+00 : f32
    %62 = vector.broadcast %cst_35 : f32 to vector<16x16xf32>
    %63 = arith.mulf %62, %57 : vector<16x16xf32>
    %64 = arith.subf %61, %63 : vector<16x16xf32>
    %cst_36 = arith.constant 0.000000e+00 : f32
    %65 = vector.broadcast %cst_36 : f32 to vector<16x16xf32>
    %66 = arith.maximumf %64, %65 : vector<16x16xf32>
    %67 = tpu.transpose %52, [1, 0] : vector<16x1xi1> -> vector<1x16xi1>
    %68 = vector.broadcast %52 : vector<16x1xi1> to vector<16x16xi1>
    %69 = vector.broadcast %67 : vector<1x16xi1> to vector<16x16xi1>
    %70 = arith.andi %68, %69 : vector<16x16xi1>
    %71 = tpu.transpose %53, [1, 0] : vector<16x1xi1> -> vector<1x16xi1>
    %72 = vector.broadcast %53 : vector<16x1xi1> to vector<16x16xi1>
    %73 = vector.broadcast %71 : vector<1x16xi1> to vector<16x16xi1>
    %74 = arith.andi %72, %73 : vector<16x16xi1>
    %75 = tpu.transpose %53, [1, 0] : vector<16x1xi1> -> vector<1x16xi1>
    %76 = vector.broadcast %52 : vector<16x1xi1> to vector<16x16xi1>
    %77 = vector.broadcast %75 : vector<1x16xi1> to vector<16x16xi1>
    %78 = arith.andi %76, %77 : vector<16x16xi1>
    %79 = tpu.transpose %52, [1, 0] : vector<16x1xi1> -> vector<1x16xi1>
    %80 = vector.broadcast %53 : vector<16x1xi1> to vector<16x16xi1>
    %81 = vector.broadcast %79 : vector<1x16xi1> to vector<16x16xi1>
    %82 = arith.andi %80, %81 : vector<16x16xi1>
    %83 = arith.ori %78, %82 : vector<16x16xi1>
    %cst_37 = arith.constant 2.500000e+01 : f32
    %84 = vector.broadcast %cst_37 : f32 to vector<16x16xf32>
    %85 = arith.cmpf olt, %66, %84 : vector<16x16xf32>
    %86 = arith.andi %74, %85 : vector<16x16xi1>
    %cst_38 = arith.constant 2.500000e+01 : f32
    %87 = vector.broadcast %cst_38 : f32 to vector<16x16xf32>
    %88 = arith.cmpf olt, %66, %87 : vector<16x16xf32>
    %89 = arith.andi %70, %88 : vector<16x16xi1>
    %cst_39 = arith.constant 2.500000e+01 : f32
    %90 = vector.broadcast %cst_39 : f32 to vector<16x16xf32>
    %91 = arith.cmpf olt, %66, %90 : vector<16x16xf32>
    %92 = arith.andi %83, %91 : vector<16x16xi1>
    %93 = arith.ori %86, %92 : vector<16x16xi1>
    %94 = arith.ori %89, %93 : vector<16x16xi1>
    %95 = arith.andi %49, %94 : vector<16x16xi1>
    %96 = arith.extui %95 : vector<16x16xi1> to vector<16x16xi32>
    %97 = arith.sitofp %96 : vector<16x16xi32> to vector<16x16xf32>
    %c0_40 = arith.constant 0 : index
    %c0_41 = arith.constant 0 : index
    %98 = vector.load %arg5[%c0_40, %c0_41] : memref<8x1xf32, #tpu.memory_space<vmem>>, vector<8x1xf32>
    %cst_42 = arith.constant 0.000000e+00 : f32
    %99 = vector.broadcast %cst_42 : f32 to vector<8x1xf32>
    %100 = tpu.concatenate %98, %99 in 0 : vector<8x1xf32>, vector<8x1xf32> -> vector<16x1xf32>
    %c0_43 = arith.constant 0 : index
    %c0_44 = arith.constant 0 : index
    %101 = vector.load %arg14[%c0_43, %c0_44] : memref<16x32xf32, #tpu.memory_space<vmem>>, vector<16x32xf32>
    %cst_45 = arith.constant dense<0.000000e+00> : vector<16x32xf32>
    %102 = tpu.matmul %43, %101, %cst_45 {dimension_numbers = #tpu.dot_dimension_numbers<[1], [0], [0], [1], [0, 0, 1, 1], [], []>} : vector<16x16xf32>, vector<16x32xf32>, vector<16x32xf32> -> vector<16x32xf32>
    %c0_46 = arith.constant 0 : index
    %c0_47 = arith.constant 0 : index
    %103 = vector.load %arg15[%c0_46, %c0_47] : memref<1x32xf32, #tpu.memory_space<vmem>>, vector<1x32xf32>
    %104 = vector.broadcast %0 : f32 to vector<1x32xf32>
    %105 = arith.mulf %104, %103 : vector<1x32xf32>
    %106 = vector.broadcast %105 : vector<1x32xf32> to vector<16x32xf32>
    %107 = arith.addf %102, %106 : vector<16x32xf32>
    %c0_48 = arith.constant 0 : index
    %c0_49 = arith.constant 0 : index
    %108 = vector.load %arg16[%c0_48, %c0_49] : memref<1x32xf32, #tpu.memory_space<vmem>>, vector<1x32xf32>
    %109 = vector.broadcast %108 : vector<1x32xf32> to vector<16x32xf32>
    %110 = arith.addf %107, %109 : vector<16x32xf32>
    %111 = arith.mulf %44, %44 : vector<16x8xf32>
    %cst_50 = arith.constant dense<0.000000e+00> : vector<16xf32>
    %112 = vector.multi_reduction <add>, %111, %cst_50 [1] : vector<16x8xf32> to vector<16xf32>
    %113 = vector.shape_cast %112 : vector<16xf32> to vector<16x1xf32>
    %cst_51 = arith.constant dense<0.000000e+00> : vector<16x16xf32>
    %114 = tpu.matmul %44, %44, %cst_51 {dimension_numbers = #tpu.dot_dimension_numbers<[1], [1], [0], [0], [0, 0, 1, 0], [], []>} : vector<16x8xf32>, vector<16x8xf32>, vector<16x16xf32> -> vector<16x16xf32>
    %115 = tpu.transpose %113, [1, 0] : vector<16x1xf32> -> vector<1x16xf32>
    %116 = vector.broadcast %113 : vector<16x1xf32> to vector<16x16xf32>
    %117 = vector.broadcast %115 : vector<1x16xf32> to vector<16x16xf32>
    %118 = arith.addf %116, %117 : vector<16x16xf32>
    %cst_52 = arith.constant 2.000000e+00 : f32
    %119 = vector.broadcast %cst_52 : f32 to vector<16x16xf32>
    %120 = arith.mulf %119, %114 : vector<16x16xf32>
    %121 = arith.subf %118, %120 : vector<16x16xf32>
    %cst_53 = arith.constant 0.000000e+00 : f32
    %122 = vector.broadcast %cst_53 : f32 to vector<16x16xf32>
    %123 = arith.maximumf %121, %122 : vector<16x16xf32>
    %c0_54 = arith.constant 0 : index
    %c0_55 = arith.constant 0 : index
    %124 = vector.load %arg21[%c0_54, %c0_55] : memref<32x64xf32, #tpu.memory_space<vmem>>, vector<32x64xf32>
    %cst_56 = arith.constant dense<0.000000e+00> : vector<16x64xf32>
    %125 = tpu.matmul %110, %124, %cst_56 {dimension_numbers = #tpu.dot_dimension_numbers<[1], [0], [0], [1], [0, 0, 1, 1], [], []>} : vector<16x32xf32>, vector<32x64xf32>, vector<16x64xf32> -> vector<16x64xf32>
    %126 = vector.extract_strided_slice %125 {offsets = [0, 0], sizes = [16, 32], strides = [1, 1]} : vector<16x64xf32> to vector<16x32xf32>
    %127 = vector.extract_strided_slice %125 {offsets = [0, 32], sizes = [16, 32], strides = [1, 1]} : vector<16x64xf32> to vector<16x32xf32>
    %128 = vector.shape_cast %126 : vector<16x32xf32> to vector<16x1x32xf32>
    %129 = vector.shape_cast %127 : vector<16x32xf32> to vector<1x16x32xf32>
    %130 = vector.broadcast %128 : vector<16x1x32xf32> to vector<16x16x32xf32>
    %131 = vector.broadcast %129 : vector<1x16x32xf32> to vector<16x16x32xf32>
    %132 = arith.addf %130, %131 : vector<16x16x32xf32>
    %133 = vector.shape_cast %123 : vector<16x16xf32> to vector<16x16x1xf32>
    %c0_57 = arith.constant 0 : index
    %c0_58 = arith.constant 0 : index
    %134 = vector.load %arg22[%c0_57, %c0_58] : memref<1x32xf32, #tpu.memory_space<vmem>>, vector<1x32xf32>
    %135 = vector.shape_cast %134 : vector<1x32xf32> to vector<1x1x32xf32>
    %136 = vector.broadcast %133 : vector<16x16x1xf32> to vector<16x16x32xf32>
    %137 = vector.broadcast %135 : vector<1x1x32xf32> to vector<16x16x32xf32>
    %138 = arith.mulf %136, %137 : vector<16x16x32xf32>
    %139 = arith.addf %132, %138 : vector<16x16x32xf32>
    %c0_59 = arith.constant 0 : index
    %c0_60 = arith.constant 0 : index
    %140 = vector.load %arg23[%c0_59, %c0_60] : memref<1x32xf32, #tpu.memory_space<vmem>>, vector<1x32xf32>
    %141 = vector.shape_cast %140 : vector<1x32xf32> to vector<1x1x32xf32>
    %142 = vector.broadcast %141 : vector<1x1x32xf32> to vector<16x16x32xf32>
    %143 = arith.addf %139, %142 : vector<16x16x32xf32>
    %144 = arith.negf %143 : vector<16x16x32xf32>
    %145 = math.exp %144 : vector<16x16x32xf32>
    %cst_61 = arith.constant 1.000000e+00 : f32
    %146 = vector.broadcast %cst_61 : f32 to vector<16x16x32xf32>
    %147 = arith.addf %146, %145 : vector<16x16x32xf32>
    %148 = arith.divf %146, %147 : vector<16x16x32xf32>
    %149 = arith.mulf %143, %148 : vector<16x16x32xf32>
    %150 = vector.shape_cast %149 : vector<16x16x32xf32> to vector<256x32xf32>
    %c0_62 = arith.constant 0 : index
    %c0_63 = arith.constant 0 : index
    %151 = vector.load %arg24[%c0_62, %c0_63] : memref<32x32xf32, #tpu.memory_space<vmem>>, vector<32x32xf32>
    %cst_64 = arith.constant dense<0.000000e+00> : vector<256x32xf32>
    %152 = tpu.matmul %150, %151, %cst_64 {dimension_numbers = #tpu.dot_dimension_numbers<[1], [0], [0], [1], [0, 0, 1, 1], [], []>} : vector<256x32xf32>, vector<32x32xf32>, vector<256x32xf32> -> vector<256x32xf32>
    %c0_65 = arith.constant 0 : index
    %c0_66 = arith.constant 0 : index
    %153 = vector.load %arg25[%c0_65, %c0_66] : memref<1x32xf32, #tpu.memory_space<vmem>>, vector<1x32xf32>
    %154 = vector.broadcast %153 : vector<1x32xf32> to vector<256x32xf32>
    %155 = arith.addf %152, %154 : vector<256x32xf32>
    %156 = arith.negf %155 : vector<256x32xf32>
    %157 = math.exp %156 : vector<256x32xf32>
    %cst_67 = arith.constant 1.000000e+00 : f32
    %158 = vector.broadcast %cst_67 : f32 to vector<256x32xf32>
    %159 = arith.addf %158, %157 : vector<256x32xf32>
    %160 = arith.divf %158, %159 : vector<256x32xf32>
    %161 = arith.mulf %155, %160 : vector<256x32xf32>
    %c0_68 = arith.constant 0 : index
    %c0_69 = arith.constant 0 : index
    %162 = vector.load %arg26[%c0_68, %c0_69] : memref<32x32xf32, #tpu.memory_space<vmem>>, vector<32x32xf32>
    %cst_70 = arith.constant dense<0.000000e+00> : vector<256x32xf32>
    %163 = tpu.matmul %161, %162, %cst_70 {dimension_numbers = #tpu.dot_dimension_numbers<[1], [0], [0], [1], [0, 0, 1, 1], [], []>} : vector<256x32xf32>, vector<32x32xf32>, vector<256x32xf32> -> vector<256x32xf32>
    %c0_71 = arith.constant 0 : index
    %c0_72 = arith.constant 0 : index
    %164 = vector.load %arg27[%c0_71, %c0_72] : memref<1x32xf32, #tpu.memory_space<vmem>>, vector<1x32xf32>
    %165 = vector.broadcast %164 : vector<1x32xf32> to vector<256x32xf32>
    %166 = arith.addf %163, %165 : vector<256x32xf32>
    %167 = arith.negf %166 : vector<256x32xf32>
    %168 = math.exp %167 : vector<256x32xf32>
    %cst_73 = arith.constant 1.000000e+00 : f32
    %169 = vector.broadcast %cst_73 : f32 to vector<256x32xf32>
    %170 = arith.addf %169, %168 : vector<256x32xf32>
    %171 = arith.divf %169, %170 : vector<256x32xf32>
    %172 = arith.mulf %166, %171 : vector<256x32xf32>
    %173 = vector.shape_cast %172 : vector<256x32xf32> to vector<16x16x32xf32>
    %c0_74 = arith.constant 0 : index
    %c0_75 = arith.constant 0 : index
    %174 = vector.load %arg28[%c0_74, %c0_75] : memref<1x32xf32, #tpu.memory_space<vmem>>, vector<1x32xf32>
    %175 = vector.shape_cast %174 : vector<1x32xf32> to vector<1x1x32xf32>
    %176 = vector.broadcast %175 : vector<1x1x32xf32> to vector<16x16x32xf32>
    %177 = arith.mulf %173, %176 : vector<16x16x32xf32>
    %cst_76 = arith.constant dense<0.000000e+00> : vector<16x16xf32>
    %178 = vector.multi_reduction <add>, %177, %cst_76 [2] : vector<16x16x32xf32> to vector<16x16xf32>
    %c0_77 = arith.constant 0 : index
    %c0_78 = arith.constant 0 : index
    %179 = vector.load %arg29[%c0_77, %c0_78] : memref<1x1xf32, #tpu.memory_space<vmem>>, vector<1x1xf32>
    %180 = vector.broadcast %179 : vector<1x1xf32> to vector<16x16xf32>
    %181 = arith.addf %178, %180 : vector<16x16xf32>
    %182 = arith.mulf %181, %97 : vector<16x16xf32>
    %cst_79 = arith.constant dense<0.000000e+00> : vector<16xf32>
    %183 = vector.multi_reduction <add>, %182, %cst_79 [1] : vector<16x16xf32> to vector<16xf32>
    %184 = vector.shape_cast %183 : vector<16xf32> to vector<16x1xf32>
    %185 = vector.broadcast %184 : vector<16x1xf32> to vector<16x8xf32>
    %186 = arith.mulf %185, %44 : vector<16x8xf32>
    %cst_80 = arith.constant dense<0.000000e+00> : vector<16x8xf32>
    %187 = tpu.matmul %182, %44, %cst_80 {dimension_numbers = #tpu.dot_dimension_numbers<[1], [0], [0], [1], [0, 0, 1, 1], [], []>} : vector<16x16xf32>, vector<16x8xf32>, vector<16x8xf32> -> vector<16x8xf32>
    %188 = arith.subf %186, %187 : vector<16x8xf32>
    %189 = vector.broadcast %100 : vector<16x1xf32> to vector<16x8xf32>
    %190 = arith.mulf %189, %188 : vector<16x8xf32>
    %191 = arith.addf %44, %190 : vector<16x8xf32>
    %192 = vector.shape_cast %161 : vector<256x32xf32> to vector<16x16x32xf32>
    %193 = vector.shape_cast %97 : vector<16x16xf32> to vector<16x16x1xf32>
    %194 = vector.broadcast %193 : vector<16x16x1xf32> to vector<16x16x32xf32>
    %195 = arith.mulf %192, %194 : vector<16x16x32xf32>
    %cst_81 = arith.constant dense<0.000000e+00> : vector<16x32xf32>
    %196 = vector.multi_reduction <add>, %195, %cst_81 [1] : vector<16x16x32xf32> to vector<16x32xf32>
    %197 = tpu.concatenate %110, %196 in 1 : vector<16x32xf32>, vector<16x32xf32> -> vector<16x64xf32>
    %c0_82 = arith.constant 0 : index
    %c0_83 = arith.constant 0 : index
    %198 = vector.load %arg30[%c0_82, %c0_83] : memref<64x32xf32, #tpu.memory_space<vmem>>, vector<64x32xf32>
    %cst_84 = arith.constant dense<0.000000e+00> : vector<16x32xf32>
    %199 = tpu.matmul %197, %198, %cst_84 {dimension_numbers = #tpu.dot_dimension_numbers<[1], [0], [0], [1], [0, 0, 1, 1], [], []>} : vector<16x64xf32>, vector<64x32xf32>, vector<16x32xf32> -> vector<16x32xf32>
    %c0_85 = arith.constant 0 : index
    %c0_86 = arith.constant 0 : index
    %200 = vector.load %arg31[%c0_85, %c0_86] : memref<1x32xf32, #tpu.memory_space<vmem>>, vector<1x32xf32>
    %201 = vector.broadcast %200 : vector<1x32xf32> to vector<16x32xf32>
    %202 = arith.addf %199, %201 : vector<16x32xf32>
    %203 = arith.negf %202 : vector<16x32xf32>
    %204 = math.exp %203 : vector<16x32xf32>
    %cst_87 = arith.constant 1.000000e+00 : f32
    %205 = vector.broadcast %cst_87 : f32 to vector<16x32xf32>
    %206 = arith.addf %205, %204 : vector<16x32xf32>
    %207 = arith.divf %205, %206 : vector<16x32xf32>
    %208 = arith.mulf %202, %207 : vector<16x32xf32>
    %c0_88 = arith.constant 0 : index
    %c0_89 = arith.constant 0 : index
    %209 = vector.load %arg32[%c0_88, %c0_89] : memref<32x32xf32, #tpu.memory_space<vmem>>, vector<32x32xf32>
    %cst_90 = arith.constant dense<0.000000e+00> : vector<16x32xf32>
    %210 = tpu.matmul %208, %209, %cst_90 {dimension_numbers = #tpu.dot_dimension_numbers<[1], [0], [0], [1], [0, 0, 1, 1], [], []>} : vector<16x32xf32>, vector<32x32xf32>, vector<16x32xf32> -> vector<16x32xf32>
    %211 = arith.addf %110, %210 : vector<16x32xf32>
    %c0_91 = arith.constant 0 : index
    %c0_92 = arith.constant 0 : index
    %212 = vector.load %arg33[%c0_91, %c0_92] : memref<1x32xf32, #tpu.memory_space<vmem>>, vector<1x32xf32>
    %213 = vector.broadcast %212 : vector<1x32xf32> to vector<16x32xf32>
    %214 = arith.addf %211, %213 : vector<16x32xf32>
    %215 = arith.mulf %191, %191 : vector<16x8xf32>
    %cst_93 = arith.constant dense<0.000000e+00> : vector<16xf32>
    %216 = vector.multi_reduction <add>, %215, %cst_93 [1] : vector<16x8xf32> to vector<16xf32>
    %217 = vector.shape_cast %216 : vector<16xf32> to vector<16x1xf32>
    %cst_94 = arith.constant dense<0.000000e+00> : vector<16x16xf32>
    %218 = tpu.matmul %191, %191, %cst_94 {dimension_numbers = #tpu.dot_dimension_numbers<[1], [1], [0], [0], [0, 0, 1, 0], [], []>} : vector<16x8xf32>, vector<16x8xf32>, vector<16x16xf32> -> vector<16x16xf32>
    %219 = tpu.transpose %217, [1, 0] : vector<16x1xf32> -> vector<1x16xf32>
    %220 = vector.broadcast %217 : vector<16x1xf32> to vector<16x16xf32>
    %221 = vector.broadcast %219 : vector<1x16xf32> to vector<16x16xf32>
    %222 = arith.addf %220, %221 : vector<16x16xf32>
    %cst_95 = arith.constant 2.000000e+00 : f32
    %223 = vector.broadcast %cst_95 : f32 to vector<16x16xf32>
    %224 = arith.mulf %223, %218 : vector<16x16xf32>
    %225 = arith.subf %222, %224 : vector<16x16xf32>
    %cst_96 = arith.constant 0.000000e+00 : f32
    %226 = vector.broadcast %cst_96 : f32 to vector<16x16xf32>
    %227 = arith.maximumf %225, %226 : vector<16x16xf32>
    %c0_97 = arith.constant 0 : index
    %c0_98 = arith.constant 0 : index
    %228 = vector.load %arg34[%c0_97, %c0_98] : memref<32x64xf32, #tpu.memory_space<vmem>>, vector<32x64xf32>
    %cst_99 = arith.constant dense<0.000000e+00> : vector<16x64xf32>
    %229 = tpu.matmul %214, %228, %cst_99 {dimension_numbers = #tpu.dot_dimension_numbers<[1], [0], [0], [1], [0, 0, 1, 1], [], []>} : vector<16x32xf32>, vector<32x64xf32>, vector<16x64xf32> -> vector<16x64xf32>
    %230 = vector.extract_strided_slice %229 {offsets = [0, 0], sizes = [16, 32], strides = [1, 1]} : vector<16x64xf32> to vector<16x32xf32>
    %231 = vector.extract_strided_slice %229 {offsets = [0, 32], sizes = [16, 32], strides = [1, 1]} : vector<16x64xf32> to vector<16x32xf32>
    %232 = vector.shape_cast %230 : vector<16x32xf32> to vector<16x1x32xf32>
    %233 = vector.shape_cast %231 : vector<16x32xf32> to vector<1x16x32xf32>
    %234 = vector.broadcast %232 : vector<16x1x32xf32> to vector<16x16x32xf32>
    %235 = vector.broadcast %233 : vector<1x16x32xf32> to vector<16x16x32xf32>
    %236 = arith.addf %234, %235 : vector<16x16x32xf32>
    %237 = vector.shape_cast %227 : vector<16x16xf32> to vector<16x16x1xf32>
    %c0_100 = arith.constant 0 : index
    %c0_101 = arith.constant 0 : index
    %238 = vector.load %arg35[%c0_100, %c0_101] : memref<1x32xf32, #tpu.memory_space<vmem>>, vector<1x32xf32>
    %239 = vector.shape_cast %238 : vector<1x32xf32> to vector<1x1x32xf32>
    %240 = vector.broadcast %237 : vector<16x16x1xf32> to vector<16x16x32xf32>
    %241 = vector.broadcast %239 : vector<1x1x32xf32> to vector<16x16x32xf32>
    %242 = arith.mulf %240, %241 : vector<16x16x32xf32>
    %243 = arith.addf %236, %242 : vector<16x16x32xf32>
    %c0_102 = arith.constant 0 : index
    %c0_103 = arith.constant 0 : index
    %244 = vector.load %arg36[%c0_102, %c0_103] : memref<1x32xf32, #tpu.memory_space<vmem>>, vector<1x32xf32>
    %245 = vector.shape_cast %244 : vector<1x32xf32> to vector<1x1x32xf32>
    %246 = vector.broadcast %245 : vector<1x1x32xf32> to vector<16x16x32xf32>
    %247 = arith.addf %243, %246 : vector<16x16x32xf32>
    %248 = arith.negf %247 : vector<16x16x32xf32>
    %249 = math.exp %248 : vector<16x16x32xf32>
    %cst_104 = arith.constant 1.000000e+00 : f32
    %250 = vector.broadcast %cst_104 : f32 to vector<16x16x32xf32>
    %251 = arith.addf %250, %249 : vector<16x16x32xf32>
    %252 = arith.divf %250, %251 : vector<16x16x32xf32>
    %253 = arith.mulf %247, %252 : vector<16x16x32xf32>
    %254 = vector.shape_cast %253 : vector<16x16x32xf32> to vector<256x32xf32>
    %c0_105 = arith.constant 0 : index
    %c0_106 = arith.constant 0 : index
    %255 = vector.load %arg37[%c0_105, %c0_106] : memref<32x32xf32, #tpu.memory_space<vmem>>, vector<32x32xf32>
    %cst_107 = arith.constant dense<0.000000e+00> : vector<256x32xf32>
    %256 = tpu.matmul %254, %255, %cst_107 {dimension_numbers = #tpu.dot_dimension_numbers<[1], [0], [0], [1], [0, 0, 1, 1], [], []>} : vector<256x32xf32>, vector<32x32xf32>, vector<256x32xf32> -> vector<256x32xf32>
    %c0_108 = arith.constant 0 : index
    %c0_109 = arith.constant 0 : index
    %257 = vector.load %arg38[%c0_108, %c0_109] : memref<1x32xf32, #tpu.memory_space<vmem>>, vector<1x32xf32>
    %258 = vector.broadcast %257 : vector<1x32xf32> to vector<256x32xf32>
    %259 = arith.addf %256, %258 : vector<256x32xf32>
    %260 = arith.negf %259 : vector<256x32xf32>
    %261 = math.exp %260 : vector<256x32xf32>
    %cst_110 = arith.constant 1.000000e+00 : f32
    %262 = vector.broadcast %cst_110 : f32 to vector<256x32xf32>
    %263 = arith.addf %262, %261 : vector<256x32xf32>
    %264 = arith.divf %262, %263 : vector<256x32xf32>
    %265 = arith.mulf %259, %264 : vector<256x32xf32>
    %c0_111 = arith.constant 0 : index
    %c0_112 = arith.constant 0 : index
    %266 = vector.load %arg39[%c0_111, %c0_112] : memref<32x32xf32, #tpu.memory_space<vmem>>, vector<32x32xf32>
    %cst_113 = arith.constant dense<0.000000e+00> : vector<256x32xf32>
    %267 = tpu.matmul %265, %266, %cst_113 {dimension_numbers = #tpu.dot_dimension_numbers<[1], [0], [0], [1], [0, 0, 1, 1], [], []>} : vector<256x32xf32>, vector<32x32xf32>, vector<256x32xf32> -> vector<256x32xf32>
    %c0_114 = arith.constant 0 : index
    %c0_115 = arith.constant 0 : index
    %268 = vector.load %arg40[%c0_114, %c0_115] : memref<1x32xf32, #tpu.memory_space<vmem>>, vector<1x32xf32>
    %269 = vector.broadcast %268 : vector<1x32xf32> to vector<256x32xf32>
    %270 = arith.addf %267, %269 : vector<256x32xf32>
    %271 = arith.negf %270 : vector<256x32xf32>
    %272 = math.exp %271 : vector<256x32xf32>
    %cst_116 = arith.constant 1.000000e+00 : f32
    %273 = vector.broadcast %cst_116 : f32 to vector<256x32xf32>
    %274 = arith.addf %273, %272 : vector<256x32xf32>
    %275 = arith.divf %273, %274 : vector<256x32xf32>
    %276 = arith.mulf %270, %275 : vector<256x32xf32>
    %277 = vector.shape_cast %276 : vector<256x32xf32> to vector<16x16x32xf32>
    %c0_117 = arith.constant 0 : index
    %c0_118 = arith.constant 0 : index
    %278 = vector.load %arg41[%c0_117, %c0_118] : memref<1x32xf32, #tpu.memory_space<vmem>>, vector<1x32xf32>
    %279 = vector.shape_cast %278 : vector<1x32xf32> to vector<1x1x32xf32>
    %280 = vector.broadcast %279 : vector<1x1x32xf32> to vector<16x16x32xf32>
    %281 = arith.mulf %277, %280 : vector<16x16x32xf32>
    %cst_119 = arith.constant dense<0.000000e+00> : vector<16x16xf32>
    %282 = vector.multi_reduction <add>, %281, %cst_119 [2] : vector<16x16x32xf32> to vector<16x16xf32>
    %c0_120 = arith.constant 0 : index
    %c0_121 = arith.constant 0 : index
    %283 = vector.load %arg42[%c0_120, %c0_121] : memref<1x1xf32, #tpu.memory_space<vmem>>, vector<1x1xf32>
    %284 = vector.broadcast %283 : vector<1x1xf32> to vector<16x16xf32>
    %285 = arith.addf %282, %284 : vector<16x16xf32>
    %286 = arith.mulf %285, %97 : vector<16x16xf32>
    %cst_122 = arith.constant dense<0.000000e+00> : vector<16xf32>
    %287 = vector.multi_reduction <add>, %286, %cst_122 [1] : vector<16x16xf32> to vector<16xf32>
    %288 = vector.shape_cast %287 : vector<16xf32> to vector<16x1xf32>
    %289 = vector.broadcast %288 : vector<16x1xf32> to vector<16x8xf32>
    %290 = arith.mulf %289, %191 : vector<16x8xf32>
    %cst_123 = arith.constant dense<0.000000e+00> : vector<16x8xf32>
    %291 = tpu.matmul %286, %191, %cst_123 {dimension_numbers = #tpu.dot_dimension_numbers<[1], [0], [0], [1], [0, 0, 1, 1], [], []>} : vector<16x16xf32>, vector<16x8xf32>, vector<16x8xf32> -> vector<16x8xf32>
    %292 = arith.subf %290, %291 : vector<16x8xf32>
    %293 = vector.broadcast %100 : vector<16x1xf32> to vector<16x8xf32>
    %294 = arith.mulf %293, %292 : vector<16x8xf32>
    %295 = arith.addf %191, %294 : vector<16x8xf32>
    %296 = vector.shape_cast %265 : vector<256x32xf32> to vector<16x16x32xf32>
    %297 = vector.shape_cast %97 : vector<16x16xf32> to vector<16x16x1xf32>
    %298 = vector.broadcast %297 : vector<16x16x1xf32> to vector<16x16x32xf32>
    %299 = arith.mulf %296, %298 : vector<16x16x32xf32>
    %cst_124 = arith.constant dense<0.000000e+00> : vector<16x32xf32>
    %300 = vector.multi_reduction <add>, %299, %cst_124 [1] : vector<16x16x32xf32> to vector<16x32xf32>
    %301 = tpu.concatenate %214, %300 in 1 : vector<16x32xf32>, vector<16x32xf32> -> vector<16x64xf32>
    %c0_125 = arith.constant 0 : index
    %c0_126 = arith.constant 0 : index
    %302 = vector.load %arg43[%c0_125, %c0_126] : memref<64x32xf32, #tpu.memory_space<vmem>>, vector<64x32xf32>
    %cst_127 = arith.constant dense<0.000000e+00> : vector<16x32xf32>
    %303 = tpu.matmul %301, %302, %cst_127 {dimension_numbers = #tpu.dot_dimension_numbers<[1], [0], [0], [1], [0, 0, 1, 1], [], []>} : vector<16x64xf32>, vector<64x32xf32>, vector<16x32xf32> -> vector<16x32xf32>
    %c0_128 = arith.constant 0 : index
    %c0_129 = arith.constant 0 : index
    %304 = vector.load %arg44[%c0_128, %c0_129] : memref<1x32xf32, #tpu.memory_space<vmem>>, vector<1x32xf32>
    %305 = vector.broadcast %304 : vector<1x32xf32> to vector<16x32xf32>
    %306 = arith.addf %303, %305 : vector<16x32xf32>
    %307 = arith.negf %306 : vector<16x32xf32>
    %308 = math.exp %307 : vector<16x32xf32>
    %cst_130 = arith.constant 1.000000e+00 : f32
    %309 = vector.broadcast %cst_130 : f32 to vector<16x32xf32>
    %310 = arith.addf %309, %308 : vector<16x32xf32>
    %311 = arith.divf %309, %310 : vector<16x32xf32>
    %312 = arith.mulf %306, %311 : vector<16x32xf32>
    %c0_131 = arith.constant 0 : index
    %c0_132 = arith.constant 0 : index
    %313 = vector.load %arg45[%c0_131, %c0_132] : memref<32x32xf32, #tpu.memory_space<vmem>>, vector<32x32xf32>
    %cst_133 = arith.constant dense<0.000000e+00> : vector<16x32xf32>
    %314 = tpu.matmul %312, %313, %cst_133 {dimension_numbers = #tpu.dot_dimension_numbers<[1], [0], [0], [1], [0, 0, 1, 1], [], []>} : vector<16x32xf32>, vector<32x32xf32>, vector<16x32xf32> -> vector<16x32xf32>
    %315 = arith.addf %214, %314 : vector<16x32xf32>
    %c0_134 = arith.constant 0 : index
    %c0_135 = arith.constant 0 : index
    %316 = vector.load %arg46[%c0_134, %c0_135] : memref<1x32xf32, #tpu.memory_space<vmem>>, vector<1x32xf32>
    %317 = vector.broadcast %316 : vector<1x32xf32> to vector<16x32xf32>
    %318 = arith.addf %315, %317 : vector<16x32xf32>
    %c0_136 = arith.constant 0 : index
    %c0_137 = arith.constant 0 : index
    %319 = vector.load %arg17[%c0_136, %c0_137] : memref<32x16xf32, #tpu.memory_space<vmem>>, vector<32x16xf32>
    %cst_138 = arith.constant dense<0.000000e+00> : vector<16x16xf32>
    %320 = tpu.matmul %318, %319, %cst_138 {dimension_numbers = #tpu.dot_dimension_numbers<[1], [0], [0], [1], [0, 0, 1, 1], [], []>} : vector<16x32xf32>, vector<32x16xf32>, vector<16x16xf32> -> vector<16x16xf32>
    %c0_139 = arith.constant 0 : index
    %c0_140 = arith.constant 0 : index
    %321 = vector.load %arg18[%c0_139, %c0_140] : memref<1x16xf32, #tpu.memory_space<vmem>>, vector<1x16xf32>
    %322 = vector.broadcast %321 : vector<1x16xf32> to vector<16x16xf32>
    %323 = arith.addf %320, %322 : vector<16x16xf32>
    %324 = arith.negf %323 : vector<16x16xf32>
    %325 = math.exp %324 : vector<16x16xf32>
    %cst_141 = arith.constant 1.000000e+00 : f32
    %326 = vector.broadcast %cst_141 : f32 to vector<16x16xf32>
    %327 = arith.addf %326, %325 : vector<16x16xf32>
    %328 = arith.divf %326, %327 : vector<16x16xf32>
    %329 = arith.mulf %323, %328 : vector<16x16xf32>
    %c0_142 = arith.constant 0 : index
    %c0_143 = arith.constant 0 : index
    %330 = vector.load %arg19[%c0_142, %c0_143] : memref<16x8xf32, #tpu.memory_space<vmem>>, vector<16x8xf32>
    %cst_144 = arith.constant dense<0.000000e+00> : vector<16x8xf32>
    %331 = tpu.matmul %329, %330, %cst_144 {dimension_numbers = #tpu.dot_dimension_numbers<[1], [0], [0], [1], [0, 0, 1, 1], [], []>} : vector<16x16xf32>, vector<16x8xf32>, vector<16x8xf32> -> vector<16x8xf32>
    %c0_145 = arith.constant 0 : index
    %c0_146 = arith.constant 0 : index
    %332 = vector.load %arg20[%c0_145, %c0_146] : memref<1x8xf32, #tpu.memory_space<vmem>>, vector<1x8xf32>
    %333 = vector.broadcast %332 : vector<1x8xf32> to vector<16x8xf32>
    %334 = arith.addf %331, %333 : vector<16x8xf32>
    %335 = arith.subf %295, %44 : vector<16x8xf32>
    %336 = arith.cmpf one, %335, %335 : vector<16x8xf32>
    %337 = arith.extui %336 : vector<16x8xi1> to vector<16x8xi32>
    %338 = arith.sitofp %337 : vector<16x8xi32> to vector<16x8xf32>
    %cst_147 = arith.constant dense<0xFF800000> : vector<16xf32>
    %339 = vector.multi_reduction <maximumf>, %338, %cst_147 [1] : vector<16x8xf32> to vector<16xf32>
    %340 = vector.shape_cast %339 : vector<16xf32> to vector<16x1xf32>
    %cst_148 = arith.constant dense<0xFF800000> : vector<1xf32>
    %341 = vector.multi_reduction <maximumf>, %340, %cst_148 [0] : vector<16x1xf32> to vector<1xf32>
    %342 = vector.shape_cast %341 : vector<1xf32> to vector<1x1xf32>
    %cst_149 = arith.constant 0.000000e+00 : f32
    %343 = vector.broadcast %cst_149 : f32 to vector<1x1xf32>
    %344 = arith.cmpf ogt, %342, %343 : vector<1x1xf32>
    %cst_150 = arith.constant 0.000000e+00 : f32
    %345 = vector.broadcast %cst_150 : f32 to vector<16x8xf32>
    %346 = vector.shape_cast %344 : vector<1x1xi1> to vector<1x1xi1>
    %347 = vector.broadcast %346 : vector<1x1xi1> to vector<16x8xi1>
    %348 = arith.select %347, %345, %335 : vector<16x8xi1>, vector<16x8xf32>
    %cst_151 = arith.constant 0.000000e+00 : f32
    %349 = vector.broadcast %cst_151 : f32 to vector<16x112xf32>
    %350 = tpu.concatenate %334, %348, %349 in 1 : vector<16x8xf32>, vector<16x8xf32>, vector<16x112xf32> -> vector<16x128xf32>
    %c0_152 = arith.constant 0 : index
    %c0_153 = arith.constant 0 : index
    %351 = vector.load %arg47[%c0_152, %c0_153] : memref<16x128xf32, #tpu.memory_space<vmem>>, vector<16x128xf32>
    tpu.vector_store %arg47[%c0_152, %c0_153], %350 {strides = array<i32>} : memref<16x128xf32, #tpu.memory_space<vmem>>, vector<16x128xf32>,
    return
  }
}

</mosaic_0001>

<bundles_post_ra>
// kernel: estimator_forward.1
= control target key start
LH: loop header
LB: loop body
LE: loop exit
PB: predicated region body
PF: predicated region fallthrough
CT: control target
= control target key end

     0   :  { %s10025_s6 = smov 1   ;;  %s10026_s10 = smov 2   ;;  %s13082_s0 = inlined_call_operand.smem [shape: u32[48], index: -1, kind: input, shape index: {}] }
   0x1   :  { %s10103_s5 = sld [smem:[%s13082_s0]]   ;;  %s10027_s14 = smov 3  }
   0x2   :  { %s10108_s9 = sld [smem:[%s13082_s0 + %s10025_s6]]   ;;  %s10028_s18 = smov 4  }
   0x3   :  { %s10113_s13 = sld [smem:[%s13082_s0 + %s10026_s10]]   ;;  %s10029_s22 = smov 5  }
   0x4   :  { %s10118_s17 = sld [smem:[%s13082_s0 + %s10027_s14]]   ;;  %s10030_s26 = smov 6  }
   0x5   :  { %s10123_s21 = sld [smem:[%s13082_s0 + %s10028_s18]]   ;;  %s10031_s30 = smov 7  }
   0x6   :  { %s10128_s25 = sld [smem:[%s13082_s0 + %s10029_s22]]   ;;  %s10032_s4 = smov 8  }
   0x7   :  { %13200 = sst [smem:[#allocation35_spill]] %s10103_s5  ;;  %s10033_s10 = smov 9  }
   0x8   :  { %13201 = sst [smem:[#allocation36_spill]] %s10108_s9  ;;  %s10034_s15 = smov 10  }
   0x9   :  { %13202 = sst [smem:[#allocation37_spill]] %s10113_s13  ;;  %s10035_s20 = smov 11  }
   0xa   :  { %13203 = sst [smem:[#allocation38_spill]] %s10118_s17  ;;  %s10037_s1 = smov 13  }
   0xb   :  { %13204 = sst [smem:[#allocation39_spill]] %s10123_s21  ;;  %s10038_s7 = smov 14  }
   0xc   :  { %13205 = sst [smem:[#allocation40_spill]] %s10128_s25  ;;  %s10040_s22 = smov 16  }
   0xd   :  { %s10133_s29 = sld [smem:[%s13082_s0 + %s10030_s26]]   ;;  %s10036_s26 = smov 12  }
   0xe   :  { %s10138_s3 = sld [smem:[%s13082_s0 + %s10031_s30]]   ;;  %s10041_s28 = smov 17  }
   0xf   :  { %s10143_s8 = sld [smem:[%s13082_s0 + %s10032_s4]]   ;;  %s10055_s16 = smov 31  }
  0x10   :  { %s10148_s14 = sld [smem:[%s13082_s0 + %s10033_s10]]   ;;  %s10054_s10 = smov 30  }
  0x11   :  { %s10153_s19 = sld [smem:[%s13082_s0 + %s10034_s15]]   ;;  %s10039_s15 = smov 15  }
  0x12   :  { %s10158_s24 = sld [smem:[%s13082_s0 + %s10035_s20]]   ;;  %s10056_s23 = smov 32  }
  0x13   :  { %s10163_s30 = sld [smem:[%s13082_s0 + %s10036_s26]]  }
  0x14   :  { %s10168_s6 = sld [smem:[%s13082_s0 + %s10037_s1]]   ;;  %s10057_s1 = smov 33  }
  0x15   :  { %13206 = sst [smem:[#allocation41_spill]] %s10143_s8 }
  0x16   :  { %s10173_s12 = sld [smem:[%s13082_s0 + %s10038_s7]]   ;;  %s10042_s7 = smov 18  }
  0x17   :  { %13207 = sst [smem:[#allocation42_spill]] %s10153_s19 }
  0x18   :  { %s10178_s20 = sld [smem:[%s13082_s0 + %s10039_s15]]   ;;  %s10043_s15 = smov 19  }
  0x19   :  { %13208 = sst [smem:[#allocation43_spill]] %s10163_s30 }
  0x1a   :  { %s10183_s27 = sld [smem:[%s13082_s0 + %s10040_s22]]   ;;  %s10044_s22 = smov 20  }
  0x1b   :  { %s10188_s4 = sld [smem:[%s13082_s0 + %s10041_s28]]   ;;  %s10045_s28 = smov 21  }
  0x1c   :  { %13209 = sst [smem:[#allocation44_spill]] %s10173_s12 }
  0x1d   :  { %s10193_s5 = sld [smem:[%s13082_s0 + %s10042_s7]]   ;;  %s10046_s7 = smov 22  }
  0x1e   :  { %s10198_s21 = sld [smem:[%s13082_s0 + %s10043_s15]]   ;;  %s10047_s15 = smov 23  }
  0x1f   :  { %s10203_s12 = sld [smem:[%s13082_s0 + %s10044_s22]]   ;;  %s10048_s22 = smov 24  }
  0x20   :  { %s10213_s25 = sld [smem:[%s13082_s0 + %s10046_s7]]   ;;  %s10050_s7 = smov 26  }
  0x21   :  { %13210 = sst [smem:[#allocation45_spill]] %s10188_s4 }
  0x22   :  { %s10208_s4 = sld [smem:[%s13082_s0 + %s10045_s28]]   ;;  %s10049_s28 = smov 25  }
  0x23   :  { %s10223_s17 = sld [smem:[%s13082_s0 + %s10048_s22]]   ;;  %s10052_s22 = smov 28  }
  0x24   :  { %13211 = sst [smem:[#allocation46_spill]] %s10198_s21 }
  0x25   :  { %s10218_s21 = sld [smem:[%s13082_s0 + %s10047_s15]]   ;;  %s10051_s15 = smov 27  }
  0x26   :  { %s10233_s30 = sld [smem:[%s13082_s0 + %s10050_s7]]   ;;  %s10062_s7 = smov 38  }
  0x27   :  { %s10238_s8 = sld [smem:[%s13082_s0 + %s10051_s15]]  }
  0x28   :  { %13212 = sst [smem:[#allocation47_spill]] %s10208_s4 }
  0x29   :  { %13213 = sst [smem:[#allocation48_spill]] %s10223_s17 }
  0x2a   :  { %s10228_s4 = sld [smem:[%s13082_s0 + %s10049_s28]]   ;;  %s10053_s28 = smov 29  }
  0x2b   :  { %s10243_s17 = sld [smem:[%s13082_s0 + %s10052_s22]]  }
  0x2c   :  { %13214 = sst [smem:[#allocation49_spill]] %s10233_s30 }
  0x2d   :  { %s7817_s13 = sld [smem:[%s13082_s0 + %s10053_s28]]  }
  0x2e   :  { %s10251_s30 = sld [smem:[%s13082_s0 + %s10054_s10]]   ;;  %s10058_s10 = smov 34  }
  0x2f   :  { %s10256_s19 = sld [smem:[%s13082_s0 + %s10055_s16]]   ;;  %s10059_s16 = smov 35  }
  0x30   :  { %s10261_s9 = sld [smem:[%s13082_s0 + %s10056_s23]]   ;;  %s10060_s23 = smov 36  }
  0x31   :  { %13215 = sst [smem:[#allocation50_spill]] %s10243_s17 }
  0x32   :  { %s10266_s17 = sld [smem:[%s13082_s0 + %s10057_s1]]   ;;  %s10061_s1 = smov 37  }
  0x33   :  { %v101_v0 = vstv %s7817_s13  ;;  %s10281_s28 = sld [smem:[%s13082_s0 + %s10060_s23]]   ;;  %s10063_s13 = smov 39  }
  0x34   :  { %13216 = sst [smem:[#allocation51_spill]] %s10251_s30  ;;  %102 = vst [vmem:[#allocation3] sm:$0x1] %v101_v0  ;;  %s10064_s23 = smov 40  }
  0x35   :  { %13217 = sst [smem:[#allocation52_spill]] %s10256_s19 }
  0x36   :  { %s10271_s30 = sld [smem:[%s13082_s0 + %s10058_s10]]  }
  0x37   :  { %s10276_s19 = sld [smem:[%s13082_s0 + %s10059_s16]]  }
  0x38   :  { %13218 = sst [smem:[#allocation53_spill]] %s10266_s17  ;;  %s10065_s17 = smov 41  }
  0x39   :  { %13221 = sst [smem:[#allocation56_spill]] %s10281_s28  ;;  %s10068_s28 = smov 45  }
  0x3a   :  { %s10286_s10 = sld [smem:[%s13082_s0 + %s10061_s1]]  }
  0x3b   :  { %s10291_s16 = sld [smem:[%s13082_s0 + %s10062_s7]]  }
  0x3c   :  { %13219 = sst [smem:[#allocation54_spill]] %s10271_s30  ;;  %s10066_s30 = smov 43  }
  0x3d   :  { %13220 = sst [smem:[#allocation55_spill]] %s10276_s19 }
  0x3e   :  { %s10296_s22 = sld [smem:[%s13082_s0 + %s10063_s13]]   ;;  %s10067_s13 = smov 44  }
  0x3f   :  { %s10301_s19 = sld [smem:[%s13082_s0 + %s10064_s23]]  }
  0x40   :  { %13222 = sst [smem:[#allocation57_spill]] %s10286_s10 }
  0x41   :  { %13223 = sst [smem:[#allocation58_spill]] %s10291_s16 }
  0x42   :  { %s10306_s10 = sld [smem:[%s13082_s0 + %s10065_s17]]   ;;  %s10069_s17 = smov 46  }
  0x43   :  { %s10311_s16 = sld [smem:[%s13082_s0 + %s10066_s30]]   ;;  %s10070_s30 = smov 47  }
  0x44   :  { %13224 = sst [smem:[#allocation59_spill]] %s10296_s22 }
  0x45   :  { %13225 = sst [smem:[#allocation60_spill]] %s10301_s19 }
  0x46   :  { %s10316_s22 = sld [smem:[%s13082_s0 + %s10067_s13]]   ;;  %s10071_s13 = smov 42  }
  0x47   :  { %s10321_s19 = sld [smem:[%s13082_s0 + %s10068_s28]]  }
  0x48   :  { %13226 = sst [smem:[#allocation61_spill]] %s10306_s10 }
  0x49   :  { %13227 = sst [smem:[#allocation62_spill]] %s10311_s16 }
  0x4a   :  { %s10326_s10 = sld [smem:[%s13082_s0 + %s10069_s17]]  }
  0x4b   :  { %s10331_s16 = sld [smem:[%s13082_s0 + %s10070_s30]]  }
  0x4c   :  { %13228 = sst [smem:[#allocation63_spill]] %s10316_s22 }
  0x4d   :  { %s7830_s22 = sld [smem:[%s13082_s0 + %s10071_s13]]  }
  0x53   :  { %v103_v1 = vstv %s7830_s22 }
  0x54   :  { %104 = vst [vmem:[#allocation4] sm:$0x1] %v103_v1 }
  0x55   :  { %105 = vsyncpa [#allocation6], 0 }
  0x56   :  { %106 = vsyncpa [#allocation8], 0 }
  0x57   :  { %107 = vsyncpa [#allocation11], 0 }
  0x58   :  { %108 = vsyncpa [#allocation14], 0 }
  0x59   :  { %109 = vsyncpa [#allocation17], 0 }
  0x5a   :  { %110 = vsyncpa [#allocation20], 0 }
  0x5b   :  { %111 = vsyncpa [#allocation23], 0 }
  0x5c   :  { %112 = vsyncpa [#allocation26], 0  ;;  %s10072_s28 = smov [#allocation7]   ;;  %s10073_s26 = smov [#allocation10]  }
  0x5d   :  { %s141_s23 = sshll.u32 %s10072_s28, 4  ;;  %s165_s17 = sshll.u32 %s10073_s26, 4  ;;  %s142_s23 = int_to_ptr.vmem [resolvable:$true] %s141_s23  ;;  %s166_s17 = int_to_ptr.vmem [resolvable:$true] %s165_s17 }
  0x5e   :  { %s9737_s1 = scalar_lea.vmem %s142_s23, 16  ;;  %s9741_s2 = scalar_lea.vmem %s142_s23, 32 }
  0x5f   :  { %p9738_p0 = scmp.ne.s32.totalorder %s142_s23, %s9737_s1  ;;  %p9742_p1 = scmp.lt.s32.totalorder %s142_s23, %s142_s23 }
  0x60   :  { %p9743_p2 = scmp.lt.s32.totalorder %s9741_s2, %s9737_s1 }
  0x62   :  { %p9744_p3 = por %p9743_p2, %p9742_p1 }
  0x64   :  { %p9745_p4 = pnand %p9744_p3, %p9738_p0 }
  0x66   :  { %9748 = shalt.err (!%p9745_p4)
}
  0x67   :  { %144 = dma.hbm_to_vmem [thread:$0]  %s10138_s3, 16, %s142_s23, [#allocation8]  }
  0x68   :  { %s9757_s0 = scalar_lea.vmem %s166_s17, 16  ;;  %s9761_s22 = scalar_lea.vmem %s166_s17, 32 }
  0x69   :  { %p9758_p5 = scmp.ne.s32.totalorder %s166_s17, %s9757_s0  ;;  %p9762_p6 = scmp.lt.s32.totalorder %s166_s17, %s166_s17 }
  0x6a   :  { %p9763_p7 = scmp.lt.s32.totalorder %s9761_s22, %s9757_s0 }
  0x6c   :  { %p9764_p8 = por %p9763_p7, %p9762_p6 }
  0x6e   :  { %p9765_p9 = pnand %p9764_p8, %p9758_p5 }
  0x70   :  { %9768 = shalt.err (!%p9765_p9)
}
  0x71   :  { %168 = dma.hbm_to_vmem [thread:$0]  %s10158_s24, 16, %s166_s17, [#allocation11]  }
  0x72   :  { %s10074_s30 = smov [#allocation13]   ;;  %s10075_s11 = smov [#allocation16]  }
  0x73   :  { %s189_s7 = sshll.u32 %s10074_s30, 4  ;;  %s211_s13 = sshll.u32 %s10075_s11, 4  ;;  %s190_s7 = int_to_ptr.vmem [resolvable:$true] %s189_s7  ;;  %s212_s13 = int_to_ptr.vmem [resolvable:$true] %s211_s13 }
  0x74   :  { %s9777_s15 = scalar_lea.vmem %s190_s7, 16  ;;  %s9781_s18 = scalar_lea.vmem %s190_s7, 32 }
  0x75   :  { %p9778_p10 = scmp.ne.s32.totalorder %s190_s7, %s9777_s15  ;;  %p9782_p11 = scmp.lt.s32.totalorder %s190_s7, %s190_s7 }
  0x76   :  { %p9783_p12 = scmp.lt.s32.totalorder %s9781_s18, %s9777_s15 }
  0x78   :  { %p9784_p13 = por %p9783_p12, %p9782_p11 }
  0x7a   :  { %p9785_p0 = pnand %p9784_p13, %p9778_p10 }
  0x7c   :  { %9788 = shalt.err (!%p9785_p0)
}
  0x7d   :  { %192 = dma.hbm_to_vmem [thread:$0]  %s10178_s20, 16, %s190_s7, [#allocation14]  }
  0x7e   :  { %s9797_s3 = scalar_lea.vmem %s212_s13, 16  ;;  %s9801_s28 = scalar_lea.vmem %s212_s13, 32 }
  0x7f   :  { %p9798_p1 = scmp.ne.s32.totalorder %s212_s13, %s9797_s3  ;;  %p9802_p2 = scmp.lt.s32.totalorder %s212_s13, %s212_s13 }
  0x80   :  { %p9803_p3 = scmp.lt.s32.totalorder %s9801_s28, %s9797_s3 }
  0x82   :  { %p9804_p4 = por %p9803_p3, %p9802_p2 }
  0x84   :  { %p9805_p5 = pnand %p9804_p4, %p9798_p1 }
  0x86   :  { %9808 = shalt.err (!%p9805_p5)
}
  0x87   :  { %214 = dma.hbm_to_vmem [thread:$0]  %s10193_s5, 16, %s212_s13, [#allocation17]  }
  0x88   :  { %s10076_s24 = smov [#allocation19]   ;;  %s10077_s26 = smov [#allocation22]  }
  0x89   :  { %s235_s23 = sshll.u32 %s10076_s24, 4  ;;  %s257_s17 = sshll.u32 %s10077_s26, 4  ;;  %s236_s23 = int_to_ptr.vmem [resolvable:$true] %s235_s23  ;;  %s258_s17 = int_to_ptr.vmem [resolvable:$true] %s257_s17 }
  0x8a   :  { %s9817_s1 = scalar_lea.vmem %s236_s23, 16  ;;  %s9821_s2 = scalar_lea.vmem %s236_s23, 32 }
  0x8b   :  { %p9818_p6 = scmp.ne.s32.totalorder %s236_s23, %s9817_s1  ;;  %p9822_p7 = scmp.lt.s32.totalorder %s236_s23, %s236_s23 }
  0x8c   :  { %p9823_p8 = scmp.lt.s32.totalorder %s9821_s2, %s9817_s1 }
  0x8e   :  { %p9824_p9 = por %p9823_p8, %p9822_p7 }
  0x90   :  { %p9825_p10 = pnand %p9824_p9, %p9818_p6 }
  0x92   :  { %9828 = shalt.err (!%p9825_p10)
}
  0x93   :  { %238 = dma.hbm_to_vmem [thread:$0]  %s10213_s25, 16, %s236_s23, [#allocation20]  }
  0x94   :  { %s9837_s20 = scalar_lea.vmem %s258_s17, 16  ;;  %s9841_s0 = scalar_lea.vmem %s258_s17, 32 }
  0x95   :  { %p9838_p11 = scmp.ne.s32.totalorder %s258_s17, %s9837_s20  ;;  %p9842_p12 = scmp.lt.s32.totalorder %s258_s17, %s258_s17 }
  0x96   :  { %p9843_p13 = scmp.lt.s32.totalorder %s9841_s0, %s9837_s20 }
  0x98   :  { %p9844_p0 = por %p9843_p13, %p9842_p12 }
  0x9a   :  { %p9845_p1 = pnand %p9844_p0, %p9838_p11 }
  0x9c   :  { %9848 = shalt.err (!%p9845_p1)
}
  0x9d   :  { %260 = dma.hbm_to_vmem [thread:$0]  %s10228_s4, 16, %s258_s17, [#allocation23]  }
  0x9e   :  { %s10078_s5 = smov [#allocation5]   ;;  %s10079_s30 = smov [#allocation9]  }
  0x9f   :  { %s131_s22 = sshll.u32 %s10078_s5, 4  ;;  %s153_s7 = sshll.u32 %s10079_s30, 4  ;;  %s132_s22 = int_to_ptr.vmem [resolvable:$true] %s131_s22  ;;  %s154_s7 = int_to_ptr.vmem [resolvable:$true] %s153_s7 }
  0xa0   :  { %s9857_s11 = scalar_lea.vmem %s132_s22, 128  ;;  %p9862_p3 = scmp.lt.s32.totalorder %s132_s22, %s132_s22 }
  0xa1   :  { %p9858_p2 = scmp.ne.s32.totalorder %s132_s22, %s9857_s11  ;;  %p9863_p4 = scmp.lt.s32.totalorder %s9857_s11, %s9857_s11 }
  0xa3   :  { %p9864_p5 = por %p9863_p4, %p9862_p3 }
  0xa5   :  { %p9865_p6 = pnand %p9864_p5, %p9858_p2 }
  0xa7   :  { %9868 = shalt.err (!%p9865_p6)
}
  0xa8   :  { %134 = dma.hbm_to_vmem [thread:$0]  %s10133_s29, 128, %s132_s22, [#allocation6]  }
  0xa9   :  { %s9877_s25 = scalar_lea.vmem %s154_s7, 16  ;;  %s9881_s13 = scalar_lea.vmem %s154_s7, 32 }
  0xaa   :  { %p9878_p7 = scmp.ne.s32.totalorder %s154_s7, %s9877_s25  ;;  %p9882_p8 = scmp.lt.s32.totalorder %s154_s7, %s154_s7 }
  0xab   :  { %p9883_p9 = scmp.lt.s32.totalorder %s9881_s13, %s9877_s25 }
  0xad   :  { %p9884_p10 = por %p9883_p9, %p9882_p8 }
  0xaf   :  { %p9885_p11 = pnand %p9884_p10, %p9878_p7 }
  0xb1   :  { %9888 = shalt.err (!%p9885_p11)
}
  0xb2   :  { %156 = dma.hbm_to_vmem [thread:$0]  %s10148_s14, 16, %s154_s7, [#allocation8]  }
  0xb3   :  { %s10080_s4 = smov [#allocation12]   ;;  %s10081_s18 = smov [#allocation15]  }
  0xb4   :  { %s177_s15 = sshll.u32 %s10080_s4, 4  ;;  %s199_s3 = sshll.u32 %s10081_s18, 4  ;;  %s178_s15 = int_to_ptr.vmem [resolvable:$true] %s177_s15  ;;  %s200_s3 = int_to_ptr.vmem [resolvable:$true] %s199_s3 }
  0xb5   :  { %s9897_s28 = scalar_lea.vmem %s178_s15, 16  ;;  %s9901_s24 = scalar_lea.vmem %s178_s15, 32 }
  0xb6   :  { %p9898_p12 = scmp.ne.s32.totalorder %s178_s15, %s9897_s28  ;;  %p9902_p13 = scmp.lt.s32.totalorder %s178_s15, %s178_s15 }
  0xb7   :  { %p9903_p0 = scmp.lt.s32.totalorder %s9901_s24, %s9897_s28 }
  0xb9   :  { %p9904_p1 = por %p9903_p0, %p9902_p13 }
  0xbb   :  { %p9905_p2 = pnand %p9904_p1, %p9898_p12 }
  0xbd   :  { %9908 = shalt.err (!%p9905_p2)
}
  0xbe   :  { %180 = dma.hbm_to_vmem [thread:$0]  %s10168_s6, 16, %s178_s15, [#allocation11]  }
  0xbf   :  { %s9917_s29 = scalar_lea.vmem %s200_s3, 16  ;;  %s9921_s23 = scalar_lea.vmem %s200_s3, 32 }
  0xc0   :  { %p9918_p3 = scmp.ne.s32.totalorder %s200_s3, %s9917_s29  ;;  %p9922_p4 = scmp.lt.s32.totalorder %s200_s3, %s200_s3 }
  0xc1   :  { %p9923_p5 = scmp.lt.s32.totalorder %s9921_s23, %s9917_s29 }
  0xc3   :  { %p9924_p6 = por %p9923_p5, %p9922_p4 }
  0xc5   :  { %p9925_p7 = pnand %p9924_p6, %p9918_p3 }
  0xc7   :  { %9928 = shalt.err (!%p9925_p7)
}
  0xc8   :  { %202 = dma.hbm_to_vmem [thread:$0]  %s10183_s27, 16, %s200_s3, [#allocation14]  }
  0xc9   :  { %s10082_s14 = smov [#allocation18]   ;;  %s10083_s17 = smov [#allocation21]  }
  0xca   :  { %s223_s26 = sshll.u32 %s10082_s14, 4  ;;  %s245_s1 = sshll.u32 %s10083_s17, 4  ;;  %s224_s26 = int_to_ptr.vmem [resolvable:$true] %s223_s26  ;;  %s246_s1 = int_to_ptr.vmem [resolvable:$true] %s245_s1 }
  0xcb   :  { %s9937_s2 = scalar_lea.vmem %s224_s26, 16  ;;  %s9941_s20 = scalar_lea.vmem %s224_s26, 32 }
  0xcc   :  { %p9938_p8 = scmp.ne.s32.totalorder %s224_s26, %s9937_s2  ;;  %p9942_p9 = scmp.lt.s32.totalorder %s224_s26, %s224_s26 }
  0xcd   :  { %p9943_p10 = scmp.lt.s32.totalorder %s9941_s20, %s9937_s2 }
  0xcf   :  { %p9944_p11 = por %p9943_p10, %p9942_p9 }
  0xd1   :  { %p9945_p12 = pnand %p9944_p11, %p9938_p8 }
  0xd3   :  { %9948 = shalt.err (!%p9945_p12)
}
  0xd4   :  { %226 = dma.hbm_to_vmem [thread:$0]  %s10203_s12, 16, %s224_s26, [#allocation17]  }
  0xd5   :  { %s9957_s6 = scalar_lea.vmem %s246_s1, 16  ;;  %s9961_s0 = scalar_lea.vmem %s246_s1, 32 }
  0xd6   :  { %p9958_p13 = scmp.ne.s32.totalorder %s246_s1, %s9957_s6  ;;  %p9962_p0 = scmp.lt.s32.totalorder %s246_s1, %s246_s1 }
  0xd7   :  { %p9963_p1 = scmp.lt.s32.totalorder %s9961_s0, %s9957_s6 }
  0xd9   :  { %p9964_p2 = por %p9963_p1, %p9962_p0 }
  0xdb   :  { %p9965_p3 = pnand %p9964_p2, %p9958_p13 }
  0xdd   :  { %9968 = shalt.err (!%p9965_p3)
}
  0xde   :  { %248 = dma.hbm_to_vmem [thread:$0]  %s10218_s21, 16, %s246_s1, [#allocation20]  }
  0xdf   :  { %s10084_s27 = smov [#allocation24]   ;;  %s10085_s22 = smov [#allocation25]  }
  0xe0   :  { %s269_s5 = sshll.u32 %s10084_s27, 4  ;;  %s279_s30 = sshll.u32 %s10085_s22, 4  ;;  %s270_s5 = int_to_ptr.vmem [resolvable:$true] %s269_s5  ;;  %s280_s30 = int_to_ptr.vmem [resolvable:$true] %s279_s30 }
  0xe1   :  { %s9977_s7 = scalar_lea.vmem %s270_s5, 16  ;;  %s9981_s11 = scalar_lea.vmem %s270_s5, 32 }
  0xe2   :  { %p9978_p4 = scmp.ne.s32.totalorder %s270_s5, %s9977_s7  ;;  %p9982_p5 = scmp.lt.s32.totalorder %s270_s5, %s270_s5 }
  0xe3   :  { %p9983_p6 = scmp.lt.s32.totalorder %s9981_s11, %s9977_s7 }
  0xe5   :  { %p9984_p7 = por %p9983_p6, %p9982_p5 }
  0xe7   :  { %p9985_p8 = pnand %p9984_p7, %p9978_p4 }
  0xe9   :  { %9988 = shalt.err (!%p9985_p8)
}
  0xea   :  { %272 = dma.hbm_to_vmem [thread:$0]  %s10238_s8, 16, %s270_s5, [#allocation23]  }
  0xeb   :  { %s9997_s12 = scalar_lea.vmem %s280_s30, 16  ;;  %s10001_s25 = scalar_lea.vmem %s280_s30, 32 }
  0xec   :  { %p9998_p9 = scmp.ne.s32.totalorder %s280_s30, %s9997_s12  ;;  %p10002_p10 = scmp.lt.s32.totalorder %s280_s30, %s280_s30 }
  0xed   :  { %p10003_p11 = scmp.lt.s32.totalorder %s10001_s25, %s9997_s12 }
  0xef   :  { %p10004_p12 = por %p10003_p11, %p10002_p10 }
  0xf1   :  { %p10005_p13 = pnand %p10004_p12, %p9998_p9 }
  0xf3   :  { %10008 = shalt.err (!%p10005_p13)
}
  0xf4   :  { %s13229_s21 = sld [smem:[#allocation50_spill]] }
  0xfa   :  { %282 = dma.hbm_to_vmem [thread:$0]  %s13229_s21, 16, %s280_s30, [#allocation26]  }
  0xfb   :  { %10009 = dma.done.wait [#allocation6], 128  }
  0xfc   :  { %10010 = vsyncadd [#allocation6], 4294967168 }
  0xfd   :  { %10011 = dma.done.wait [#allocation8], 32  }
  0xfe   :  { %10012 = vsyncadd [#allocation8], 4294967264 }
  0xff   :  { %10013 = dma.done.wait [#allocation11], 32  }
 0x100   :  { %10014 = vsyncadd [#allocation11], 4294967264 }
 0x101   :  { %10015 = dma.done.wait [#allocation14], 32  }
 0x102   :  { %10016 = vsyncadd [#allocation14], 4294967264 }
 0x103   :  { %10017 = dma.done.wait [#allocation17], 32  }
 0x104   :  { %10018 = vsyncadd [#allocation17], 4294967264 }
 0x105   :  { %10019 = dma.done.wait [#allocation20], 32  }
 0x106   :  { %10020 = vsyncadd [#allocation20], 4294967264 }
 0x107   :  { %10021 = dma.done.wait [#allocation23], 32  }
 0x108   :  { %10022 = vsyncadd [#allocation23], 4294967264 }
 0x109   :  { %10023 = dma.done.wait [#allocation26], 16  }
 0x10a   :  { %10024 = vsyncadd [#allocation26], 4294967280  ;;  %s13230_s8 = sld [smem:[#allocation36_spill]]  ;;  %v13101_v2 = vmov 0.0   ;;  %vm10087_vm0 = vmmov 0   ;;  %vm565_vm1 = vcmask 1041408   ;;  %v13100_v57 = vlaneseq }
 0x10b   :  { %s13231_s13 = sld [smem:[#allocation42_spill]]  ;;  %8461 = vmatprep.subr.mxu1 %v13101_v2  ;;  %8463 = vmatprep.mubr.msk.f32.mxu1 %vm10087_vm0, %v13101_v2  ;;  %vm13123_vm2 = vcmask 64512   ;;  %v365_v3 = vld [vmem:[#allocation5] sm:$0xff]  ;;  %vm561_vm3 = vcmask 80896   ;;  %vm660_vm4 = vcmask 1043456   ;;  %v13103_v22 = vmov 0   ;;  %vm922_vm10 = vmpackc.low %vm10087_vm0, %vm10087_vm0 }
 0x10c   :  { %s13232_s4 = sld [smem:[#allocation37_spill]]  ;;  %8477 = vmatprep.subr.mxu0 %v13101_v2  ;;  %8481 = vmatprep.mubr.msk.f32.mxu0 %vm10087_vm0, %v13101_v2  ;;  %v7836_v24 = vld [vmem:[#allocation7] ss:$0 sm:$0xff]  ;;  %v7841_v26 = vld [vmem:[#allocation10] ss:$0 sm:$0xff]  ;;  %vm465_vm6 = vcmask 261120  }
 0x10d   :  { %s13233_s15 = sld [smem:[#allocation41_spill]]  ;;  %8462 = vmatpush3.msra.mxu1 %v365_v3  ;;  %8922 = vset.pattern.permute.xlu0 %v13103_v22  ;;  %vm656_vm7 = vcmask 162816   ;;  %v7839_v44 = vld [vmem:[#allocation9] ss:$0 sm:$0xff]  ;;  %s10089_s29 = smov 112   ;;  %vm1039_vm8 = vcmask 130048  }
 0x10e   :  { %8466 = vmatprep.subr.mxu1 %v13101_v2  ;;  %s13234_s18 = sld [smem:[#allocation43_spill]]  ;;  %v7845_v53 = vld [vmem:[#allocation12] ss:$0 sm:$0xff]  ;;  %v10413_v58 = vshrl.u32 %v13100_v57, 7  ;;  %vm10090_vm11 = vmmov 1   ;;  %s10091_s1 = smov 96  }
 0x10f   :  { %s13235_s3 = sld [smem:[#allocation38_spill]]  ;;  %vm923_vm12 = vmpackc.low %vm10090_vm11, %vm10090_vm11  ;;  %s10093_s6 = smov 32  }
 0x110   :  { %v364_v4 = vld [vmem:[%s13230_s8] sm:$0xff]  ;;  %s13236_s28 = sld [smem:[#allocation40_spill]]  ;;  %13238 = vst [vmem:[#allocation64_spill] sm:$0xff] %v10413_v58  ;;  %v10416_v60 = vsub.s32 0, %v10413_v58 }
 0x111   :  { %v553_v5 = vld [vmem:[%s13231_s13 + $0x8] sm:$0x3]  ;;  %v552_v6 = vld [vmem:[%s13231_s13] sm:$0xff]  ;;  %8464 = vmatmul.mubr.msk.f32.vlgmr.msra.gmra.mxu1 %vm13123_vm2, %v364_v4  ;;  %s13237_s24 = sld [smem:[#allocation44_spill]] }
 0x112   :  { %8478 = vmatpush3.msk.msra.mxu0 %vm565_vm1, %v553_v5  ;;  %v551_v7 = vld [vmem:[%s13232_s4] sm:$0xff]  ;;  %8474 = vmatprep.mubr.msk.f32.mxu1 %vm10087_vm0, %v13101_v2  ;;  %13239 = vst [vmem:[#allocation65_spill] sm:$0xff] %v10416_v60  ;;  %s13241_s23 = sld [smem:[#allocation47_spill]] }
 0x113   :  { %8479 = vmatprep.subr.mxu0 %v13101_v2  ;;  %v457_v8 = vld [vmem:[%s13233_s15 + $0x18] sm:$0xff]  ;;  %v456_v9 = vld [vmem:[%s13233_s15 + $0x10] sm:$0xff]  ;;  %v455_v10 = vld [vmem:[%s13233_s15 + $0x8] sm:$0xff]  ;;  %s13246_s14 = sld [smem:[#allocation39_spill]] }
 0x114   :  { %8480 = vmatpush3.msra.mxu0 %v552_v6  ;;  %8467 = vmatpush3.msra.mxu1 %v457_v8  ;;  %v454_v11 = vld [vmem:[%s13233_s15] sm:$0xff]  ;;  %v648_v12 = vld [vmem:[%s13234_s18 + $0x10] sm:$0xf]  ;;  %v647_v13 = vld [vmem:[%s13234_s18 + $0x8] sm:$0xff]  ;;  %v10420_v6 = vsub.s32 2, %v10413_v58  ;;  %s13249_s26 = sld [smem:[#allocation35_spill]] }
 0x115   :  { %8482 = vmatmul.mubr.msk.f32.vlgmr.msra.gmra.mxu0 %vm561_vm3, %v551_v7  ;;  %8484 = vmatprep.subr.mxu0 %v13101_v2  ;;  %v646_v14 = vld [vmem:[%s13234_s18] sm:$0xff]  ;;  %v10383_v16 = vld [vmem:[%s13235_s3 + $0x8] sm:$0xff]  ;;  %s13252_s17 = sld [smem:[#allocation48_spill]] }
 0x116   :  { %8490 = vmatprep.mubr.msk.f32.mxu0 %vm10087_vm0, %v13101_v2  ;;  %8468 = vmatprep.subr.mxu1 %v13101_v2  ;;  %v10380_v15 = vld [vmem:[%s13235_s3] sm:$0xff]  ;;  %v790_v18 = vmul.f32 %v10383_v16, %v10383_v16  ;;  %13240 = vst [vmem:[#allocation66_spill] sm:$0xff] %v10420_v6  ;;  %s13265_s2 = sld [smem:[#allocation49_spill]] }
 0x117   :  { %8469 = vmatpush3.msra.mxu1 %v456_v9  ;;  %8485 = vmatpush3.msk.msra.mxu0 %vm660_vm4, %v648_v12  ;;  %v789_v17 = vmul.f32 %v10380_v15, %v10380_v15  ;;  %v539_v21 = vld [vmem:[%s13236_s28] sm:$0xff]  ;;  %v1029_v42 = vld [vmem:[%s13237_s24 + $0x8] sm:$0xff]  ;;  %v10425_v9 = vsub.s32 7, %v10413_v58  ;;  %s13283_s20 = sld [smem:[#allocation51_spill]] }
 0x118   :  { %8470 = vmatprep.subr.mxu1 %v13101_v2  ;;  %8486 = vmatprep.subr.mxu0 %v13101_v2  ;;  %v794_v20 = vsel %vm13123_vm2, %v790_v18, 0.0  ;;  %vm540_vm5 = vcmp.gt.f32.partialorder %v539_v21, 0.0  ;;  %v1028_v43 = vld [vmem:[%s13237_s24] sm:$0xff]  ;;  %s13325_s0 = sld [smem:[#allocation52_spill]] }
 0x119   :  { %8471 = vmatpush3.msra.mxu1 %v455_v10  ;;  %8487 = vmatpush3.msra.mxu0 %v647_v13  ;;  %v791_v19 = vsel %vm13123_vm2, %v789_v17, 0.0  ;;  %v541_v23 = vsel %vm540_vm5, 1, %v13103_v22  ;;  %13242 = vst [vmem:[#allocation67_spill] sm:$0xff] %v10425_v9  ;;  %s13326_s27 = sld [smem:[#allocation54_spill]] }
 0x11a   :  { %8472 = vmatprep.subr.mxu1 %v13101_v2  ;;  %8488 = vmatprep.subr.mxu0 %v13101_v2  ;;  %s13328_s5 = sld [smem:[#allocation53_spill]] }
 0x11b   :  { %8473 = vmatpush3.msra.mxu1 %v454_v11  ;;  %8489 = vmatpush3.msra.mxu0 %v646_v14  ;;  %v10441_v14 = vsub.s32 1, %v10413_v58  ;;  %s13347_s22 = sld [smem:[#allocation55_spill]] }
 0x11c   :  { %8493 = vmatprep.subr.msk.mxu1 %vm13123_vm2, %v10383_v16  ;;  %792 = vadd.xlane.f32.xlu1 %v791_v19  ;;  %v10454_v19 = vsub.s32 3, %v10413_v58  ;;  %s13348_s30 = sld [smem:[#allocation56_spill]] }
 0x11d   :  { %543 = vperm.xlu0 %8922, %v541_v23   ;;  %8500 = vmatprep.subr.mxu0 %v1029_v42  ;;  %13243 = vst [vmem:[#allocation68_spill] sm:$0xff] %v10441_v14  ;;  %v10463_v23 = vsub.s32 4, %v10413_v58  ;;  %s13350_s7 = sld [smem:[#allocation59_spill]] }
 0x11e   :  { %13244 = vst [vmem:[#allocation69_spill] sm:$0xff] %v10454_v19  ;;  %s13351_s11 = sld [smem:[#allocation58_spill]] }
 0x11f   :  { %13245 = vst [vmem:[#allocation70_spill] sm:$0xff] %v10463_v23  ;;  %s13372_s12 = sld [smem:[#allocation62_spill]] }
 0x120   :  { %795 = vadd.xlane.f32.xlu1 %v794_v20  ;;  %v1133_v20 = vld [vmem:[%s13241_s23 + $0x18] sm:$0xff]  ;;  %s13373_s25 = sld [smem:[#allocation60_spill]] }
 0x121   :  { %s13374_s21 = sld [smem:[#allocation61_spill]] }
 0x122   :  { %s13405_s8 = sld [smem:[#allocation63_spill]] }
 0x123   :  { %s13406_s13 = sld [smem:[#allocation45_spill]] }
 0x198   :  { %v544_v52 = vpop.permute.xlu0 %543 }
 0x199   :  { %vm545_vm9 = vcmp.eq.s32.totalorder %v544_v52, 1 }
 0x1a5   :  { %v793_v50 = vpop.xlane.xlu1 %792 }
 0x1a9   :  { %v796_v51 = vpop.xlane.xlu1 %795 }
 0x1d1   :  { %v443_v25 = vpop.f32.mrf.mxu1 }
 0x1d2   :  { %v444_v27 = vadd.f32 %v7836_v24, %v443_v25  ;;  %v1132_v24 = vld [vmem:[%s13241_s23 + $0x10] sm:$0xff]  ;;  %v1131_v25 = vld [vmem:[%s13241_s23 + $0x8] sm:$0xff] }
 0x1d3   :  { %v8465_v28 = vpop.f32.mrf.mxu1 }
 0x1d4   :  { %v7838_v30 = vmul.f32 -1.442695, %v444_v27  ;;  %v1130_v28 = vld [vmem:[%s13241_s23] sm:$0xff] }
 0x1d5   :  { %v635_v29 = vpop.f32.mrf.mxu0 }
 0x1d6   :  { %v636_v31 = vadd.f32 %v7841_v26, %v635_v29  ;;  %8924 = vpow2.f32 %v7838_v30  ;;  %v10482_v30 = vsub.s32 6, %v10413_v58 }
 0x1d7   :  { %v8483_v32 = vpop.f32.mrf.mxu0 }
 0x1d8   :  { %v7844_v33 = vmul.f32 -1.442695, %v636_v31  ;;  %13248 = vst [vmem:[#allocation72_spill] sm:$0xff] %v10482_v30 }
 0x1da   :  { %8926 = vpow2.f32 %v7844_v33 }
 0x1e3   :  { %v8925_v34 = vpop.eup %8924 }
 0x1e4   :  { %v450_v35 = vadd.f32 1.0, %v8925_v34  ;;  %v737_v34 = vld [vmem:[%s13246_s14 + $0x8] sm:$0xff] }
 0x1e6   :  { %8928 = vrcp.f32 %v450_v35 }
 0x1e7   :  { %v8927_v36 = vpop.eup %8926 }
 0x1e8   :  { %v642_v37 = vadd.f32 1.0, %v8927_v36 }
 0x1ea   :  { %8930 = vrcp.f32 %v642_v37  ;;  %v10505_v37 = vsel %vm922_vm10, 65537, %v13103_v22 }
 0x1f3   :  { %v8929_v38 = vpop.eup %8928 }
 0x1f4   :  { %v453_v39 = vmul.f32 %v8929_v38, %v444_v27  ;;  %v10473_v27 = vsub.s32 5, %v10413_v58  ;;  %v10508_v38 = vsel %vm923_vm12, 65537, %v13103_v22 }
 0x1f6   :  { %8475 = vmatmul.mubr.msk.f32.vlgmr.msra.gmra.mxu1 %vm465_vm6, %v453_v39  ;;  %13247 = vst [vmem:[#allocation71_spill] sm:$0xff] %v10473_v27  ;;  %v7853_v39 = vcombine.low %v10508_v38, %v10505_v37 }
 0x1f7   :  { %v8931_v40 = vpop.eup %8930  ;;  %8494 = vmatpush3.xpose.msk.msra.mxu1 %vm13123_vm2, %v10383_v16  ;;  %8497 = vmatprep.mubr.msk.f32.mxu1 %vm13123_vm2, %v10380_v15 }
 0x1f8   :  { %v645_v41 = vmul.f32 %v8931_v40, %v636_v31  ;;  %8495 = vmatprep.subr.msk.mxu1 %vm13123_vm2, %v10380_v15  ;;  %vm970_vm13 = vcmp.ne.s16.totalorder %v7853_v39, 0 }
 0x1f9   :  { %v971_v40 = vsel %vm970_vm13, 65537, %v13103_v22 }
 0x1fa   :  { %8491 = vmatmul.mubr.msk.f32.vlgmr.msra.gmra.mxu0 %vm656_vm7, %v645_v41  ;;  %v10514_v41 = vld [vmem:[%s13246_s14] sm:$0xff] }
 0x1fb   :  { %8496 = vmatpush3.xpose.msk.msra.mxu1 %vm13123_vm2, %v10380_v15  ;;  %8501 = vmatpush3.msra.mxu0 %v1029_v42  ;;  %v1030_v42 = vld [vmem:[#allocation13] sm:$0x1] }
 0x1fc   :  { %8502 = vmatprep.subr.mxu0 %v1028_v43 }
 0x1fd   :  { %8503 = vmatpush3.msra.mxu0 %v1028_v43  ;;  %v1031_v43 = vstv %s13249_s26 }
 0x1fe   :  { %8498 = vmatmul.mubr.msk.f32.vlgmr.msra.gmra.mxu1 %vm13123_vm2, %v10383_v16  ;;  %8507 = vmatprep.subr.mxu0 %v1133_v20 }
 0x2b6   :  { %v535_v45 = vpop.f32.mrf.mxu1 }
 0x2b7   :  { %v536_v46 = vadd.f32 %v7839_v44, %v535_v45  ;;  %v1032_v44 = vmul.f32 %v1031_v43, %v1030_v42 }
 0x2b8   :  { %v8476_v47 = vpop.f32.mrf.mxu1 }
 0x2b9   :  { %547 = vrot.lane.b32.xlu0 %v536_v46, %s10089_s29  ;;  %v1037_v45 = vrot.slane %v1032_v44, %v10416_v60 }
 0x2ba   :  { %v730_v48 = vpop.f32.mrf.mxu0 }
 0x2bb   :  { %v731_v55 = vadd.f32 %v7845_v53, %v730_v48 }
 0x2bc   :  { %v8492_v49 = vpop.f32.mrf.mxu0 }
 0x2bd   :  { %v7858_v49 = vld [vmem:[#allocation15] ss:$0 sm:$0xff] }
 0x2be   :  { %v8499_v59 = vpop.f32.mrf.mxu1 }
 0x2bf   :  { %v917_v4 = vmul.f32 2.0, %v8499_v59 }
 0x2c0   :  { %v869_v61 = vpop.f32.mrf.mxu1 }
 0x2c1   :  { %v916_v0 = vmul.f32 2.0, %v869_v61  ;;  %v1946_v61 = vld [vmem:[%s13252_s17 + $0x18] sm:$0xff] }
 0x2c2   :  { %8518 = vmatprep.subr.mxu1 %v1946_v61 }
 0x2c3   :  { %8519 = vmatpush3.msra.mxu1 %v1946_v61 }
 0x2d7   :  { %878 = vxpose.xlu0.b32.start [1/2] (short) (narrow) %v793_v50, 8 }
 0x2db   :  { %879 = vxpose.xlu0.b32.end [2/2] (short) (narrow) %v796_v51, 8 }
 0x32b   :  { %v548_v54 = vpop.permute.xlu0 %547 }
 0x32c   :  { %v550_v56 = vsel %vm545_vm9, %v536_v46, %v548_v54 }
 0x32d   :  { %8504 = vmatprep.mubr.msk.f32.mxu0 %vm1039_vm8, %v550_v56 }
 0x32e   :  { %8505 = vmatmul.mubr.msk.f32.vlgmr.msra.gmra.mxu0 %vm1039_vm8, %v731_v55 }
 0x32f   :  { %8508 = vmatpush3.msra.mxu0 %v1133_v20  ;;  %v10092_v20 = vmov 1966171168  }
 0x330   :  { %8509 = vmatprep.subr.mxu0 %v1132_v24 }
 0x331   :  { %8510 = vmatpush3.msra.mxu0 %v1132_v24 }
 0x332   :  { %8511 = vmatprep.subr.mxu0 %v1131_v25 }
 0x333   :  { %8512 = vmatpush3.msra.mxu0 %v1131_v25 }
 0x334   :  { %8513 = vmatprep.subr.mxu0 %v1130_v28 }
 0x335   :  { %8514 = vmatpush3.msra.mxu0 %v1130_v28 }
 0x353   :  { %v894_v62 = vpop.trf.xlu0 }
 0x354   :  { %v913_v63 = vrot.slane %v894_v62, %v10416_v60  ;;  %v1945_v62 = vld [vmem:[%s13252_s17 + $0x10] sm:$0xff] }
 0x355   :  { %8520 = vmatprep.subr.mxu1 %v1945_v62 }
 0x356   :  { %v914_v1 = vadd.f32 %v913_v63, %v793_v50  ;;  %v915_v3 = vadd.f32 %v913_v63, %v796_v51  ;;  %8521 = vmatpush3.msra.mxu1 %v1945_v62  ;;  %v1944_v63 = vld [vmem:[%s13252_s17 + $0x8] sm:$0xff] }
 0x357   :  { %8522 = vmatprep.subr.mxu1 %v1944_v63 }
 0x358   :  { %v918_v5 = vsub.f32 %v914_v1, %v916_v0  ;;  %v919_v7 = vsub.f32 %v915_v3, %v917_v4  ;;  %8523 = vmatpush3.msra.mxu1 %v1944_v63  ;;  %v1943_v0 = vld [vmem:[%s13252_s17] sm:$0xff] }
 0x359   :  { %8524 = vmatprep.subr.mxu1 %v1943_v0 }
 0x35a   :  { %v10422_v8 = vmax.f32 %v918_v5, 0.0  ;;  %v10429_v11 = vmax.f32 %v919_v7, 0.0  ;;  %8525 = vmatpush3.msra.mxu1 %v1943_v0 }
 0x35b   :  { %8630 = vmatprep.subr.mxu1 %v10383_v16 }
 0x35c   :  { %v1458_v10 = vrot.slane %v10422_v8, %v10420_v6  ;;  %v10433_v12 = vrot.slane %v10422_v8, %v10425_v9  ;;  %v10438_v13 = vrot.slane %v10429_v11, %v10416_v60  ;;  %v10446_v17 = vrot.slane %v10429_v11, %v10441_v14 }
 0x35d   :  { %v10451_v18 = vrot.slane %v10429_v11, %v10420_v6  ;;  %v10460_v21 = vrot.slane %v10429_v11, %v10454_v19  ;;  %v10470_v26 = vrot.slane %v10429_v11, %v10463_v23  ;;  %v10479_v29 = vrot.slane %v10429_v11, %v10473_v27 }
 0x35e   :  { %1460 = vbcast.lane.b32.xlu0 %v1458_v10, 256  ;;  %v10487_v31 = vrot.slane %v10429_v11, %v10482_v30  ;;  %v10492_v32 = vrot.slane %v10429_v11, %v10425_v9  ;;  %v1436_v33 = vrot.slane %v10422_v8, %v10416_v60  ;;  %v1447_v35 = vrot.slane %v10422_v8, %v10441_v14 }
 0x35f   :  { %v1469_v36 = vrot.slane %v10422_v8, %v10454_v19  ;;  %v1480_v55 = vrot.slane %v10422_v8, %v10463_v23  ;;  %v1491_v56 = vrot.slane %v10422_v8, %v10473_v27  ;;  %v1502_v59 = vrot.slane %v10422_v8, %v10482_v30 }
 0x360   :  { %1438 = vbcast.lane.b32.xlu1 %v1436_v33, 256  ;;  %vm1011_vm5 = vcmp.lt.f32.partialorder %v10429_v11, 25.0  ;;  %vm1010_vm11 = vcmp.lt.f32.partialorder %v10422_v8, 25.0  ;;  %v13255_v11 = vmov 0.0  }
 0x362   :  { %1519 = vbcast.lane.b32.xlu0 %v10433_v12, 264 }
 0x364   :  { %1442 = vbcast.lane.b32.xlu1 %v1436_v33, 264 }
 0x366   :  { %1530 = vbcast.lane.b32.xlu0 %v10438_v13, 264 }
 0x368   :  { %1449 = vbcast.lane.b32.xlu1 %v1447_v35, 256 }
 0x36a   :  { %1541 = vbcast.lane.b32.xlu0 %v10446_v17, 264 }
 0x36c   :  { %1453 = vbcast.lane.b32.xlu1 %v1447_v35, 264 }
 0x36e   :  { %1552 = vbcast.lane.b32.xlu0 %v10451_v18, 264 }
 0x370   :  { %1464 = vbcast.lane.b32.xlu1 %v1458_v10, 264 }
 0x372   :  { %1563 = vbcast.lane.b32.xlu0 %v10460_v21, 264 }
 0x374   :  { %1471 = vbcast.lane.b32.xlu1 %v1469_v36, 256 }
 0x376   :  { %1574 = vbcast.lane.b32.xlu0 %v10470_v26, 264 }
 0x378   :  { %1475 = vbcast.lane.b32.xlu1 %v1469_v36, 264 }
 0x37a   :  { %1585 = vbcast.lane.b32.xlu0 %v10479_v29, 264 }
 0x37e   :  { %1596 = vbcast.lane.b32.xlu0 %v10487_v31, 264 }
 0x382   :  { %1607 = vbcast.lane.b32.xlu0 %v10492_v32, 264 }
 0x386   :  { %774 = vperm.xlu0 %8922, %v737_v34  }
 0x3a4   :  { %972 = vxpose.xlu0.c.b16.start.end [1/1] (short) (narrow) %v971_v40, 16 }
 0x3a8   :  { %738 = vxpose.xlu0.b32.start [1/2] (short) (narrow) %v10514_v41, 8 }
 0x3ac   :  { %739 = vxpose.xlu0.b32.end [2/2] (short) (narrow) %v737_v34, 8 }
 0x3d0   :  { %v1461_v1 = vpop.permute.xlu0 %1460 }
 0x3d2   :  { %v1439_v4 = vpop.permute.xlu1 %1438 }
 0x3d4   :  { %v1520_v3 = vpop.permute.xlu0 %1519 }
 0x3d6   :  { %v1443_v7 = vpop.permute.xlu1 %1442 }
 0x3d8   :  { %v1531_v5 = vpop.permute.xlu0 %1530 }
 0x3dc   :  { %v1542_v10 = vpop.permute.xlu0 %1541 }
 0x3ee   :  { %v8506_v46 = vpop.f32.mrf.mxu0 }
 0x3ef   :  { %v1118_v47 = vadd.f32 %v8506_v46, %v1037_v45 }
 0x3f0   :  { %v1112_v48 = vpop.f32.mrf.mxu0 }
 0x3f1   :  { %v1113_v50 = vadd.f32 %v1112_v48, %v1037_v45  ;;  %v10521_v52 = vadd.f32 %v7858_v49, %v1118_v47 }
 0x3f3   :  { %v10519_v51 = vadd.f32 %v7858_v49, %v1113_v50  ;;  %13251 = vst [vmem:[#allocation74_spill] sm:$0xff] %v10521_v52 }
 0x3f5   :  { %13250 = vst [vmem:[#allocation73_spill] sm:$0xff] %v10519_v51  ;;  %8515 = vmatprep.mubr.msk.f32.mxu0 %vm465_vm6, %v10519_v51 }
 0x3f6   :  { %8516 = vmatmul.mubr.msk.f32.vlgmr.msra.gmra.mxu0 %vm465_vm6, %v10521_v52 }
 0x4b6   :  { %v10527_v53 = vpop.f32.mrf.mxu0 }
 0x4b7   :  { %1397 = vrot.lane.b32.xlu1 %v10527_v53, %s10091_s1  ;;  %v1266_v45 = vcombine.high %v10527_v53, %v10527_v53 }
 0x4b8   :  { %v1206_v54 = vpop.f32.mrf.mxu0 }
 0x4bb   :  { %1395 = vrot.lane.b32.xlu1 %v1206_v54, %s10091_s1 }
 0x4bf   :  { %1482 = vbcast.lane.b32.xlu1 %v1480_v55, 256 }
 0x4c3   :  { %1486 = vbcast.lane.b32.xlu1 %v1480_v55, 264 }
 0x4c7   :  { %1493 = vbcast.lane.b32.xlu1 %v1491_v56, 256 }
 0x4cb   :  { %1497 = vbcast.lane.b32.xlu1 %v1491_v56, 264 }
 0x4cf   :  { %1504 = vbcast.lane.b32.xlu1 %v1502_v59, 256 }
 0x4d3   :  { %1508 = vbcast.lane.b32.xlu1 %v1502_v59, 264 }
 0x4d7   :  { %1515 = vbcast.lane.b32.xlu1 %v10433_v12, 256  ;;  %v1450_v12 = vpop.permute.xlu1 %1449 }
 0x4db   :  { %1526 = vbcast.lane.b32.xlu1 %v10438_v13, 256  ;;  %v1553_v13 = vpop.permute.xlu0 %1552 }
 0x4df   :  { %1537 = vbcast.lane.b32.xlu1 %v10446_v17, 256  ;;  %v7852_v17 = vcombine.low %v10505_v37, %v10508_v38  ;;  %v1564_v24 = vpop.permute.xlu0 %1563  ;;  %v10562_v38 = vld [vmem:[#allocation19] ss:$0 sm:$0xff] }
 0x4e0   :  { %v1620_v43 = vmul.f32 %v10562_v38, %v1461_v1  ;;  %v10567_v44 = vmul.f32 %v10562_v38, %v1520_v3  ;;  %v10576_v47 = vmul.f32 %v10562_v38, %v1542_v10  ;;  %v10580_v50 = vmul.f32 %v10562_v38, %v1553_v13 }
 0x4e1   :  { %vm929_vm14 = vcmp.ne.s16.totalorder %v7852_v17, 0  ;;  %v1616_v62 = vmul.f32 %v10562_v38, %v1439_v4  ;;  %v1617_v63 = vmul.f32 %v10562_v38, %v1443_v7 }
 0x4e2   :  { %v930_v25 = vsel %vm929_vm14, 65537, %v13103_v22 }
 0x4e3   :  { %1548 = vbcast.lane.b32.xlu1 %v10451_v18, 256  ;;  %v1454_v18 = vpop.permute.xlu1 %1453 }
 0x4e7   :  { %1559 = vbcast.lane.b32.xlu1 %v10460_v21, 256  ;;  %v1219_v21 = vunpack.c.l.s4 %v10092_v20  ;;  %v1465_v28 = vpop.permute.xlu1 %1464 }
 0x4eb   :  { %1570 = vbcast.lane.b32.xlu1 %v10470_v26, 256  ;;  %v1220_v26 = vunpack.c.0.s8 %v1219_v21  ;;  %v1472_v34 = vpop.permute.xlu1 %1471  ;;  %v1618_v21 = vmul.f32 %v10562_v38, %v1450_v12 }
 0x4ef   :  { %1581 = vbcast.lane.b32.xlu1 %v10479_v29, 256  ;;  %v1217_v29 = vcombine.high %v1206_v54, %v1206_v54  ;;  %v1476_v42 = vpop.permute.xlu1 %1475 }
 0x4f3   :  { %1592 = vbcast.lane.b32.xlu1 %v10487_v31, 256  ;;  %v10556_v31 = vsub.s32 %v1220_v26, %v10413_v58  ;;  %v1622_v26 = vmul.f32 %v10562_v38, %v1472_v34 }
 0x4f5   :  { %13253 = vst [vmem:[#allocation75_spill] sm:$0xff] %v10556_v31  ;;  %v1224_v33 = vrot.slane %v1206_v54, %v10556_v31  ;;  %v1231_v35 = vrot.slane %v1217_v29, %v10556_v31  ;;  %v10583_v54 = vmul.f32 %v10562_v38, %v1564_v24  ;;  %v10601_v3 = vrot.slane %v10527_v53, %v10556_v31 }
 0x4f6   :  { %v1619_v24 = vmul.f32 %v10562_v38, %v1454_v18  ;;  %v1621_v53 = vmul.f32 %v10562_v38, %v1465_v28  ;;  %v1623_v29 = vmul.f32 %v10562_v38, %v1476_v42 }
 0x4f7   :  { %1603 = vbcast.lane.b32.xlu1 %v10492_v32, 256  ;;  %v1575_v32 = vpop.permute.xlu0 %1574  ;;  %v1232_v37 = vcombine.high %v1224_v33, %v1224_v33  ;;  %v1233_v39 = vcombine.high %v1231_v35, %v1231_v35  ;;  %v1240_v40 = vrot.slane %v1224_v33, %v10556_v31  ;;  %v10608_v17 = vrot.slane %v1231_v35, %v10556_v31  ;;  %v10620_v33 = vld [vmem:[#allocation21] ss:$0 sm:$0xff] }
 0x4f8   :  { %v10586_v55 = vmul.f32 %v10562_v38, %v1575_v32  ;;  %v1281_v12 = vcombine.high %v10601_v3, %v10601_v3  ;;  %v10629_v28 = vrot.slane %v10601_v3, %v10556_v31 }
 0x4f9   :  { %v1254_v46 = vrot.slane %v1232_v37, %v10556_v31  ;;  %v1261_v48 = vrot.slane %v1233_v39, %v10556_v31  ;;  %v1262_v49 = vcombine.high %v1240_v40, %v1240_v40  ;;  %v1318_v0 = vrot.slane %v1240_v40, %v10416_v60 }
 0x4fa   :  { %v1334_v37 = vrot.slane %v10608_v17, %v10416_v60 }
 0x4fb   :  { %v1586_v36 = vpop.permute.xlu0 %1585  ;;  %v1264_v10 = vcombine.high %v1254_v46, %v1254_v46  ;;  %v1322_v13 = vrot.slane %v1254_v46, %v10416_v60  ;;  %v1326_v4 = vrot.slane %v1262_v49, %v10416_v60  ;;  %v1265_v7 = vcombine.high %v1261_v48, %v1261_v48 }
 0x4fc   :  { %v10589_v56 = vmul.f32 %v10562_v38, %v1586_v36  ;;  %v10635_v39 = vrot.slane %v1261_v48, %v10416_v60 }
 0x4fd   :  { %v1330_v34 = vrot.slane %v1264_v10, %v10416_v60  ;;  %v10638_v40 = vrot.slane %v1265_v7, %v10416_v60 }
 0x4ff   :  { %v1597_v59 = vpop.permute.xlu0 %1596 }
 0x500   :  { %v10592_v61 = vmul.f32 %v10562_v38, %v1597_v59 }
 0x51a   :  { %931 = vxpose.xlu1.c.b16.start.end [1/1] (short) (narrow) %v930_v25, 16 }
 0x51e   :  { %8923 = vset.pattern.permute.xlu1 %v13103_v22 }
 0x51f   :  { %771 = vperm.xlu1 %8923, %v10514_v41   ;;  %v10573_v41 = vmul.f32 %v10562_v38, %v1531_v5  ;;  %v10604_v5 = vrot.slane %v1266_v45, %v10556_v31 }
 0x521   :  { %v1282_v18 = vcombine.high %v10604_v5, %v10604_v5 }
 0x529   :  { %v10597_v1 = vpop.permute.xlu1 %1397 }
 0x52a   :  { %v1402_v20 = vadd.f32 %v10597_v1, %v1318_v0  ;;  %v1404_v25 = vadd.f32 %v10597_v1, %v1322_v13  ;;  %v1406_v36 = vadd.f32 %v10597_v1, %v1326_v4  ;;  %v1408_v59 = vadd.f32 %v10597_v1, %v1330_v34 }
 0x52c   :  { %v1649_v35 = vadd.f32 %v1617_v63, %v1402_v20  ;;  %v1651_v49 = vadd.f32 %v1619_v24, %v1404_v25  ;;  %v1653_v20 = vadd.f32 %v1621_v53, %v1406_v36 }
 0x52d   :  { %v10618_v32 = vpop.permute.xlu1 %1395 }
 0x52e   :  { %v1401_v42 = vadd.f32 %v10618_v32, %v1318_v0  ;;  %v10642_v45 = vadd.f32 %v10620_v33, %v1649_v35  ;;  %v1403_v46 = vadd.f32 %v10618_v32, %v1322_v13  ;;  %v1409_v63 = vadd.f32 %v10618_v32, %v1334_v37 }
 0x52f   :  { %v1405_v48 = vadd.f32 %v10618_v32, %v1326_v4  ;;  %v10651_v35 = vadd.f32 %v10620_v33, %v1651_v49  ;;  %v10657_v25 = vadd.f32 %v10620_v33, %v1653_v20  ;;  %v1655_v20 = vadd.f32 %v1623_v29, %v1408_v59 }
 0x530   :  { %v1648_v10 = vadd.f32 %v1616_v62, %v1401_v42  ;;  %v7864_v57 = vmul.f32 -1.442695, %v10642_v45  ;;  %v1650_v0 = vadd.f32 %v1618_v21, %v1403_v46  ;;  %v1407_v62 = vadd.f32 %v10618_v32, %v1330_v34 }
 0x531   :  { %v1483_v3 = vpop.permute.xlu1 %1482  ;;  %v1652_v24 = vadd.f32 %v1620_v43, %v1405_v48  ;;  %v7866_v53 = vmul.f32 -1.442695, %v10651_v35  ;;  %v1410_v21 = vadd.f32 %v10597_v1, %v1334_v37  ;;  %v7868_v37 = vmul.f32 -1.442695, %v10657_v25 }
 0x532   :  { %v1624_v7 = vmul.f32 %v10562_v38, %v1483_v3  ;;  %v10654_v13 = vadd.f32 %v10620_v33, %v1648_v10  ;;  %8932 = vpow2.f32 %v7864_v57  ;;  %v10661_v4 = vadd.f32 %v10620_v33, %v1650_v0 }
 0x533   :  { %v10667_v49 = vadd.f32 %v10620_v33, %v1652_v24  ;;  %v1654_v43 = vadd.f32 %v1622_v26, %v1407_v62  ;;  %8934 = vpow2.f32 %v7866_v53  ;;  %v1416_v26 = vadd.f32 %v10597_v1, %v10638_v40 }
 0x534   :  { %v1656_v42 = vadd.f32 %v1624_v7, %v1409_v63  ;;  %v7863_v46 = vmul.f32 -1.442695, %v10654_v13  ;;  %v7865_v57 = vmul.f32 -1.442695, %v10661_v4  ;;  %v10683_v7 = vrot.slane %v10604_v5, %v10556_v31 }
 0x535   :  { %v1487_v36 = vpop.permute.xlu1 %1486  ;;  %v7867_v63 = vmul.f32 -1.442695, %v10667_v49  ;;  %v10677_v10 = vadd.f32 %v10620_v33, %v1654_v43  ;;  %v1411_v53 = vadd.f32 %v10618_v32, %v10635_v39  ;;  %v10694_v29 = vadd.f32 %v10620_v33, %v1655_v20  ;;  %v1608_v43 = vpop.permute.xlu0 %1607 }
 0x536   :  { %v10670_v3 = vadd.f32 %v10620_v33, %v1656_v42  ;;  %v1625_v34 = vmul.f32 %v10562_v38, %v1487_v36  ;;  %8936 = vpow2.f32 %v7863_v46  ;;  %v1303_v59 = vrot.slane %v1281_v12, %v10556_v31 }
 0x537   :  { %8938 = vpow2.f32 %v7865_v57  ;;  %v7869_v62 = vmul.f32 -1.442695, %v10677_v10  ;;  %v10699_v36 = vrot.slane %v10629_v28, %v10416_v60  ;;  %v1263_v46 = vcombine.high %v10608_v17, %v10608_v17 }
 0x538   :  { %v1657_v48 = vadd.f32 %v1625_v34, %v1410_v21  ;;  %v7871_v0 = vmul.f32 -1.442695, %v10670_v3  ;;  %8940 = vpow2.f32 %v7867_v63  ;;  %v7870_v57 = vmul.f32 -1.442695, %v10694_v29 }
 0x539   :  { %v1494_v24 = vpop.permute.xlu1 %1493  ;;  %8942 = vpow2.f32 %v7868_v37  ;;  %v1663_v63 = vadd.f32 %v10567_v44, %v1416_v26  ;;  %v1311_v17 = vcombine.high %v10629_v28, %v10629_v28  ;;  %v10723_v26 = vrot.slane %v1282_v18, %v10556_v31 }
 0x53a   :  { %v10688_v42 = vadd.f32 %v10620_v33, %v1657_v48  ;;  %v1626_v21 = vmul.f32 %v10562_v38, %v1494_v24  ;;  %8944 = vpow2.f32 %v7869_v62  ;;  %v10706_v48 = vmul.f32 %v10562_v38, %v1608_v43 }
 0x53b   :  { %8946 = vpow2.f32 %v7871_v0  ;;  %v1418_v24 = vadd.f32 %v10597_v1, %v10699_v36  ;;  %v1412_v62 = vadd.f32 %v10597_v1, %v10635_v39  ;;  %v1313_v0 = vcombine.high %v1303_v59, %v1303_v59 }
 0x53c   :  { %v1658_v34 = vadd.f32 %v1626_v21, %v1411_v53  ;;  %v7872_v12 = vmul.f32 -1.442695, %v10688_v42  ;;  %v1342_v53 = vrot.slane %v1263_v46, %v10416_v60  ;;  %8948 = vpow2.f32 %v7870_v57 }
 0x53d   :  { %v1498_v20 = vpop.permute.xlu1 %1497  ;;  %v1312_v28 = vcombine.high %v10683_v7, %v10683_v7  ;;  %v10730_v39 = vadd.f32 %v10620_v33, %v1663_v63  ;;  %v10734_v18 = vrot.slane %v1303_v59, %v10416_v60  ;;  %v1665_v46 = vadd.f32 %v10573_v41, %v1418_v24 }
 0x53e   :  { %v10714_v37 = vadd.f32 %v10620_v33, %v1658_v34  ;;  %v1627_v44 = vmul.f32 %v10562_v38, %v1498_v20  ;;  %8950 = vpow2.f32 %v7872_v12  ;;  %v1413_v20 = vadd.f32 %v10618_v32, %v1342_v53 }
 0x53f   :  { %v8933_v34 = vpop.eup %8932  ;;  %v1420_v63 = vadd.f32 %v10597_v1, %v10734_v18  ;;  %v10744_v12 = vrot.slane %v1311_v17, %v10416_v60  ;;  %v10747_v22 = vrot.slane %v1313_v0, %v10416_v60  ;;  %v10751_v41 = vrot.slane %v10683_v7, %v10416_v60 }
 0x540   :  { %v7873_v21 = vmul.f32 -1.442695, %v10714_v37  ;;  %v1659_v43 = vadd.f32 %v1627_v44, %v1412_v62  ;;  %v1816_v62 = vadd.f32 1.0, %v8933_v34  ;;  %v8935_v44 = vpop.eup %8934  ;;  %v7878_v34 = vmul.f32 -1.442695, %v10730_v39 }
 0x541   :  { %v1505_v5 = vpop.permute.xlu1 %1504  ;;  %v1818_v17 = vadd.f32 1.0, %v8935_v44  ;;  %v10757_v0 = vadd.f32 %v10620_v33, %v1665_v46 }
 0x542   :  { %8952 = vpow2.f32 %v7873_v21  ;;  %v10738_v57 = vadd.f32 %v10620_v33, %v1659_v43  ;;  %v1628_v2 = vmul.f32 %v10562_v38, %v1505_v5  ;;  %v1414_v43 = vadd.f32 %v10597_v1, %v1342_v53 }
 0x543   :  { %v8937_v59 = vpop.eup %8936  ;;  %8954 = vrcp.f32 %v1816_v62  ;;  %v10765_v53 = vrot.slane %v10723_v26, %v10416_v60  ;;  %v1667_v62 = vadd.f32 %v10576_v47, %v1420_v63 }
 0x544   :  { %v7874_v24 = vmul.f32 -1.442695, %v10738_v57  ;;  %v1660_v21 = vadd.f32 %v1628_v2, %v1413_v20  ;;  %v8939_v5 = vpop.eup %8938  ;;  %v1815_v58 = vadd.f32 1.0, %v8937_v59  ;;  %v10768_v20 = vrot.slane %v1312_v28, %v10416_v60 }
 0x545   :  { %v1509_v31 = vpop.permute.xlu1 %1508  ;;  %v8941_v52 = vpop.eup %8940  ;;  %v1817_v2 = vadd.f32 1.0, %v8939_v5  ;;  %v1422_v5 = vadd.f32 %v10597_v1, %v10744_v12  ;;  %v7880_v28 = vmul.f32 -1.442695, %v10757_v0 }
 0x546   :  { %8956 = vpow2.f32 %v7874_v24  ;;  %v10760_v7 = vadd.f32 %v10620_v33, %v1660_v21  ;;  %v1629_v51 = vmul.f32 %v10562_v38, %v1509_v31  ;;  %v8943_v46 = vpop.eup %8942  ;;  %v1819_v24 = vadd.f32 1.0, %v8941_v52 }
 0x547   :  { %8958 = vrcp.f32 %v1815_v58  ;;  %v8945_v21 = vpop.eup %8944  ;;  %v1415_v31 = vadd.f32 %v10618_v32, %v10638_v40  ;;  %v1424_v52 = vadd.f32 %v10597_v1, %v10747_v22  ;;  %v1314_v40 = vcombine.high %v10723_v26, %v10723_v26 }
 0x548   :  { %v7875_v44 = vmul.f32 -1.442695, %v10760_v7  ;;  %v1661_v59 = vadd.f32 %v1629_v51, %v1414_v43  ;;  %8960 = vrcp.f32 %v1817_v2  ;;  %v8947_v9 = vpop.eup %8946  ;;  %v1820_v51 = vadd.f32 1.0, %v8943_v46 }
 0x549   :  { %v1516_v58 = vpop.permute.xlu1 %1515  ;;  %8962 = vpow2.f32 %v7878_v34  ;;  %v10786_v43 = vadd.f32 %v10620_v33, %v1667_v62  ;;  %v8949_v34 = vpop.eup %8948  ;;  %v1823_v27 = vadd.f32 1.0, %v8947_v9  ;;  %v1419_v9 = vadd.f32 %v10618_v32, %v10734_v18 }
 0x54a   :  { %v10778_v47 = vadd.f32 %v10620_v33, %v1661_v59  ;;  %v1630_v63 = vmul.f32 %v10562_v38, %v1516_v58  ;;  %8964 = vrcp.f32 %v1818_v17  ;;  %v1821_v59 = vadd.f32 1.0, %v8945_v21 }
 0x54b   :  { %8966 = vpow2.f32 %v7875_v44  ;;  %v1417_v17 = vadd.f32 %v10618_v32, %v10699_v36  ;;  %v1669_v44 = vadd.f32 %v10580_v50, %v1422_v5  ;;  %v8951_v58 = vpop.eup %8950  ;;  %v1822_v19 = vadd.f32 1.0, %v8949_v34 }
 0x54c   :  { %v7876_v2 = vmul.f32 -1.442695, %v10778_v47  ;;  %v1662_v30 = vadd.f32 %v1630_v63, %v1415_v31  ;;  %8968 = vrcp.f32 %v1819_v24  ;;  %v1426_v36 = vadd.f32 %v10597_v1, %v10751_v41 }
 0x54d   :  { %v1527_v46 = vpop.permute.xlu1 %1526  ;;  %8970 = vpow2.f32 %v7880_v28  ;;  %v10801_v24 = vrot.slane %v1314_v40, %v10416_v60  ;;  %v1824_v31 = vadd.f32 1.0, %v8951_v58  ;;  %v10806_v28 = vadd.f32 %v10620_v33, %v1669_v44 }
 0x54e   :  { %v10793_v26 = vadd.f32 %v10620_v33, %v1662_v30  ;;  %v1632_v62 = vmul.f32 %v10562_v38, %v1527_v46  ;;  %8972 = vrcp.f32 %v1820_v51  ;;  %v7882_v30 = vmul.f32 -1.442695, %v10786_v43 }
 0x54f   :  { %v8953_v23 = vpop.eup %8952  ;;  %8974 = vpow2.f32 %v7876_v2  ;;  %v1671_v18 = vadd.f32 %v10583_v54, %v1424_v52 }
 0x550   :  { %v7877_v50 = vmul.f32 -1.442695, %v10793_v26  ;;  %v1664_v21 = vadd.f32 %v1632_v62, %v1417_v17  ;;  %8976 = vrcp.f32 %v1821_v59  ;;  %v8955_v63 = vpop.eup %8954  ;;  %v1825_v51 = vadd.f32 1.0, %v8953_v23 }
 0x551   :  { %8978 = vrcp.f32 %v1823_v27  ;;  %v1538_v5 = vpop.permute.xlu1 %1537  ;;  %v1421_v27 = vadd.f32 %v10618_v32, %v10744_v12  ;;  %v1428_v59 = vadd.f32 %v10597_v1, %v10765_v53  ;;  %v1673_v17 = vadd.f32 %v10586_v55, %v1426_v36 }
 0x552   :  { %v10810_v34 = vadd.f32 %v10620_v33, %v1664_v21  ;;  %v1634_v40 = vmul.f32 %v10562_v38, %v1538_v5  ;;  %8980 = vrcp.f32 %v1822_v19  ;;  %v7884_v62 = vmul.f32 -1.442695, %v10806_v28 }
 0x553   :  { %v8957_v2 = vpop.eup %8956  ;;  %8982 = vpow2.f32 %v7877_v50  ;;  %v10822_v12 = vadd.f32 %v10620_v33, %v1671_v18 }
 0x554   :  { %v8959_v46 = vpop.eup %8958  ;;  %v1826_v54 = vadd.f32 1.0, %v8957_v2  ;;  %v7879_v23 = vmul.f32 -1.442695, %v10810_v34  ;;  %v1666_v52 = vadd.f32 %v1634_v40, %v1419_v9  ;;  %8984 = vpow2.f32 %v7882_v30 }
 0x555   :  { %v8961_v44 = vpop.eup %8960  ;;  %8986 = vrcp.f32 %v1824_v31  ;;  %v1549_v58 = vpop.permute.xlu1 %1548  ;;  %v1911_v19 = vmul.f32 %v8959_v46, %v10654_v13  ;;  %v1912_v9 = vmul.f32 %v8955_v63, %v10642_v45  ;;  %v1423_v30 = vadd.f32 %v10618_v32, %v10747_v22 }
 0x556   :  { %v8963_v50 = vpop.eup %8962  ;;  %8988 = vrcp.f32 %v1825_v51  ;;  %v10825_v55 = vadd.f32 %v10620_v33, %v1666_v52  ;;  %v1636_v36 = vmul.f32 %v10562_v38, %v1549_v58  ;;  %v1913_v13 = vmul.f32 %v8961_v44, %v10661_v4 }
 0x557   :  { %v8965_v21 = vpop.eup %8964  ;;  %8990 = vpow2.f32 %v7879_v23  ;;  %8526 = vmatprep.mubr.msk.f32.mxu1 %vm465_vm6, %v1911_v19  ;;  %v1430_v31 = vadd.f32 %v10597_v1, %v10768_v20  ;;  %v10838_v45 = vadd.f32 %v10620_v33, %v1673_v17  ;;  %v7886_v22 = vmul.f32 -1.442695, %v10822_v12 }
 0x558   :  { %v8967_v5 = vpop.eup %8966  ;;  %8992 = vrcp.f32 %v1826_v54  ;;  %v7881_v18 = vmul.f32 -1.442695, %v10825_v55  ;;  %v1668_v51 = vadd.f32 %v1636_v36, %v1421_v27  ;;  %8527 = vmatmul.mubr.msk.f32.vlgmr.msra.gmra.mxu1 %vm465_vm6, %v1912_v9  ;;  %v1675_v2 = vadd.f32 %v10589_v56, %v1428_v59 }
 0x559   :  { %v8969_v63 = vpop.eup %8968  ;;  %v1827_v40 = vadd.f32 1.0, %v8967_v5  ;;  %8529 = vmatprep.mubr.msk.f32.mxu1 %vm465_vm6, %v1913_v13  ;;  %v1560_v4 = vpop.permute.xlu1 %1559  ;;  %8994 = vpow2.f32 %v7884_v62  ;;  %8631 = vmatpush3.msra.mxu1 %v10383_v16  ;;  %v1914_v54 = vmul.f32 %v8965_v21, %v10651_v35  ;;  %v1425_v56 = vadd.f32 %v10618_v32, %v10751_v41 }
 0x55a   :  { %v8971_v46 = vpop.eup %8970  ;;  %8996 = vpow2.f32 %v7881_v18  ;;  %v10845_v27 = vadd.f32 %v10620_v33, %v1668_v51  ;;  %v1638_v17 = vmul.f32 %v10562_v38, %v1560_v4  ;;  %8632 = vmatprep.subr.mxu1 %v10380_v15  ;;  %v1915_v52 = vmul.f32 %v8969_v63, %v10667_v49 }
 0x55b   :  { %v8973_v23 = vpop.eup %8972  ;;  %8998 = vrcp.f32 %v1827_v40  ;;  %v1432_v16 = vadd.f32 %v10597_v1, %v10801_v24  ;;  %8633 = vmatpush3.msra.mxu1 %v10380_v15  ;;  %v1830_v35 = vadd.f32 1.0, %v8963_v50  ;;  %v7888_v19 = vmul.f32 -1.442695, %v10838_v45 }
 0x55c   :  { %v8975_v59 = vpop.eup %8974  ;;  %v7883_v44 = vmul.f32 -1.442695, %v10845_v27  ;;  %v1670_v58 = vadd.f32 %v1638_v17, %v1423_v30  ;;  %8530 = vmatmul.mubr.msk.f32.gmra.mxu1 %vm465_vm6, %v1914_v54  ;;  %9000 = vpow2.f32 %v7886_v22  ;;  %v10861_v41 = vadd.f32 %v10620_v33, %v1675_v2 }
 0x55d   :  { %v8977_v62 = vpop.eup %8976  ;;  %v1828_v36 = vadd.f32 1.0, %v8975_v59  ;;  %8532 = vmatprep.mubr.msk.f32.mxu1 %vm465_vm6, %v1915_v52  ;;  %v1571_v49 = vpop.permute.xlu1 %1570  ;;  %v1677_v15 = vadd.f32 %v10592_v61, %v1430_v31  ;;  %v1916_v21 = vmul.f32 %v8973_v23, %v10657_v25  ;;  %v1427_v5 = vadd.f32 %v10618_v32, %v10765_v53 }
 0x55e   :  { %v8979_v1 = vpop.eup %8978  ;;  %9002 = vpow2.f32 %v7883_v44  ;;  %v10865_v9 = vadd.f32 %v10620_v33, %v1670_v58  ;;  %v1640_v50 = vmul.f32 %v10562_v38, %v1571_v49  ;;  %v1917_v30 = vmul.f32 %v8977_v62, %v10677_v10 }
 0x55f   :  { %v8981_v13 = vpop.eup %8980  ;;  %9004 = vrcp.f32 %v1828_v36  ;;  %v1679_v18 = vadd.f32 %v10706_v48, %v1432_v16  ;;  %v1832_v63 = vadd.f32 1.0, %v8971_v46  ;;  %v7890_v10 = vmul.f32 -1.442695, %v10861_v41 }
 0x560   :  { %v8983_v51 = vpop.eup %8982  ;;  %v7885_v61 = vmul.f32 -1.442695, %v10865_v9  ;;  %v1672_v31 = vadd.f32 %v1640_v50, %v1425_v56  ;;  %8533 = vmatmul.mubr.msk.f32.gmra.mxu1 %vm465_vm6, %v1916_v21  ;;  %9006 = vrcp.f32 %v1830_v35  ;;  %v10878_v53 = vadd.f32 %v10620_v33, %v1677_v15 }
 0x561   :  { %v8985_v40 = vpop.eup %8984  ;;  %v1829_v4 = vadd.f32 1.0, %v8983_v51  ;;  %8535 = vmatprep.mubr.msk.f32.mxu1 %vm465_vm6, %v1917_v30  ;;  %v1582_v25 = vpop.permute.xlu1 %1581  ;;  %9008 = vpow2.f32 %v7888_v19  ;;  %v1918_v46 = vmul.f32 %v8981_v13, %v10694_v29  ;;  %v1919_v54 = vmul.f32 %v8979_v1, %v10670_v3 }
 0x562   :  { %v8987_v48 = vpop.eup %8986  ;;  %9010 = vpow2.f32 %v7885_v61  ;;  %v10881_v22 = vadd.f32 %v10620_v33, %v1672_v31  ;;  %v1642_v2 = vmul.f32 %v10562_v38, %v1582_v25  ;;  %v10887_v23 = vadd.f32 %v10620_v33, %v1679_v18 }
 0x563   :  { %v8989_v17 = vpop.eup %8988  ;;  %9012 = vrcp.f32 %v1829_v4  ;;  %v1834_v59 = vadd.f32 1.0, %v8985_v40  ;;  %v1429_v29 = vadd.f32 %v10618_v32, %v10768_v20  ;;  %v7892_v3 = vmul.f32 -1.442695, %v10878_v53 }
 0x564   :  { %v8991_v52 = vpop.eup %8990  ;;  %v7887_v56 = vmul.f32 -1.442695, %v10881_v22  ;;  %v1674_v16 = vadd.f32 %v1642_v2, %v1427_v5  ;;  %8536 = vmatmul.mubr.msk.f32.gmra.mxu1 %vm465_vm6, %v1918_v46  ;;  %9014 = vrcp.f32 %v1832_v63  ;;  %v1920_v49 = vmul.f32 %v8987_v48, %v10688_v42 }
 0x565   :  { %v8993_v44 = vpop.eup %8992  ;;  %v1831_v58 = vadd.f32 1.0, %v8991_v52  ;;  %8538 = vmatprep.mubr.msk.f32.mxu1 %vm465_vm6, %v1919_v54  ;;  %v1593_v35 = vpop.permute.xlu1 %1592  ;;  %9016 = vpow2.f32 %v7890_v10  ;;  %v1921_v1 = vmul.f32 %v8989_v17, %v10714_v37  ;;  %v7894_v50 = vmul.f32 -1.442695, %v10887_v23 }
 0x566   :  { %v8995_v19 = vpop.eup %8994  ;;  %9018 = vpow2.f32 %v7887_v56  ;;  %v10896_v62 = vadd.f32 %v10620_v33, %v1674_v16  ;;  %v1644_v36 = vmul.f32 %v10562_v38, %v1593_v35  ;;  %v1431_v5 = vadd.f32 %v10618_v32, %v10801_v24 }
 0x567   :  { %v8997_v15 = vpop.eup %8996  ;;  %9020 = vrcp.f32 %v1831_v58  ;;  %v1836_v18 = vadd.f32 1.0, %v8995_v19  ;;  %v1922_v31 = vmul.f32 %v8993_v44, %v10738_v57 }
 0x568   :  { %v8999_v20 = vpop.eup %8998  ;;  %v1833_v21 = vadd.f32 1.0, %v8997_v15  ;;  %v7889_v13 = vmul.f32 -1.442695, %v10896_v62  ;;  %v1676_v30 = vadd.f32 %v1644_v36, %v1429_v29  ;;  %8539 = vmatmul.mubr.msk.f32.gmra.mxu1 %vm465_vm6, %v1920_v49  ;;  %9022 = vrcp.f32 %v1834_v59 }
 0x569   :  { %8541 = vmatprep.mubr.msk.f32.mxu1 %vm465_vm6, %v1921_v1  ;;  %v1604_v42 = vpop.permute.xlu1 %1603  ;;  %9024 = vpow2.f32 %v7892_v3  ;;  %v9001_v51 = vpop.eup %9000  ;;  %v1923_v40 = vmul.f32 %v8999_v20, %v10760_v7 }
 0x56a   :  { %9026 = vrcp.f32 %v1833_v21  ;;  %v10908_v37 = vadd.f32 %v10620_v33, %v1676_v30  ;;  %v1646_v61 = vmul.f32 %v10562_v38, %v1604_v42  ;;  %v1838_v38 = vadd.f32 1.0, %v9001_v51  ;;  %v10931_v20 = vpop.permute.xlu0 %774 }
 0x56b   :  { %v9003_v63 = vpop.eup %9002  ;;  %9028 = vpow2.f32 %v7889_v13 }
 0x56c   :  { %v9005_v4 = vpop.eup %9004  ;;  %v1835_v25 = vadd.f32 1.0, %v9003_v63  ;;  %v7891_v32 = vmul.f32 -1.442695, %v10908_v37  ;;  %v1678_v24 = vadd.f32 %v1646_v61, %v1431_v5  ;;  %8542 = vmatmul.mubr.msk.f32.gmra.mxu1 %vm465_vm6, %v1922_v31  ;;  %9030 = vpow2.f32 %v7894_v50 }
 0x56d   :  { %v9007_v10 = vpop.eup %9006  ;;  %8544 = vmatprep.mubr.msk.f32.mxu1 %vm465_vm6, %v1923_v40  ;;  %v1924_v48 = vmul.f32 %v9005_v4, %v10778_v47  ;;  %9032 = vrcp.f32 %v1836_v18  ;;  %v13254_v63 = vmov 0  }
 0x56e   :  { %v9009_v57 = vpop.eup %9008  ;;  %9034 = vrcp.f32 %v1835_v25  ;;  %v10918_v2 = vadd.f32 %v10620_v33, %v1678_v24  ;;  %v1926_v59 = vmul.f32 %v9007_v10, %v10730_v39  ;;  %v980_v18 = vpop.trf.xlu0 }
 0x56f   :  { %v9011_v7 = vpop.eup %9010  ;;  %9036 = vpow2.f32 %v7891_v32  ;;  %v1840_v47 = vadd.f32 1.0, %v9009_v57  ;;  %vm988_vm0 = vcmp.ne.s16.totalorder %v980_v18, 0  ;;  %v2502_v18 = vld [vmem:[%s13265_s2 + $0x18] sm:$0xff] }
 0x570   :  { %v9013_v46 = vpop.eup %9012  ;;  %v1837_v17 = vadd.f32 1.0, %v9011_v7  ;;  %v7893_v54 = vmul.f32 -1.442695, %v10918_v2  ;;  %8545 = vmatmul.mubr.msk.f32.gmra.mxu1 %vm465_vm6, %v1924_v48  ;;  %9038 = vrcp.f32 %v1838_v38  ;;  %v993_v10 = vsel %vm988_vm0, 65537, %v13254_v63  ;;  %8574 = vmatprep.subr.mxu0 %v2502_v18 }
 0x571   :  { %v9015_v52 = vpop.eup %9014  ;;  %v1925_v56 = vmul.f32 %v9013_v46, %v10793_v26  ;;  %v994_v57 = vunpack.c.l.b16 %v993_v10  ;;  %8575 = vmatpush3.msra.mxu0 %v2502_v18 }
 0x572   :  { %v9017_v16 = vpop.eup %9016  ;;  %9040 = vrcp.f32 %v1837_v17  ;;  %v1928_v26 = vmul.f32 %v9015_v52, %v10757_v0 }
 0x573   :  { %v9019_v44 = vpop.eup %9018  ;;  %9042 = vpow2.f32 %v7893_v54  ;;  %8547 = vmatprep.mubr.msk.f32.mxu1 %vm465_vm6, %v1925_v56  ;;  %v1842_v19 = vadd.f32 1.0, %v9017_v16  ;;  %vm995_vm3 = vcmp.ne.s32.totalorder %v994_v57, 0 }
 0x574   :  { %v9021_v33 = vpop.eup %9020  ;;  %v1839_v58 = vadd.f32 1.0, %v9019_v44  ;;  %8548 = vmatmul.mubr.msk.f32.gmra.mxu1 %vm465_vm6, %v1926_v59  ;;  %9044 = vrcp.f32 %v1840_v47  ;;  %v996_v56 = vsel %vm995_vm3, 1, %v13254_v63  ;;  %v754_v44 = vpop.trf.xlu0 }
 0x575   :  { %v9023_v29 = vpop.eup %9022  ;;  %v1927_v35 = vmul.f32 %v9021_v33, %v10810_v34 }
 0x576   :  { %v9025_v3 = vpop.eup %9024  ;;  %9046 = vrcp.f32 %v1839_v58  ;;  %v1930_v34 = vmul.f32 %v9023_v29, %v10786_v43 }
 0x577   :  { %v9027_v36 = vpop.eup %9026  ;;  %8550 = vmatprep.mubr.msk.f32.mxu1 %vm465_vm6, %v1927_v35  ;;  %9048 = vrcp.f32 %v1842_v19  ;;  %v1844_v0 = vadd.f32 1.0, %v9025_v3  ;;  %v13256_v35 = vld [vmem:[#allocation70_spill] sm:$0xff] }
 0x578   :  { %v9029_v39 = vpop.eup %9028  ;;  %8551 = vmatmul.mubr.msk.f32.gmra.mxu1 %vm465_vm6, %v1928_v26  ;;  %v1929_v49 = vmul.f32 %v9027_v36, %v10825_v55  ;;  %v13257_v26 = vld [vmem:[#allocation69_spill] sm:$0xff] }
 0x579   :  { %v9031_v15 = vpop.eup %9030  ;;  %v1841_v1 = vadd.f32 1.0, %v9029_v39  ;;  %v13258_v39 = vld [vmem:[#allocation71_spill] sm:$0xff] }
 0x57a   :  { %v9033_v50 = vpop.eup %9032  ;;  %8553 = vmatprep.mubr.msk.f32.mxu1 %vm465_vm6, %v1929_v49  ;;  %v1846_v43 = vadd.f32 1.0, %v9031_v15 }
 0x57b   :  { %v9035_v21 = vpop.eup %9034  ;;  %9050 = vrcp.f32 %v1841_v1  ;;  %v1932_v51 = vmul.f32 %v9033_v50, %v10806_v28  ;;  %v13259_v50 = vld [vmem:[#allocation72_spill] sm:$0xff] }
 0x57c   :  { %v9037_v13 = vpop.eup %9036  ;;  %8554 = vmatmul.mubr.msk.f32.gmra.mxu1 %vm465_vm6, %v1930_v34  ;;  %v939_v30 = vpop.trf.xlu1  ;;  %v1931_v5 = vmul.f32 %v9035_v21, %v10845_v27  ;;  %9052 = vrcp.f32 %v1844_v0  ;;  %v13261_v21 = vld [vmem:[#allocation67_spill] sm:$0xff] }
 0x57d   :  { %v1843_v55 = vadd.f32 1.0, %v9037_v13  ;;  %vm947_vm15 = vcmp.ne.s16.totalorder %v939_v30, 0  ;;  %v9039_v42 = vpop.eup %9038 }
 0x57e   :  { %8556 = vmatprep.mubr.msk.f32.mxu1 %vm465_vm6, %v1931_v5  ;;  %v952_v40 = vsel %vm947_vm15, 65537, %v13254_v63  ;;  %v1934_v32 = vmul.f32 %v9039_v42, %v10822_v12  ;;  %v8026_v42 = vld [vmem:[#allocation3] ss:$0 sm:$0xff] }
 0x57f   :  { %v9041_v61 = vpop.eup %9040  ;;  %9054 = vrcp.f32 %v1843_v55  ;;  %v953_v24 = vunpack.c.l.b16 %v952_v40  ;;  %v11049_v40 = vld [vmem:[#allocation22] ss:$0 sm:$0xff] }
 0x580   :  { %v9043_v31 = vpop.eup %9042  ;;  %8557 = vmatmul.mubr.msk.f32.gmra.mxu1 %vm465_vm6, %v1932_v51  ;;  %v1933_v4 = vmul.f32 %v9041_v61, %v10865_v9  ;;  %9056 = vrcp.f32 %v1846_v43  ;;  %v2501_v51 = vld [vmem:[%s13265_s2 + $0x10] sm:$0xff]  ;;  %v2500_v43 = vld [vmem:[%s13265_s2 + $0x8] sm:$0xff]  ;;  %v2499_v61 = vld [vmem:[%s13265_s2] sm:$0xff] }
 0x581   :  { %v1845_v27 = vadd.f32 1.0, %v9043_v31  ;;  %v9045_v25 = vpop.eup %9044  ;;  %vm954_vm1 = vcmp.ne.s32.totalorder %v953_v24, 0  ;;  %8576 = vmatprep.subr.mxu0 %v2501_v51 }
 0x582   :  { %8559 = vmatprep.mubr.msk.f32.mxu1 %vm465_vm6, %v1933_v4  ;;  %v1936_v9 = vmul.f32 %v9045_v25, %v10838_v45  ;;  %v955_v46 = vsel %vm954_vm1, 1, %v13254_v63  ;;  %8577 = vmatpush3.msra.mxu0 %v2501_v51 }
 0x583   :  { %v9047_v28 = vpop.eup %9046  ;;  %9058 = vrcp.f32 %v1845_v27  ;;  %v959_v45 = vrot.slane %v955_v46, %v10416_v60  ;;  %8578 = vmatprep.subr.mxu0 %v2500_v43 }
 0x584   :  { %8560 = vmatmul.mubr.msk.f32.gmra.mxu1 %vm465_vm6, %v1934_v32  ;;  %v1935_v48 = vmul.f32 %v9047_v28, %v10881_v22  ;;  %v9049_v38 = vpop.eup %9048  ;;  %8579 = vmatpush3.msra.mxu0 %v2500_v43 }
 0x585   :  { %v1938_v17 = vmul.f32 %v9049_v38, %v10861_v41  ;;  %v1000_v41 = vrot.slane %v996_v56, %v10416_v60  ;;  %vm960_vm4 = vcmp.eq.s32.totalorder %v959_v45, 1  ;;  %8580 = vmatprep.subr.mxu0 %v2499_v61 }
 0x586   :  { %8562 = vmatprep.mubr.msk.f32.mxu1 %vm465_vm6, %v1935_v48  ;;  %vm1015_vm7 = vmand %vm960_vm4, %vm1011_vm5  ;;  %8581 = vmatpush3.msra.mxu0 %v2499_v61 }
 0x587   :  { %vm1001_vm9 = vcmp.eq.s32.totalorder %v1000_v41, 1  ;;  %vm1016_vm13 = vmand %vm960_vm4, %vm1010_vm11  ;;  %vm3752_vm4 = vcmask 1042434  }
 0x588   :  { %v9051_v7 = vpop.eup %9050  ;;  %8563 = vmatmul.mubr.msk.f32.gmra.mxu1 %vm465_vm6, %v1936_v9  ;;  %vm1017_vm10 = vmand %vm1001_vm9, %vm1011_vm5  ;;  %vm3754_vm5 = vcmask 1043459  }
 0x589   :  { %v1937_v12 = vmul.f32 %v9051_v7, %v10896_v62  ;;  %v9053_v54 = vpop.eup %9052  ;;  %vm1021_vm12 = vmor %vm1015_vm7, %vm1017_vm10  ;;  %vm3756_vm7 = vcmask 1044484   ;;  %vm3760_vm10 = vcmask 1046534  }
 0x58a   :  { %v1940_v47 = vmul.f32 %v9053_v54, %v10878_v53  ;;  %v779_v53 = vrot.slane %v754_v44, %v10416_v60  ;;  %vm1012_vm15 = vmand %vm1001_vm9, %vm1010_vm11  ;;  %vm3758_vm9 = vcmask 1045509   ;;  %vm3762_vm11 = vcmask 1047559  }
 0x58b   :  { %8565 = vmatprep.mubr.msk.f32.mxu1 %vm465_vm6, %v1937_v12  ;;  %vm1018_vm3 = vmor %vm1012_vm15, %vm1016_vm13  ;;  %vm3613_vm13 = vcmask 130112  }
 0x58c   :  { %v9055_v22 = vpop.eup %9054  ;;  %8566 = vmatmul.mubr.msk.f32.gmra.mxu1 %vm465_vm6, %v1938_v17  ;;  %vm781_vm14 = vcmp.eq.s32.totalorder %v10931_v20, %v779_v53 }
 0x58d   :  { %v1939_v52 = vmul.f32 %v9055_v22, %v10908_v37  ;;  %v9057_v62 = vpop.eup %9056  ;;  %vm1023_vm0 = vmand %vm781_vm14, %vm1021_vm12  ;;  %vm4281_vm12 = vcmask 523264   ;;  %vm13332_vm14 = vcmask 64512  }
 0x58e   :  { %v1942_v33 = vmul.f32 %v9057_v62, %v10887_v23  ;;  %v7855_v8 = vsel %vm1023_vm0, 1.0, %v13255_v11  ;;  %vm13333_vm15 = vmmov %vm13332_vm14 }
 0x58f   :  { %8568 = vmatprep.mubr.msk.f32.mxu1 %vm465_vm6, %v1939_v52  ;;  %v10981_v29 = vrot.slane %v7855_v8, %v10420_v6  ;;  %v10991_v19 = vrot.slane %v7855_v8, %v13257_v26  ;;  %v11000_v15 = vrot.slane %v7855_v8, %v13256_v35  ;;  %v3325_v1 = vrot.slane %v7855_v8, %v10416_v60  ;;  %vm13334_vm0 = vmmov %vm13332_vm14 }
 0x590   :  { %v9059_v16 = vpop.eup %9058  ;;  %8569 = vmatmul.mubr.msk.f32.gmra.mxu1 %vm465_vm6, %v1940_v47  ;;  %v11009_v34 = vrot.slane %v7855_v8, %v13258_v39  ;;  %v3336_v0 = vrot.slane %v7855_v8, %v10441_v14  ;;  %v11018_v30 = vrot.slane %v7855_v8, %v13259_v50  ;;  %v11023_v55 = vrot.slane %v7855_v8, %v13261_v21 }
 0x591   :  { %v1941_v59 = vmul.f32 %v9059_v16, %v10918_v2 }
 0x592   :  { %13260 = vst [vmem:[#allocation76_spill] sm:$0xff] %v11009_v34  ;;  %13263 = vst [vmem:[#allocation78_spill] sm:$0xff] %v11018_v30 }
 0x593   :  { %8571 = vmatprep.mubr.msk.f32.mxu1 %vm465_vm6, %v1941_v59  ;;  %13264 = vst [vmem:[#allocation79_spill] sm:$0xff] %v11023_v55 }
 0x594   :  { %8572 = vmatmul.mubr.msk.f32.gmra.mxu1 %vm465_vm6, %v1942_v33 }
 0x59a   :  { %v772_v23 = vpop.permute.xlu1 %771 }
 0x59b   :  { %vm780_vm1 = vcmp.eq.s32.totalorder %v772_v23, %v779_v53 }
 0x59c   :  { %vm1022_vm2 = vmand %vm780_vm1, %vm1018_vm3 }
 0x59d   :  { %v7854_v37 = vsel %vm1022_vm2, 1.0, %v13255_v11  ;;  %vm3750_vm2 = vcmask 1041409   ;;  %vm13335_vm1 = vmmov %vm13334_vm0 }
 0x59e   :  { %v10972_v2 = vrot.slane %v7854_v37, %v10441_v14  ;;  %v10975_v58 = vrot.slane %v7854_v37, %v10416_v60  ;;  %v10986_v3 = vrot.slane %v7854_v37, %v13256_v35  ;;  %v3259_v36 = vrot.slane %v7854_v37, %v10420_v6  ;;  %vm13336_vm3 = vmmov %vm13334_vm0 }
 0x59f   :  { %v10996_v49 = vrot.slane %v7854_v37, %v13258_v39  ;;  %v11005_v20 = vrot.slane %v7854_v37, %v13259_v50  ;;  %v11014_v13 = vrot.slane %v7854_v37, %v13261_v21  ;;  %v3270_v5 = vrot.slane %v7854_v37, %v13257_v26 }
 0x5a0   :  { %3892 = vbcast.lane.b32.xlu0 %v10972_v2, 256  ;;  %3881 = vbcast.lane.b32.xlu1 %v10975_v58, 256 }
 0x5a1   :  { %13262 = vst [vmem:[#allocation77_spill] sm:$0xff] %v11014_v13 }
 0x5a4   :  { %3995 = vbcast.lane.b32.xlu0 %v10981_v29, 264  ;;  %3885 = vbcast.lane.b32.xlu1 %v10975_v58, 264 }
 0x5a8   :  { %3929 = vbcast.lane.b32.xlu0 %v10986_v3, 264  ;;  %3896 = vbcast.lane.b32.xlu1 %v10972_v2, 264 }
 0x5ac   :  { %4006 = vbcast.lane.b32.xlu0 %v10991_v19, 264  ;;  %3903 = vbcast.lane.b32.xlu1 %v3259_v36, 256 }
 0x5b0   :  { %3940 = vbcast.lane.b32.xlu0 %v10996_v49, 264  ;;  %3907 = vbcast.lane.b32.xlu1 %v3259_v36, 264 }
 0x5b4   :  { %4017 = vbcast.lane.b32.xlu0 %v11000_v15, 264  ;;  %3969 = vbcast.lane.b32.xlu1 %v3325_v1, 256 }
 0x5b8   :  { %3951 = vbcast.lane.b32.xlu0 %v11005_v20, 264  ;;  %3973 = vbcast.lane.b32.xlu1 %v3325_v1, 264 }
 0x5bc   :  { %4028 = vbcast.lane.b32.xlu0 %v11009_v34, 264  ;;  %3980 = vbcast.lane.b32.xlu1 %v3336_v0, 256 }
 0x5c0   :  { %3962 = vbcast.lane.b32.xlu0 %v11014_v13, 264  ;;  %3984 = vbcast.lane.b32.xlu1 %v3336_v0, 264 }
 0x5c4   :  { %4039 = vbcast.lane.b32.xlu0 %v11018_v30, 264  ;;  %3914 = vbcast.lane.b32.xlu1 %v3270_v5, 256 }
 0x5c8   :  { %4050 = vbcast.lane.b32.xlu0 %v11023_v55, 264  ;;  %3918 = vbcast.lane.b32.xlu1 %v3270_v5, 264 }
 0x5cc   :  { %3197 = vperm.xlu0 %8922, %v8026_v42   ;;  %3991 = vbcast.lane.b32.xlu1 %v10981_v29, 256 }
 0x5d0   :  { %3250 = vbcast.lane.b32.xlu0 %v10972_v2, 256  ;;  %3925 = vbcast.lane.b32.xlu1 %v10986_v3, 256 }
 0x5d4   :  { %3261 = vbcast.lane.b32.xlu0 %v3259_v36, 256  ;;  %4002 = vbcast.lane.b32.xlu1 %v10991_v19, 256 }
 0x5d8   :  { %3327 = vbcast.lane.b32.xlu0 %v3325_v1, 256  ;;  %3936 = vbcast.lane.b32.xlu1 %v10996_v49, 256 }
 0x5dc   :  { %3338 = vbcast.lane.b32.xlu0 %v3336_v0, 256  ;;  %4013 = vbcast.lane.b32.xlu1 %v11000_v15, 256 }
 0x5e0   :  { %3272 = vbcast.lane.b32.xlu0 %v3270_v5, 256  ;;  %3947 = vbcast.lane.b32.xlu1 %v11005_v20, 256 }
 0x5e4   :  { %3349 = vbcast.lane.b32.xlu0 %v10981_v29, 256  ;;  %4024 = vbcast.lane.b32.xlu1 %v11009_v34, 256 }
 0x5e8   :  { %3958 = vbcast.lane.b32.xlu1 %v11014_v13, 256 }
 0x5ec   :  { %4035 = vbcast.lane.b32.xlu1 %v11018_v30, 256 }
 0x5f0   :  { %4046 = vbcast.lane.b32.xlu1 %v11023_v55, 256 }
 0x5f4   :  { %3239 = vbcast.lane.b32.xlu1 %v10975_v58, 256 }
 0x5f8   :  { %3243 = vbcast.lane.b32.xlu1 %v10975_v58, 264 }
 0x5fc   :  { %3254 = vbcast.lane.b32.xlu1 %v10972_v2, 264 }
 0x600   :  { %3265 = vbcast.lane.b32.xlu1 %v3259_v36, 264 }
 0x604   :  { %3331 = vbcast.lane.b32.xlu1 %v3325_v1, 264 }
 0x608   :  { %3342 = vbcast.lane.b32.xlu1 %v3336_v0, 264 }
 0x60c   :  { %3276 = vbcast.lane.b32.xlu1 %v3270_v5, 264 }
 0x612   :  { %v11045_v31 = vpop.permute.xlu1 %3881 }
 0x613   :  { %13266 = vst [vmem:[#allocation80_spill] sm:$0xff] %v11045_v31 }
 0x616   :  { %v11047_v63 = vpop.permute.xlu1 %3885 }
 0x617   :  { %13267 = vst [vmem:[#allocation81_spill] sm:$0xff] %v11047_v63 }
 0x618   :  { %v8528_v4 = vpop.f32.mrf.mxu1 }
 0x619   :  { %v11052_v27 = vadd.f32 %v8528_v4, %v11049_v40 }
 0x61a   :  { %v2116_v25 = vpop.f32.mrf.mxu1  ;;  %v11058_v24 = vpop.permute.xlu1 %3896 }
 0x61b   :  { %v7929_v32 = vmul.f32 -1.442695, %v11052_v27  ;;  %v11056_v28 = vadd.f32 %v11049_v40, %v2116_v25  ;;  %13268 = vst [vmem:[#allocation82_spill] sm:$0xff] %v11058_v24 }
 0x61c   :  { %v8531_v10 = vpop.f32.mrf.mxu1 }
 0x61d   :  { %9060 = vpow2.f32 %v7929_v32  ;;  %v7928_v48 = vmul.f32 -1.442695, %v11056_v28  ;;  %v11062_v9 = vadd.f32 %v8531_v10, %v11049_v40 }
 0x61e   :  { %v2126_v38 = vpop.f32.mrf.mxu1  ;;  %v11068_v12 = vpop.permute.xlu1 %3903 }
 0x61f   :  { %9062 = vpow2.f32 %v7928_v48  ;;  %v7931_v57 = vmul.f32 -1.442695, %v11062_v9  ;;  %v11066_v7 = vadd.f32 %v11049_v40, %v2126_v38  ;;  %13269 = vst [vmem:[#allocation83_spill] sm:$0xff] %v11068_v12 }
 0x620   :  { %v8534_v46 = vpop.f32.mrf.mxu1 }
 0x621   :  { %9064 = vpow2.f32 %v7931_v57  ;;  %v7930_v17 = vmul.f32 -1.442695, %v11066_v7  ;;  %v11072_v54 = vadd.f32 %v8534_v46, %v11049_v40 }
 0x622   :  { %v2136_v22 = vpop.f32.mrf.mxu1  ;;  %v11078_v56 = vpop.permute.xlu1 %3907 }
 0x623   :  { %9066 = vpow2.f32 %v7930_v17  ;;  %v7933_v45 = vmul.f32 -1.442695, %v11072_v54  ;;  %v11076_v52 = vadd.f32 %v11049_v40, %v2136_v22 }
 0x624   :  { %v8537_v47 = vpop.f32.mrf.mxu1 }
 0x625   :  { %9068 = vpow2.f32 %v7933_v45  ;;  %v7932_v62 = vmul.f32 -1.442695, %v11076_v52  ;;  %v11082_v16 = vadd.f32 %v8537_v47, %v11049_v40 }
 0x626   :  { %v2146_v41 = vpop.f32.mrf.mxu1  ;;  %v11088_v33 = vpop.permute.xlu1 %3969 }
 0x627   :  { %9070 = vpow2.f32 %v7932_v62  ;;  %v7935_v59 = vmul.f32 -1.442695, %v11082_v16  ;;  %v11086_v44 = vadd.f32 %v11049_v40, %v2146_v41 }
 0x628   :  { %v8540_v53 = vpop.f32.mrf.mxu1 }
 0x629   :  { %9072 = vpow2.f32 %v7935_v59  ;;  %v7934_v23 = vmul.f32 -1.442695, %v11086_v44  ;;  %v11092_v37 = vadd.f32 %v8540_v53, %v11049_v40 }
 0x62a   :  { %v9061_v2 = vpop.eup %9060  ;;  %v2156_v58 = vpop.f32.mrf.mxu1 }
 0x62b   :  { %v2372_v8 = vadd.f32 1.0, %v9061_v2  ;;  %9074 = vpow2.f32 %v7934_v23  ;;  %v7937_v36 = vmul.f32 -1.442695, %v11092_v37  ;;  %v11096_v1 = vadd.f32 %v11049_v40, %v2156_v58  ;;  %v11098_v0 = vpop.permute.xlu1 %3973 }
 0x62c   :  { %13270 = vst [vmem:[#allocation84_spill] sm:$0xff] %v11098_v0  ;;  %v9063_v5 = vpop.eup %9062  ;;  %v8543_v42 = vpop.f32.mrf.mxu1 }
 0x62d   :  { %9076 = vrcp.f32 %v2372_v8  ;;  %v2371_v18 = vadd.f32 1.0, %v9063_v5  ;;  %v7936_v51 = vmul.f32 -1.442695, %v11096_v1  ;;  %v11102_v43 = vadd.f32 %v8543_v42, %v11049_v40 }
 0x62e   :  { %v9065_v61 = vpop.eup %9064  ;;  %9078 = vpow2.f32 %v7937_v36  ;;  %v2166_v4 = vpop.f32.mrf.mxu1 }
 0x62f   :  { %9080 = vrcp.f32 %v2371_v18  ;;  %v2374_v25 = vadd.f32 1.0, %v9065_v61  ;;  %v7939_v32 = vmul.f32 -1.442695, %v11102_v43  ;;  %v11106_v10 = vadd.f32 %v11049_v40, %v2166_v4  ;;  %v11108_v48 = vpop.permute.xlu1 %3980  ;;  %v11124_v18 = vpop.permute.xlu0 %3892 }
 0x630   :  { %v9067_v38 = vpop.eup %9066  ;;  %9082 = vpow2.f32 %v7936_v51  ;;  %v8546_v57 = vpop.f32.mrf.mxu1  ;;  %13271 = vst [vmem:[#allocation85_spill] sm:$0xff] %v11124_v18 }
 0x631   :  { %9084 = vrcp.f32 %v2374_v25  ;;  %v2373_v46 = vadd.f32 1.0, %v9067_v38  ;;  %v7938_v17 = vmul.f32 -1.442695, %v11106_v10  ;;  %v11112_v22 = vadd.f32 %v8546_v57, %v11049_v40 }
 0x632   :  { %v9069_v45 = vpop.eup %9068  ;;  %9086 = vpow2.f32 %v7939_v32  ;;  %v2176_v47 = vpop.f32.mrf.mxu1 }
 0x633   :  { %9088 = vrcp.f32 %v2373_v46  ;;  %v2376_v62 = vadd.f32 1.0, %v9069_v45  ;;  %v7941_v41 = vmul.f32 -1.442695, %v11112_v22  ;;  %v11116_v59 = vadd.f32 %v11049_v40, %v2176_v47  ;;  %v11118_v53 = vpop.permute.xlu1 %3984 }
 0x634   :  { %v9071_v23 = vpop.eup %9070  ;;  %9090 = vpow2.f32 %v7938_v17  ;;  %v8549_v2 = vpop.f32.mrf.mxu1 }
 0x635   :  { %9092 = vrcp.f32 %v2376_v62  ;;  %v2375_v58 = vadd.f32 1.0, %v9071_v23  ;;  %v7940_v8 = vmul.f32 -1.442695, %v11116_v59  ;;  %v11122_v36 = vadd.f32 %v8549_v2, %v11049_v40 }
 0x636   :  { %v9073_v5 = vpop.eup %9072  ;;  %9094 = vpow2.f32 %v7941_v41  ;;  %v2186_v42 = vpop.f32.mrf.mxu1 }
 0x637   :  { %9096 = vrcp.f32 %v2375_v58  ;;  %v2378_v51 = vadd.f32 1.0, %v9073_v5  ;;  %v7943_v61 = vmul.f32 -1.442695, %v11122_v36  ;;  %v11128_v4 = vadd.f32 %v11049_v40, %v2186_v42  ;;  %v11130_v25 = vpop.permute.xlu1 %3914 }
 0x638   :  { %13272 = vst [vmem:[#allocation86_spill] sm:$0xff] %v11130_v25  ;;  %v9075_v32 = vpop.eup %9074  ;;  %9098 = vpow2.f32 %v7940_v8  ;;  %v8552_v38 = vpop.f32.mrf.mxu1 }
 0x639   :  { %9100 = vrcp.f32 %v2378_v51  ;;  %v2377_v57 = vadd.f32 1.0, %v9075_v32  ;;  %v7942_v46 = vmul.f32 -1.442695, %v11128_v4  ;;  %v11134_v17 = vadd.f32 %v8552_v38, %v11049_v40  ;;  %v11142_v51 = vpop.permute.xlu0 %3995 }
 0x63a   :  { %v9077_v45 = vpop.eup %9076  ;;  %9102 = vpow2.f32 %v7943_v61  ;;  %v2196_v47 = vpop.f32.mrf.mxu1 }
 0x63b   :  { %v9079_v62 = vpop.eup %9078  ;;  %9104 = vrcp.f32 %v2377_v57  ;;  %v7945_v41 = vmul.f32 -1.442695, %v11134_v17  ;;  %v11138_v23 = vadd.f32 %v11049_v40, %v2196_v47  ;;  %v11140_v2 = vpop.permute.xlu1 %3918  ;;  %v2468_v57 = vmul.f32 %v9077_v45, %v11052_v27 }
 0x63c   :  { %13273 = vst [vmem:[#allocation87_spill] sm:$0xff] %v11140_v2  ;;  %v9081_v58 = vpop.eup %9080  ;;  %v2380_v8 = vadd.f32 1.0, %v9079_v62  ;;  %9106 = vpow2.f32 %v7942_v46  ;;  %v8555_v5 = vpop.f32.mrf.mxu1 }
 0x63d   :  { %v9083_v42 = vpop.eup %9082  ;;  %v2467_v32 = vmul.f32 %v9081_v58, %v11056_v28  ;;  %9108 = vpow2.f32 %v7945_v41  ;;  %v7944_v61 = vmul.f32 -1.442695, %v11138_v23  ;;  %v11148_v11 = vadd.f32 %v8555_v5, %v11049_v40  ;;  %v11162_v6 = vpop.permute.xlu0 %3929 }
 0x63e   :  { %v9085_v38 = vpop.eup %9084  ;;  %9110 = vrcp.f32 %v2380_v8  ;;  %v2379_v47 = vadd.f32 1.0, %v9083_v42  ;;  %v2206_v21 = vpop.f32.mrf.mxu1  ;;  %13274 = vst [vmem:[#allocation88_spill] sm:$0xff] %v11162_v6 }
 0x63f   :  { %v9087_v62 = vpop.eup %9086  ;;  %9112 = vpow2.f32 %v7944_v61  ;;  %8582 = vmatprep.mubr.msk.f32.mxu0 %vm465_vm6, %v2467_v32  ;;  %v11151_v46 = vpop.permute.xlu1 %3991  ;;  %v7947_v41 = vmul.f32 -1.442695, %v11148_v11  ;;  %v11155_v58 = vadd.f32 %v11049_v40, %v2206_v21  ;;  %v4052_v8 = vmul.f32 %v11045_v31, %v2467_v32 }
 0x640   :  { %v9089_v50 = vpop.eup %9088  ;;  %9114 = vrcp.f32 %v2379_v47  ;;  %v2382_v28 = vadd.f32 1.0, %v9087_v62  ;;  %v8558_v27 = vpop.f32.mrf.mxu1  ;;  %8583 = vmatmul.mubr.msk.f32.vlgmr.msra.gmra.mxu0 %vm465_vm6, %v2468_v57  ;;  %v2470_v61 = vmul.f32 %v9085_v38, %v11062_v9 }
 0x641   :  { %v9091_v45 = vpop.eup %9090  ;;  %v2469_v5 = vmul.f32 %v9089_v50, %v11066_v7  ;;  %v7946_v47 = vmul.f32 -1.442695, %v11155_v58  ;;  %v11165_v21 = vadd.f32 %v8558_v27, %v11049_v40  ;;  %v4053_v50 = vmul.f32 %v11047_v63, %v2468_v57 }
 0x642   :  { %v9093_v42 = vpop.eup %9092  ;;  %9116 = vrcp.f32 %v2382_v28  ;;  %v2381_v35 = vadd.f32 1.0, %v9091_v45  ;;  %v2216_v62 = vpop.f32.mrf.mxu1  ;;  %v4084_v27 = vsel %vm465_vm6, %v4052_v8, 0.0  ;;  %v4055_v60 = vmul.f32 %v11058_v24, %v2470_v61 }
 0x643   :  { %v9095_v26 = vpop.eup %9094  ;;  %9118 = vpow2.f32 %v7947_v41  ;;  %8585 = vmatprep.mubr.msk.f32.mxu0 %vm465_vm6, %v2469_v5  ;;  %v11169_v9 = vpop.permute.xlu1 %3925  ;;  %v2472_v31 = vmul.f32 %v9093_v42, %v11072_v54  ;;  %v4085_v63 = vsel %vm465_vm6, %v4053_v50, 0.0 }
 0x644   :  { %v9097_v32 = vpop.eup %9096  ;;  %9120 = vrcp.f32 %v2381_v35  ;;  %v2384_v7 = vadd.f32 1.0, %v9095_v26  ;;  %13275 = vst [vmem:[#allocation89_spill] sm:$0xff] %v11169_v9  ;;  %v11171_v38 = vpop.f32.mrf.mxu1  ;;  %8586 = vmatmul.mubr.msk.f32.gmra.mxu0 %vm465_vm6, %v2470_v61  ;;  %v7949_v26 = vmul.f32 -1.442695, %v11165_v21  ;;  %v4086_v8 = vadd.f32 %v4085_v63, %v4084_v27 }
 0x645   :  { %v9099_v28 = vpop.eup %9098  ;;  %v2471_v45 = vmul.f32 %v9097_v32, %v11076_v52  ;;  %9122 = vpow2.f32 %v7946_v47  ;;  %v4054_v52 = vmul.f32 %v11124_v18, %v2469_v5  ;;  %v11186_v42 = vpop.permute.xlu0 %4006 }
 0x646   :  { %v9101_v41 = vpop.eup %9100  ;;  %v2383_v14 = vadd.f32 1.0, %v9099_v28  ;;  %v11177_v39 = vpop.f32.mrf.mxu1  ;;  %9124 = vrcp.f32 %v2384_v7  ;;  %v4087_v61 = vrot.slane %v4086_v8, 4 }
 0x647   :  { %v9103_v35 = vpop.eup %9102  ;;  %8588 = vmatprep.mubr.msk.f32.mxu0 %vm465_vm6, %v2471_v45  ;;  %v2474_v55 = vmul.f32 %v9101_v41, %v11082_v16  ;;  %v11191_v50 = vpop.permute.xlu1 %4002  ;;  %v4093_v63 = vsel %vm465_vm6, %v4054_v52, 0.0 }
 0x648   :  { %v9105_v57 = vpop.eup %9104  ;;  %9126 = vrcp.f32 %v2383_v14  ;;  %v2386_v47 = vadd.f32 1.0, %v9103_v35  ;;  %v11183_v32 = vpop.f32.mrf.mxu1  ;;  %8589 = vmatmul.mubr.msk.f32.gmra.mxu0 %vm465_vm6, %v2472_v31  ;;  %v11211_v34 = vadd.f32 %v4087_v61, %v4086_v8 }
 0x649   :  { %v9107_v54 = vpop.eup %9106  ;;  %v2473_v7 = vmul.f32 %v9105_v57, %v11086_v44  ;;  %9128 = vpow2.f32 %v7949_v26  ;;  %v11198_v44 = vadd.f32 %v11049_v40, %v2216_v62  ;;  %v4094_v26 = vsel %vm465_vm6, %v4055_v60, 0.0  ;;  %v11203_v30 = vpop.permute.xlu0 %3940 }
 0x64a   :  { %v9109_v28 = vpop.eup %9108  ;;  %v2385_v14 = vadd.f32 1.0, %v9107_v54  ;;  %v11193_v35 = vpop.f32.mrf.mxu1  ;;  %9130 = vrcp.f32 %v2386_v47  ;;  %v4056_v57 = vmul.f32 %v11068_v12, %v2471_v45  ;;  %v4095_v24 = vadd.f32 %v4094_v26, %v4093_v63  ;;  %13276 = vst [vmem:[#allocation90_spill] sm:$0xff] %v11203_v30 }
 0x64b   :  { %v9111_v5 = vpop.eup %9110  ;;  %8591 = vmatprep.mubr.msk.f32.mxu0 %vm465_vm6, %v2473_v7  ;;  %v2388_v27 = vadd.f32 1.0, %v9109_v28  ;;  %v4057_v62 = vmul.f32 %v11078_v56, %v2472_v31  ;;  %v4058_v31 = vmul.f32 %v11130_v25, %v2473_v7  ;;  %v4059_v8 = vmul.f32 %v11140_v2, %v2474_v55 }
 0x64c   :  { %v9113_v18 = vpop.eup %9112  ;;  %8592 = vmatmul.mubr.msk.f32.gmra.mxu0 %vm465_vm6, %v2474_v55  ;;  %9132 = vrcp.f32 %v2385_v14  ;;  %v8567_v47 = vpop.f32.mrf.mxu1  ;;  %v2476_v13 = vmul.f32 %v9111_v5, %v11092_v37  ;;  %v7948_v14 = vmul.f32 -1.442695, %v11198_v44  ;;  %v11219_v37 = vadd.f32 %v11171_v38, %v11049_v40 }
 0x64d   :  { %v9115_v16 = vpop.eup %9114  ;;  %v2387_v41 = vadd.f32 1.0, %v9113_v18  ;;  %9134 = vrcp.f32 %v2388_v27  ;;  %v11209_v18 = vpop.permute.xlu1 %3936  ;;  %v4096_v5 = vrot.slane %v4095_v24, 4  ;;  %v4103_v26 = vsel %vm465_vm6, %v4057_v62, 0.0 }
 0x64e   :  { %v2475_v52 = vmul.f32 %v9115_v16, %v11096_v1  ;;  %13277 = vst [vmem:[#allocation91_spill] sm:$0xff] %v11209_v18  ;;  %v4102_v1 = vsel %vm465_vm6, %v4056_v57, 0.0  ;;  %v2246_v61 = vpop.f32.mrf.mxu1  ;;  %v11226_v38 = vpop.permute.xlu0 %4017  ;;  %v4111_v55 = vsel %vm465_vm6, %v4058_v31, 0.0 }
 0x64f   :  { %v9117_v54 = vpop.eup %9116  ;;  %9136 = vrcp.f32 %v2387_v41  ;;  %v4104_v7 = vadd.f32 %v4103_v26, %v4102_v1  ;;  %v11256_v26 = vadd.f32 %v11049_v40, %v11193_v35 }
 0x650   :  { %v9119_v28 = vpop.eup %9118  ;;  %8594 = vmatprep.mubr.msk.f32.mxu0 %vm465_vm6, %v2475_v52  ;;  %v2478_v57 = vmul.f32 %v9117_v54, %v11102_v43  ;;  %v11238_v54 = vadd.f32 %v4096_v5, %v4095_v24 }
 0x651   :  { %v9121_v60 = vpop.eup %9120  ;;  %v2390_v45 = vadd.f32 1.0, %v9119_v28  ;;  %8595 = vmatmul.mubr.msk.f32.gmra.mxu0 %vm465_vm6, %v2476_v13  ;;  %v11234_v62 = vpop.permute.xlu1 %4013  ;;  %v4105_v5 = vrot.slane %v4104_v7, 4 }
 0x652   :  { %v9123_v63 = vpop.eup %9122  ;;  %v2477_v16 = vmul.f32 %v9121_v60, %v11106_v10  ;;  %v4060_v60 = vmul.f32 %v11169_v9, %v2475_v52  ;;  %v4061_v52 = vmul.f32 %v11162_v6, %v2476_v13 }
 0x653   :  { %9138 = vrcp.f32 %v2390_v45  ;;  %v2389_v27 = vadd.f32 1.0, %v9123_v63  ;;  %v9125_v41 = vpop.eup %9124  ;;  %v7951_v45 = vmul.f32 -1.442695, %v11219_v37  ;;  %v8570_v63 = vpop.f32.mrf.mxu1 }
 0x654   :  { %9140 = vpow2.f32 %v7948_v14  ;;  %8597 = vmatprep.mubr.msk.f32.mxu0 %vm465_vm6, %v2477_v16  ;;  %v4112_v14 = vsel %vm465_vm6, %v4059_v8, 0.0  ;;  %v2480_v31 = vmul.f32 %v9125_v41, %v11112_v22  ;;  %v4120_v22 = vsel %vm465_vm6, %v4060_v60, 0.0 }
 0x655   :  { %v9127_v10 = vpop.eup %9126  ;;  %9142 = vrcp.f32 %v2389_v27  ;;  %8598 = vmatmul.mubr.msk.f32.gmra.mxu0 %vm465_vm6, %v2478_v57  ;;  %v11249_v27 = vadd.f32 %v11183_v32, %v11049_v40  ;;  %v4113_v8 = vadd.f32 %v4112_v14, %v4111_v55  ;;  %v4062_v32 = vmul.f32 %v11209_v18, %v2477_v16  ;;  %v2256_v43 = vpop.f32.mrf.mxu1 }
 0x656   :  { %v11229_v28 = vmul.f32 %v9127_v10, %v11116_v59  ;;  %v11243_v59 = vadd.f32 %v11049_v40, %v11177_v39  ;;  %v9129_v1 = vpop.eup %9128  ;;  %9144 = vpow2.f32 %v7951_v45  ;;  %v11262_v10 = vadd.f32 %v8567_v47, %v11049_v40  ;;  %v11265_v45 = vpop.permute.xlu0 %3951 }
 0x657   :  { %v9131_v24 = vpop.eup %9130  ;;  %v7953_v41 = vmul.f32 -1.442695, %v11249_v27  ;;  %13278 = vst [vmem:[#allocation92_spill] sm:$0xff] %v11265_v45  ;;  %v4063_v55 = vmul.f32 %v11203_v30, %v2478_v57  ;;  %v2392_v35 = vadd.f32 1.0, %v9129_v1  ;;  %v4121_v60 = vsel %vm465_vm6, %v4061_v52, 0.0  ;;  %v11276_v16 = vpop.permute.xlu1 %3947 }
 0x658   :  { %8600 = vmatprep.mubr.msk.f32.mxu0 %vm465_vm6, %v11229_v28  ;;  %v7950_v39 = vmul.f32 -1.442695, %v11243_v59  ;;  %v11273_v6 = vmul.f32 %v9131_v24, %v11122_v36  ;;  %v7952_v47 = vmul.f32 -1.442695, %v11256_v26  ;;  %13279 = vst [vmem:[#allocation93_spill] sm:$0xff] %v11276_v16  ;;  %v4114_v9 = vrot.slane %v4113_v8, 4 }
 0x659   :  { %v9133_v13 = vpop.eup %9132  ;;  %8601 = vmatmul.mubr.msk.f32.gmra.mxu0 %vm465_vm6, %v2480_v31  ;;  %v4122_v25 = vadd.f32 %v4121_v60, %v4120_v22  ;;  %v4129_v57 = vsel %vm465_vm6, %v4062_v32, 0.0  ;;  %v11283_v36 = vadd.f32 %v11049_v40, %v2246_v61  ;;  %v11286_v52 = vadd.f32 %v8570_v63, %v11049_v40  ;;  %v8573_v32 = vpop.f32.mrf.mxu1 }
 0x65a   :  { %v11269_v14 = vmul.f32 %v9133_v13, %v11128_v4  ;;  %9146 = vpow2.f32 %v7950_v39  ;;  %v9135_v18 = vpop.eup %9134  ;;  %v7955_v4 = vmul.f32 -1.442695, %v11262_v10  ;;  %v11289_v24 = vadd.f32 %v11049_v40, %v2256_v43 }
 0x65b   :  { %9148 = vpow2.f32 %v7953_v41  ;;  %v4106_v39 = vadd.f32 %v4105_v5, %v4104_v7  ;;  %v4130_v13 = vsel %vm465_vm6, %v4063_v55, 0.0  ;;  %v11298_v61 = vmul.f32 %v9135_v18, %v11134_v17 }
 0x65c   :  { %8603 = vmatprep.mubr.msk.f32.mxu0 %vm465_vm6, %v11269_v14  ;;  %v9137_v1 = vpop.eup %9136  ;;  %9150 = vpow2.f32 %v7952_v47  ;;  %v7954_v63 = vmul.f32 -1.442695, %v11283_v36  ;;  %v7957_v43 = vmul.f32 -1.442695, %v11286_v52  ;;  %v11302_v47 = vpop.permute.xlu0 %4028  ;;  %v4065_v7 = vmul.f32 %v11265_v45, %v2480_v31 }
 0x65d   :  { %8604 = vmatmul.mubr.msk.f32.gmra.mxu0 %vm465_vm6, %v11273_v6  ;;  %v11295_v22 = vmul.f32 %v9137_v1, %v11138_v23  ;;  %9152 = vrcp.f32 %v2392_v35  ;;  %v4115_v5 = vadd.f32 %v4114_v9, %v4113_v8  ;;  %v4131_v55 = vadd.f32 %v4130_v13, %v4129_v57  ;;  %v11310_v1 = vpop.permute.xlu1 %4024 }
 0x65e   :  { %9154 = vpow2.f32 %v7955_v4  ;;  %v7956_v23 = vmul.f32 -1.442695, %v11289_v24  ;;  %v4123_v35 = vrot.slane %v4122_v25, 4  ;;  %v4064_v4 = vmul.f32 %v11276_v16, %v11229_v28 }
 0x65f   :  { %8606 = vmatprep.mubr.msk.f32.mxu0 %vm465_vm6, %v11295_v22  ;;  %9156 = vpow2.f32 %v7954_v63  ;;  %v4098_v9 = vrot.slane %v11238_v54, 2  ;;  %v4107_v8 = vrot.slane %v4106_v39, 2  ;;  %v2266_v63 = vpop.f32.mrf.mxu1  ;;  %v4139_v45 = vsel %vm465_vm6, %v4065_v7, 0.0 }
 0x660   :  { %v9139_v41 = vpop.eup %9138  ;;  %9158 = vpow2.f32 %v7957_v43  ;;  %v4138_v13 = vsel %vm465_vm6, %v4064_v4, 0.0  ;;  %v4132_v30 = vrot.slane %v4131_v55, 4 }
 0x661   :  { %v9141_v60 = vpop.eup %9140  ;;  %8607 = vmatmul.mubr.msk.f32.gmra.mxu0 %vm465_vm6, %v11298_v61  ;;  %v11319_v57 = vmul.f32 %v9139_v41, %v11148_v11  ;;  %v4124_v11 = vadd.f32 %v4123_v35, %v4122_v25  ;;  %v4140_v43 = vadd.f32 %v4139_v45, %v4138_v13  ;;  %v11343_v4 = vadd.f32 %v4107_v8, %v4106_v39  ;;  %v11347_v45 = vpop.permute.xlu1 %3958 }
 0x662   :  { %v9143_v17 = vpop.eup %9142  ;;  %v2391_v18 = vadd.f32 1.0, %v9141_v60  ;;  %v13280_v60 = vrot.slane %v11211_v34, 2  ;;  %13282 = vst [vmem:[#allocation95_spill] sm:$0xff] %v11347_v45 }
 0x663   :  { %v11316_v31 = vmul.f32 %v9143_v17, %v11155_v58  ;;  %v9145_v28 = vpop.eup %9144  ;;  %v4116_v58 = vrot.slane %v4115_v5, 2  ;;  %v11332_v17 = vpop.permute.xlu0 %3962 }
 0x664   :  { %9160 = vrcp.f32 %v2391_v18  ;;  %v11325_v16 = vadd.f32 %v13280_v60, %v11211_v34  ;;  %v2394_v41 = vadd.f32 1.0, %v9145_v28  ;;  %13281 = vst [vmem:[#allocation94_spill] sm:$0xff] %v11332_v17  ;;  %v11335_v18 = vadd.f32 %v8573_v32, %v11049_v40 }
 0x665   :  { %9162 = vpow2.f32 %v7956_v23  ;;  %8609 = vmatprep.mubr.msk.f32.mxu0 %vm465_vm6, %v11316_v31  ;;  %v11338_v34 = vadd.f32 %v11049_v40, %v2266_v63  ;;  %v11341_v23 = vadd.f32 %v4098_v9, %v11238_v54  ;;  %v4067_v25 = vmul.f32 %v11332_v17, %v11273_v6 }
 0x666   :  { %8610 = vmatmul.mubr.msk.f32.gmra.mxu0 %vm465_vm6, %v11319_v57  ;;  %9164 = vrcp.f32 %v2394_v41  ;;  %v4133_v28 = vadd.f32 %v4132_v30, %v4131_v55  ;;  %v4141_v32 = vrot.slane %v4140_v43, 4  ;;  %v7959_v60 = vmul.f32 -1.442695, %v11335_v18 }
 0x667   :  { %v9147_v7 = vpop.eup %9146  ;;  %v4091_v40 = vrot.slane %v11325_v16, 1  ;;  %v11351_v63 = vadd.f32 %v4116_v58, %v4115_v5  ;;  %v4125_v54 = vrot.slane %v4124_v11, 2  ;;  %v7958_v6 = vmul.f32 -1.442695, %v11338_v34 }
 0x668   :  { %v9149_v35 = vpop.eup %9148  ;;  %v2393_v13 = vadd.f32 1.0, %v9147_v7  ;;  %v4142_v8 = vadd.f32 %v4141_v32, %v4140_v43  ;;  %v4066_v41 = vmul.f32 %v11347_v45, %v11269_v14  ;;  %v4100_v30 = vrot.slane %v11341_v23, 1 }
 0x669   :  { %v2396_v9 = vadd.f32 1.0, %v9149_v35  ;;  %v9151_v39 = vpop.eup %9150  ;;  %v4109_v55 = vrot.slane %v11343_v4, 1  ;;  %v4148_v5 = vsel %vm465_vm6, %v4067_v25, 0.0  ;;  %v4134_v58 = vrot.slane %v4133_v28, 2 }
 0x66a   :  { %9166 = vrcp.f32 %v2393_v13  ;;  %v9153_v17 = vpop.eup %9152  ;;  %v2395_v7 = vadd.f32 1.0, %v9151_v39  ;;  %v4147_v35 = vsel %vm465_vm6, %v4066_v41, 0.0  ;;  %v4126_v43 = vadd.f32 %v4125_v54, %v4124_v11 }
 0x66b   :  { %9168 = vrcp.f32 %v2396_v9  ;;  %v9155_v2 = vpop.eup %9154  ;;  %v4143_v32 = vrot.slane %v4142_v8, 2  ;;  %v4069_v45 = vmul.f32 %v11098_v0, %v11298_v61  ;;  %v4118_v12 = vrot.slane %v11351_v63, 1 }
 0x66c   :  { %9170 = vpow2.f32 %v7959_v60  ;;  %v2398_v13 = vadd.f32 1.0, %v9155_v2  ;;  %v9157_v14 = vpop.eup %9156  ;;  %v4149_v9 = vadd.f32 %v4148_v5, %v4147_v35  ;;  %v4068_v25 = vmul.f32 %v11088_v33, %v11295_v22 }
 0x66d   :  { %9172 = vrcp.f32 %v2395_v7  ;;  %v9159_v39 = vpop.eup %9158  ;;  %v2488_v60 = vmul.f32 %v9153_v17, %v11165_v21  ;;  %v2397_v11 = vadd.f32 1.0, %v9157_v14  ;;  %v4070_v54 = vmul.f32 %v11108_v48, %v11316_v31 }
 0x66e   :  { %9174 = vpow2.f32 %v7958_v6  ;;  %v4135_v41 = vadd.f32 %v4134_v58, %v4133_v28  ;;  %v2400_v61 = vadd.f32 1.0, %v9159_v39  ;;  %v4150_v7 = vrot.slane %v4149_v9, 4 }
 0x66f   :  { %9176 = vrcp.f32 %v2398_v13  ;;  %v4127_v35 = vrot.slane %v4126_v43, 1  ;;  %v4144_v0 = vadd.f32 %v4143_v32, %v4142_v8  ;;  %v4071_v21 = vmul.f32 %v11118_v53, %v11319_v57 }
 0x670   :  { %9178 = vrcp.f32 %v2397_v11  ;;  %v4151_v17 = vadd.f32 %v4150_v7, %v4149_v9  ;;  %v4092_v31 = vadd.f32 %v4091_v40, %v11325_v16  ;;  %v4101_v28 = vadd.f32 %v4100_v30, %v11341_v23 }
 0x671   :  { %v9161_v2 = vpop.eup %9160  ;;  %9180 = vrcp.f32 %v2400_v61  ;;  %v4156_v58 = vsel %vm465_vm6, %v4068_v25, 0.0  ;;  %v4073_v13 = vmul.f32 %v11142_v51, %v2488_v60  ;;  %v4165_v8 = vsel %vm465_vm6, %v4070_v54, 0.0 }
 0x672   :  { %v9163_v6 = vpop.eup %9162  ;;  %v2487_v5 = vmul.f32 %v9161_v2, %v11198_v44  ;;  %v4136_v32 = vrot.slane %v4135_v41, 1  ;;  %v4152_v57 = vrot.slane %v4151_v17, 2  ;;  %v4110_v14 = vadd.f32 %v4109_v55, %v11343_v4 }
 0x673   :  { %v2399_v22 = vadd.f32 1.0, %v9163_v6  ;;  %v9165_v44 = vpop.eup %9164  ;;  %v4119_v16 = vadd.f32 %v4118_v12, %v11351_v63  ;;  %v4145_v40 = vrot.slane %v4144_v0, 1  ;;  %v4157_v30 = vsel %vm465_vm6, %v4069_v45, 0.0 }
 0x674   :  { %8612 = vmatprep.mubr.msk.f32.mxu0 %vm465_vm6, %v2487_v5  ;;  %v2490_v23 = vmul.f32 %v9165_v44, %v11219_v37  ;;  %v4166_v9 = vsel %vm465_vm6, %v4071_v21, 0.0  ;;  %v4128_v39 = vadd.f32 %v4127_v35, %v4126_v43  ;;  %v4153_v25 = vadd.f32 %v4152_v57, %v4151_v17 }
 0x675   :  { %9182 = vrcp.f32 %v2399_v22  ;;  %8613 = vmatmul.mubr.msk.f32.gmra.mxu0 %vm465_vm6, %v2488_v60  ;;  %v11383_v2 = vadd.f32 %v4157_v30, %v4156_v58  ;;  %v11385_v54 = vadd.f32 %v4166_v9, %v4165_v8  ;;  %v4175_v60 = vsel %vm465_vm6, %v4073_v13, 0.0 }
 0x676   :  { %v4072_v4 = vmul.f32 %v11151_v46, %v2487_v5  ;;  %v4137_v37 = vadd.f32 %v4136_v32, %v4135_v41  ;;  %v4154_v63 = vrot.slane %v4153_v25, 1  ;;  %v4244_v45 = vsel %vm3750_vm2, %v4101_v28, %v4092_v31 }
 0x677   :  { %v9167_v11 = vpop.eup %9166  ;;  %v4075_v43 = vmul.f32 %v11186_v42, %v2490_v23  ;;  %v4146_v6 = vadd.f32 %v4145_v40, %v4144_v0  ;;  %v4245_v35 = vsel %vm3752_vm4, %v4110_v14, %v4244_v45 }
 0x678   :  { %v9169_v55 = vpop.eup %9168  ;;  %v2489_v12 = vmul.f32 %v9167_v11, %v11243_v59  ;;  %v4155_v5 = vadd.f32 %v4154_v63, %v4153_v25  ;;  %v4246_v59 = vsel %vm3754_vm5, %v4119_v16, %v4245_v35  ;;  %v4174_v31 = vsel %vm465_vm6, %v4072_v4, 0.0 }
 0x679   :  { %v9171_v61 = vpop.eup %9170  ;;  %v2492_v7 = vmul.f32 %v9169_v55, %v11249_v27  ;;  %v4247_v0 = vsel %vm3756_vm7, %v4128_v39, %v4246_v59  ;;  %v4184_v32 = vsel %vm465_vm6, %v4075_v43, 0.0 }
 0x67a   :  { %v9173_v21 = vpop.eup %9172  ;;  %v4074_v22 = vmul.f32 %v11191_v50, %v2489_v12  ;;  %v2402_v17 = vadd.f32 1.0, %v9171_v61  ;;  %8615 = vmatprep.mubr.msk.f32.mxu0 %vm465_vm6, %v2489_v12  ;;  %v4248_v8 = vsel %vm3758_vm9, %v4137_v37, %v4247_v0  ;;  %v11417_v12 = vpop.permute.xlu0 %4039  ;;  %v4168_v37 = vrot.slane %v11385_v54, 4 }
 0x67b   :  { %v9175_v41 = vpop.eup %9174  ;;  %v4077_v28 = vmul.f32 %v11226_v38, %v2492_v7  ;;  %v2491_v58 = vmul.f32 %v9173_v21, %v11256_v26  ;;  %8616 = vmatmul.mubr.msk.f32.gmra.mxu0 %vm465_vm6, %v2490_v23  ;;  %v4249_v16 = vsel %vm3760_vm10, %v4146_v6, %v4248_v8  ;;  %v4176_v23 = vadd.f32 %v4175_v60, %v4174_v31 }
 0x67c   :  { %v9177_v27 = vpop.eup %9176  ;;  %v4183_v13 = vsel %vm465_vm6, %v4074_v22, 0.0  ;;  %9184 = vrcp.f32 %v2402_v17  ;;  %v2401_v44 = vadd.f32 1.0, %v9175_v41  ;;  %v4250_v30 = vsel %vm3762_vm11, %v4155_v5, %v4249_v16  ;;  %v11429_v22 = vpop.permute.xlu1 %4035  ;;  %v4271_v41 = vld [vmem:[%s13283_s20 + $0x28] sm:$0xff]  ;;  %v4269_v16 = vld [vmem:[%s13283_s20 + $0x18] sm:$0xff] }
 0x67d   :  { %v2494_v57 = vmul.f32 %v9177_v27, %v11262_v10  ;;  %v4076_v14 = vmul.f32 %v11234_v62, %v2491_v58  ;;  %8618 = vmatprep.mubr.msk.f32.mxu0 %vm465_vm6, %v2491_v58  ;;  %v9179_v26 = vpop.eup %9178  ;;  %v4185_v40 = vadd.f32 %v4184_v32, %v4183_v13  ;;  %v4193_v39 = vsel %vm465_vm6, %v4077_v28, 0.0  ;;  %4258 = vrot.lane.b32.xlu1 %v4250_v30, %s10093_s6 }
 0x67e   :  { %9186 = vrcp.f32 %v2401_v44  ;;  %v9181_v9 = vpop.eup %9180  ;;  %v2493_v10 = vmul.f32 %v9179_v26, %v11283_v36  ;;  %v4273_v36 = vld [vmem:[%s13283_s20 + $0x38] sm:$0xff]  ;;  %v4177_v45 = vrot.slane %v4176_v23, 4  ;;  %13284 = vst [vmem:[#allocation96_spill] sm:$0xff] %v11429_v22  ;;  %v4169_v59 = vadd.f32 %v4168_v37, %v11385_v54  ;;  %v4270_v44 = vld [vmem:[%s13283_s20 + $0x20] sm:$0xff]  ;;  %v11445_v30 = vpop.permute.xlu0 %4050 }
 0x67f   :  { %v4079_v25 = vmul.f32 %v11302_v47, %v2494_v57  ;;  %v4192_v11 = vsel %vm465_vm6, %v4076_v14, 0.0  ;;  %8619 = vmatmul.mubr.msk.f32.gmra.mxu0 %vm465_vm6, %v2492_v7  ;;  %v2496_v4 = vmul.f32 %v9181_v9, %v11286_v52  ;;  %8637 = vmatprep.subr.mxu0 %v4273_v36  ;;  %v4272_v7 = vld [vmem:[%s13283_s20 + $0x30] sm:$0xff]  ;;  %v4159_v52 = vrot.slane %v11383_v2, 4  ;;  %13285 = vst [vmem:[#allocation97_spill] sm:$0xff] %v11445_v30 }
 0x680   :  { %v4194_v60 = vadd.f32 %v4193_v39, %v4192_v11  ;;  %v4078_v63 = vmul.f32 %v11310_v1, %v2493_v10  ;;  %8621 = vmatprep.mubr.msk.f32.mxu0 %vm465_vm6, %v2493_v10  ;;  %v4186_v6 = vrot.slane %v4185_v40, 4  ;;  %8638 = vmatpush3.msra.mxu0 %v4273_v36  ;;  %v4178_v31 = vadd.f32 %v4177_v45, %v4176_v23  ;;  %v4267_v45 = vld [vmem:[%s13283_s20 + $0x8] sm:$0xff] }
 0x681   :  { %v4081_v61 = vmul.f32 %v11417_v12, %v2496_v4  ;;  %v4202_v35 = vsel %vm465_vm6, %v4079_v25, 0.0  ;;  %3353 = vbcast.lane.b32.xlu1 %v10981_v29, 264  ;;  %8639 = vmatprep.subr.mxu0 %v4272_v7  ;;  %v4160_v0 = vadd.f32 %v4159_v52, %v11383_v2  ;;  %v4170_v32 = vrot.slane %v4169_v59, 2  ;;  %v4268_v25 = vld [vmem:[%s13283_s20 + $0x10] sm:$0xff] }
 0x682   :  { %v9183_v55 = vpop.eup %9182  ;;  %v4201_v21 = vsel %vm465_vm6, %v4078_v63, 0.0  ;;  %v4195_v17 = vrot.slane %v4194_v60, 4  ;;  %8640 = vmatpush3.msra.mxu0 %v4272_v7  ;;  %v4187_v27 = vadd.f32 %v4186_v6, %v4185_v40  ;;  %v4179_v26 = vrot.slane %v4178_v31, 2  ;;  %v4266_v6 = vld [vmem:[%s13283_s20] sm:$0xff] }
 0x683   :  { %v2495_v43 = vmul.f32 %v9183_v55, %v11289_v24  ;;  %8622 = vmatmul.mubr.msk.f32.gmra.mxu0 %vm465_vm6, %v2494_v57  ;;  %v4203_v5 = vadd.f32 %v4202_v35, %v4201_v21  ;;  %v4211_v28 = vsel %vm465_vm6, %v4081_v61, 0.0  ;;  %8641 = vmatprep.subr.mxu0 %v4271_v41  ;;  %v4161_v40 = vrot.slane %v4160_v0, 2  ;;  %v11451_v55 = vpop.permute.xlu1 %4046 }
 0x684   :  { %v4196_v54 = vadd.f32 %v4195_v17, %v4194_v60  ;;  %8642 = vmatpush3.msra.mxu0 %v4271_v41  ;;  %v4188_v9 = vrot.slane %v4187_v27, 2  ;;  %13286 = vst [vmem:[#allocation98_spill] sm:$0xff] %v11451_v55  ;;  %v4180_v37 = vadd.f32 %v4179_v26, %v4178_v31 }
 0x685   :  { %v4080_v24 = vmul.f32 %v11429_v22, %v2495_v43  ;;  %8624 = vmatprep.mubr.msk.f32.mxu0 %vm465_vm6, %v2495_v43  ;;  %v4204_v58 = vrot.slane %v4203_v5, 4  ;;  %3287 = vbcast.lane.b32.xlu1 %v10986_v3, 264  ;;  %v4162_v61 = vadd.f32 %v4161_v40, %v4160_v0 }
 0x686   :  { %8643 = vmatprep.subr.mxu0 %v4270_v44  ;;  %v4197_v10 = vrot.slane %v4196_v54, 2  ;;  %v4189_v43 = vadd.f32 %v4188_v9, %v4187_v27 }
 0x687   :  { %v4210_v29 = vsel %vm465_vm6, %v4080_v24, 0.0  ;;  %8625 = vmatmul.mubr.msk.f32.gmra.mxu0 %vm465_vm6, %v2496_v4  ;;  %v4205_v57 = vadd.f32 %v4204_v58, %v4203_v5  ;;  %v4171_v4 = vadd.f32 %v4170_v32, %v4169_v59  ;;  %v4181_v5 = vrot.slane %v4180_v37, 1 }
 0x688   :  { %v4212_v13 = vadd.f32 %v4211_v28, %v4210_v29  ;;  %8644 = vmatpush3.msra.mxu0 %v4270_v44  ;;  %v4163_v59 = vrot.slane %v4162_v61, 1  ;;  %v4190_v41 = vrot.slane %v4189_v43, 1 }
 0x689   :  { %v9185_v8 = vpop.eup %9184  ;;  %3364 = vbcast.lane.b32.xlu1 %v10991_v19, 264  ;;  %8645 = vmatprep.subr.mxu0 %v4269_v16  ;;  %v4172_v35 = vrot.slane %v4171_v4, 1  ;;  %v4182_v27 = vadd.f32 %v4181_v5, %v4180_v37  ;;  %v13290_v37 = vld [vmem:[#allocation79_spill] sm:$0xff] }
 0x68a   :  { %v4213_v14 = vrot.slane %v4212_v13, 4  ;;  %v2498_v23 = vmul.f32 %v9185_v8, %v11335_v18  ;;  %v4206_v18 = vrot.slane %v4205_v57, 2  ;;  %8646 = vmatpush3.msra.mxu0 %v4269_v16  ;;  %v4164_v44 = vadd.f32 %v4163_v59, %v4162_v61 }
 0x68b   :  { %v9187_v2 = vpop.eup %9186  ;;  %8647 = vmatprep.subr.mxu0 %v4268_v25  ;;  %v4173_v58 = vadd.f32 %v4172_v35, %v4171_v4  ;;  %v13288_v4 = vld [vmem:[#allocation77_spill] sm:$0xff]  ;;  %v11509_v35 = vld [vmem:[#allocation24] ss:$0 sm:$0xff] }
 0x68c   :  { %v4214_v39 = vadd.f32 %v4213_v14, %v4212_v13  ;;  %v4083_v11 = vmul.f32 %v11445_v30, %v2498_v23  ;;  %v2497_v60 = vmul.f32 %v9187_v2, %v11338_v34  ;;  %v4198_v34 = vadd.f32 %v4197_v10, %v4196_v54  ;;  %8648 = vmatpush3.msra.mxu0 %v4268_v25  ;;  %v13287_v2 = vld [vmem:[#allocation76_spill] sm:$0xff] }
 0x68d   :  { %3298 = vbcast.lane.b32.xlu1 %v10996_v49, 264  ;;  %v4207_v21 = vadd.f32 %v4206_v18, %v4205_v57  ;;  %8649 = vmatprep.subr.mxu0 %v4267_v45  ;;  %v4191_v54 = vadd.f32 %v4190_v41, %v4189_v43  ;;  %v4251_v16 = vsel %vm3750_vm2, %v4173_v58, %v4164_v44  ;;  %v13289_v18 = vld [vmem:[#allocation78_spill] sm:$0xff] }
 0x68e   :  { %v4215_v63 = vrot.slane %v4214_v39, 2  ;;  %v4082_v36 = vmul.f32 %v11451_v55, %v2497_v60  ;;  %8627 = vmatprep.mubr.msk.f32.mxu0 %vm465_vm6, %v2497_v60  ;;  %v4220_v7 = vsel %vm465_vm6, %v4083_v11, 0.0  ;;  %8650 = vmatpush3.msra.mxu0 %v4267_v45  ;;  %v4199_v28 = vrot.slane %v4198_v34, 1 }
 0x68f   :  { %8628 = vmatmul.mubr.msk.f32.gmra.mxu0 %vm465_vm6, %v2498_v23  ;;  %8651 = vmatprep.subr.mxu0 %v4266_v6  ;;  %v4208_v29 = vrot.slane %v4207_v21, 1  ;;  %v4252_v23 = vsel %vm3752_vm4, %v4182_v27, %v4251_v16 }
 0x690   :  { %v4219_v52 = vsel %vm465_vm6, %v4082_v36, 0.0  ;;  %v4216_v24 = vadd.f32 %v4215_v63, %v4214_v39  ;;  %8652 = vmatpush3.msra.mxu0 %v4266_v6  ;;  %v4200_v32 = vadd.f32 %v4199_v28, %v4198_v34  ;;  %v4253_v9 = vsel %vm3754_vm5, %v4191_v54, %v4252_v23  ;;  %v11484_v63 = vpop.permute.xlu1 %3239  ;;  %v13295_v34 = vld [vmem:[#allocation73_spill] sm:$0xff] }
 0x691   :  { %v4221_v17 = vadd.f32 %v4220_v7, %v4219_v52  ;;  %3375 = vbcast.lane.b32.xlu1 %v11000_v15, 264  ;;  %v4209_v57 = vadd.f32 %v4208_v29, %v4207_v21 }
 0x692   :  { %v4217_v13 = vrot.slane %v4216_v24, 1  ;;  %v4254_v39 = vsel %vm3756_vm7, %v4200_v32, %v4253_v9 }
 0x693   :  { %v4222_v31 = vrot.slane %v4221_v17, 4  ;;  %v4255_v10 = vsel %vm3758_vm9, %v4209_v57, %v4254_v39 }
 0x694   :  { %v4218_v26 = vadd.f32 %v4217_v13, %v4216_v24 }
 0x695   :  { %v4223_v0 = vadd.f32 %v4222_v31, %v4221_v17  ;;  %3309 = vbcast.lane.b32.xlu1 %v11005_v20, 264 }
 0x696   :  { %v4256_v11 = vsel %vm3760_vm10, %v4218_v26, %v4255_v10 }
 0x697   :  { %v4224_v8 = vrot.slane %v4223_v0, 2 }
 0x699   :  { %v4225_v14 = vadd.f32 %v4224_v8, %v4223_v0  ;;  %3386 = vbcast.lane.b32.xlu1 %v13287_v2, 264 }
 0x69b   :  { %v4226_v40 = vrot.slane %v4225_v14, 1 }
 0x69d   :  { %v4227_v25 = vadd.f32 %v4226_v40, %v4225_v14  ;;  %3320 = vbcast.lane.b32.xlu1 %v13288_v4, 264 }
 0x69f   :  { %v4257_v60 = vsel %vm3762_vm11, %v4227_v25, %v4256_v11 }
 0x6a0   :  { %4260 = vrot.lane.b32.xlu0 %v4257_v60, %s10093_s6 }
 0x6a1   :  { %3397 = vbcast.lane.b32.xlu1 %v13289_v18, 264 }
 0x6a4   :  { %3283 = vbcast.lane.b32.xlu0 %v10986_v3, 256  ;;  %v11486_v3 = vpop.permute.xlu1 %3243 }
 0x6a5   :  { %3408 = vbcast.lane.b32.xlu1 %v13290_v37, 264 }
 0x6a8   :  { %3360 = vbcast.lane.b32.xlu0 %v10991_v19, 256  ;;  %v11488_v36 = vpop.permute.xlu1 %3254 }
 0x6ac   :  { %3294 = vbcast.lane.b32.xlu0 %v10996_v49, 256  ;;  %v11490_v19 = vpop.permute.xlu1 %3265 }
 0x6ad   :  { %13291 = vst [vmem:[#allocation76_spill] sm:$0xff] %v11490_v19 }
 0x6b0   :  { %3371 = vbcast.lane.b32.xlu0 %v11000_v15, 256  ;;  %v11492_v49 = vpop.permute.xlu1 %3331 }
 0x6b1   :  { %13292 = vst [vmem:[#allocation77_spill] sm:$0xff] %v11492_v49 }
 0x6b4   :  { %3305 = vbcast.lane.b32.xlu0 %v11005_v20, 256  ;;  %v11494_v15 = vpop.permute.xlu1 %3342  ;;  %v11496_v20 = vpop.permute.xlu0 %3197 }
 0x6b5   :  { %13293 = vst [vmem:[#allocation78_spill] sm:$0xff] %v11494_v15 }
 0x6b8   :  { %3382 = vbcast.lane.b32.xlu0 %v13287_v2, 256  ;;  %v11498_v45 = vpop.permute.xlu1 %3276  ;;  %v11500_v61 = vpop.permute.xlu0 %3250 }
 0x6b9   :  { %13294 = vst [vmem:[#allocation79_spill] sm:$0xff] %v11498_v45 }
 0x6bc   :  { %3316 = vbcast.lane.b32.xlu0 %v13288_v4, 256  ;;  %v11505_v52 = vpop.permute.xlu0 %3261 }
 0x6bd   :  { %13296 = vst [vmem:[#allocation73_spill] sm:$0xff] %v11505_v52 }
 0x6c0   :  { %3393 = vbcast.lane.b32.xlu0 %v13289_v18, 256  ;;  %v11507_v6 = vpop.permute.xlu0 %3327 }
 0x6c1   :  { %13297 = vst [vmem:[#allocation99_spill] sm:$0xff] %v11507_v6 }
 0x6c4   :  { %3404 = vbcast.lane.b32.xlu0 %v13290_v37, 256  ;;  %v11514_v24 = vpop.permute.xlu0 %3338 }
 0x6c5   :  { %13298 = vst [vmem:[#allocation100_spill] sm:$0xff] %v11514_v24 }
 0x6c8   :  { %v11528_v44 = vpop.permute.xlu0 %3272 }
 0x6c9   :  { %13299 = vst [vmem:[#allocation101_spill] sm:$0xff] %v11528_v44 }
 0x6cc   :  { %v11542_v40 = vpop.permute.xlu0 %3349 }
 0x6cd   :  { %13300 = vst [vmem:[#allocation102_spill] sm:$0xff] %v11542_v40 }
 0x6ef   :  { %v4259_v43 = vpop.permute.xlu1 %4258 }
 0x6f0   :  { %v4264_v7 = vsel %vm465_vm6, %v13295_v34, %v4259_v43  ;;  %v13301_v43 = vld [vmem:[#allocation74_spill] sm:$0xff] }
 0x6f1   :  { %8653 = vmatprep.mubr.msk.f32.mxu0 %vm4281_vm12, %v4264_v7 }
 0x700   :  { %v8584_v21 = vpop.f32.mrf.mxu0 }
 0x701   :  { %v11512_v17 = vadd.f32 %v8584_v21, %v11509_v35 }
 0x702   :  { %v2672_v5 = vpop.f32.mrf.mxu0 }
 0x703   :  { %v7994_v59 = vmul.f32 -1.442695, %v11512_v17  ;;  %v11518_v41 = vadd.f32 %v11509_v35, %v2672_v5 }
 0x704   :  { %v8587_v31 = vpop.f32.mrf.mxu0 }
 0x705   :  { %9188 = vpow2.f32 %v7994_v59  ;;  %v7993_v28 = vmul.f32 -1.442695, %v11518_v41  ;;  %v11522_v58 = vadd.f32 %v8587_v31, %v11509_v35 }
 0x706   :  { %v2682_v29 = vpop.f32.mrf.mxu0 }
 0x707   :  { %9190 = vpow2.f32 %v7993_v28  ;;  %v7996_v0 = vmul.f32 -1.442695, %v11522_v58  ;;  %v11526_v27 = vadd.f32 %v11509_v35, %v2682_v29 }
 0x708   :  { %v8590_v13 = vpop.f32.mrf.mxu0 }
 0x709   :  { %9192 = vpow2.f32 %v7996_v0  ;;  %v7995_v54 = vmul.f32 -1.442695, %v11526_v27  ;;  %v11532_v8 = vadd.f32 %v8590_v13, %v11509_v35 }
 0x70a   :  { %v2692_v32 = vpop.f32.mrf.mxu0 }
 0x70b   :  { %9194 = vpow2.f32 %v7995_v54  ;;  %v7998_v57 = vmul.f32 -1.442695, %v11532_v8  ;;  %v11536_v14 = vadd.f32 %v11509_v35, %v2692_v32 }
 0x70c   :  { %v8593_v16 = vpop.f32.mrf.mxu0 }
 0x70d   :  { %9196 = vpow2.f32 %v7998_v57  ;;  %v7997_v26 = vmul.f32 -1.442695, %v11536_v14  ;;  %v11540_v23 = vadd.f32 %v8593_v16, %v11509_v35 }
 0x70e   :  { %v2702_v2 = vpop.f32.mrf.mxu0 }
 0x70f   :  { %9198 = vpow2.f32 %v7997_v26  ;;  %v8000_v9 = vmul.f32 -1.442695, %v11540_v23  ;;  %v11546_v39 = vadd.f32 %v11509_v35, %v2702_v2 }
 0x711   :  { %9200 = vpow2.f32 %v8000_v9  ;;  %v7999_v25 = vmul.f32 -1.442695, %v11546_v39  ;;  %v8596_v11 = vpop.f32.mrf.mxu0 }
 0x712   :  { %v9189_v10 = vpop.eup %9188  ;;  %v4261_v60 = vpop.permute.xlu0 %4260  ;;  %v11550_v18 = vadd.f32 %v8596_v11, %v11509_v35 }
 0x713   :  { %v2928_v4 = vadd.f32 1.0, %v9189_v10  ;;  %9202 = vpow2.f32 %v7999_v25  ;;  %v4265_v7 = vsel %vm465_vm6, %v13301_v43, %v4261_v60  ;;  %v2712_v21 = vpop.f32.mrf.mxu0 }
 0x714   :  { %v9191_v37 = vpop.eup %9190  ;;  %8654 = vmatmul.mubr.msk.f32.vlgmr.msra.gmra.mxu0 %vm4281_vm12, %v4265_v7  ;;  %v8002_v59 = vmul.f32 -1.442695, %v11550_v18  ;;  %v11557_v31 = vadd.f32 %v11509_v35, %v2712_v21 }
 0x715   :  { %9204 = vrcp.f32 %v2928_v4  ;;  %v2927_v5 = vadd.f32 1.0, %v9191_v37  ;;  %v8599_v29 = vpop.f32.mrf.mxu0 }
 0x716   :  { %v9193_v28 = vpop.eup %9192  ;;  %v8001_v13 = vmul.f32 -1.442695, %v11557_v31  ;;  %v11561_v54 = vadd.f32 %v8599_v29, %v11509_v35 }
 0x717   :  { %9206 = vrcp.f32 %v2927_v5  ;;  %v2930_v0 = vadd.f32 1.0, %v9193_v28  ;;  %v2722_v57 = vpop.f32.mrf.mxu0 }
 0x718   :  { %v9195_v32 = vpop.eup %9194  ;;  %9208 = vpow2.f32 %v8002_v59  ;;  %v8004_v26 = vmul.f32 -1.442695, %v11561_v54  ;;  %v11565_v2 = vadd.f32 %v11509_v35, %v2722_v57 }
 0x719   :  { %9210 = vrcp.f32 %v2930_v0  ;;  %v2929_v16 = vadd.f32 1.0, %v9195_v32  ;;  %v8602_v25 = vpop.f32.mrf.mxu0 }
 0x71a   :  { %v9197_v9 = vpop.eup %9196  ;;  %9212 = vpow2.f32 %v8001_v13  ;;  %v8003_v11 = vmul.f32 -1.442695, %v11565_v2  ;;  %v11569_v60 = vadd.f32 %v8602_v25, %v11509_v35 }
 0x71b   :  { %9214 = vrcp.f32 %v2929_v16  ;;  %v2932_v10 = vadd.f32 1.0, %v9197_v9  ;;  %v2732_v37 = vpop.f32.mrf.mxu0 }
 0x71c   :  { %v9199_v4 = vpop.eup %9198  ;;  %9216 = vpow2.f32 %v8004_v26  ;;  %v8006_v21 = vmul.f32 -1.442695, %v11569_v60  ;;  %v11573_v5 = vadd.f32 %v11509_v35, %v2732_v37 }
 0x71d   :  { %9218 = vrcp.f32 %v2932_v10  ;;  %v2931_v7 = vadd.f32 1.0, %v9199_v4  ;;  %v8605_v28 = vpop.f32.mrf.mxu0 }
 0x71e   :  { %v9201_v59 = vpop.eup %9200  ;;  %9220 = vpow2.f32 %v8003_v11  ;;  %v8005_v0 = vmul.f32 -1.442695, %v11573_v5  ;;  %v11577_v13 = vadd.f32 %v8605_v28, %v11509_v35 }
 0x71f   :  { %9222 = vrcp.f32 %v2931_v7  ;;  %v2934_v29 = vadd.f32 1.0, %v9201_v59  ;;  %v2742_v57 = vpop.f32.mrf.mxu0  ;;  %v11588_v7 = vld [vmem:[#allocation25] ss:$0 sm:$0xff] }
 0x720   :  { %v9203_v32 = vpop.eup %9202  ;;  %9224 = vpow2.f32 %v8006_v21  ;;  %v8008_v26 = vmul.f32 -1.442695, %v11577_v13  ;;  %v11581_v9 = vadd.f32 %v11509_v35, %v2742_v57 }
 0x721   :  { %9226 = vrcp.f32 %v2934_v29  ;;  %v2933_v16 = vadd.f32 1.0, %v9203_v32  ;;  %v8608_v10 = vpop.f32.mrf.mxu0 }
 0x722   :  { %v9205_v25 = vpop.eup %9204  ;;  %9228 = vpow2.f32 %v8005_v0  ;;  %v8007_v4 = vmul.f32 -1.442695, %v11581_v9  ;;  %v11586_v37 = vadd.f32 %v8608_v10, %v11509_v35 }
 0x723   :  { %v3024_v11 = vmul.f32 %v9205_v25, %v11512_v17  ;;  %9230 = vrcp.f32 %v2933_v16  ;;  %v2752_v59 = vpop.f32.mrf.mxu0 }
 0x724   :  { %v9207_v21 = vpop.eup %9206  ;;  %9232 = vpow2.f32 %v8008_v26  ;;  %v8010_v0 = vmul.f32 -1.442695, %v11586_v37  ;;  %v11593_v32 = vadd.f32 %v11509_v35, %v2752_v59 }
 0x725   :  { %v9209_v28 = vpop.eup %9208  ;;  %v3023_v29 = vmul.f32 %v9207_v21, %v11518_v41  ;;  %9234 = vpow2.f32 %v8007_v4  ;;  %v3063_v25 = vmul.f32 %v11588_v7, %v3024_v11 }
 0x726   :  { %v9211_v17 = vpop.eup %9210  ;;  %v2936_v57 = vadd.f32 1.0, %v9209_v28  ;;  %v8611_v16 = vpop.f32.mrf.mxu0  ;;  %9236 = vpow2.f32 %v8010_v0  ;;  %v8009_v26 = vmul.f32 -1.442695, %v11593_v32 }
 0x727   :  { %v9213_v10 = vpop.eup %9212  ;;  %v3026_v55 = vmul.f32 %v9211_v17, %v11522_v58  ;;  %v11599_v30 = vadd.f32 %v8611_v16, %v11509_v35  ;;  %v3097_v59 = vsel %vm465_vm6, %v3063_v25, 0.0  ;;  %v3062_v28 = vmul.f32 %v11588_v7, %v3023_v29 }
 0x728   :  { %v9215_v41 = vpop.eup %9214  ;;  %9238 = vrcp.f32 %v2936_v57  ;;  %v2935_v4 = vadd.f32 1.0, %v9213_v10  ;;  %v2762_v21 = vpop.f32.mrf.mxu0  ;;  %3098 = vadd.xlane.f32.xlu0 %v3097_v59 }
 0x729   :  { %v9217_v22 = vpop.eup %9216  ;;  %v3025_v11 = vmul.f32 %v9215_v41, %v11526_v27  ;;  %9240 = vpow2.f32 %v8009_v26  ;;  %v8012_v58 = vmul.f32 -1.442695, %v11599_v30  ;;  %v11606_v0 = vadd.f32 %v11509_v35, %v2762_v21 }
 0x72a   :  { %v9219_v17 = vpop.eup %9218  ;;  %9242 = vrcp.f32 %v2935_v4  ;;  %v2938_v16 = vadd.f32 1.0, %v9217_v22  ;;  %v3094_v57 = vsel %vm465_vm6, %v3062_v28, 0.0  ;;  %v3065_v10 = vmul.f32 %v11588_v7, %v3026_v55 }
 0x72b   :  { %v9221_v25 = vpop.eup %9220  ;;  %v3028_v29 = vmul.f32 %v9219_v17, %v11532_v8  ;;  %9244 = vpow2.f32 %v8012_v58  ;;  %v8011_v27 = vmul.f32 -1.442695, %v11606_v0  ;;  %3095 = vadd.xlane.f32.xlu1 %v3094_v57  ;;  %v3064_v26 = vmul.f32 %v11588_v7, %v3025_v11 }
 0x72c   :  { %v9223_v41 = vpop.eup %9222  ;;  %9246 = vrcp.f32 %v2938_v16  ;;  %v2937_v21 = vadd.f32 1.0, %v9221_v25  ;;  %v3103_v8 = vsel %vm465_vm6, %v3065_v10, 0.0 }
 0x72d   :  { %v9225_v59 = vpop.eup %9224  ;;  %v3027_v4 = vmul.f32 %v9223_v41, %v11536_v14  ;;  %9248 = vpow2.f32 %v8011_v27  ;;  %v3100_v22 = vsel %vm465_vm6, %v3064_v26, 0.0  ;;  %v3067_v58 = vmul.f32 %v11588_v7, %v3028_v29 }
 0x72e   :  { %v9227_v28 = vpop.eup %9226  ;;  %9250 = vrcp.f32 %v2937_v21  ;;  %v2940_v55 = vadd.f32 1.0, %v9225_v59  ;;  %3101 = vadd.xlane.f32.xlu0 %v3100_v22 }
 0x72f   :  { %v9229_v17 = vpop.eup %9228  ;;  %v3030_v11 = vmul.f32 %v9227_v28, %v11540_v23  ;;  %3104 = vadd.xlane.f32.xlu1 %v3103_v8  ;;  %v3066_v16 = vmul.f32 %v11588_v7, %v3027_v4  ;;  %v3109_v21 = vsel %vm465_vm6, %v3067_v58, 0.0 }
 0x730   :  { %v9231_v57 = vpop.eup %9230  ;;  %9252 = vrcp.f32 %v2940_v55  ;;  %v2939_v14 = vadd.f32 1.0, %v9229_v17 }
 0x731   :  { %v9233_v25 = vpop.eup %9232  ;;  %v3029_v27 = vmul.f32 %v9231_v57, %v11546_v39  ;;  %v3106_v26 = vsel %vm465_vm6, %v3066_v16, 0.0  ;;  %v3069_v29 = vmul.f32 %v11588_v7, %v3030_v11 }
 0x732   :  { %v9235_v41 = vpop.eup %9234  ;;  %9254 = vrcp.f32 %v2939_v14  ;;  %v2942_v10 = vadd.f32 1.0, %v9233_v25  ;;  %3107 = vadd.xlane.f32.xlu0 %v3106_v26 }
 0x733   :  { %v2941_v23 = vadd.f32 1.0, %v9235_v41  ;;  %3110 = vadd.xlane.f32.xlu1 %v3109_v21  ;;  %v3068_v59 = vmul.f32 %v11588_v7, %v3029_v27  ;;  %v9237_v4 = vpop.eup %9236  ;;  %v3115_v11 = vsel %vm465_vm6, %v3069_v29, 0.0 }
 0x734   :  { %9256 = vrcp.f32 %v2942_v10  ;;  %v2944_v28 = vadd.f32 1.0, %v9237_v4 }
 0x735   :  { %v9239_v22 = vpop.eup %9238  ;;  %9258 = vrcp.f32 %v2941_v23  ;;  %v8614_v39 = vpop.f32.mrf.mxu0  ;;  %v3112_v55 = vsel %vm465_vm6, %v3068_v59, 0.0 }
 0x736   :  { %v9241_v8 = vpop.eup %9240  ;;  %v3032_v17 = vmul.f32 %v9239_v22, %v11550_v18  ;;  %v11627_v58 = vadd.f32 %v8614_v39, %v11509_v35  ;;  %3113 = vadd.xlane.f32.xlu0 %v3112_v55  ;;  %9260 = vrcp.f32 %v2944_v28 }
 0x737   :  { %v9243_v16 = vpop.eup %9242  ;;  %v2943_v57 = vadd.f32 1.0, %v9241_v8  ;;  %v2772_v14 = vpop.f32.mrf.mxu0  ;;  %3116 = vadd.xlane.f32.xlu1 %v3115_v11 }
 0x738   :  { %v9245_v25 = vpop.eup %9244  ;;  %v3031_v27 = vmul.f32 %v9243_v16, %v11557_v31  ;;  %v8014_v26 = vmul.f32 -1.442695, %v11627_v58  ;;  %v11633_v41 = vadd.f32 %v11509_v35, %v2772_v14  ;;  %v3071_v18 = vmul.f32 %v11588_v7, %v3032_v17 }
 0x739   :  { %v9247_v10 = vpop.eup %9246  ;;  %9262 = vrcp.f32 %v2943_v57  ;;  %v2946_v21 = vadd.f32 1.0, %v9245_v25 }
 0x73a   :  { %v9249_v29 = vpop.eup %9248  ;;  %v3034_v23 = vmul.f32 %v9247_v10, %v11561_v54  ;;  %9264 = vpow2.f32 %v8014_v26  ;;  %v8013_v59 = vmul.f32 -1.442695, %v11633_v41  ;;  %v3121_v4 = vsel %vm465_vm6, %v3071_v18, 0.0 }
 0x73b   :  { %v9251_v22 = vpop.eup %9250  ;;  %9266 = vrcp.f32 %v2946_v21  ;;  %v2945_v31 = vadd.f32 1.0, %v9249_v29  ;;  %3122 = vadd.xlane.f32.xlu1 %v3121_v4  ;;  %v3070_v28 = vmul.f32 %v11588_v7, %v3031_v27  ;;  %v8617_v55 = vpop.f32.mrf.mxu0 }
 0x73c   :  { %v3033_v39 = vmul.f32 %v9251_v22, %v11565_v2  ;;  %9268 = vpow2.f32 %v8013_v59  ;;  %v3073_v8 = vmul.f32 %v11588_v7, %v3034_v23  ;;  %v11643_v54 = vadd.f32 %v8617_v55, %v11509_v35 }
 0x73d   :  { %v9253_v17 = vpop.eup %9252  ;;  %9270 = vrcp.f32 %v2945_v31  ;;  %v3118_v11 = vsel %vm465_vm6, %v3070_v28, 0.0  ;;  %v2782_v57 = vpop.f32.mrf.mxu0 }
 0x73e   :  { %v3036_v16 = vmul.f32 %v9253_v17, %v11569_v60  ;;  %3119 = vadd.xlane.f32.xlu0 %v3118_v11  ;;  %v3127_v14 = vsel %vm465_vm6, %v3073_v8, 0.0  ;;  %v3072_v25 = vmul.f32 %v11588_v7, %v3033_v39  ;;  %v8016_v27 = vmul.f32 -1.442695, %v11643_v54 }
 0x73f   :  { %v9255_v2 = vpop.eup %9254  ;;  %v11651_v26 = vadd.f32 %v11509_v35, %v2782_v57  ;;  %3128 = vadd.xlane.f32.xlu1 %v3127_v14  ;;  %v8620_v10 = vpop.f32.mrf.mxu0 }
 0x740   :  { %v3035_v18 = vmul.f32 %v9255_v2, %v11573_v5  ;;  %v3124_v21 = vsel %vm465_vm6, %v3072_v25, 0.0  ;;  %v3075_v60 = vmul.f32 %v11588_v7, %v3036_v16  ;;  %9272 = vpow2.f32 %v8016_v27 }
 0x741   :  { %v9257_v29 = vpop.eup %9256  ;;  %v8015_v23 = vmul.f32 -1.442695, %v11651_v26  ;;  %v11658_v59 = vadd.f32 %v8620_v10, %v11509_v35  ;;  %v2792_v31 = vpop.f32.mrf.mxu0 }
 0x742   :  { %v9259_v4 = vpop.eup %9258  ;;  %v3038_v22 = vmul.f32 %v9257_v29, %v11577_v13  ;;  %3125 = vadd.xlane.f32.xlu0 %v3124_v21  ;;  %v3133_v28 = vsel %vm465_vm6, %v3075_v60, 0.0  ;;  %v3074_v5 = vmul.f32 %v11588_v7, %v3035_v18  ;;  %v11666_v8 = vadd.f32 %v11509_v35, %v2792_v31 }
 0x743   :  { %v3037_v39 = vmul.f32 %v9259_v4, %v11581_v9  ;;  %9274 = vpow2.f32 %v8015_v23  ;;  %v8018_v55 = vmul.f32 -1.442695, %v11658_v59  ;;  %3134 = vadd.xlane.f32.xlu1 %v3133_v28  ;;  %v9261_v17 = vpop.eup %9260  ;;  %v8623_v11 = vpop.f32.mrf.mxu0 }
 0x744   :  { %v3130_v16 = vsel %vm465_vm6, %v3074_v5, 0.0  ;;  %v3077_v13 = vmul.f32 %v11588_v7, %v3038_v22  ;;  %v3040_v57 = vmul.f32 %v9261_v17, %v11586_v37  ;;  %v8017_v14 = vmul.f32 -1.442695, %v11666_v8 }
 0x745   :  { %9276 = vpow2.f32 %v8018_v55  ;;  %v11673_v9 = vadd.f32 %v8623_v11, %v11509_v35  ;;  %v2802_v2 = vpop.f32.mrf.mxu0  ;;  %v3076_v18 = vmul.f32 %v11588_v7, %v3037_v39 }
 0x746   :  { %v9263_v25 = vpop.eup %9262  ;;  %3131 = vadd.xlane.f32.xlu0 %v3130_v16  ;;  %v3139_v27 = vsel %vm465_vm6, %v3077_v13, 0.0  ;;  %9278 = vpow2.f32 %v8017_v14  ;;  %v11680_v37 = vadd.f32 %v11509_v35, %v2802_v2  ;;  %v3079_v31 = vmul.f32 %v11588_v7, %v3040_v57 }
 0x747   :  { %v9265_v10 = vpop.eup %9264  ;;  %v3039_v21 = vmul.f32 %v9263_v25, %v11593_v32  ;;  %v8020_v60 = vmul.f32 -1.442695, %v11673_v9  ;;  %3140 = vadd.xlane.f32.xlu1 %v3139_v27  ;;  %v8626_v4 = vpop.f32.mrf.mxu0  ;;  %v3136_v22 = vsel %vm465_vm6, %v3076_v18, 0.0 }
 0x748   :  { %v9267_v29 = vpop.eup %9266  ;;  %v2948_v23 = vadd.f32 1.0, %v9265_v10  ;;  %v8019_v32 = vmul.f32 -1.442695, %v11680_v37  ;;  %v11687_v39 = vadd.f32 %v8626_v4, %v11509_v35  ;;  %v3145_v16 = vsel %vm465_vm6, %v3079_v31, 0.0 }
 0x749   :  { %v9269_v28 = vpop.eup %9268  ;;  %v3042_v5 = vmul.f32 %v9267_v29, %v11599_v30  ;;  %9280 = vpow2.f32 %v8020_v60  ;;  %v2812_v11 = vpop.f32.mrf.mxu0  ;;  %v3078_v13 = vmul.f32 %v11588_v7, %v3039_v21 }
 0x74a   :  { %v9271_v55 = vpop.eup %9270  ;;  %9282 = vrcp.f32 %v2948_v23  ;;  %v2947_v17 = vadd.f32 1.0, %v9269_v28  ;;  %3137 = vadd.xlane.f32.xlu0 %v3136_v22  ;;  %v8022_v30 = vmul.f32 -1.442695, %v11687_v39  ;;  %v11694_v14 = vadd.f32 %v11509_v35, %v2812_v11 }
 0x74b   :  { %v3041_v57 = vmul.f32 %v9271_v55, %v11606_v0  ;;  %9284 = vpow2.f32 %v8019_v32  ;;  %3146 = vadd.xlane.f32.xlu1 %v3145_v16  ;;  %v3142_v25 = vsel %vm465_vm6, %v3078_v13, 0.0  ;;  %v3081_v2 = vmul.f32 %v11588_v7, %v3042_v5 }
 0x74c   :  { %9286 = vrcp.f32 %v2947_v17  ;;  %v8021_v27 = vmul.f32 -1.442695, %v11694_v14 }
 0x74d   :  { %9288 = vpow2.f32 %v8022_v30  ;;  %v3080_v18 = vmul.f32 %v11588_v7, %v3041_v57  ;;  %v9273_v10 = vpop.eup %9272  ;;  %v3151_v0 = vsel %vm465_vm6, %v3081_v2, 0.0 }
 0x74e   :  { %3143 = vadd.xlane.f32.xlu0 %v3142_v25  ;;  %v2950_v21 = vadd.f32 1.0, %v9273_v10  ;;  %9290 = vpow2.f32 %v8021_v27 }
 0x74f   :  { %3152 = vadd.xlane.f32.xlu1 %v3151_v0  ;;  %v3148_v60 = vsel %vm465_vm6, %v3080_v18, 0.0  ;;  %v8629_v23 = vpop.f32.mrf.mxu0 }
 0x750   :  { %v9275_v29 = vpop.eup %9274  ;;  %9292 = vrcp.f32 %v2950_v21  ;;  %v11703_v22 = vadd.f32 %v8629_v23, %v11509_v35 }
 0x751   :  { %v2949_v4 = vadd.f32 1.0, %v9275_v29  ;;  %v2822_v28 = vpop.f32.mrf.mxu0 }
 0x752   :  { %v9277_v31 = vpop.eup %9276  ;;  %3149 = vadd.xlane.f32.xlu0 %v3148_v60  ;;  %v8024_v32 = vmul.f32 -1.442695, %v11703_v22  ;;  %v11707_v55 = vadd.f32 %v11509_v35, %v2822_v28 }
 0x753   :  { %9294 = vrcp.f32 %v2949_v4  ;;  %v2952_v5 = vadd.f32 1.0, %v9277_v31  ;;  %v9279_v17 = vpop.eup %9278 }
 0x754   :  { %v2951_v11 = vadd.f32 1.0, %v9279_v17  ;;  %v8023_v16 = vmul.f32 -1.442695, %v11707_v55 }
 0x755   :  { %9296 = vrcp.f32 %v2952_v5 }
 0x756   :  { %v9281_v13 = vpop.eup %9280  ;;  %9298 = vpow2.f32 %v8024_v32 }
 0x757   :  { %v9283_v57 = vpop.eup %9282  ;;  %9300 = vrcp.f32 %v2951_v11  ;;  %v2954_v30 = vadd.f32 1.0, %v9281_v13 }
 0x758   :  { %v9285_v25 = vpop.eup %9284  ;;  %v3044_v2 = vmul.f32 %v9283_v57, %v11627_v58  ;;  %9302 = vpow2.f32 %v8023_v16 }
 0x759   :  { %v9287_v27 = vpop.eup %9286  ;;  %9304 = vrcp.f32 %v2954_v30  ;;  %v2953_v18 = vadd.f32 1.0, %v9285_v25 }
 0x75a   :  { %v9289_v10 = vpop.eup %9288  ;;  %v3043_v35 = vmul.f32 %v9287_v27, %v11633_v41  ;;  %v3083_v0 = vmul.f32 %v11588_v7, %v3044_v2 }
 0x75b   :  { %9306 = vrcp.f32 %v2953_v18  ;;  %v2956_v21 = vadd.f32 1.0, %v9289_v10  ;;  %v9291_v60 = vpop.eup %9290 }
 0x75c   :  { %v3157_v29 = vsel %vm465_vm6, %v3083_v0, 0.0  ;;  %v3082_v23 = vmul.f32 %v11588_v7, %v3043_v35  ;;  %v2955_v4 = vadd.f32 1.0, %v9291_v60 }
 0x75d   :  { %9308 = vrcp.f32 %v2956_v21  ;;  %3158 = vadd.xlane.f32.xlu1 %v3157_v29  ;;  %v9293_v58 = vpop.eup %9292 }
 0x75e   :  { %v3154_v31 = vsel %vm465_vm6, %v3082_v23, 0.0  ;;  %v3046_v28 = vmul.f32 %v9293_v58, %v11643_v54  ;;  %9310 = vrcp.f32 %v2955_v4 }
 0x75f   :  { %3155 = vadd.xlane.f32.xlu0 %v3154_v31 }
 0x760   :  { %v9295_v41 = vpop.eup %9294  ;;  %v3085_v32 = vmul.f32 %v11588_v7, %v3046_v28 }
 0x761   :  { %v3045_v5 = vmul.f32 %v9295_v41, %v11651_v26 }
 0x762   :  { %v9297_v17 = vpop.eup %9296  ;;  %v3163_v13 = vsel %vm465_vm6, %v3085_v32, 0.0 }
 0x763   :  { %v9299_v11 = vpop.eup %9298  ;;  %v3048_v16 = vmul.f32 %v9297_v17, %v11658_v59  ;;  %v3084_v57 = vmul.f32 %v11588_v7, %v3045_v5  ;;  %3164 = vadd.xlane.f32.xlu1 %v3163_v13 }
 0x764   :  { %v9301_v30 = vpop.eup %9300  ;;  %v2958_v25 = vadd.f32 1.0, %v9299_v11 }
 0x765   :  { %v9303_v2 = vpop.eup %9302  ;;  %v3047_v54 = vmul.f32 %v9301_v30, %v11666_v8  ;;  %v3160_v27 = vsel %vm465_vm6, %v3084_v57, 0.0  ;;  %v3087_v26 = vmul.f32 %v11588_v7, %v3048_v16 }
 0x766   :  { %v9305_v18 = vpop.eup %9304  ;;  %9312 = vrcp.f32 %v2958_v25  ;;  %v2957_v10 = vadd.f32 1.0, %v9303_v2  ;;  %3161 = vadd.xlane.f32.xlu0 %v3160_v27  ;;  %v11745_v25 = vpop.permute.xlu1 %3353 }
 0x767   :  { %v3050_v59 = vmul.f32 %v9305_v18, %v11673_v9  ;;  %v3169_v35 = vsel %vm465_vm6, %v3087_v26, 0.0  ;;  %v3086_v0 = vmul.f32 %v11588_v7, %v3047_v54  ;;  %13302 = vst [vmem:[#allocation74_spill] sm:$0xff] %v11745_v25  ;;  %v11748_v54 = vpop.permute.xlu0 %3283 }
 0x768   :  { %v9307_v21 = vpop.eup %9306  ;;  %9314 = vrcp.f32 %v2957_v10  ;;  %3170 = vadd.xlane.f32.xlu1 %v3169_v35  ;;  %13303 = vst [vmem:[#allocation103_spill] sm:$0xff] %v11748_v54 }
 0x769   :  { %v3049_v60 = vmul.f32 %v9307_v21, %v11680_v37  ;;  %v3166_v8 = vsel %vm465_vm6, %v3086_v0, 0.0  ;;  %v3089_v29 = vmul.f32 %v11588_v7, %v3050_v59 }
 0x76a   :  { %v9309_v23 = vpop.eup %9308  ;;  %3167 = vadd.xlane.f32.xlu0 %v3166_v8  ;;  %v11750_v27 = vpop.permute.xlu1 %3287 }
 0x76b   :  { %v3052_v4 = vmul.f32 %v9309_v23, %v11687_v39  ;;  %v3175_v58 = vsel %vm465_vm6, %v3089_v29, 0.0  ;;  %v3088_v9 = vmul.f32 %v11588_v7, %v3049_v60  ;;  %v9311_v31 = vpop.eup %9310  ;;  %13304 = vst [vmem:[#allocation104_spill] sm:$0xff] %v11750_v27 }
 0x76c   :  { %3176 = vadd.xlane.f32.xlu1 %v3175_v58  ;;  %v3051_v28 = vmul.f32 %v9311_v31, %v11694_v14 }
 0x76d   :  { %v3172_v41 = vsel %vm465_vm6, %v3088_v9, 0.0  ;;  %v3091_v37 = vmul.f32 %v11588_v7, %v3052_v4 }
 0x76e   :  { %3173 = vadd.xlane.f32.xlu0 %v3172_v41  ;;  %v3090_v32 = vmul.f32 %v11588_v7, %v3051_v28  ;;  %v11754_v26 = vpop.permute.xlu1 %3364 }
 0x76f   :  { %v3181_v5 = vsel %vm465_vm6, %v3091_v37, 0.0  ;;  %13306 = vst [vmem:[#allocation106_spill] sm:$0xff] %v11754_v26 }
 0x770   :  { %3182 = vadd.xlane.f32.xlu1 %v3181_v5  ;;  %v3178_v39 = vsel %vm465_vm6, %v3090_v32, 0.0 }
 0x772   :  { %3179 = vadd.xlane.f32.xlu0 %v3178_v39  ;;  %v11758_v18 = vpop.permute.xlu1 %3298 }
 0x773   :  { %v9313_v17 = vpop.eup %9312  ;;  %13308 = vst [vmem:[#allocation108_spill] sm:$0xff] %v11758_v18 }
 0x774   :  { %v3054_v11 = vmul.f32 %v9313_v17, %v11703_v22  ;;  %v11752_v22 = vpop.permute.xlu0 %3360 }
 0x775   :  { %v9315_v16 = vpop.eup %9314  ;;  %13305 = vst [vmem:[#allocation105_spill] sm:$0xff] %v11752_v22 }
 0x776   :  { %v3053_v13 = vmul.f32 %v9315_v16, %v11707_v55  ;;  %v3093_v14 = vmul.f32 %v11588_v7, %v3054_v11 }
 0x778   :  { %v3187_v57 = vsel %vm465_vm6, %v3093_v14, 0.0  ;;  %v3092_v30 = vmul.f32 %v11588_v7, %v3053_v13  ;;  %v11756_v55 = vpop.permute.xlu0 %3294  ;;  %v11762_v7 = vpop.permute.xlu1 %3375 }
 0x779   :  { %3188 = vadd.xlane.f32.xlu1 %v3187_v57  ;;  %13307 = vst [vmem:[#allocation107_spill] sm:$0xff] %v11756_v55  ;;  %13310 = vst [vmem:[#allocation110_spill] sm:$0xff] %v11762_v7 }
 0x77a   :  { %v3184_v2 = vsel %vm465_vm6, %v3092_v30, 0.0 }
 0x77b   :  { %3185 = vadd.xlane.f32.xlu0 %v3184_v2 }
 0x77c   :  { %v11760_v10 = vpop.permute.xlu0 %3371  ;;  %v11766_v35 = vpop.permute.xlu1 %3309 }
 0x77d   :  { %13309 = vst [vmem:[#allocation109_spill] sm:$0xff] %v11760_v10  ;;  %13312 = vst [vmem:[#allocation112_spill] sm:$0xff] %v11766_v35 }
 0x780   :  { %v11764_v59 = vpop.permute.xlu0 %3305  ;;  %v11770_v21 = vpop.permute.xlu1 %3386 }
 0x781   :  { %13311 = vst [vmem:[#allocation111_spill] sm:$0xff] %v11764_v59  ;;  %13314 = vst [vmem:[#allocation114_spill] sm:$0xff] %v11770_v21 }
 0x784   :  { %v11768_v0 = vpop.permute.xlu0 %3382  ;;  %v11774_v8 = vpop.permute.xlu1 %3320 }
 0x785   :  { %13313 = vst [vmem:[#allocation113_spill] sm:$0xff] %v11768_v0  ;;  %13316 = vst [vmem:[#allocation116_spill] sm:$0xff] %v11774_v8 }
 0x788   :  { %v11772_v60 = vpop.permute.xlu0 %3316  ;;  %v11778_v23 = vpop.permute.xlu1 %3397 }
 0x789   :  { %13315 = vst [vmem:[#allocation115_spill] sm:$0xff] %v11772_v60  ;;  %13318 = vst [vmem:[#allocation118_spill] sm:$0xff] %v11778_v23 }
 0x78c   :  { %v11776_v29 = vpop.permute.xlu0 %3393  ;;  %v11782_v58 = vpop.permute.xlu1 %3408 }
 0x78d   :  { %13317 = vst [vmem:[#allocation117_spill] sm:$0xff] %v11776_v29  ;;  %13320 = vst [vmem:[#allocation120_spill] sm:$0xff] %v11782_v58 }
 0x790   :  { %v11780_v4 = vpop.permute.xlu0 %3404 }
 0x791   :  { %13319 = vst [vmem:[#allocation119_spill] sm:$0xff] %v11780_v4 }
 0x7b1   :  { %v3099_v9 = vpop.xlane.xlu0 %3098 }
 0x7b2   :  { %v3201_v31 = vadd.f32 %v11496_v20, %v3099_v9 }
 0x7b4   :  { %v3096_v28 = vpop.xlane.xlu1 %3095  ;;  %v3443_v41 = vmul.f32 %v11486_v3, %v3201_v31 }
 0x7b5   :  { %v3200_v37 = vadd.f32 %v11496_v20, %v3096_v28 }
 0x7b6   :  { %3510 = vperm.xlu1 %8923, %v3443_v41  }
 0x7b7   :  { %v3442_v5 = vmul.f32 %v11484_v63, %v3200_v37  ;;  %v3102_v32 = vpop.xlane.xlu0 %3101 }
 0x7b8   :  { %v3202_v39 = vadd.f32 %v11496_v20, %v3102_v32  ;;  %v3105_v17 = vpop.xlane.xlu1 %3104 }
 0x7b9   :  { %v3203_v11 = vadd.f32 %v11496_v20, %v3105_v17  ;;  %3507 = vperm.xlu0 %8922, %v3442_v5  }
 0x7ba   :  { %v3444_v16 = vmul.f32 %v11500_v61, %v3202_v39 }
 0x7bb   :  { %v3445_v13 = vmul.f32 %v11488_v36, %v3203_v11  ;;  %v3108_v14 = vpop.xlane.xlu0 %3107 }
 0x7bc   :  { %v3204_v57 = vadd.f32 %v11496_v20, %v3108_v14  ;;  %v3111_v30 = vpop.xlane.xlu1 %3110 }
 0x7bd   :  { %v3205_v2 = vadd.f32 %v11496_v20, %v3111_v30  ;;  %3513 = vperm.xlu0 %8922, %v3444_v16   ;;  %3516 = vperm.xlu1 %8923, %v3445_v13  }
 0x7be   :  { %v3446_v9 = vmul.f32 %v11505_v52, %v3204_v57 }
 0x7bf   :  { %v3447_v31 = vmul.f32 %v11490_v19, %v3205_v2  ;;  %v3114_v28 = vpop.xlane.xlu0 %3113 }
 0x7c0   :  { %v3206_v41 = vadd.f32 %v11496_v20, %v3114_v28  ;;  %v3117_v37 = vpop.xlane.xlu1 %3116 }
 0x7c1   :  { %v3207_v5 = vadd.f32 %v11496_v20, %v3117_v37  ;;  %3519 = vperm.xlu0 %8922, %v3446_v9   ;;  %3522 = vperm.xlu1 %8923, %v3447_v31  }
 0x7c2   :  { %v3448_v32 = vmul.f32 %v11528_v44, %v3206_v41 }
 0x7c3   :  { %v3449_v39 = vmul.f32 %v11498_v45, %v3207_v5 }
 0x7c4   :  { %v3123_v17 = vpop.xlane.xlu1 %3122 }
 0x7c5   :  { %v3209_v11 = vadd.f32 %v11496_v20, %v3123_v17  ;;  %3525 = vperm.xlu0 %8922, %v3448_v32   ;;  %3528 = vperm.xlu1 %8923, %v3449_v39  }
 0x7c7   :  { %v3120_v16 = vpop.xlane.xlu0 %3119  ;;  %v3451_v13 = vmul.f32 %v11750_v27, %v3209_v11 }
 0x7c8   :  { %v3208_v14 = vadd.f32 %v11496_v20, %v3120_v16  ;;  %v3129_v57 = vpop.xlane.xlu1 %3128 }
 0x7c9   :  { %v3211_v30 = vadd.f32 %v11496_v20, %v3129_v57  ;;  %3534 = vperm.xlu1 %8923, %v3451_v13  }
 0x7ca   :  { %v3450_v2 = vmul.f32 %v11748_v54, %v3208_v14 }
 0x7cb   :  { %v3126_v9 = vpop.xlane.xlu0 %3125  ;;  %v3453_v31 = vmul.f32 %v11758_v18, %v3211_v30 }
 0x7cc   :  { %v3210_v28 = vadd.f32 %v11496_v20, %v3126_v9  ;;  %3531 = vperm.xlu0 %8922, %v3450_v2   ;;  %v3135_v41 = vpop.xlane.xlu1 %3134 }
 0x7cd   :  { %v3213_v37 = vadd.f32 %v11496_v20, %v3135_v41  ;;  %3540 = vperm.xlu1 %8923, %v3453_v31  }
 0x7ce   :  { %v3452_v5 = vmul.f32 %v11756_v55, %v3210_v28 }
 0x7cf   :  { %v3132_v32 = vpop.xlane.xlu0 %3131  ;;  %v3455_v39 = vmul.f32 %v11766_v35, %v3213_v37 }
 0x7d0   :  { %v3212_v17 = vadd.f32 %v11496_v20, %v3132_v32  ;;  %3537 = vperm.xlu0 %8922, %v3452_v5   ;;  %v3141_v11 = vpop.xlane.xlu1 %3140 }
 0x7d1   :  { %v3215_v16 = vadd.f32 %v11496_v20, %v3141_v11  ;;  %3546 = vperm.xlu1 %8923, %v3455_v39  }
 0x7d2   :  { %v3454_v13 = vmul.f32 %v11764_v59, %v3212_v17 }
 0x7d3   :  { %v3138_v14 = vpop.xlane.xlu0 %3137  ;;  %v3457_v57 = vmul.f32 %v11774_v8, %v3215_v16 }
 0x7d4   :  { %v3214_v30 = vadd.f32 %v11496_v20, %v3138_v14  ;;  %3543 = vperm.xlu0 %8922, %v3454_v13   ;;  %v3147_v2 = vpop.xlane.xlu1 %3146 }
 0x7d5   :  { %v3217_v9 = vadd.f32 %v11496_v20, %v3147_v2  ;;  %3552 = vperm.xlu1 %8923, %v3457_v57  }
 0x7d6   :  { %v3456_v31 = vmul.f32 %v11772_v60, %v3214_v30 }
 0x7d7   :  { %v3144_v28 = vpop.xlane.xlu0 %3143  ;;  %v3459_v41 = vmul.f32 %v11492_v49, %v3217_v9 }
 0x7d8   :  { %v3216_v37 = vadd.f32 %v11496_v20, %v3144_v28  ;;  %3549 = vperm.xlu0 %8922, %v3456_v31   ;;  %v3153_v5 = vpop.xlane.xlu1 %3152 }
 0x7d9   :  { %v3219_v32 = vadd.f32 %v11496_v20, %v3153_v5  ;;  %3558 = vperm.xlu1 %8923, %v3459_v41  }
 0x7da   :  { %v3458_v39 = vmul.f32 %v11507_v6, %v3216_v37 }
 0x7db   :  { %v3150_v17 = vpop.xlane.xlu0 %3149  ;;  %v3461_v11 = vmul.f32 %v11494_v15, %v3219_v32 }
 0x7dc   :  { %v3218_v16 = vadd.f32 %v11496_v20, %v3150_v17  ;;  %3555 = vperm.xlu0 %8922, %v3458_v39  }
 0x7dd   :  { %3564 = vperm.xlu1 %8923, %v3461_v11  }
 0x7de   :  { %v3460_v13 = vmul.f32 %v11514_v24, %v3218_v16 }
 0x7e0   :  { %3561 = vperm.xlu0 %8922, %v3460_v13  }
 0x7e6   :  { %v3159_v14 = vpop.xlane.xlu1 %3158 }
 0x7e7   :  { %v3221_v57 = vadd.f32 %v11496_v20, %v3159_v14 }
 0x7e8   :  { %v3156_v30 = vpop.xlane.xlu0 %3155 }
 0x7e9   :  { %v3220_v2 = vadd.f32 %v11496_v20, %v3156_v30  ;;  %v3463_v9 = vmul.f32 %v11745_v25, %v3221_v57 }
 0x7eb   :  { %v3462_v31 = vmul.f32 %v11542_v40, %v3220_v2  ;;  %3570 = vperm.xlu1 %8923, %v3463_v9  }
 0x7ec   :  { %v3165_v28 = vpop.xlane.xlu1 %3164 }
 0x7ed   :  { %3567 = vperm.xlu0 %8922, %v3462_v31   ;;  %v3223_v41 = vadd.f32 %v11496_v20, %v3165_v28 }
 0x7ef   :  { %v3162_v37 = vpop.xlane.xlu0 %3161  ;;  %v3465_v32 = vmul.f32 %v11754_v26, %v3223_v41 }
 0x7f0   :  { %v3222_v5 = vadd.f32 %v11496_v20, %v3162_v37 }
 0x7f1   :  { %v3171_v39 = vpop.xlane.xlu1 %3170  ;;  %3576 = vperm.xlu1 %8923, %v3465_v32  }
 0x7f2   :  { %v3464_v17 = vmul.f32 %v11752_v22, %v3222_v5  ;;  %v3225_v11 = vadd.f32 %v11496_v20, %v3171_v39 }
 0x7f3   :  { %v3168_v16 = vpop.xlane.xlu0 %3167 }
 0x7f4   :  { %v3224_v13 = vadd.f32 %v11496_v20, %v3168_v16  ;;  %v3467_v14 = vmul.f32 %v11762_v7, %v3225_v11  ;;  %3573 = vperm.xlu0 %8922, %v3464_v17  }
 0x7f5   :  { %v3177_v57 = vpop.xlane.xlu1 %3176 }
 0x7f6   :  { %v3466_v30 = vmul.f32 %v11760_v10, %v3224_v13  ;;  %v3227_v2 = vadd.f32 %v11496_v20, %v3177_v57  ;;  %3582 = vperm.xlu1 %8923, %v3467_v14  }
 0x7f7   :  { %v3174_v9 = vpop.xlane.xlu0 %3173 }
 0x7f8   :  { %v3226_v31 = vadd.f32 %v11496_v20, %v3174_v9  ;;  %v3469_v28 = vmul.f32 %v11770_v21, %v3227_v2  ;;  %3579 = vperm.xlu0 %8922, %v3466_v30   ;;  %v11849_v9 = vld [vmem:[%s10261_s9 + $0x18] sm:$0xff] }
 0x7f9   :  { %v3183_v41 = vpop.xlane.xlu1 %3182  ;;  %8656 = vmatprep.subr.mxu1 %v11849_v9 }
 0x7fa   :  { %v3468_v37 = vmul.f32 %v11768_v0, %v3226_v31  ;;  %v3229_v5 = vadd.f32 %v11496_v20, %v3183_v41  ;;  %3588 = vperm.xlu1 %8923, %v3469_v28  }
 0x7fb   :  { %v3180_v32 = vpop.xlane.xlu0 %3179 }
 0x7fc   :  { %v3228_v39 = vadd.f32 %v11496_v20, %v3180_v32  ;;  %v3471_v17 = vmul.f32 %v11778_v23, %v3229_v5  ;;  %3585 = vperm.xlu0 %8922, %v3468_v37  }
 0x7fe   :  { %v3470_v11 = vmul.f32 %v11776_v29, %v3228_v39  ;;  %3594 = vperm.xlu1 %8923, %v3471_v17   ;;  %v13321_v39 = vlaneseq }
 0x800   :  { %3591 = vperm.xlu0 %8922, %v3470_v11   ;;  %v3603_v17 = vand.u32 127, %v13321_v39 }
 0x802   :  { %v3189_v16 = vpop.xlane.xlu1 %3188 }
 0x803   :  { %v3231_v13 = vadd.f32 %v11496_v20, %v3189_v16  ;;  %v3608_v16 = vadd.s32 4294967288, %v3603_v17 }
 0x804   :  { %v3186_v14 = vpop.xlane.xlu0 %3185 }
 0x805   :  { %v3230_v57 = vadd.f32 %v11496_v20, %v3186_v14  ;;  %v3473_v30 = vmul.f32 %v11782_v58, %v3231_v13 }
 0x807   :  { %v3472_v2 = vmul.f32 %v11780_v4, %v3230_v57  ;;  %3600 = vperm.xlu1 %8923, %v3473_v30   ;;  %v13322_v57 = vld [vmem:[#allocation64_spill] sm:$0xff] }
 0x808   :  { %v11854_v30 = vsub.s32 %v3603_v17, %v13322_v57 }
 0x809   :  { %3597 = vperm.xlu0 %8922, %v3472_v2   ;;  %v11857_v2 = vsub.s32 %v3608_v16, %v13322_v57 }
 0x80a   :  { %13323 = vst [vmem:[#allocation64_spill] sm:$0xff] %v11854_v30 }
 0x80b   :  { %13324 = vst [vmem:[#allocation121_spill] sm:$0xff] %v11857_v2 }
 0x831   :  { %v3511_v31 = vpop.permute.xlu1 %3510 }
 0x834   :  { %v3508_v28 = vpop.permute.xlu0 %3507 }
 0x835   :  { %v3607_v21 = vrot.slane %v3508_v28, %v11854_v30 }
 0x838   :  { %v3514_v41 = vpop.permute.xlu0 %3513  ;;  %v3517_v37 = vpop.permute.xlu1 %3516 }
 0x839   :  { %v3618_v58 = vrot.slane %v3514_v41, %v11854_v30  ;;  %v3622_v29 = vrot.slane %v3517_v37, %v11857_v2  ;;  %v3612_v41 = vrot.slane %v3511_v31, %v11857_v2 }
 0x83b   :  { %v3623_v37 = vsel %vm3613_vm13, %v3622_v29, %v3618_v58 }
 0x83c   :  { %v3520_v5 = vpop.permute.xlu0 %3519  ;;  %v3523_v32 = vpop.permute.xlu1 %3522 }
 0x83d   :  { %v3627_v23 = vrot.slane %v3520_v5, %v11854_v30  ;;  %v3631_v39 = vrot.slane %v3523_v32, %v11857_v2 }
 0x83f   :  { %v3632_v28 = vsel %vm3613_vm13, %v3631_v39, %v3627_v23  ;;  %v8655_v39 = vpop.f32.mrf.mxu0 }
 0x840   :  { %v3529_v11 = vpop.permute.xlu1 %3528  ;;  %v3526_v20 = vpop.permute.xlu0 %3525 }
 0x841   :  { %v3636_v10 = vrot.slane %v3526_v20, %v11854_v30  ;;  %v3640_v17 = vrot.slane %v3529_v11, %v11857_v2  ;;  %v3614_v11 = vsel %vm3613_vm13, %v3612_v41, %v3607_v21 }
 0x842   :  { %v3751_v31 = vsel %vm3750_vm2, %v3623_v37, %v3614_v11  ;;  %v4354_v37 = vpop.f32.mrf.mxu0 }
 0x843   :  { %v3641_v26 = vsel %vm3613_vm13, %v3640_v17, %v3636_v10 }
 0x844   :  { %v3535_v13 = vpop.permute.xlu1 %3534 }
 0x845   :  { %v3649_v57 = vrot.slane %v3535_v13, %v11857_v2 }
 0x847   :  { %v3532_v14 = vpop.permute.xlu0 %3531 }
 0x848   :  { %v3541_v4 = vpop.permute.xlu1 %3540  ;;  %v3645_v16 = vrot.slane %v3532_v14, %v11854_v30 }
 0x849   :  { %v3658_v32 = vrot.slane %v3541_v4, %v11857_v2 }
 0x84a   :  { %v3650_v29 = vsel %vm3613_vm13, %v3649_v57, %v3645_v16 }
 0x84b   :  { %v3538_v0 = vpop.permute.xlu0 %3537 }
 0x84c   :  { %v3547_v7 = vpop.permute.xlu1 %3546  ;;  %v3654_v5 = vrot.slane %v3538_v0, %v11854_v30  ;;  %v3753_v0 = vsel %vm3752_vm4, %v3632_v28, %v3751_v31 }
 0x84d   :  { %v3667_v20 = vrot.slane %v3547_v7, %v11857_v2  ;;  %v3755_v7 = vsel %vm3754_vm5, %v3641_v26, %v3753_v0 }
 0x84e   :  { %v3659_v4 = vsel %vm3613_vm13, %v3658_v32, %v3654_v5  ;;  %v3757_v10 = vsel %vm3756_vm7, %v3650_v29, %v3755_v7  ;;  %v8029_v5 = vld [vmem:[%s13325_s0] ss:$0 sm:$0xff] }
 0x84f   :  { %v3544_v22 = vpop.permute.xlu0 %3543  ;;  %v3759_v17 = vsel %vm3758_vm9, %v3659_v4, %v3757_v10  ;;  %v4355_v28 = vadd.f32 %v8029_v5, %v4354_v37 }
 0x850   :  { %v3663_v14 = vrot.slane %v3544_v22, %v11854_v30  ;;  %v3553_v13 = vpop.permute.xlu1 %3552 }
 0x851   :  { %v3676_v23 = vrot.slane %v3553_v13, %v11857_v2  ;;  %v8032_v11 = vmul.f32 -1.442695, %v4355_v28  ;;  %v11893_v13 = vadd.f32 %v8655_v39, %v8029_v5 }
 0x852   :  { %v3668_v21 = vsel %vm3613_vm13, %v3667_v20, %v3663_v14 }
 0x853   :  { %v3550_v58 = vpop.permute.xlu0 %3549  ;;  %v3761_v57 = vsel %vm3760_vm10, %v3668_v21, %v3759_v17  ;;  %9316 = vpow2.f32 %v8032_v11  ;;  %v8033_v29 = vmul.f32 -1.442695, %v11893_v13 }
 0x854   :  { %v3672_v22 = vrot.slane %v3550_v58, %v11854_v30  ;;  %v3559_v32 = vpop.permute.xlu1 %3558 }
 0x855   :  { %9318 = vpow2.f32 %v8033_v29  ;;  %v3685_v40 = vrot.slane %v3559_v32, %v11857_v2 }
 0x856   :  { %v3677_v16 = vsel %vm3613_vm13, %v3676_v23, %v3672_v22 }
 0x857   :  { %v3763_v41 = vsel %vm3762_vm11, %v3677_v16, %v3761_v57  ;;  %v3556_v20 = vpop.permute.xlu0 %3555 }
 0x858   :  { %8634 = vmatprep.mubr.msk.f32.mxu1 %vm1039_vm8, %v3763_v41  ;;  %v3773_v26 = vsel %vm1039_vm8, %v3763_v41, 0.0  ;;  %v3565_v14 = vpop.permute.xlu1 %3564  ;;  %v3681_v29 = vrot.slane %v3556_v20, %v11854_v30 }
 0x859   :  { %3774 = vadd.xlane.f32.xlu1 %v3773_v26  ;;  %v3694_v26 = vrot.slane %v3565_v14, %v11857_v2 }
 0x85b   :  { %v3562_v31 = vpop.permute.xlu0 %3561 }
 0x85c   :  { %v3690_v39 = vrot.slane %v3562_v31, %v11854_v30 }
 0x85e   :  { %v3695_v14 = vsel %vm3613_vm13, %v3694_v26, %v3690_v39 }
 0x860   :  { %v9317_v21 = vpop.eup %9316 }
 0x861   :  { %v4369_v22 = vadd.f32 1.0, %v9317_v21 }
 0x862   :  { %v9319_v57 = vpop.eup %9318 }
 0x863   :  { %9320 = vrcp.f32 %v4369_v22  ;;  %v4370_v41 = vadd.f32 1.0, %v9319_v57 }
 0x865   :  { %9322 = vrcp.f32 %v4370_v41 }
 0x866   :  { %v3571_v0 = vpop.permute.xlu1 %3570 }
 0x867   :  { %v3703_v5 = vrot.slane %v3571_v0, %v11857_v2 }
 0x868   :  { %v3568_v4 = vpop.permute.xlu0 %3567 }
 0x869   :  { %v3699_v37 = vrot.slane %v3568_v4, %v11854_v30 }
 0x86b   :  { %v3704_v20 = vsel %vm3613_vm13, %v3703_v5, %v3699_v37 }
 0x86c   :  { %v3577_v23 = vpop.permute.xlu1 %3576 }
 0x86d   :  { %v3712_v25 = vrot.slane %v3577_v23, %v11857_v2  ;;  %v3686_v23 = vsel %vm3613_vm13, %v3685_v40, %v3681_v29 }
 0x86f   :  { %v3574_v7 = vpop.permute.xlu0 %3573 }
 0x870   :  { %v3708_v21 = vrot.slane %v3574_v7, %v11854_v30  ;;  %v9321_v37 = vpop.eup %9320 }
 0x871   :  { %v3583_v58 = vpop.permute.xlu1 %3582 }
 0x872   :  { %v3721_v31 = vrot.slane %v3583_v58, %v11857_v2  ;;  %v3713_v57 = vsel %vm3613_vm13, %v3712_v25, %v3708_v21 }
 0x873   :  { %v3580_v10 = vpop.permute.xlu0 %3579 }
 0x874   :  { %v3717_v22 = vrot.slane %v3580_v10, %v11854_v30  ;;  %v3764_v10 = vsel %vm3750_vm2, %v3695_v14, %v3686_v23  ;;  %v4379_v14 = vld [vmem:[%s10261_s9 + $0x10] sm:$0xff] }
 0x875   :  { %v3589_v17 = vpop.permute.xlu1 %3588  ;;  %v4608_v23 = vld [vmem:[%s13326_s27 + $0x10] sm:$0xff] }
 0x876   :  { %v3730_v0 = vrot.slane %v3589_v17, %v11857_v2  ;;  %v3722_v58 = vsel %vm3613_vm13, %v3721_v31, %v3717_v22  ;;  %v4375_v22 = vmul.f32 %v9321_v37, %v4355_v28  ;;  %v4377_v28 = vld [vmem:[%s10261_s9] sm:$0xff] }
 0x877   :  { %v3586_v16 = vpop.permute.xlu0 %3585 }
 0x878   :  { %v3726_v4 = vrot.slane %v3586_v16, %v11854_v30  ;;  %v3765_v16 = vsel %vm3752_vm4, %v3704_v20, %v3764_v10  ;;  %v9323_v20 = vpop.eup %9322  ;;  %v4606_v10 = vld [vmem:[%s13326_s27] sm:$0xff] }
 0x879   :  { %v3595_v11 = vpop.permute.xlu1 %3594 }
 0x87a   :  { %v3739_v7 = vrot.slane %v3595_v11, %v11857_v2  ;;  %v3731_v17 = vsel %vm3613_vm13, %v3730_v0, %v3726_v4  ;;  %v4378_v0 = vld [vmem:[%s10261_s9 + $0x8] sm:$0xff]  ;;  %s13327_s9 = sld [smem:[#allocation57_spill]] }
 0x87b   :  { %v3592_v24 = vpop.permute.xlu0 %3591 }
 0x87c   :  { %v3735_v32 = vrot.slane %v3592_v24, %v11854_v30  ;;  %v3766_v24 = vsel %vm3754_vm5, %v3713_v57, %v3765_v16  ;;  %v4607_v57 = vld [vmem:[%s13326_s27 + $0x8] sm:$0xff] }
 0x87d   :  { %v3767_v25 = vsel %vm3756_vm7, %v3722_v58, %v3766_v24 }
 0x87e   :  { %v3740_v26 = vsel %vm3613_vm13, %v3739_v7, %v3735_v32  ;;  %v3768_v11 = vsel %vm3758_vm9, %v3731_v17, %v3767_v25  ;;  %v4376_v32 = vmul.f32 %v9323_v20, %v11893_v13  ;;  %v4609_v7 = vld [vmem:[%s13326_s27 + $0x18] sm:$0xff]  ;;  %v8036_v20 = vld [vmem:[%s13328_s5] ss:$0 sm:$0xff] }
 0x87f   :  { %v3769_v29 = vsel %vm3760_vm10, %v3740_v26, %v3768_v11 }
 0x882   :  { %v3601_v41 = vpop.permute.xlu1 %3600 }
 0x883   :  { %v3748_v39 = vrot.slane %v3601_v41, %v11857_v2  ;;  %v9725_v41 = vld [vmem:[%s13235_s3 + $0x8] sm:$0xff] }
 0x884   :  { %v3598_v40 = vpop.permute.xlu0 %3597 }
 0x885   :  { %v3744_v5 = vrot.slane %v3598_v40, %v11854_v30 }
 0x887   :  { %v3749_v21 = vsel %vm3613_vm13, %v3748_v39, %v3744_v5  ;;  %v9726_v39 = vld [vmem:[%s13235_s3] sm:$0xff] }
 0x888   :  { %v3770_v31 = vsel %vm3762_vm11, %v3749_v21, %v3769_v29 }
 0x889   :  { %8635 = vmatmul.mubr.msk.f32.vlgmr.msra.gmra.mxu1 %vm1039_vm8, %v3770_v31  ;;  %v3776_v4 = vsel %vm1039_vm8, %v3770_v31, 0.0 }
 0x88a   :  { %8657 = vmatpush3.msra.mxu1 %v11849_v9  ;;  %8664 = vmatprep.mubr.msk.f32.mxu1 %vm465_vm6, %v4375_v22  ;;  %v9724_v9 = vld [vmem:[%s13236_s28] sm:$0xff] }
 0x88b   :  { %8658 = vmatprep.subr.mxu1 %v4379_v14  ;;  %3777 = vadd.xlane.f32.xlu0 %v3776_v4 }
 0x88c   :  { %8659 = vmatpush3.msra.mxu1 %v4379_v14 }
 0x88d   :  { %8660 = vmatprep.subr.mxu1 %v4378_v0 }
 0x88e   :  { %8661 = vmatpush3.msra.mxu1 %v4378_v0  ;;  %v5422_v0 = vld [vmem:[%s13327_s9 + $0x18] sm:$0xff] }
 0x88f   :  { %8662 = vmatprep.subr.mxu1 %v4377_v28 }
 0x890   :  { %8663 = vmatpush3.msra.mxu1 %v4377_v28 }
 0x891   :  { %8665 = vmatmul.mubr.msk.f32.vlgmr.msra.gmra.mxu1 %vm465_vm6, %v4376_v32  ;;  %8674 = vmatprep.subr.mxu1 %v4609_v7 }
 0x892   :  { %8675 = vmatpush3.msra.mxu1 %v4609_v7 }
 0x893   :  { %8676 = vmatprep.subr.mxu1 %v4608_v23 }
 0x894   :  { %8677 = vmatpush3.msra.mxu1 %v4608_v23  ;;  %v5421_v23 = vld [vmem:[%s13327_s9 + $0x10] sm:$0xff] }
 0x895   :  { %8678 = vmatprep.subr.mxu1 %v4607_v57 }
 0x896   :  { %8679 = vmatpush3.msra.mxu1 %v4607_v57  ;;  %v5420_v57 = vld [vmem:[%s13327_s9 + $0x8] sm:$0xff] }
 0x897   :  { %8680 = vmatprep.subr.mxu1 %v4606_v10 }
 0x898   :  { %8681 = vmatpush3.msra.mxu1 %v4606_v10  ;;  %v5419_v10 = vld [vmem:[%s13327_s9] sm:$0xff] }
 0x8a1   :  { %3864 = vperm.xlu0 %8922, %v9724_v9  }
 0x8e2   :  { %v3775_v58 = vpop.xlane.xlu1 %3774 }
 0x8e3   :  { %v3779_v24 = vmul.f32 %v9726_v39, %v3775_v58 }
 0x914   :  { %v3778_v13 = vpop.xlane.xlu0 %3777 }
 0x915   :  { %v3780_v16 = vmul.f32 %v9725_v41, %v3778_v13 }
 0x91c   :  { %v11943_v5 = vpop.permute.xlu0 %3864 }
 0x91d   :  { %13329 = vst [vmem:[#allocation122_spill] sm:$0xff] %v11943_v5 }
 0x949   :  { %v8636_v17 = vpop.f32.mrf.mxu1 }
 0x94a   :  { %v3861_v26 = vsub.f32 %v3780_v16, %v8636_v17 }
 0x94b   :  { %v3851_v40 = vpop.f32.mrf.mxu1 }
 0x94c   :  { %v3873_v37 = vmul.f32 0.0, %v3861_v26  ;;  %v3860_v25 = vsub.f32 %v3779_v24, %v3851_v40  ;;  %v13339_v26 = vld [vmem:[#allocation65_spill] sm:$0xff] }
 0x94e   :  { %v11945_v11 = vadd.f32 %v9725_v41, %v3873_v37  ;;  %v3872_v29 = vmul.f32 %v11943_v5, %v3860_v25 }
 0x950   :  { %13330 = vst [vmem:[#allocation123_spill] sm:$0xff] %v11945_v11  ;;  %v11948_v21 = vadd.f32 %v9726_v39, %v3872_v29  ;;  %8667 = vmatprep.subr.msk.mxu0 %vm13332_vm14, %v11945_v11  ;;  %vm13337_vm14 = vmmov %vm13334_vm0  ;;  %v4474_v9 = vmul.f32 %v11945_v11, %v11945_v11 }
 0x951   :  { %v8666_v22 = vpop.f32.mrf.mxu1  ;;  %8668 = vmatpush3.xpose.msk.msra.mxu0 %vm13333_vm15, %v11945_v11  ;;  %vm13338_vm15 = vmmov %vm13334_vm0 }
 0x952   :  { %13331 = vst [vmem:[#allocation124_spill] sm:$0xff] %v11948_v21  ;;  %8669 = vmatprep.subr.msk.mxu0 %vm13334_vm0, %v11948_v21  ;;  %8671 = vmatprep.mubr.msk.f32.mxu0 %vm13335_vm1, %v11948_v21  ;;  %v4473_v31 = vmul.f32 %v11948_v21, %v11948_v21  ;;  %v4463_v14 = vadd.f32 %v8666_v22, %v13301_v43 }
 0x953   :  { %v4453_v4 = vpop.f32.mrf.mxu1 }
 0x954   :  { %v4462_v28 = vadd.f32 %v4453_v4, %v13295_v34  ;;  %v4475_v32 = vsel %vm13336_vm3, %v4473_v31, 0.0  ;;  %v11971_v43 = vadd.f32 %v8036_v20, %v4463_v14  ;;  %v4478_v34 = vsel %vm13334_vm0, %v4474_v9, 0.0  ;;  %v13341_v9 = vld [vmem:[#allocation68_spill] sm:$0xff] }
 0x955   :  { %8670 = vmatpush3.xpose.msk.msra.mxu0 %vm13337_vm14, %v11948_v21  ;;  %4476 = vadd.xlane.f32.xlu1 %v4475_v32 }
 0x956   :  { %v11969_v7 = vadd.f32 %v8036_v20, %v4462_v28  ;;  %8685 = vmatprep.subr.mxu0 %v5422_v0  ;;  %v13340_v20 = vld [vmem:[#allocation71_spill] sm:$0xff] }
 0x958   :  { %8682 = vmatprep.mubr.msk.f32.mxu1 %vm465_vm6, %v11969_v7  ;;  %8672 = vmatmul.mubr.msk.f32.vlgmr.msra.gmra.mxu0 %vm13338_vm15, %v11945_v11 }
 0x959   :  { %8683 = vmatmul.mubr.msk.f32.vlgmr.msra.gmra.mxu1 %vm465_vm6, %v11971_v43  ;;  %8686 = vmatpush3.msra.mxu0 %v5422_v0 }
 0x95a   :  { %4479 = vadd.xlane.f32.xlu1 %v4478_v34  ;;  %8687 = vmatprep.subr.mxu0 %v5421_v23  ;;  %v13342_v34 = vld [vmem:[#allocation66_spill] sm:$0xff] }
 0x95b   :  { %8688 = vmatpush3.msra.mxu0 %v5421_v23 }
 0x95c   :  { %8689 = vmatprep.subr.mxu0 %v5420_v57 }
 0x95d   :  { %8690 = vmatpush3.msra.mxu0 %v5420_v57 }
 0x95e   :  { %8691 = vmatprep.subr.mxu0 %v5419_v10 }
 0x95f   :  { %8692 = vmatpush3.msra.mxu0 %v5419_v10 }
 0x960   :  { %8797 = vmatprep.subr.mxu0 %v11945_v11 }
 0x9de   :  { %v4477_v13 = vpop.xlane.xlu1 %4476 }
 0x9df   :  { %4562 = vxpose.xlu1.b32.start [1/2] (short) (narrow) %v4477_v13, 8 }
 0x9e3   :  { %v4480_v58 = vpop.xlane.xlu1 %4479 }
 0x9e4   :  { %4563 = vxpose.xlu1.b32.end [2/2] (short) (narrow) %v4480_v58, 8 }
 0xa18   :  { %v8673_v17 = vpop.f32.mrf.mxu0 }
 0xa19   :  { %v11984_v41 = vpop.f32.mrf.mxu1  ;;  %v4601_v37 = vmul.f32 2.0, %v8673_v17  ;;  %v13344_v17 = vld [vmem:[#allocation70_spill] sm:$0xff] }
 0xa1a   :  { %4873 = vrot.lane.b32.xlu0 %v11984_v41, %s10091_s1  ;;  %v4553_v39 = vpop.f32.mrf.mxu0 }
 0xa1b   :  { %v11988_v16 = vpop.f32.mrf.mxu1  ;;  %v4600_v25 = vmul.f32 2.0, %v4553_v39 }
 0xa1e   :  { %4871 = vrot.lane.b32.xlu0 %v11988_v16, %s10091_s1 }
 0xa5c   :  { %v4578_v24 = vpop.trf.xlu1 }
 0xa5d   :  { %v4597_v40 = vrot.slane %v4578_v24, %v13339_v26 }
 0xa5f   :  { %v4598_v29 = vadd.f32 %v4597_v40, %v4477_v13  ;;  %v4599_v22 = vadd.f32 %v4597_v40, %v4480_v58  ;;  %v13343_v13 = vld [vmem:[#allocation69_spill] sm:$0xff] }
 0xa61   :  { %v4602_v31 = vsub.f32 %v4598_v29, %v4600_v25  ;;  %v4603_v14 = vsub.f32 %v4599_v22, %v4601_v37  ;;  %v13345_v37 = vld [vmem:[#allocation72_spill] sm:$0xff]  ;;  %v13346_v22 = vld [vmem:[#allocation67_spill] sm:$0xff] }
 0xa63   :  { %v4604_v4 = vmax.f32 %v4602_v31, 0.0  ;;  %v4605_v0 = vmax.f32 %v4603_v14, 0.0 }
 0xa65   :  { %v4967_v28 = vrot.slane %v4604_v4, %v13340_v20  ;;  %v4912_v32 = vrot.slane %v4604_v4, %v13339_v26  ;;  %v5011_v23 = vrot.slane %v4605_v0, %v13341_v9  ;;  %v5022_v57 = vrot.slane %v4605_v0, %v13342_v34 }
 0xa66   :  { %v4923_v10 = vrot.slane %v4604_v4, %v13341_v9  ;;  %v5033_v58 = vrot.slane %v4605_v0, %v13343_v13  ;;  %v5044_v39 = vrot.slane %v4605_v0, %v13344_v17  ;;  %v4934_v24 = vrot.slane %v4604_v4, %v13342_v34  ;;  %v13349_v34 = vld [vmem:[#allocation75_spill] sm:$0xff] }
 0xa67   :  { %4973 = vbcast.lane.b32.xlu1 %v4967_v28, 264  ;;  %4914 = vbcast.lane.b32.xlu0 %v4912_v32, 256  ;;  %v5055_v40 = vrot.slane %v4605_v0, %v13340_v20  ;;  %v5066_v25 = vrot.slane %v4605_v0, %v13345_v37  ;;  %v4945_v29 = vrot.slane %v4604_v4, %v13343_v13 }
 0xa68   :  { %v5077_v31 = vrot.slane %v4605_v0, %v13346_v22  ;;  %v4956_v14 = vrot.slane %v4604_v4, %v13344_v17  ;;  %v4989_v20 = vrot.slane %v4604_v4, %v13346_v22  ;;  %v5000_v9 = vrot.slane %v4605_v0, %v13339_v26  ;;  %v12017_v0 = vld [vmem:[%s13347_s22] ss:$0 sm:$0xff] }
 0xa6b   :  { %5017 = vbcast.lane.b32.xlu1 %v5011_v23, 264  ;;  %4918 = vbcast.lane.b32.xlu0 %v4912_v32, 264  ;;  %v4978_v32 = vrot.slane %v4604_v4, %v13345_v37  ;;  %v4700_v4 = vrot.slane %v11988_v16, %v13349_v34 }
 0xa6f   :  { %5028 = vbcast.lane.b32.xlu1 %v5022_v57, 264  ;;  %4925 = vbcast.lane.b32.xlu0 %v4923_v10, 256 }
 0xa73   :  { %5039 = vbcast.lane.b32.xlu1 %v5033_v58, 264  ;;  %4929 = vbcast.lane.b32.xlu0 %v4923_v10, 264  ;;  %v4716_v10 = vrot.slane %v4700_v4, %v13349_v34 }
 0xa77   :  { %5050 = vbcast.lane.b32.xlu1 %v5044_v39, 264  ;;  %4936 = vbcast.lane.b32.xlu0 %v4934_v24, 256 }
 0xa7b   :  { %5061 = vbcast.lane.b32.xlu1 %v5055_v40, 264  ;;  %4940 = vbcast.lane.b32.xlu0 %v4934_v24, 264  ;;  %v12023_v24 = vld [vmem:[%s13348_s30] ss:$0 sm:$0xff] }
 0xa7f   :  { %5072 = vbcast.lane.b32.xlu1 %v5066_v25, 264  ;;  %4947 = vbcast.lane.b32.xlu0 %v4945_v29, 256 }
 0xa83   :  { %5083 = vbcast.lane.b32.xlu1 %v5077_v31, 264  ;;  %4951 = vbcast.lane.b32.xlu0 %v4945_v29, 264 }
 0xa87   :  { %4958 = vbcast.lane.b32.xlu0 %v4956_v14, 256 }
 0xa8b   :  { %4962 = vbcast.lane.b32.xlu0 %v4956_v14, 264 }
 0xa8f   :  { %4969 = vbcast.lane.b32.xlu0 %v4967_v28, 256  ;;  %v12009_v28 = vpop.permute.xlu0 %4873 }
 0xa93   :  { %4980 = vbcast.lane.b32.xlu0 %v4978_v32, 256  ;;  %v12014_v13 = vpop.permute.xlu0 %4871 }
 0xa97   :  { %4984 = vbcast.lane.b32.xlu0 %v4978_v32, 264 }
 0xa9b   :  { %4991 = vbcast.lane.b32.xlu0 %v4989_v20, 256 }
 0xa9f   :  { %4995 = vbcast.lane.b32.xlu0 %v4989_v20, 264 }
 0xaa3   :  { %5002 = vbcast.lane.b32.xlu0 %v5000_v9, 256 }
 0xaa7   :  { %5006 = vbcast.lane.b32.xlu0 %v5000_v9, 264 }
 0xaab   :  { %5013 = vbcast.lane.b32.xlu0 %v5011_v23, 256  ;;  %v4794_v23 = vrot.slane %v4716_v10, %v13339_v26 }
 0xaad   :  { %v4878_v22 = vadd.f32 %v12009_v28, %v4794_v23 }
 0xaaf   :  { %5024 = vbcast.lane.b32.xlu0 %v5022_v57, 256  ;;  %v4708_v57 = vcombine.high %v4700_v4, %v4700_v4 }
 0xab1   :  { %v4730_v37 = vrot.slane %v4708_v57, %v13349_v34 }
 0xab3   :  { %5035 = vbcast.lane.b32.xlu0 %v5033_v58, 256  ;;  %v4877_v58 = vadd.f32 %v12014_v13, %v4794_v23  ;;  %v4798_v20 = vrot.slane %v4730_v37, %v13339_v26 }
 0xab5   :  { %v4879_v57 = vadd.f32 %v12014_v13, %v4798_v20 }
 0xab7   :  { %5046 = vbcast.lane.b32.xlu0 %v5044_v39, 256 }
 0xabb   :  { %5057 = vbcast.lane.b32.xlu0 %v5055_v40, 256 }
 0xabf   :  { %5068 = vbcast.lane.b32.xlu0 %v5066_v25, 256 }
 0xac3   :  { %5079 = vbcast.lane.b32.xlu0 %v5077_v31, 256 }
 0xad9   :  { %v4915_v17 = vpop.permute.xlu0 %4914 }
 0xada   :  { %v5092_v39 = vmul.f32 %v12017_v0, %v4915_v17 }
 0xadc   :  { %v5124_v40 = vadd.f32 %v5092_v39, %v4877_v58  ;;  %v4693_v58 = vcombine.high %v11988_v16, %v11988_v16  ;;  %v4738_v39 = vcombine.high %v4716_v10, %v4716_v10 }
 0xadd   :  { %v4919_v25 = vpop.permute.xlu0 %4918 }
 0xade   :  { %v12027_v29 = vadd.f32 %v12023_v24, %v5124_v40  ;;  %v5093_v31 = vmul.f32 %v12017_v0, %v4919_v25  ;;  %v4802_v16 = vrot.slane %v4738_v39, %v13339_v26 }
 0xae0   :  { %v8045_v14 = vmul.f32 -1.442695, %v12027_v29  ;;  %v5125_v32 = vadd.f32 %v5093_v31, %v4878_v22  ;;  %v4880_v22 = vadd.f32 %v12009_v28, %v4798_v20  ;;  %v4881_v20 = vadd.f32 %v12014_v13, %v4802_v16 }
 0xae1   :  { %v4926_v9 = vpop.permute.xlu0 %4925 }
 0xae2   :  { %v12034_v4 = vadd.f32 %v12023_v24, %v5125_v32  ;;  %9324 = vpow2.f32 %v8045_v14  ;;  %v5094_v17 = vmul.f32 %v12017_v0, %v4926_v9  ;;  %v4707_v14 = vrot.slane %v4693_v58, %v13349_v34 }
 0xae4   :  { %v8046_v23 = vmul.f32 -1.442695, %v12034_v4  ;;  %v5126_v40 = vadd.f32 %v5094_v17, %v4879_v57  ;;  %v4709_v17 = vcombine.high %v4707_v14, %v4707_v14 }
 0xae5   :  { %v4930_v25 = vpop.permute.xlu0 %4929 }
 0xae6   :  { %v5095_v31 = vmul.f32 %v12017_v0, %v4930_v25  ;;  %9326 = vpow2.f32 %v8046_v23  ;;  %v12044_v32 = vadd.f32 %v12023_v24, %v5126_v40  ;;  %v4740_v40 = vcombine.high %v4730_v37, %v4730_v37 }
 0xae8   :  { %v5127_v5 = vadd.f32 %v5095_v31, %v4880_v22  ;;  %v8047_v9 = vmul.f32 -1.442695, %v12044_v32  ;;  %v4882_v22 = vadd.f32 %v12009_v28, %v4802_v16  ;;  %v4806_v37 = vrot.slane %v4740_v40, %v13339_v26 }
 0xae9   :  { %v4937_v2 = vpop.permute.xlu0 %4936 }
 0xaea   :  { %v12050_v10 = vadd.f32 %v12023_v24, %v5127_v5  ;;  %9328 = vpow2.f32 %v8047_v9  ;;  %v5096_v57 = vmul.f32 %v12017_v0, %v4937_v2  ;;  %v12061_v9 = vrot.slane %v4709_v17, %v13349_v34  ;;  %v4974_v2 = vpop.permute.xlu1 %4973 }
 0xaeb   :  { %v4723_v17 = vrot.slane %v4707_v14, %v13349_v34  ;;  %v4884_v49 = vadd.f32 %v12009_v28, %v4806_v37 }
 0xaec   :  { %v8048_v23 = vmul.f32 -1.442695, %v12050_v10  ;;  %v5128_v25 = vadd.f32 %v5096_v57, %v4881_v20  ;;  %v4883_v57 = vadd.f32 %v12014_v13, %v4806_v37 }
 0xaed   :  { %v4941_v58 = vpop.permute.xlu0 %4940  ;;  %v4739_v55 = vcombine.high %v4723_v17, %v4723_v17 }
 0xaee   :  { %v5097_v31 = vmul.f32 %v12017_v0, %v4941_v58  ;;  %9330 = vpow2.f32 %v8048_v23  ;;  %v12058_v39 = vadd.f32 %v12023_v24, %v5128_v25  ;;  %v4814_v58 = vrot.slane %v12061_v9, %v13339_v26 }
 0xaef   :  { %v9325_v5 = vpop.eup %9324 }
 0xaf0   :  { %v5129_v30 = vadd.f32 %v5097_v31, %v4882_v22  ;;  %v5291_v15 = vadd.f32 1.0, %v9325_v5  ;;  %v8049_v6 = vmul.f32 -1.442695, %v12058_v39  ;;  %v5103_v22 = vmul.f32 %v12017_v0, %v4974_v2 }
 0xaf1   :  { %v4948_v20 = vpop.permute.xlu0 %4947 }
 0xaf2   :  { %v12066_v16 = vadd.f32 %v12023_v24, %v5129_v30  ;;  %9332 = vrcp.f32 %v5291_v15  ;;  %v5098_v23 = vmul.f32 %v12017_v0, %v4948_v20  ;;  %v4888_v15 = vadd.f32 %v12009_v28, %v4814_v58 }
 0xaf3   :  { %v9327_v25 = vpop.eup %9326  ;;  %9334 = vpow2.f32 %v8049_v6 }
 0xaf4   :  { %v5292_v31 = vadd.f32 1.0, %v9327_v25  ;;  %v8050_v40 = vmul.f32 -1.442695, %v12066_v16  ;;  %v5130_v5 = vadd.f32 %v5098_v23, %v4883_v57  ;;  %v5135_v8 = vadd.f32 %v5103_v22, %v4888_v15 }
 0xaf5   :  { %v4952_v30 = vpop.permute.xlu0 %4951  ;;  %v4810_v57 = vrot.slane %v4723_v17, %v13339_v26 }
 0xaf6   :  { %v5099_v20 = vmul.f32 %v12017_v0, %v4952_v30  ;;  %9336 = vrcp.f32 %v5292_v31  ;;  %v12079_v14 = vadd.f32 %v12023_v24, %v5130_v5  ;;  %v4749_v31 = vrot.slane %v11984_v41, %v13349_v34 }
 0xaf7   :  { %v9329_v60 = vpop.eup %9328  ;;  %9338 = vpow2.f32 %v8050_v40  ;;  %v4885_v5 = vadd.f32 %v12014_v13, %v4810_v57 }
 0xaf8   :  { %v5131_v59 = vadd.f32 %v5099_v20, %v4884_v49  ;;  %v5293_v2 = vadd.f32 1.0, %v9329_v60  ;;  %v8051_v6 = vmul.f32 -1.442695, %v12079_v14  ;;  %v12091_v49 = vadd.f32 %v12023_v24, %v5135_v8 }
 0xaf9   :  { %v4959_v23 = vpop.permute.xlu0 %4958 }
 0xafa   :  { %v12084_v25 = vadd.f32 %v12023_v24, %v5131_v59  ;;  %v5100_v37 = vmul.f32 %v12017_v0, %v4959_v23  ;;  %9340 = vrcp.f32 %v5293_v2  ;;  %v4886_v59 = vadd.f32 %v12009_v28, %v4810_v57  ;;  %v5018_v57 = vpop.permute.xlu1 %5017 }
 0xafb   :  { %v9331_v22 = vpop.eup %9330  ;;  %9342 = vpow2.f32 %v8051_v6  ;;  %v4757_v23 = vcombine.high %v4749_v31, %v4749_v31  ;;  %v8056_v8 = vmul.f32 -1.442695, %v12091_v49 }
 0xafc   :  { %v5294_v60 = vadd.f32 1.0, %v9331_v22  ;;  %v8052_v40 = vmul.f32 -1.442695, %v12084_v25  ;;  %v5132_v30 = vadd.f32 %v5100_v37, %v4885_v5 }
 0xafd   :  { %v4963_v15 = vpop.permute.xlu0 %4962  ;;  %v12108_v17 = vrot.slane %v4757_v23, %v13349_v34 }
 0xafe   :  { %v5101_v20 = vmul.f32 %v12017_v0, %v4963_v15  ;;  %9344 = vrcp.f32 %v5294_v60  ;;  %v12097_v2 = vadd.f32 %v12023_v24, %v5132_v30  ;;  %v4887_v60 = vadd.f32 %v12014_v13, %v4814_v58 }
 0xaff   :  { %v9333_v35 = vpop.eup %9332  ;;  %9346 = vpow2.f32 %v8052_v40 }
 0xb00   :  { %v5133_v18 = vadd.f32 %v5101_v20, %v4886_v59  ;;  %v8053_v6 = vmul.f32 -1.442695, %v12097_v2  ;;  %v5387_v37 = vmul.f32 %v9333_v35, %v12027_v29  ;;  %v9335_v5 = vpop.eup %9334  ;;  %v4818_v59 = vrot.slane %v4739_v55, %v13339_v26 }
 0xb01   :  { %v4970_v22 = vpop.permute.xlu0 %4969  ;;  %v5295_v54 = vadd.f32 1.0, %v9335_v5  ;;  %v12126_v55 = vrot.slane %v12108_v17, %v13339_v26  ;;  %v5111_v5 = vmul.f32 %v12017_v0, %v5018_v57 }
 0xb02   :  { %v12103_v15 = vadd.f32 %v12023_v24, %v5133_v18  ;;  %v5102_v30 = vmul.f32 %v12017_v0, %v4970_v22  ;;  %9348 = vpow2.f32 %v8053_v6  ;;  %8693 = vmatprep.mubr.msk.f32.mxu0 %vm465_vm6, %v5387_v37  ;;  %v4889_v6 = vadd.f32 %v12014_v13, %v4818_v59 }
 0xb03   :  { %v9337_v40 = vpop.eup %9336  ;;  %9350 = vpow2.f32 %v8056_v8  ;;  %v4742_v8 = vcombine.high %v11984_v41, %v11984_v41  ;;  %v12122_v37 = vrot.slane %v4749_v31, %v13349_v34  ;;  %v4741_v41 = vcombine.high %v12061_v9, %v12061_v9 }
 0xb04   :  { %v8054_v35 = vmul.f32 -1.442695, %v12103_v15  ;;  %v5134_v29 = vadd.f32 %v5102_v30, %v4887_v60  ;;  %v5388_v18 = vmul.f32 %v9337_v40, %v12034_v4  ;;  %9352 = vrcp.f32 %v5295_v54  ;;  %v9339_v20 = vpop.eup %9338  ;;  %v5029_v60 = vpop.permute.xlu1 %5028 }
 0xb05   :  { %v4981_v58 = vpop.permute.xlu0 %4980  ;;  %v5296_v54 = vadd.f32 1.0, %v9339_v20  ;;  %v4896_v31 = vadd.f32 %v12009_v28, %v12126_v55  ;;  %v12145_v20 = vrot.slane %v4742_v8, %v13349_v34 }
 0xb06   :  { %9354 = vpow2.f32 %v8054_v35  ;;  %v12115_v23 = vadd.f32 %v12023_v24, %v5134_v29  ;;  %v5104_v22 = vmul.f32 %v12017_v0, %v4981_v58  ;;  %8694 = vmatmul.mubr.msk.f32.vlgmr.msra.gmra.mxu0 %vm465_vm6, %v5388_v18  ;;  %v4890_v58 = vadd.f32 %v12009_v28, %v4818_v59 }
 0xb07   :  { %v9341_v4 = vpop.eup %9340  ;;  %8798 = vmatpush3.msra.mxu0 %v11945_v11  ;;  %9356 = vrcp.f32 %v5296_v54  ;;  %v5143_v54 = vadd.f32 %v5111_v5, %v4896_v31  ;;  %v12160_v5 = vrot.slane %v12145_v20, %v13349_v34 }
 0xb08   :  { %v8055_v30 = vmul.f32 -1.442695, %v12115_v23  ;;  %v5136_v40 = vadd.f32 %v5104_v22, %v4889_v6  ;;  %8799 = vmatprep.subr.mxu0 %v11948_v21  ;;  %v5389_v29 = vmul.f32 %v9341_v4, %v12044_v32  ;;  %v9343_v18 = vpop.eup %9342  ;;  %v4787_v6 = vcombine.high %v12122_v37, %v12122_v37  ;;  %v5040_v8 = vpop.permute.xlu1 %5039 }
 0xb09   :  { %v4985_v35 = vpop.permute.xlu0 %4984  ;;  %8800 = vmatpush3.msra.mxu0 %v11948_v21  ;;  %v5297_v22 = vadd.f32 1.0, %v9343_v18  ;;  %v5115_v52 = vmul.f32 %v12017_v0, %v5040_v8 }
 0xb0a   :  { %9358 = vpow2.f32 %v8055_v30  ;;  %v12139_v57 = vadd.f32 %v12023_v24, %v5136_v40  ;;  %v5105_v9 = vmul.f32 %v12017_v0, %v4985_v35  ;;  %8696 = vmatprep.mubr.msk.f32.mxu0 %vm465_vm6, %v5389_v29  ;;  %v4822_v40 = vrot.slane %v4741_v41, %v13339_v26 }
 0xb0b   :  { %v9345_v32 = vpop.eup %9344  ;;  %9360 = vrcp.f32 %v5297_v22 }
 0xb0c   :  { %v8057_v4 = vmul.f32 -1.442695, %v12139_v57  ;;  %v5137_v30 = vadd.f32 %v5105_v9, %v4890_v58  ;;  %v5390_v35 = vmul.f32 %v9345_v32, %v12050_v10  ;;  %v9347_v21 = vpop.eup %9346  ;;  %v4891_v18 = vadd.f32 %v12014_v13, %v4822_v40 }
 0xb0d   :  { %v4992_v59 = vpop.permute.xlu0 %4991  ;;  %v5298_v31 = vadd.f32 1.0, %v9347_v21  ;;  %v12164_v10 = vadd.f32 %v12023_v24, %v5143_v54  ;;  %v12167_v58 = vrot.slane %v4787_v6, %v13339_v26  ;;  %v4892_v6 = vadd.f32 %v12009_v28, %v4822_v40 }
 0xb0e   :  { %9362 = vpow2.f32 %v8057_v4  ;;  %v12154_v11 = vadd.f32 %v12023_v24, %v5137_v30  ;;  %v5106_v29 = vmul.f32 %v12017_v0, %v4992_v59  ;;  %8697 = vmatmul.mubr.msk.f32.gmra.mxu0 %vm465_vm6, %v5390_v35  ;;  %v5113_v4 = vmul.f32 %v12017_v0, %v5029_v60 }
 0xb0f   :  { %v9349_v41 = vpop.eup %9348  ;;  %v4789_v30 = vcombine.high %v12108_v17, %v12108_v17  ;;  %9364 = vrcp.f32 %v5298_v31  ;;  %v4826_v17 = vrot.slane %v12122_v37, %v13339_v26  ;;  %v5051_v31 = vpop.permute.xlu1 %5050 }
 0xb10   :  { %v8058_v9 = vmul.f32 -1.442695, %v12154_v11  ;;  %v5138_v22 = vadd.f32 %v5106_v29, %v4891_v18  ;;  %v9351_v32 = vpop.eup %9350  ;;  %v5299_v21 = vadd.f32 1.0, %v9349_v41  ;;  %v4898_v18 = vadd.f32 %v12009_v28, %v12167_v58 }
 0xb11   :  { %v4996_v59 = vpop.permute.xlu0 %4995  ;;  %v9353_v35 = vpop.eup %9352  ;;  %v8064_v29 = vmul.f32 -1.442695, %v12164_v10  ;;  %v5302_v40 = vadd.f32 1.0, %v9351_v32  ;;  %v4758_v32 = vcombine.high %v12145_v20, %v12145_v20 }
 0xb12   :  { %9366 = vpow2.f32 %v8058_v9  ;;  %v12174_v54 = vadd.f32 %v12023_v24, %v5138_v22  ;;  %v5107_v27 = vmul.f32 %v12017_v0, %v4996_v59  ;;  %v5391_v60 = vmul.f32 %v9353_v35, %v12058_v39 }
 0xb13   :  { %v9355_v44 = vpop.eup %9354  ;;  %9368 = vrcp.f32 %v5299_v21  ;;  %v5145_v45 = vadd.f32 %v5113_v4, %v4898_v18  ;;  %v12186_v59 = vrot.slane %v4789_v30, %v13339_v26 }
 0xb14   :  { %v5300_v41 = vadd.f32 1.0, %v9355_v44  ;;  %v8059_v9 = vmul.f32 -1.442695, %v12174_v54  ;;  %v5139_v22 = vadd.f32 %v5107_v27, %v4892_v6  ;;  %8699 = vmatprep.mubr.msk.f32.mxu0 %vm465_vm6, %v5391_v60  ;;  %v9357_v21 = vpop.eup %9356  ;;  %v4893_v44 = vadd.f32 %v12014_v13, %v4826_v17 }
 0xb15   :  { %v5003_v39 = vpop.permute.xlu0 %5002  ;;  %v4900_v4 = vadd.f32 %v12009_v28, %v12186_v59  ;;  %v5392_v8 = vmul.f32 %v9357_v21, %v12066_v16  ;;  %v12202_v60 = vadd.f32 %v12023_v24, %v5145_v45  ;;  %v12216_v21 = vrot.slane %v4758_v32, %v13349_v34 }
 0xb16   :  { %9370 = vrcp.f32 %v5300_v41  ;;  %v12191_v37 = vadd.f32 %v12023_v24, %v5139_v22  ;;  %v5108_v35 = vmul.f32 %v12017_v0, %v5003_v39  ;;  %v12206_v22 = vrot.slane %v12160_v5, %v13339_v26  ;;  %v5062_v39 = vpop.permute.xlu1 %5061 }
 0xb17   :  { %v9359_v27 = vpop.eup %9358  ;;  %9372 = vpow2.f32 %v8059_v9  ;;  %v5147_v41 = vadd.f32 %v5115_v52, %v4900_v4  ;;  %8700 = vmatmul.mubr.msk.f32.gmra.mxu0 %vm465_vm6, %v5392_v8  ;;  %v5117_v52 = vmul.f32 %v12017_v0, %v5051_v31  ;;  %v8066_v8 = vmul.f32 -1.442695, %v12202_v60 }
 0xb18   :  { %9374 = vpow2.f32 %v8064_v29  ;;  %v5301_v30 = vadd.f32 1.0, %v9359_v27  ;;  %v8060_v6 = vmul.f32 -1.442695, %v12191_v37  ;;  %v5140_v18 = vadd.f32 %v5108_v35, %v4893_v44  ;;  %v9361_v9 = vpop.eup %9360 }
 0xb19   :  { %9376 = vrcp.f32 %v5302_v40  ;;  %v5007_v20 = vpop.permute.xlu0 %5006  ;;  %v4894_v29 = vadd.f32 %v12009_v28, %v4826_v17  ;;  %v5393_v44 = vmul.f32 %v9361_v9, %v12079_v14  ;;  %v4902_v17 = vadd.f32 %v12009_v28, %v12206_v22 }
 0xb1a   :  { %9378 = vrcp.f32 %v5301_v30  ;;  %v12210_v16 = vadd.f32 %v12023_v24, %v5140_v18  ;;  %v5109_v40 = vmul.f32 %v12017_v0, %v5007_v20  ;;  %v12222_v30 = vadd.f32 %v12023_v24, %v5147_v41 }
 0xb1b   :  { %v9363_v45 = vpop.eup %9362  ;;  %9380 = vpow2.f32 %v8060_v6  ;;  %v4788_v31 = vcombine.high %v12160_v5, %v12160_v5  ;;  %8702 = vmatprep.mubr.msk.f32.mxu0 %vm465_vm6, %v5393_v44  ;;  %v4895_v6 = vadd.f32 %v12014_v13, %v12126_v55  ;;  %v5149_v20 = vadd.f32 %v5117_v52, %v4902_v17 }
 0xb1c   :  { %v5303_v35 = vadd.f32 1.0, %v9363_v45  ;;  %v8061_v27 = vmul.f32 -1.442695, %v12210_v16  ;;  %v5141_v4 = vadd.f32 %v5109_v40, %v4894_v29  ;;  %v9365_v32 = vpop.eup %9364  ;;  %v12237_v9 = vrot.slane %v12216_v21, %v13339_v26  ;;  %v5073_v45 = vpop.permute.xlu1 %5072 }
 0xb1d   :  { %v5014_v34 = vpop.permute.xlu0 %5013  ;;  %v5394_v5 = vmul.f32 %v9365_v32, %v12084_v25  ;;  %v5119_v40 = vmul.f32 %v12017_v0, %v5062_v39  ;;  %v8068_v55 = vmul.f32 -1.442695, %v12222_v30  ;;  %v4897_v39 = vadd.f32 %v12014_v13, %v12167_v58 }
 0xb1e   :  { %9382 = vrcp.f32 %v5303_v35  ;;  %v12230_v14 = vadd.f32 %v12023_v24, %v5141_v4  ;;  %v5110_v18 = vmul.f32 %v12017_v0, %v5014_v34  ;;  %v4904_v52 = vadd.f32 %v12009_v28, %v12237_v9 }
 0xb1f   :  { %v9367_v41 = vpop.eup %9366  ;;  %9384 = vpow2.f32 %v8061_v27  ;;  %8703 = vmatmul.mubr.msk.f32.gmra.mxu0 %vm465_vm6, %v5394_v5  ;;  %v12254_v32 = vadd.f32 %v12023_v24, %v5149_v20  ;;  %v5121_v20 = vmul.f32 %v12017_v0, %v5073_v45 }
 0xb20   :  { %v9369_v29 = vpop.eup %9368  ;;  %v5304_v44 = vadd.f32 1.0, %v9367_v41  ;;  %v8062_v35 = vmul.f32 -1.442695, %v12230_v14  ;;  %v5142_v4 = vadd.f32 %v5110_v18, %v4895_v6  ;;  %9386 = vpow2.f32 %v8066_v8 }
 0xb21   :  { %v5025_v17 = vpop.permute.xlu0 %5024  ;;  %v5395_v27 = vmul.f32 %v9369_v29, %v12097_v2  ;;  %v4790_v6 = vcombine.high %v12216_v21, %v12216_v21  ;;  %v5151_v18 = vadd.f32 %v5119_v40, %v4904_v52  ;;  %v4899_v40 = vadd.f32 %v12014_v13, %v12186_v59 }
 0xb22   :  { %9388 = vrcp.f32 %v5304_v44  ;;  %v12248_v25 = vadd.f32 %v12023_v24, %v5142_v4  ;;  %v5112_v34 = vmul.f32 %v12017_v0, %v5025_v17  ;;  %v12262_v44 = vrot.slane %v4788_v31, %v13339_v26 }
 0xb23   :  { %v9371_v8 = vpop.eup %9370  ;;  %9390 = vpow2.f32 %v8062_v35  ;;  %8705 = vmatprep.mubr.msk.f32.mxu0 %vm465_vm6, %v5395_v27  ;;  %v5084_v35 = vpop.permute.xlu1 %5083  ;;  %v8070_v31 = vmul.f32 -1.442695, %v12254_v32  ;;  %v12276_v52 = vrot.slane %v4790_v6, %v13339_v26  ;;  %v4901_v6 = vadd.f32 %v12014_v13, %v12206_v22 }
 0xb24   :  { %v9373_v2 = vpop.eup %9372  ;;  %v8063_v41 = vmul.f32 -1.442695, %v12248_v25  ;;  %v5144_v5 = vadd.f32 %v5112_v34, %v4897_v39  ;;  %v5396_v29 = vmul.f32 %v9371_v8, %v12103_v15  ;;  %9392 = vpow2.f32 %v8068_v55 }
 0xb25   :  { %v9375_v58 = vpop.eup %9374  ;;  %v5305_v4 = vadd.f32 1.0, %v9373_v2  ;;  %v5036_v17 = vpop.permute.xlu0 %5035  ;;  %v4906_v45 = vadd.f32 %v12009_v28, %v12262_v44  ;;  %v12279_v34 = vadd.f32 %v12023_v24, %v5151_v18 }
 0xb26   :  { %v9377_v21 = vpop.eup %9376  ;;  %9394 = vpow2.f32 %v8063_v41  ;;  %v12266_v27 = vadd.f32 %v12023_v24, %v5144_v5  ;;  %v5114_v15 = vmul.f32 %v12017_v0, %v5036_v17  ;;  %8706 = vmatmul.mubr.msk.f32.gmra.mxu0 %vm465_vm6, %v5396_v29  ;;  %v5123_v29 = vmul.f32 %v12017_v0, %v5084_v35 }
 0xb27   :  { %v9379_v55 = vpop.eup %9378  ;;  %9396 = vrcp.f32 %v5305_v4  ;;  %v5398_v41 = vmul.f32 %v9377_v21, %v12091_v49  ;;  %v5153_v5 = vadd.f32 %v5121_v20, %v4906_v45  ;;  %v4908_v49 = vadd.f32 %v12009_v28, %v12276_v52 }
 0xb28   :  { %v9381_v39 = vpop.eup %9380  ;;  %v8065_v59 = vmul.f32 -1.442695, %v12266_v27  ;;  %v5146_v8 = vadd.f32 %v5114_v15, %v4899_v40  ;;  %v5397_v2 = vmul.f32 %v9379_v55, %v12115_v23  ;;  %v5310_v23 = vadd.f32 1.0, %v9375_v58 }
 0xb29   :  { %v5306_v17 = vadd.f32 1.0, %v9381_v39  ;;  %v5047_v19 = vpop.permute.xlu0 %5046  ;;  %v8072_v22 = vmul.f32 -1.442695, %v12279_v34  ;;  %v5155_v15 = vadd.f32 %v5123_v29, %v4908_v49 }
 0xb2a   :  { %9398 = vpow2.f32 %v8065_v59  ;;  %v12286_v26 = vadd.f32 %v12023_v24, %v5146_v8  ;;  %v5116_v18 = vmul.f32 %v12017_v0, %v5047_v19  ;;  %8708 = vmatprep.mubr.msk.f32.mxu0 %vm465_vm6, %v5397_v2  ;;  %v12299_v19 = vadd.f32 %v12023_v24, %v5153_v5 }
 0xb2b   :  { %v9383_v4 = vpop.eup %9382  ;;  %9400 = vrcp.f32 %v5306_v17  ;;  %8709 = vmatmul.mubr.msk.f32.gmra.mxu0 %vm465_vm6, %v5398_v41  ;;  %v12312_v29 = vadd.f32 %v12023_v24, %v5155_v15 }
 0xb2c   :  { %v9385_v20 = vpop.eup %9384  ;;  %9402 = vpow2.f32 %v8070_v31  ;;  %v8067_v21 = vmul.f32 -1.442695, %v12286_v26  ;;  %v5148_v35 = vadd.f32 %v5116_v18, %v4901_v6  ;;  %v5399_v40 = vmul.f32 %v9383_v4, %v12139_v57 }
 0xb2d   :  { %v5307_v58 = vadd.f32 1.0, %v9385_v20  ;;  %v5058_v55 = vpop.permute.xlu0 %5057  ;;  %v9387_v45 = vpop.eup %9386  ;;  %v4903_v31 = vadd.f32 %v12014_v13, %v12237_v9  ;;  %v8074_v5 = vmul.f32 -1.442695, %v12299_v19  ;;  %v4905_v4 = vadd.f32 %v12014_v13, %v12262_v44 }
 0xb2e   :  { %9404 = vpow2.f32 %v8067_v21  ;;  %v12302_v28 = vadd.f32 %v12023_v24, %v5148_v35  ;;  %v5118_v39 = vmul.f32 %v12017_v0, %v5058_v55  ;;  %8711 = vmatprep.mubr.msk.f32.mxu0 %vm465_vm6, %v5399_v40  ;;  %v5312_v20 = vadd.f32 1.0, %v9387_v45 }
 0xb2f   :  { %v9389_v57 = vpop.eup %9388  ;;  %9406 = vrcp.f32 %v5307_v58  ;;  %v4907_v55 = vadd.f32 %v12014_v13, %v12276_v52 }
 0xb30   :  { %v9391_v59 = vpop.eup %9390  ;;  %9408 = vrcp.f32 %v5310_v23  ;;  %v5400_v8 = vmul.f32 %v9389_v57, %v12154_v11  ;;  %v8069_v2 = vmul.f32 -1.442695, %v12302_v28  ;;  %v5150_v41 = vadd.f32 %v5118_v39, %v4903_v31 }
 0xb31   :  { %9410 = vpow2.f32 %v8072_v22  ;;  %v5308_v9 = vadd.f32 1.0, %v9391_v59  ;;  %v5069_v17 = vpop.permute.xlu0 %5068  ;;  %v9393_v6 = vpop.eup %9392  ;;  %v8076_v22 = vmul.f32 -1.442695, %v12312_v29 }
 0xb32   :  { %9412 = vpow2.f32 %v8069_v2  ;;  %v12315_v18 = vadd.f32 %v12023_v24, %v5150_v41  ;;  %v5120_v11 = vmul.f32 %v12017_v0, %v5069_v17  ;;  %8712 = vmatmul.mubr.msk.f32.gmra.mxu0 %vm465_vm6, %v5400_v8  ;;  %v5314_v2 = vadd.f32 1.0, %v9393_v6 }
 0xb33   :  { %v9395_v23 = vpop.eup %9394  ;;  %9414 = vrcp.f32 %v5308_v9 }
 0xb34   :  { %v9397_v49 = vpop.eup %9396  ;;  %v5309_v21 = vadd.f32 1.0, %v9395_v23  ;;  %v8071_v35 = vmul.f32 -1.442695, %v12315_v18  ;;  %v5152_v40 = vadd.f32 %v5120_v11, %v4905_v4  ;;  %9416 = vpow2.f32 %v8074_v5 }
 0xb35   :  { %v5401_v15 = vmul.f32 %v9397_v49, %v12174_v54  ;;  %v5080_v58 = vpop.permute.xlu0 %5079 }
 0xb36   :  { %9418 = vrcp.f32 %v5309_v21  ;;  %v12325_v44 = vadd.f32 %v12023_v24, %v5152_v40  ;;  %v5122_v31 = vmul.f32 %v12017_v0, %v5080_v58 }
 0xb37   :  { %v9399_v45 = vpop.eup %9398  ;;  %9420 = vpow2.f32 %v8071_v35  ;;  %8714 = vmatprep.mubr.msk.f32.mxu0 %vm465_vm6, %v5401_v15 }
 0xb38   :  { %v9401_v39 = vpop.eup %9400  ;;  %9422 = vrcp.f32 %v5312_v20  ;;  %v5311_v57 = vadd.f32 1.0, %v9399_v45  ;;  %v8073_v59 = vmul.f32 -1.442695, %v12325_v44  ;;  %v5154_v54 = vadd.f32 %v5122_v31, %v4907_v55 }
 0xb39   :  { %v9403_v8 = vpop.eup %9402  ;;  %9424 = vpow2.f32 %v8076_v22  ;;  %v5402_v41 = vmul.f32 %v9401_v39, %v12191_v37 }
 0xb3a   :  { %9426 = vrcp.f32 %v5311_v57  ;;  %v12334_v13 = vadd.f32 %v12023_v24, %v5154_v54  ;;  %v5316_v4 = vadd.f32 1.0, %v9403_v8 }
 0xb3b   :  { %v9405_v0 = vpop.eup %9404  ;;  %9428 = vpow2.f32 %v8073_v59  ;;  %8715 = vmatmul.mubr.msk.f32.gmra.mxu0 %vm465_vm6, %v5402_v41 }
 0xb3c   :  { %v9407_v52 = vpop.eup %9406  ;;  %v5313_v5 = vadd.f32 1.0, %v9405_v0  ;;  %v8075_v9 = vmul.f32 -1.442695, %v12334_v13  ;;  %9430 = vrcp.f32 %v5314_v2 }
 0xb3d   :  { %v9409_v17 = vpop.eup %9408  ;;  %v5403_v6 = vmul.f32 %v9407_v52, %v12210_v16 }
 0xb3e   :  { %v9411_v11 = vpop.eup %9410  ;;  %9432 = vrcp.f32 %v5313_v5  ;;  %v5406_v15 = vmul.f32 %v9409_v17, %v12164_v10 }
 0xb3f   :  { %v9413_v37 = vpop.eup %9412  ;;  %9434 = vpow2.f32 %v8075_v9  ;;  %8717 = vmatprep.mubr.msk.f32.mxu0 %vm465_vm6, %v5403_v6  ;;  %v5318_v21 = vadd.f32 1.0, %v9411_v11 }
 0xb40   :  { %v9415_v24 = vpop.eup %9414  ;;  %v5315_v23 = vadd.f32 1.0, %v9413_v37  ;;  %9436 = vrcp.f32 %v5316_v4 }
 0xb41   :  { %v5404_v49 = vmul.f32 %v9415_v24, %v12230_v14  ;;  %v9417_v20 = vpop.eup %9416  ;;  %v5976_v24 = vld [vmem:[%s13350_s7 + $0x8] sm:$0xff] }
 0xb42   :  { %9438 = vrcp.f32 %v5315_v23  ;;  %v5320_v31 = vadd.f32 1.0, %v9417_v20  ;;  %v5975_v23 = vld [vmem:[%s13350_s7] sm:$0xff] }
 0xb43   :  { %v9419_v35 = vpop.eup %9418  ;;  %8718 = vmatmul.mubr.msk.f32.gmra.mxu0 %vm465_vm6, %v5404_v49  ;;  %9440 = vrcp.f32 %v5318_v21 }
 0xb44   :  { %v9421_v40 = vpop.eup %9420  ;;  %v5405_v16 = vmul.f32 %v9419_v35, %v12248_v25 }
 0xb45   :  { %v9423_v22 = vpop.eup %9422  ;;  %v5317_v58 = vadd.f32 1.0, %v9421_v40 }
 0xb46   :  { %v9425_v55 = vpop.eup %9424  ;;  %8720 = vmatprep.mubr.msk.f32.mxu0 %vm465_vm6, %v5405_v16  ;;  %v5408_v57 = vmul.f32 %v9423_v22, %v12202_v60 }
 0xb47   :  { %v9427_v45 = vpop.eup %9426  ;;  %9442 = vrcp.f32 %v5317_v58  ;;  %8721 = vmatmul.mubr.msk.f32.gmra.mxu0 %vm465_vm6, %v5406_v15  ;;  %v5322_v54 = vadd.f32 1.0, %v9425_v55 }
 0xb48   :  { %v9429_v14 = vpop.eup %9428  ;;  %v5407_v39 = vmul.f32 %v9427_v45, %v12266_v27  ;;  %9444 = vrcp.f32 %v5320_v31 }
 0xb49   :  { %v5319_v59 = vadd.f32 1.0, %v9429_v14  ;;  %v9431_v25 = vpop.eup %9430 }
 0xb4a   :  { %8723 = vmatprep.mubr.msk.f32.mxu0 %vm465_vm6, %v5407_v39  ;;  %v5410_v41 = vmul.f32 %v9431_v25, %v12222_v30 }
 0xb4b   :  { %v9433_v10 = vpop.eup %9432  ;;  %9446 = vrcp.f32 %v5319_v59  ;;  %8724 = vmatmul.mubr.msk.f32.gmra.mxu0 %vm465_vm6, %v5408_v57 }
 0xb4c   :  { %v9435_v8 = vpop.eup %9434  ;;  %v5409_v2 = vmul.f32 %v9433_v10, %v12286_v26  ;;  %9448 = vrcp.f32 %v5322_v54 }
 0xb4d   :  { %v5321_v0 = vadd.f32 1.0, %v9435_v8  ;;  %v9437_v52 = vpop.eup %9436 }
 0xb4e   :  { %8726 = vmatprep.mubr.msk.f32.mxu0 %vm465_vm6, %v5409_v2  ;;  %v5412_v5 = vmul.f32 %v9437_v52, %v12254_v32 }
 0xb4f   :  { %v9439_v60 = vpop.eup %9438  ;;  %9450 = vrcp.f32 %v5321_v0  ;;  %8727 = vmatmul.mubr.msk.f32.gmra.mxu0 %vm465_vm6, %v5410_v41 }
 0xb50   :  { %v5411_v27 = vmul.f32 %v9439_v60, %v12302_v28  ;;  %v9441_v9 = vpop.eup %9440 }
 0xb51   :  { %v5414_v17 = vmul.f32 %v9441_v9, %v12279_v34 }
 0xb52   :  { %8729 = vmatprep.mubr.msk.f32.mxu0 %vm465_vm6, %v5411_v27 }
 0xb53   :  { %8730 = vmatmul.mubr.msk.f32.gmra.mxu0 %vm465_vm6, %v5412_v5 }
 0xb54   :  { %v9443_v26 = vpop.eup %9442 }
 0xb55   :  { %v5413_v30 = vmul.f32 %v9443_v26, %v12315_v18  ;;  %v9445_v4 = vpop.eup %9444 }
 0xb56   :  { %v5416_v28 = vmul.f32 %v9445_v4, %v12299_v19  ;;  %v5977_v19 = vld [vmem:[%s13350_s7 + $0x10] sm:$0xff] }
 0xb57   :  { %8732 = vmatprep.mubr.msk.f32.mxu0 %vm465_vm6, %v5413_v30 }
 0xb58   :  { %v9447_v6 = vpop.eup %9446  ;;  %8733 = vmatmul.mubr.msk.f32.gmra.mxu0 %vm465_vm6, %v5414_v17 }
 0xb59   :  { %v5415_v32 = vmul.f32 %v9447_v6, %v12325_v44  ;;  %v9449_v11 = vpop.eup %9448  ;;  %v5978_v44 = vld [vmem:[%s13350_s7 + $0x18] sm:$0xff] }
 0xb5a   :  { %v5418_v37 = vmul.f32 %v9449_v11, %v12312_v29  ;;  %8741 = vmatprep.subr.mxu1 %v5978_v44 }
 0xb5b   :  { %8735 = vmatprep.mubr.msk.f32.mxu0 %vm465_vm6, %v5415_v32  ;;  %8742 = vmatpush3.msra.mxu1 %v5978_v44 }
 0xb5c   :  { %v9451_v18 = vpop.eup %9450  ;;  %8736 = vmatmul.mubr.msk.f32.gmra.mxu0 %vm465_vm6, %v5416_v28  ;;  %8743 = vmatprep.subr.mxu1 %v5977_v19 }
 0xb5d   :  { %v5417_v34 = vmul.f32 %v9451_v18, %v12334_v13  ;;  %8744 = vmatpush3.msra.mxu1 %v5977_v19  ;;  %v12375_v13 = vld [vmem:[%s13351_s11] ss:$0 sm:$0xff] }
 0xb5e   :  { %8745 = vmatprep.subr.mxu1 %v5976_v24 }
 0xb5f   :  { %8738 = vmatprep.mubr.msk.f32.mxu0 %vm465_vm6, %v5417_v34  ;;  %8746 = vmatpush3.msra.mxu1 %v5976_v24 }
 0xb60   :  { %8739 = vmatmul.mubr.msk.f32.gmra.mxu0 %vm465_vm6, %v5418_v37  ;;  %8747 = vmatprep.subr.mxu1 %v5975_v23 }
 0xb61   :  { %8748 = vmatpush3.msra.mxu1 %v5975_v23 }
 0xbc6   :  { %v8695_v49 = vpop.f32.mrf.mxu0 }
 0xbc7   :  { %v5598_v29 = vadd.f32 %v8695_v49, %v12375_v13 }
 0xbc8   :  { %v5592_v20 = vpop.f32.mrf.mxu0 }
 0xbc9   :  { %v8111_v21 = vmul.f32 -1.442695, %v5598_v29  ;;  %v5593_v35 = vadd.f32 %v12375_v13, %v5592_v20 }
 0xbcb   :  { %9452 = vpow2.f32 %v8111_v21  ;;  %v8110_v40 = vmul.f32 -1.442695, %v5593_v35 }
 0xbcd   :  { %9454 = vpow2.f32 %v8110_v40 }
 0xbce   :  { %v8698_v16 = vpop.f32.mrf.mxu0 }
 0xbcf   :  { %v12380_v22 = vadd.f32 %v8698_v16, %v12375_v13 }
 0xbd0   :  { %v5602_v15 = vpop.f32.mrf.mxu0 }
 0xbd1   :  { %v8113_v58 = vmul.f32 -1.442695, %v12380_v22  ;;  %v12384_v55 = vadd.f32 %v12375_v13, %v5602_v15 }
 0xbd3   :  { %9456 = vpow2.f32 %v8113_v58  ;;  %v8112_v31 = vmul.f32 -1.442695, %v12384_v55 }
 0xbd5   :  { %9458 = vpow2.f32 %v8112_v31 }
 0xbd7   :  { %v8701_v14 = vpop.f32.mrf.mxu0 }
 0xbd8   :  { %v9453_v45 = vpop.eup %9452  ;;  %v12388_v57 = vadd.f32 %v8701_v14, %v12375_v13 }
 0xbd9   :  { %v5848_v39 = vadd.f32 1.0, %v9453_v45  ;;  %v5612_v25 = vpop.f32.mrf.mxu0 }
 0xbda   :  { %v9455_v59 = vpop.eup %9454  ;;  %v8115_v10 = vmul.f32 -1.442695, %v12388_v57  ;;  %v12392_v8 = vadd.f32 %v12375_v13, %v5612_v25 }
 0xbdb   :  { %v5847_v54 = vadd.f32 1.0, %v9455_v59  ;;  %9460 = vrcp.f32 %v5848_v39 }
 0xbdc   :  { %v8114_v2 = vmul.f32 -1.442695, %v12392_v8 }
 0xbdd   :  { %9462 = vrcp.f32 %v5847_v54 }
 0xbde   :  { %9464 = vpow2.f32 %v8115_v10 }
 0xbdf   :  { %9466 = vpow2.f32 %v8114_v2  ;;  %v8704_v0 = vpop.f32.mrf.mxu0 }
 0xbe0   :  { %v9457_v41 = vpop.eup %9456  ;;  %v12396_v60 = vadd.f32 %v8704_v0, %v12375_v13 }
 0xbe1   :  { %v5850_v52 = vadd.f32 1.0, %v9457_v41  ;;  %v5622_v5 = vpop.f32.mrf.mxu0 }
 0xbe2   :  { %v9459_v27 = vpop.eup %9458  ;;  %v8117_v26 = vmul.f32 -1.442695, %v12396_v60  ;;  %v12400_v30 = vadd.f32 %v12375_v13, %v5622_v5 }
 0xbe3   :  { %v5849_v9 = vadd.f32 1.0, %v9459_v27  ;;  %9468 = vrcp.f32 %v5850_v52 }
 0xbe4   :  { %v8116_v17 = vmul.f32 -1.442695, %v12400_v30 }
 0xbe5   :  { %9470 = vrcp.f32 %v5849_v9 }
 0xbe6   :  { %v8707_v4 = vpop.f32.mrf.mxu0  ;;  %9472 = vpow2.f32 %v8117_v26  ;;  %v13353_v26 = vld [vmem:[#allocation81_spill] sm:$0xff] }
 0xbe7   :  { %v12404_v6 = vadd.f32 %v8707_v4, %v12375_v13  ;;  %9474 = vpow2.f32 %v8116_v17 }
 0xbe8   :  { %v5632_v32 = vpop.f32.mrf.mxu0  ;;  %v9461_v18 = vpop.eup %9460 }
 0xbe9   :  { %v8119_v28 = vmul.f32 -1.442695, %v12404_v6  ;;  %v12408_v11 = vadd.f32 %v12375_v13, %v5632_v32  ;;  %v5944_v20 = vmul.f32 %v9461_v18, %v5598_v29  ;;  %v13354_v32 = vld [vmem:[#allocation85_spill] sm:$0xff] }
 0xbea   :  { %v9463_v34 = vpop.eup %9462 }
 0xbeb   :  { %9476 = vpow2.f32 %v8119_v28  ;;  %v8118_v37 = vmul.f32 -1.442695, %v12408_v11  ;;  %v8710_v44 = vpop.f32.mrf.mxu0  ;;  %v9465_v19 = vpop.eup %9464  ;;  %v5943_v24 = vmul.f32 %v9463_v34, %v5593_v35 }
 0xbec   :  { %v12412_v23 = vadd.f32 %v8710_v44, %v12375_v13  ;;  %v9467_v49 = vpop.eup %9466  ;;  %v5852_v21 = vadd.f32 1.0, %v9465_v19  ;;  %v13355_v19 = vld [vmem:[#allocation82_spill] sm:$0xff] }
 0xbed   :  { %9478 = vpow2.f32 %v8118_v37  ;;  %v5642_v40 = vpop.f32.mrf.mxu0  ;;  %v5851_v16 = vadd.f32 1.0, %v9467_v49  ;;  %8749 = vmatprep.mubr.msk.f32.mxu1 %vm465_vm6, %v5943_v24 }
 0xbee   :  { %v8121_v15 = vmul.f32 -1.442695, %v12412_v23  ;;  %9480 = vrcp.f32 %v5852_v21  ;;  %v12417_v58 = vadd.f32 %v12375_v13, %v5642_v40  ;;  %8750 = vmatmul.mubr.msk.f32.vlgmr.msra.gmra.mxu1 %vm465_vm6, %v5944_v20 }
 0xbef   :  { %9482 = vrcp.f32 %v5851_v16 }
 0xbf0   :  { %9484 = vpow2.f32 %v8121_v15  ;;  %v8120_v35 = vmul.f32 -1.442695, %v12417_v58  ;;  %v9469_v31 = vpop.eup %9468 }
 0xbf1   :  { %v5946_v10 = vmul.f32 %v9469_v31, %v12380_v22  ;;  %v7122_v22 = vmul.f32 %v5944_v20, %v13353_v26 }
 0xbf2   :  { %v8713_v29 = vpop.f32.mrf.mxu0  ;;  %v9471_v45 = vpop.eup %9470  ;;  %9486 = vpow2.f32 %v8120_v35 }
 0xbf3   :  { %v12422_v14 = vadd.f32 %v8713_v29, %v12375_v13  ;;  %v9473_v39 = vpop.eup %9472  ;;  %v5945_v59 = vmul.f32 %v9471_v45, %v12384_v55  ;;  %v13352_v55 = vld [vmem:[#allocation80_spill] sm:$0xff]  ;;  %v7124_v49 = vmul.f32 %v5946_v10, %v13355_v19  ;;  %v7154_v20 = vsel %vm465_vm6, %v7122_v22, 0.0 }
 0xbf4   :  { %v5652_v25 = vpop.f32.mrf.mxu0  ;;  %v9475_v54 = vpop.eup %9474  ;;  %v5854_v2 = vadd.f32 1.0, %v9473_v39  ;;  %v7121_v9 = vmul.f32 %v5943_v24, %v13352_v55 }
 0xbf5   :  { %v8123_v41 = vmul.f32 -1.442695, %v12422_v14  ;;  %v12428_v0 = vadd.f32 %v12375_v13, %v5652_v25  ;;  %v5853_v52 = vadd.f32 1.0, %v9475_v54  ;;  %8752 = vmatprep.mubr.msk.f32.mxu1 %vm465_vm6, %v5945_v59  ;;  %v7123_v28 = vmul.f32 %v5945_v59, %v13354_v32 }
 0xbf6   :  { %9488 = vrcp.f32 %v5854_v2  ;;  %8753 = vmatmul.mubr.msk.f32.gmra.mxu1 %vm465_vm6, %v5946_v10  ;;  %v7153_v44 = vsel %vm465_vm6, %v7121_v9, 0.0  ;;  %v7163_v10 = vsel %vm465_vm6, %v7124_v49, 0.0 }
 0xbf7   :  { %v8122_v27 = vmul.f32 -1.442695, %v12428_v0  ;;  %9490 = vrcp.f32 %v5853_v52  ;;  %v7162_v35 = vsel %vm465_vm6, %v7123_v28, 0.0  ;;  %v7155_v39 = vadd.f32 %v7154_v20, %v7153_v44  ;;  %v13357_v20 = vld [vmem:[#allocation87_spill] sm:$0xff] }
 0xbf8   :  { %v9477_v5 = vpop.eup %9476  ;;  %9492 = vpow2.f32 %v8123_v41 }
 0xbf9   :  { %v5856_v17 = vadd.f32 1.0, %v9477_v5  ;;  %9494 = vpow2.f32 %v8122_v27  ;;  %v7156_v5 = vrot.slane %v7155_v39, 4 }
 0xbfa   :  { %v9479_v4 = vpop.eup %9478 }
 0xbfb   :  { %9496 = vrcp.f32 %v5856_v17  ;;  %v5855_v18 = vadd.f32 1.0, %v9479_v4  ;;  %v8716_v34 = vpop.f32.mrf.mxu0  ;;  %v9481_v37 = vpop.eup %9480  ;;  %v12466_v49 = vadd.f32 %v7156_v5, %v7155_v39 }
 0xbfc   :  { %v12439_v21 = vadd.f32 %v8716_v34, %v12375_v13  ;;  %v9483_v24 = vpop.eup %9482  ;;  %v5948_v40 = vmul.f32 %v9481_v37, %v12388_v57  ;;  %v13356_v57 = vld [vmem:[#allocation83_spill] sm:$0xff] }
 0xbfd   :  { %9498 = vrcp.f32 %v5855_v18  ;;  %v5662_v16 = vpop.f32.mrf.mxu0  ;;  %v9485_v15 = vpop.eup %9484  ;;  %v5947_v31 = vmul.f32 %v9483_v24, %v12392_v8  ;;  %v7164_v8 = vadd.f32 %v7163_v10, %v7162_v35 }
 0xbfe   :  { %v8125_v29 = vmul.f32 -1.442695, %v12439_v21  ;;  %v12447_v45 = vadd.f32 %v12375_v13, %v5662_v16  ;;  %v7126_v59 = vmul.f32 %v5948_v40, %v11078_v56  ;;  %v5858_v25 = vadd.f32 1.0, %v9485_v15 }
 0xbff   :  { %v9487_v54 = vpop.eup %9486  ;;  %v7125_v2 = vmul.f32 %v5947_v31, %v13356_v57  ;;  %8755 = vmatprep.mubr.msk.f32.mxu1 %vm465_vm6, %v5947_v31  ;;  %v7165_v4 = vrot.slane %v7164_v8, 4  ;;  %v13358_v31 = vld [vmem:[#allocation86_spill] sm:$0xff] }
 0xc00   :  { %9500 = vpow2.f32 %v8125_v29  ;;  %v8124_v41 = vmul.f32 -1.442695, %v12447_v45  ;;  %v5857_v52 = vadd.f32 1.0, %v9487_v54  ;;  %8756 = vmatmul.mubr.msk.f32.gmra.mxu1 %vm465_vm6, %v5948_v40  ;;  %v7172_v27 = vsel %vm465_vm6, %v7126_v59, 0.0 }
 0xc01   :  { %9502 = vrcp.f32 %v5858_v25  ;;  %v7171_v56 = vsel %vm465_vm6, %v7125_v2, 0.0  ;;  %v7166_v59 = vadd.f32 %v7165_v4, %v7164_v8  ;;  %v13359_v4 = vld [vmem:[#allocation89_spill] sm:$0xff] }
 0xc02   :  { %9504 = vpow2.f32 %v8124_v41  ;;  %v7173_v55 = vadd.f32 %v7172_v27, %v7171_v56 }
 0xc03   :  { %9506 = vrcp.f32 %v5857_v52  ;;  %v8719_v9 = vpop.f32.mrf.mxu0  ;;  %v9489_v26 = vpop.eup %9488 }
 0xc04   :  { %v12458_v22 = vadd.f32 %v8719_v9, %v12375_v13  ;;  %v9491_v17 = vpop.eup %9490  ;;  %v5950_v32 = vmul.f32 %v9489_v26, %v12396_v60  ;;  %v7174_v24 = vrot.slane %v7173_v55, 4  ;;  %v7158_v26 = vrot.slane %v12466_v49, 2 }
 0xc05   :  { %v5672_v28 = vpop.f32.mrf.mxu0  ;;  %v9493_v18 = vpop.eup %9492  ;;  %v5949_v34 = vmul.f32 %v9491_v17, %v12400_v30  ;;  %v7167_v17 = vrot.slane %v7166_v59, 2 }
 0xc06   :  { %v8127_v37 = vmul.f32 -1.442695, %v12458_v22  ;;  %v12464_v44 = vadd.f32 %v12375_v13, %v5672_v28  ;;  %v9495_v19 = vpop.eup %9494  ;;  %v7128_v40 = vmul.f32 %v5950_v32, %v13357_v20  ;;  %v5860_v16 = vadd.f32 1.0, %v9493_v18 }
 0xc07   :  { %v8722_v15 = vpop.f32.mrf.mxu0  ;;  %v7127_v60 = vmul.f32 %v5949_v34, %v13358_v31  ;;  %v5859_v29 = vadd.f32 1.0, %v9495_v19  ;;  %8758 = vmatprep.mubr.msk.f32.mxu1 %vm465_vm6, %v5949_v34  ;;  %v7175_v52 = vadd.f32 %v7174_v24, %v7173_v55 }
 0xc08   :  { %v9497_v35 = vpop.eup %9496  ;;  %9508 = vpow2.f32 %v8127_v37  ;;  %v8126_v30 = vmul.f32 -1.442695, %v12464_v44  ;;  %v7181_v25 = vsel %vm465_vm6, %v7128_v40, 0.0  ;;  %8759 = vmatmul.mubr.msk.f32.gmra.mxu1 %vm465_vm6, %v5950_v32  ;;  %v12477_v2 = vadd.f32 %v8722_v15, %v12375_v13 }
 0xc09   :  { %v5952_v39 = vmul.f32 %v9497_v35, %v12404_v6  ;;  %9510 = vrcp.f32 %v5860_v16  ;;  %v5682_v54 = vpop.f32.mrf.mxu0  ;;  %v7180_v57 = vsel %vm465_vm6, %v7127_v60, 0.0  ;;  %v7176_v20 = vrot.slane %v7175_v52, 2 }
 0xc0a   :  { %v9499_v10 = vpop.eup %9498  ;;  %9512 = vrcp.f32 %v5859_v29  ;;  %v12480_v41 = vadd.f32 %v12375_v13, %v5682_v54  ;;  %v7182_v8 = vadd.f32 %v7181_v25, %v7180_v57  ;;  %v8129_v6 = vmul.f32 -1.442695, %v12477_v2  ;;  %v13361_v54 = vld [vmem:[#allocation90_spill] sm:$0xff] }
 0xc0b   :  { %v5951_v27 = vmul.f32 %v9499_v10, %v12408_v11  ;;  %v8725_v56 = vpop.f32.mrf.mxu0  ;;  %9514 = vpow2.f32 %v8126_v30  ;;  %v13360_v11 = vld [vmem:[#allocation88_spill] sm:$0xff]  ;;  %v12500_v25 = vadd.f32 %v7167_v17, %v7166_v59  ;;  %v13362_v59 = vld [vmem:[#allocation91_spill] sm:$0xff] }
 0xc0c   :  { %v12485_v5 = vadd.f32 %v8725_v56, %v12375_v13  ;;  %v8128_v28 = vmul.f32 -1.442695, %v12480_v41  ;;  %v7130_v34 = vmul.f32 %v5952_v39, %v13360_v11  ;;  %9516 = vpow2.f32 %v8129_v6 }
 0xc0d   :  { %v9501_v9 = vpop.eup %9500  ;;  %v7129_v32 = vmul.f32 %v5951_v27, %v13359_v4  ;;  %v5692_v18 = vpop.f32.mrf.mxu0  ;;  %8761 = vmatprep.mubr.msk.f32.mxu1 %vm465_vm6, %v5951_v27  ;;  %v7183_v40 = vrot.slane %v7182_v8, 4  ;;  %v12511_v6 = vadd.f32 %v7176_v20, %v7175_v52 }
 0xc0e   :  { %v9503_v55 = vpop.eup %9502  ;;  %v5862_v37 = vadd.f32 1.0, %v9501_v9  ;;  %v12493_v19 = vadd.f32 %v12375_v13, %v5692_v18  ;;  %8762 = vmatmul.mubr.msk.f32.gmra.mxu1 %vm465_vm6, %v5952_v39  ;;  %v8131_v15 = vmul.f32 -1.442695, %v12485_v5 }
 0xc0f   :  { %v9505_v24 = vpop.eup %9504  ;;  %v5954_v16 = vmul.f32 %v9503_v55, %v12412_v23  ;;  %v8728_v35 = vpop.f32.mrf.mxu0  ;;  %v7189_v60 = vsel %vm465_vm6, %v7129_v32, 0.0  ;;  %v7190_v23 = vsel %vm465_vm6, %v7130_v34, 0.0  ;;  %v7184_v4 = vadd.f32 %v7183_v40, %v7182_v8 }
 0xc10   :  { %v9507_v31 = vpop.eup %9506  ;;  %9518 = vrcp.f32 %v5862_v37  ;;  %v5861_v29 = vadd.f32 1.0, %v9505_v24  ;;  %v8130_v30 = vmul.f32 -1.442695, %v12493_v19  ;;  %v12506_v27 = vadd.f32 %v8728_v35, %v12375_v13 }
 0xc11   :  { %v7132_v10 = vmul.f32 %v5954_v16, %v13361_v54  ;;  %v5953_v39 = vmul.f32 %v9507_v31, %v12417_v58  ;;  %9520 = vpow2.f32 %v8128_v28  ;;  %v5702_v57 = vpop.f32.mrf.mxu0  ;;  %v7191_v9 = vadd.f32 %v7190_v23, %v7189_v60  ;;  %v13364_v23 = vld [vmem:[#allocation93_spill] sm:$0xff] }
 0xc12   :  { %9522 = vrcp.f32 %v5861_v29  ;;  %v12509_v56 = vadd.f32 %v12375_v13, %v5702_v57  ;;  %v8133_v32 = vmul.f32 -1.442695, %v12506_v27  ;;  %v12524_v24 = vadd.f32 %v7158_v26, %v12466_v49  ;;  %v13363_v26 = vld [vmem:[#allocation92_spill] sm:$0xff] }
 0xc13   :  { %v7131_v17 = vmul.f32 %v5953_v39, %v13362_v59  ;;  %9524 = vpow2.f32 %v8131_v15  ;;  %8764 = vmatprep.mubr.msk.f32.mxu1 %vm465_vm6, %v5953_v39  ;;  %v8731_v58 = vpop.f32.mrf.mxu0  ;;  %v7199_v55 = vsel %vm465_vm6, %v7132_v10, 0.0  ;;  %v7192_v15 = vrot.slane %v7191_v9, 4 }
 0xc14   :  { %9526 = vpow2.f32 %v8130_v30  ;;  %v8132_v28 = vmul.f32 -1.442695, %v12509_v56  ;;  %8765 = vmatmul.mubr.msk.f32.gmra.mxu1 %vm465_vm6, %v5954_v16  ;;  %v12521_v11 = vadd.f32 %v8731_v58, %v12375_v13  ;;  %v7169_v31 = vrot.slane %v12500_v25, 1 }
 0xc15   :  { %v9509_v18 = vpop.eup %9508  ;;  %v7198_v52 = vsel %vm465_vm6, %v7131_v17, 0.0  ;;  %v5712_v34 = vpop.f32.mrf.mxu0  ;;  %9528 = vpow2.f32 %v8133_v32  ;;  %v7185_v29 = vrot.slane %v7184_v4, 2  ;;  %v7193_v32 = vadd.f32 %v7192_v15, %v7191_v9 }
 0xc16   :  { %v9511_v37 = vpop.eup %9510  ;;  %v7200_v8 = vadd.f32 %v7199_v55, %v7198_v52  ;;  %v5864_v20 = vadd.f32 1.0, %v9509_v18  ;;  %9530 = vpow2.f32 %v8132_v28  ;;  %v8135_v35 = vmul.f32 -1.442695, %v12521_v11 }
 0xc17   :  { %v9513_v40 = vpop.eup %9512  ;;  %v5956_v16 = vmul.f32 %v9511_v37, %v12422_v14  ;;  %v12533_v39 = vadd.f32 %v12375_v13, %v5712_v34  ;;  %v12546_v52 = vadd.f32 %v7185_v29, %v7184_v4 }
 0xc18   :  { %v5955_v30 = vmul.f32 %v9513_v40, %v12428_v0  ;;  %v8734_v54 = vpop.f32.mrf.mxu0  ;;  %v9515_v49 = vpop.eup %9514  ;;  %9532 = vpow2.f32 %v8135_v35  ;;  %v7201_v57 = vrot.slane %v7200_v8, 4 }
 0xc19   :  { %v7134_v10 = vmul.f32 %v5956_v16, %v13363_v26  ;;  %v12536_v14 = vadd.f32 %v8734_v54, %v12375_v13  ;;  %9534 = vrcp.f32 %v5864_v20  ;;  %v5863_v17 = vadd.f32 1.0, %v9515_v49  ;;  %v9517_v0 = vpop.eup %9516 }
 0xc1a   :  { %v7133_v59 = vmul.f32 %v5955_v30, %v13364_v23  ;;  %v5722_v58 = vpop.f32.mrf.mxu0  ;;  %8767 = vmatprep.mubr.msk.f32.mxu1 %vm465_vm6, %v5955_v30  ;;  %v8134_v28 = vmul.f32 -1.442695, %v12533_v39  ;;  %v5866_v9 = vadd.f32 1.0, %v9517_v0  ;;  %v7202_v54 = vadd.f32 %v7201_v57, %v7200_v8 }
 0xc1b   :  { %v8137_v18 = vmul.f32 -1.442695, %v12536_v14  ;;  %v12543_v55 = vadd.f32 %v12375_v13, %v5722_v58  ;;  %8768 = vmatmul.mubr.msk.f32.gmra.mxu1 %vm465_vm6, %v5956_v16  ;;  %v7208_v34 = vsel %vm465_vm6, %v7134_v10, 0.0  ;;  %9536 = vrcp.f32 %v5863_v17  ;;  %v13365_v17 = vld [vmem:[#allocation94_spill] sm:$0xff] }
 0xc1c   :  { %v7207_v37 = vsel %vm465_vm6, %v7133_v59, 0.0  ;;  %v8737_v20 = vpop.f32.mrf.mxu0  ;;  %9538 = vpow2.f32 %v8134_v28  ;;  %v7194_v26 = vrot.slane %v7193_v32, 2 }
 0xc1d   :  { %v9519_v40 = vpop.eup %9518  ;;  %v7209_v35 = vadd.f32 %v7208_v34, %v7207_v37  ;;  %v8136_v15 = vmul.f32 -1.442695, %v12543_v55  ;;  %9540 = vpow2.f32 %v8137_v18  ;;  %v12553_v4 = vadd.f32 %v8737_v20, %v12375_v13 }
 0xc1e   :  { %v9521_v30 = vpop.eup %9520  ;;  %v5958_v49 = vmul.f32 %v9519_v40, %v12439_v21  ;;  %v5732_v16 = vpop.f32.mrf.mxu0  ;;  %9542 = vrcp.f32 %v5866_v9  ;;  %v7203_v37 = vrot.slane %v7202_v54, 2  ;;  %v13366_v40 = vld [vmem:[#allocation95_spill] sm:$0xff] }
 0xc1f   :  { %v9523_v29 = vpop.eup %9522  ;;  %v7210_v10 = vrot.slane %v7209_v35, 4  ;;  %v5865_v23 = vadd.f32 1.0, %v9521_v30  ;;  %9544 = vpow2.f32 %v8136_v15  ;;  %v12558_v8 = vadd.f32 %v12375_v13, %v5732_v16 }
 0xc20   :  { %v9525_v59 = vpop.eup %9524  ;;  %v7136_v58 = vmul.f32 %v5958_v49, %v13365_v17  ;;  %v5957_v0 = vmul.f32 %v9523_v29, %v12447_v45  ;;  %v8740_v21 = vpop.f32.mrf.mxu0  ;;  %v8139_v34 = vmul.f32 -1.442695, %v12553_v4 }
 0xc21   :  { %v9527_v57 = vpop.eup %9526  ;;  %v7211_v28 = vadd.f32 %v7210_v10, %v7209_v35  ;;  %9546 = vrcp.f32 %v5865_v23  ;;  %v5868_v18 = vadd.f32 1.0, %v9525_v59  ;;  %v12565_v16 = vadd.f32 %v8740_v21, %v12375_v13 }
 0xc22   :  { %v7217_v20 = vsel %vm465_vm6, %v7136_v58, 0.0  ;;  %v7135_v9 = vmul.f32 %v5957_v0, %v13366_v40  ;;  %v5867_v30 = vadd.f32 1.0, %v9527_v57  ;;  %v5742_v17 = vpop.f32.mrf.mxu0  ;;  %8770 = vmatprep.mubr.msk.f32.mxu1 %vm465_vm6, %v5957_v0  ;;  %v9529_v45 = vpop.eup %9528  ;;  %v8138_v59 = vmul.f32 -1.442695, %v12558_v8 }
 0xc23   :  { %v7212_v15 = vrot.slane %v7211_v28, 2  ;;  %9548 = vrcp.f32 %v5868_v18  ;;  %v12568_v35 = vadd.f32 %v12375_v13, %v5742_v17  ;;  %8771 = vmatmul.mubr.msk.f32.gmra.mxu1 %vm465_vm6, %v5958_v49  ;;  %v9531_v29 = vpop.eup %9530  ;;  %v5870_v23 = vadd.f32 1.0, %v9529_v45 }
 0xc24   :  { %v7216_v10 = vsel %vm465_vm6, %v7135_v9, 0.0  ;;  %9550 = vrcp.f32 %v5867_v30  ;;  %v7195_v58 = vadd.f32 %v7194_v26, %v7193_v32  ;;  %v5869_v57 = vadd.f32 1.0, %v9531_v29 }
 0xc25   :  { %v7218_v0 = vadd.f32 %v7217_v20, %v7216_v10  ;;  %9552 = vpow2.f32 %v8139_v34  ;;  %v9533_v18 = vpop.eup %9532  ;;  %v7204_v40 = vadd.f32 %v7203_v37, %v7202_v54  ;;  %v7213_v21 = vadd.f32 %v7212_v15, %v7211_v28 }
 0xc26   :  { %9554 = vrcp.f32 %v5870_v23  ;;  %v8141_v13 = vmul.f32 -1.442695, %v12565_v16  ;;  %v9535_v17 = vpop.eup %9534  ;;  %v5872_v49 = vadd.f32 1.0, %v9533_v18  ;;  %v8140_v9 = vmul.f32 -1.442695, %v12568_v35 }
 0xc27   :  { %v7219_v60 = vrot.slane %v7218_v0, 4  ;;  %9556 = vrcp.f32 %v5869_v57  ;;  %v7160_v30 = vrot.slane %v12524_v24, 1  ;;  %v7170_v32 = vadd.f32 %v7169_v31, %v12500_v25 }
 0xc28   :  { %v7187_v26 = vrot.slane %v12546_v52, 1  ;;  %9558 = vpow2.f32 %v8138_v59  ;;  %v9537_v54 = vpop.eup %9536  ;;  %v13367_v28 = vrot.slane %v12511_v6, 1  ;;  %v7196_v37 = vrot.slane %v7195_v58, 1 }
 0xc29   :  { %v7220_v20 = vadd.f32 %v7219_v60, %v7218_v0  ;;  %9560 = vrcp.f32 %v5872_v49  ;;  %v9539_v45 = vpop.eup %9538  ;;  %v7205_v15 = vrot.slane %v7204_v40, 1  ;;  %v5960_v29 = vmul.f32 %v9535_v17, %v12458_v22 }
 0xc2a   :  { %v7179_v34 = vadd.f32 %v13367_v28, %v12511_v6  ;;  %v5959_v10 = vmul.f32 %v9537_v54, %v12464_v44  ;;  %9562 = vpow2.f32 %v8141_v13  ;;  %v9541_v23 = vpop.eup %9540  ;;  %v5871_v31 = vadd.f32 1.0, %v9539_v45 }
 0xc2b   :  { %v7221_v25 = vrot.slane %v7220_v20, 2  ;;  %9564 = vpow2.f32 %v8140_v9  ;;  %v7214_v59 = vrot.slane %v7213_v21, 1  ;;  %v9543_v57 = vpop.eup %9542  ;;  %v7161_v18 = vadd.f32 %v7160_v30, %v12524_v24 }
 0xc2c   :  { %v7188_v6 = vadd.f32 %v7187_v26, %v12546_v52  ;;  %v5874_v28 = vadd.f32 1.0, %v9541_v23  ;;  %8773 = vmatprep.mubr.msk.f32.mxu1 %vm465_vm6, %v5959_v10  ;;  %v9545_v60 = vpop.eup %9544  ;;  %v7197_v0 = vadd.f32 %v7196_v37, %v7195_v58  ;;  %9566 = vrcp.f32 %v5871_v31  ;;  %v13368_v23 = vld [vmem:[#allocation84_spill] sm:$0xff] }
 0xc2d   :  { %8774 = vmatmul.mubr.msk.f32.gmra.mxu1 %vm465_vm6, %v5960_v29  ;;  %v7222_v22 = vadd.f32 %v7221_v25, %v7220_v20  ;;  %v5873_v13 = vadd.f32 1.0, %v9545_v60  ;;  %v7206_v17 = vadd.f32 %v7205_v15, %v7204_v40  ;;  %v7313_v49 = vsel %vm3750_vm2, %v7170_v32, %v7161_v18 }
 0xc2e   :  { %v9547_v44 = vpop.eup %9546  ;;  %9568 = vrcp.f32 %v5874_v28  ;;  %v7215_v24 = vadd.f32 %v7214_v59, %v7213_v21  ;;  %v7314_v52 = vsel %vm3752_vm4, %v7179_v34, %v7313_v49  ;;  %v5962_v54 = vmul.f32 %v9543_v57, %v12477_v2 }
 0xc2f   :  { %v5961_v9 = vmul.f32 %v9547_v44, %v12480_v41  ;;  %v7223_v30 = vrot.slane %v7222_v22, 1  ;;  %9570 = vrcp.f32 %v5873_v13  ;;  %v7315_v58 = vsel %vm3754_vm5, %v7188_v6, %v7314_v52 }
 0xc30   :  { %v9549_v26 = vpop.eup %9548  ;;  %v7316_v20 = vsel %vm3756_vm7, %v7197_v0, %v7315_v58  ;;  %v7138_v25 = vmul.f32 %v5960_v29, %v13368_v23  ;;  %v7137_v60 = vmul.f32 %v5959_v10, %v11088_v33 }
 0xc31   :  { %v9551_v37 = vpop.eup %9550  ;;  %8776 = vmatprep.mubr.msk.f32.mxu1 %vm465_vm6, %v5961_v9  ;;  %v7224_v41 = vadd.f32 %v7223_v30, %v7222_v22  ;;  %v7317_v21 = vsel %vm3758_vm9, %v7206_v17, %v7316_v20  ;;  %v5964_v31 = vmul.f32 %v9549_v26, %v12485_v5  ;;  %v7140_v22 = vmul.f32 %v5962_v54, %v11118_v53 }
 0xc32   :  { %v9553_v40 = vpop.eup %9552  ;;  %v5963_v32 = vmul.f32 %v9551_v37, %v12493_v19  ;;  %8777 = vmatmul.mubr.msk.f32.gmra.mxu1 %vm465_vm6, %v5962_v54  ;;  %v7318_v2 = vsel %vm3760_vm10, %v7215_v24, %v7317_v21  ;;  %v7139_v19 = vmul.f32 %v5961_v9, %v11108_v48  ;;  %v7226_v33 = vsel %vm465_vm6, %v7138_v25, 0.0 }
 0xc33   :  { %v9555_v34 = vpop.eup %9554  ;;  %v5876_v45 = vadd.f32 1.0, %v9553_v40  ;;  %v7319_v59 = vsel %vm3762_vm11, %v7224_v41, %v7318_v2  ;;  %v7142_v44 = vmul.f32 %v5964_v31, %v11142_v51  ;;  %v7225_v53 = vsel %vm465_vm6, %v7137_v60, 0.0 }
 0xc34   :  { %v9557_v15 = vpop.eup %9556  ;;  %8779 = vmatprep.mubr.msk.f32.mxu1 %vm465_vm6, %v5963_v32  ;;  %v5966_v18 = vmul.f32 %v9555_v34, %v12506_v27  ;;  %7327 = vrot.lane.b32.xlu0 %v7319_v59, %s10093_s6  ;;  %v7141_v29 = vmul.f32 %v5963_v32, %v11151_v46  ;;  %v7234_v46 = vsel %vm465_vm6, %v7139_v19, 0.0  ;;  %v7235_v51 = vsel %vm465_vm6, %v7140_v22, 0.0 }
 0xc35   :  { %v9559_v57 = vpop.eup %9558  ;;  %v5965_v6 = vmul.f32 %v9557_v15, %v12509_v56  ;;  %9572 = vrcp.f32 %v5876_v45  ;;  %v7236_v52 = vadd.f32 %v7235_v51, %v7234_v46  ;;  %v7227_v58 = vadd.f32 %v7226_v33, %v7225_v53  ;;  %v13370_v53 = vld [vmem:[#allocation97_spill] sm:$0xff] }
 0xc36   :  { %v9561_v28 = vpop.eup %9560  ;;  %v5875_v5 = vadd.f32 1.0, %v9559_v57  ;;  %8780 = vmatmul.mubr.msk.f32.gmra.mxu1 %vm465_vm6, %v5964_v31  ;;  %v7144_v10 = vmul.f32 %v5966_v18, %v11186_v42  ;;  %v7244_v42 = vsel %vm465_vm6, %v7142_v44, 0.0 }
 0xc37   :  { %v9563_v0 = vpop.eup %9562  ;;  %v7143_v48 = vmul.f32 %v5965_v6, %v11191_v50  ;;  %v5968_v27 = vmul.f32 %v9561_v28, %v12521_v11  ;;  %8782 = vmatprep.mubr.msk.f32.mxu1 %vm465_vm6, %v5965_v6  ;;  %v7243_v50 = vsel %vm465_vm6, %v7141_v29, 0.0  ;;  %v7237_v21 = vrot.slane %v7236_v52, 4 }
 0xc38   :  { %v9565_v56 = vpop.eup %9564  ;;  %9574 = vrcp.f32 %v5875_v5  ;;  %v5878_v13 = vadd.f32 1.0, %v9563_v0  ;;  %v7245_v37 = vadd.f32 %v7244_v42, %v7243_v50  ;;  %v7253_v20 = vsel %vm465_vm6, %v7144_v10, 0.0 }
 0xc39   :  { %v9567_v17 = vpop.eup %9566  ;;  %v5877_v11 = vadd.f32 1.0, %v9565_v56  ;;  %v7252_v9 = vsel %vm465_vm6, %v7143_v48, 0.0  ;;  %v7146_v24 = vmul.f32 %v5968_v27, %v11226_v38  ;;  %v7228_v45 = vrot.slane %v7227_v58, 4 }
 0xc3a   :  { %9576 = vrcp.f32 %v5878_v13  ;;  %8783 = vmatmul.mubr.msk.f32.gmra.mxu1 %vm465_vm6, %v5966_v18  ;;  %v5967_v30 = vmul.f32 %v9567_v17, %v12533_v39  ;;  %v7254_v32 = vadd.f32 %v7253_v20, %v7252_v9  ;;  %v7246_v2 = vrot.slane %v7245_v37, 4 }
 0xc3b   :  { %v9569_v49 = vpop.eup %9568  ;;  %9578 = vrcp.f32 %v5877_v11  ;;  %v7262_v39 = vsel %vm465_vm6, %v7146_v24, 0.0  ;;  %v7229_v18 = vadd.f32 %v7228_v45, %v7227_v58  ;;  %v13371_v24 = vld [vmem:[#allocation98_spill] sm:$0xff] }
 0xc3c   :  { %v5970_v26 = vmul.f32 %v9569_v49, %v12536_v14  ;;  %v9571_v54 = vpop.eup %9570  ;;  %v7145_v40 = vmul.f32 %v5967_v30, %v11234_v62  ;;  %8785 = vmatprep.mubr.msk.f32.mxu1 %vm465_vm6, %v5967_v30  ;;  %v7255_v23 = vrot.slane %v7254_v32, 4  ;;  %v7247_v6 = vadd.f32 %v7246_v2, %v7245_v37 }
 0xc3d   :  { %v5969_v38 = vmul.f32 %v9571_v54, %v12543_v55  ;;  %v7230_v33 = vrot.slane %v7229_v18, 2 }
 0xc3e   :  { %8786 = vmatmul.mubr.msk.f32.gmra.mxu1 %vm465_vm6, %v5968_v27  ;;  %v7261_v41 = vsel %vm465_vm6, %v7145_v40, 0.0  ;;  %v7148_v14 = vmul.f32 %v5970_v26, %v11302_v47  ;;  %v7238_v47 = vadd.f32 %v7237_v21, %v7236_v52  ;;  %v7256_v28 = vadd.f32 %v7255_v23, %v7254_v32  ;;  %v13369_v27 = vld [vmem:[#allocation96_spill] sm:$0xff] }
 0xc3f   :  { %v7263_v34 = vadd.f32 %v7262_v39, %v7261_v41  ;;  %8788 = vmatprep.mubr.msk.f32.mxu1 %vm465_vm6, %v5969_v38  ;;  %v7147_v62 = vmul.f32 %v5969_v38, %v11310_v1  ;;  %v7248_v13 = vrot.slane %v7247_v6, 2  ;;  %v7231_v52 = vadd.f32 %v7230_v33, %v7229_v18  ;;  %v7337_v33 = vld [vmem:[%s13372_s12 + $0x10] sm:$0xff] }
 0xc40   :  { %v7271_v25 = vsel %vm465_vm6, %v7148_v14, 0.0  ;;  %v7239_v22 = vrot.slane %v7238_v47, 2  ;;  %v7257_v46 = vrot.slane %v7256_v28, 2 }
 0xc41   :  { %v7264_v55 = vrot.slane %v7263_v34, 4  ;;  %v7270_v31 = vsel %vm465_vm6, %v7147_v62, 0.0  ;;  %v7249_v51 = vadd.f32 %v7248_v13, %v7247_v6  ;;  %v7232_v39 = vrot.slane %v7231_v52, 1  ;;  %v7341_v6 = vld [vmem:[%s13372_s12 + $0x30] sm:$0xff]  ;;  %v8208_v13 = vld [vmem:[#allocation4] ss:$0 sm:$0xff] }
 0xc42   :  { %v9573_v15 = vpop.eup %9572  ;;  %8789 = vmatmul.mubr.msk.f32.gmra.mxu1 %vm465_vm6, %v5970_v26  ;;  %v7272_v57 = vadd.f32 %v7271_v25, %v7270_v31  ;;  %v7240_v49 = vadd.f32 %v7239_v22, %v7238_v47  ;;  %v7258_v42 = vadd.f32 %v7257_v46, %v7256_v28  ;;  %v7336_v46 = vld [vmem:[%s13372_s12 + $0x8] sm:$0xff] }
 0xc43   :  { %v5972_v59 = vmul.f32 %v9573_v15, %v12553_v4  ;;  %v7265_v0 = vadd.f32 %v7264_v55, %v7263_v34  ;;  %v7250_v32 = vrot.slane %v7249_v51, 1  ;;  %v7233_v55 = vadd.f32 %v7232_v39, %v7231_v52 }
 0xc44   :  { %v7273_v60 = vrot.slane %v7272_v57, 4  ;;  %v7241_v20 = vrot.slane %v7240_v49, 1  ;;  %v7259_v41 = vrot.slane %v7258_v42, 1 }
 0xc45   :  { %v9575_v19 = vpop.eup %9574  ;;  %v7150_v1 = vmul.f32 %v5972_v59, %v11417_v12  ;;  %v7266_v10 = vrot.slane %v7265_v0, 2  ;;  %v7251_v15 = vadd.f32 %v7250_v32, %v7249_v51 }
 0xc46   :  { %v5971_v29 = vmul.f32 %v9575_v19, %v12558_v8  ;;  %v7274_v48 = vadd.f32 %v7273_v60, %v7272_v57  ;;  %v7242_v45 = vadd.f32 %v7241_v20, %v7240_v49  ;;  %v7260_v25 = vadd.f32 %v7259_v41, %v7258_v42 }
 0xc47   :  { %v9577_v5 = vpop.eup %9576  ;;  %v7280_v12 = vsel %vm465_vm6, %v7150_v1, 0.0  ;;  %v7267_v26 = vadd.f32 %v7266_v10, %v7265_v0 }
 0xc48   :  { %v7149_v56 = vmul.f32 %v5971_v29, %v13369_v27  ;;  %v5974_v44 = vmul.f32 %v9577_v5, %v12565_v16  ;;  %8791 = vmatprep.mubr.msk.f32.mxu1 %vm465_vm6, %v5971_v29  ;;  %v9579_v4 = vpop.eup %9578  ;;  %v7275_v16 = vrot.slane %v7274_v48, 2  ;;  %v7320_v18 = vsel %vm3750_vm2, %v7242_v45, %v7233_v55  ;;  %v7340_v5 = vld [vmem:[%s13372_s12 + $0x28] sm:$0xff]  ;;  %v7339_v27 = vld [vmem:[%s13372_s12 + $0x20] sm:$0xff] }
 0xc49   :  { %8792 = vmatmul.mubr.msk.f32.gmra.mxu1 %vm465_vm6, %v5972_v59  ;;  %v5973_v11 = vmul.f32 %v9579_v4, %v12568_v35  ;;  %v7268_v21 = vrot.slane %v7267_v26, 1  ;;  %v7342_v59 = vld [vmem:[%s13372_s12 + $0x38] sm:$0xff]  ;;  %v7321_v60 = vsel %vm3752_vm4, %v7251_v15, %v7320_v18 }
 0xc4a   :  { %v7279_v8 = vsel %vm465_vm6, %v7149_v56, 0.0  ;;  %v7152_v50 = vmul.f32 %v5974_v44, %v13370_v53  ;;  %v7276_v35 = vadd.f32 %v7275_v16, %v7274_v48  ;;  %8804 = vmatprep.subr.mxu1 %v7342_v59  ;;  %v7322_v29 = vsel %vm3754_vm5, %v7260_v25, %v7321_v60  ;;  %v7338_v4 = vld [vmem:[%s13372_s12 + $0x18] sm:$0xff] }
 0xc4b   :  { %v7281_v17 = vadd.f32 %v7280_v12, %v7279_v8  ;;  %v7151_v30 = vmul.f32 %v5973_v11, %v13371_v24  ;;  %8794 = vmatprep.mubr.msk.f32.mxu1 %vm465_vm6, %v5973_v11  ;;  %v7269_v47 = vadd.f32 %v7268_v21, %v7267_v26  ;;  %8805 = vmatpush3.msra.mxu1 %v7342_v59  ;;  %v7335_v12 = vld [vmem:[%s13372_s12] sm:$0xff] }
 0xc4c   :  { %v7289_v58 = vsel %vm465_vm6, %v7152_v50, 0.0  ;;  %v7277_v2 = vrot.slane %v7276_v35, 1  ;;  %8806 = vmatprep.subr.mxu1 %v7341_v6 }
 0xc4d   :  { %v7282_v9 = vrot.slane %v7281_v17, 4  ;;  %8795 = vmatmul.mubr.msk.f32.gmra.mxu1 %vm465_vm6, %v5974_v44  ;;  %v7288_v37 = vsel %vm465_vm6, %v7151_v30, 0.0  ;;  %v7323_v0 = vsel %vm3756_vm7, %v7269_v47, %v7322_v29 }
 0xc4e   :  { %v7290_v40 = vadd.f32 %v7289_v58, %v7288_v37  ;;  %v7278_v57 = vadd.f32 %v7277_v2, %v7276_v35  ;;  %8807 = vmatpush3.msra.mxu1 %v7341_v6 }
 0xc4f   :  { %v7283_v54 = vadd.f32 %v7282_v9, %v7281_v17  ;;  %8808 = vmatprep.subr.mxu1 %v7340_v5  ;;  %v12677_v17 = vld [vmem:[%s13373_s25] ss:$0 sm:$0xff] }
 0xc50   :  { %v7291_v14 = vrot.slane %v7290_v40, 4  ;;  %v7324_v48 = vsel %vm3758_vm9, %v7278_v57, %v7323_v0  ;;  %8809 = vmatpush3.msra.mxu1 %v7340_v5 }
 0xc51   :  { %v7284_v38 = vrot.slane %v7283_v54, 2  ;;  %8810 = vmatprep.subr.mxu1 %v7339_v27 }
 0xc52   :  { %v7292_v62 = vadd.f32 %v7291_v14, %v7290_v40  ;;  %8811 = vmatpush3.msra.mxu1 %v7339_v27 }
 0xc53   :  { %v7285_v34 = vadd.f32 %v7284_v38, %v7283_v54  ;;  %8812 = vmatprep.subr.mxu1 %v7338_v4 }
 0xc54   :  { %v7293_v31 = vrot.slane %v7292_v62, 2  ;;  %8813 = vmatpush3.msra.mxu1 %v7338_v4 }
 0xc55   :  { %v7286_v23 = vrot.slane %v7285_v34, 1  ;;  %8814 = vmatprep.subr.mxu1 %v7337_v33 }
 0xc56   :  { %v7294_v19 = vadd.f32 %v7293_v31, %v7292_v62  ;;  %8815 = vmatpush3.msra.mxu1 %v7337_v33 }
 0xc57   :  { %v7287_v28 = vadd.f32 %v7286_v23, %v7285_v34  ;;  %8816 = vmatprep.subr.mxu1 %v7336_v46 }
 0xc58   :  { %v7295_v1 = vrot.slane %v7294_v19, 1  ;;  %8817 = vmatpush3.msra.mxu1 %v7336_v46 }
 0xc59   :  { %v7325_v56 = vsel %vm3760_vm10, %v7287_v28, %v7324_v48  ;;  %8818 = vmatprep.subr.mxu1 %v7335_v12  ;;  %v12713_v28 = vld [vmem:[%s13374_s21] ss:$0 sm:$0xff] }
 0xc5a   :  { %v7296_v22 = vadd.f32 %v7295_v1, %v7294_v19  ;;  %8819 = vmatpush3.msra.mxu1 %v7335_v12 }
 0xc5c   :  { %v7326_v44 = vsel %vm3762_vm11, %v7296_v22, %v7325_v56 }
 0xc5d   :  { %7329 = vrot.lane.b32.xlu1 %v7326_v44, %s10093_s6 }
 0xc61   :  { %6673 = vperm.xlu1 %8923, %v8208_v13  }
 0xca6   :  { %v7328_v8 = vpop.permute.xlu0 %7327 }
 0xca7   :  { %v7333_v10 = vsel %vm465_vm6, %v11969_v7, %v7328_v8 }
 0xca8   :  { %8820 = vmatprep.mubr.msk.f32.mxu1 %vm4281_vm12, %v7333_v10 }
 0xcae   :  { %v8751_v53 = vpop.f32.mrf.mxu1 }
 0xcaf   :  { %v6154_v50 = vadd.f32 %v8751_v53, %v12677_v17 }
 0xcb0   :  { %v6148_v11 = vpop.f32.mrf.mxu1 }
 0xcb1   :  { %v8176_v49 = vmul.f32 -1.442695, %v6154_v50  ;;  %v6149_v16 = vadd.f32 %v12677_v17, %v6148_v11 }
 0xcb3   :  { %9580 = vpow2.f32 %v8176_v49  ;;  %v8175_v51 = vmul.f32 -1.442695, %v6149_v16 }
 0xcb5   :  { %9582 = vpow2.f32 %v8175_v51 }
 0xcb6   :  { %v8754_v9 = vpop.f32.mrf.mxu1 }
 0xcb7   :  { %v12682_v24 = vadd.f32 %v8754_v9, %v12677_v17 }
 0xcb8   :  { %v6158_v30 = vpop.f32.mrf.mxu1 }
 0xcb9   :  { %v8178_v52 = vmul.f32 -1.442695, %v12682_v24  ;;  %v12686_v42 = vadd.f32 %v12677_v17, %v6158_v30 }
 0xcbb   :  { %9584 = vpow2.f32 %v8178_v52  ;;  %v8177_v26 = vmul.f32 -1.442695, %v12686_v42 }
 0xcbd   :  { %9586 = vpow2.f32 %v8177_v26 }
 0xcc0   :  { %v9581_v54 = vpop.eup %9580  ;;  %v8757_v58 = vpop.f32.mrf.mxu1 }
 0xcc1   :  { %v6404_v37 = vadd.f32 1.0, %v9581_v54  ;;  %v12690_v20 = vadd.f32 %v8757_v58, %v12677_v17 }
 0xcc2   :  { %v9583_v35 = vpop.eup %9582  ;;  %v6168_v40 = vpop.f32.mrf.mxu1 }
 0xcc3   :  { %9588 = vrcp.f32 %v6404_v37  ;;  %v6403_v32 = vadd.f32 1.0, %v9583_v35  ;;  %v8180_v38 = vmul.f32 -1.442695, %v12690_v20  ;;  %v12694_v39 = vadd.f32 %v12677_v17, %v6168_v40 }
 0xcc5   :  { %9590 = vrcp.f32 %v6403_v32  ;;  %v8179_v41 = vmul.f32 -1.442695, %v12694_v39 }
 0xcc6   :  { %9592 = vpow2.f32 %v8180_v38 }
 0xcc7   :  { %9594 = vpow2.f32 %v8179_v41 }
 0xcc8   :  { %v9585_v14 = vpop.eup %9584  ;;  %v8760_v21 = vpop.f32.mrf.mxu1 }
 0xcc9   :  { %v6406_v34 = vadd.f32 1.0, %v9585_v14  ;;  %v12698_v45 = vadd.f32 %v8760_v21, %v12677_v17 }
 0xcca   :  { %v9587_v2 = vpop.eup %9586  ;;  %v6178_v62 = vpop.f32.mrf.mxu1 }
 0xccb   :  { %9596 = vrcp.f32 %v6406_v34  ;;  %v6405_v15 = vadd.f32 1.0, %v9587_v2  ;;  %v8182_v23 = vmul.f32 -1.442695, %v12698_v45  ;;  %v12702_v55 = vadd.f32 %v12677_v17, %v6178_v62 }
 0xccd   :  { %9598 = vrcp.f32 %v6405_v15  ;;  %v8181_v25 = vmul.f32 -1.442695, %v12702_v55 }
 0xcce   :  { %v8763_v31 = vpop.f32.mrf.mxu1  ;;  %9600 = vpow2.f32 %v8182_v23 }
 0xccf   :  { %v12706_v59 = vadd.f32 %v8763_v31, %v12677_v17  ;;  %9602 = vpow2.f32 %v8181_v25  ;;  %v7330_v19 = vpop.permute.xlu1 %7329 }
 0xcd0   :  { %v6188_v47 = vpop.f32.mrf.mxu1  ;;  %v9589_v57 = vpop.eup %9588  ;;  %v7334_v1 = vsel %vm465_vm6, %v11971_v43, %v7330_v19 }
 0xcd1   :  { %v8184_v18 = vmul.f32 -1.442695, %v12706_v59  ;;  %v12710_v6 = vadd.f32 %v12677_v17, %v6188_v47  ;;  %v6500_v60 = vmul.f32 %v9589_v57, %v6154_v50  ;;  %8821 = vmatmul.mubr.msk.f32.vlgmr.msra.gmra.mxu1 %vm4281_vm12, %v7334_v1 }
 0xcd2   :  { %v9591_v29 = vpop.eup %9590 }
 0xcd3   :  { %9604 = vpow2.f32 %v8184_v18  ;;  %v8183_v5 = vmul.f32 -1.442695, %v12710_v6  ;;  %v9593_v0 = vpop.eup %9592  ;;  %v6499_v22 = vmul.f32 %v9591_v29, %v6149_v16  ;;  %v6539_v27 = vmul.f32 %v12713_v28, %v6500_v60 }
 0xcd4   :  { %v8766_v48 = vpop.f32.mrf.mxu1  ;;  %v9595_v56 = vpop.eup %9594  ;;  %v6408_v44 = vadd.f32 1.0, %v9593_v0 }
 0xcd5   :  { %9606 = vpow2.f32 %v8183_v5  ;;  %v12721_v4 = vadd.f32 %v8766_v48, %v12677_v17  ;;  %v6407_v13 = vadd.f32 1.0, %v9595_v56  ;;  %v6573_v46 = vsel %vm465_vm6, %v6539_v27, 0.0 }
 0xcd6   :  { %v6198_v33 = vpop.f32.mrf.mxu1  ;;  %v6538_v12 = vmul.f32 %v12713_v28, %v6499_v22  ;;  %9608 = vrcp.f32 %v6408_v44  ;;  %6574 = vadd.xlane.f32.xlu1 %v6573_v46 }
 0xcd7   :  { %v8186_v8 = vmul.f32 -1.442695, %v12721_v4  ;;  %v12727_v10 = vadd.f32 %v12677_v17, %v6198_v33  ;;  %9610 = vrcp.f32 %v6407_v13 }
 0xcd8   :  { %v6570_v53 = vsel %vm465_vm6, %v6538_v12, 0.0  ;;  %v9597_v50 = vpop.eup %9596 }
 0xcd9   :  { %9612 = vpow2.f32 %v8186_v8  ;;  %v8185_v11 = vmul.f32 -1.442695, %v12727_v10  ;;  %6571 = vadd.xlane.f32.xlu0 %v6570_v53  ;;  %v6502_v49 = vmul.f32 %v9597_v50, %v12682_v24 }
 0xcda   :  { %v9599_v16 = vpop.eup %9598 }
 0xcdb   :  { %9614 = vpow2.f32 %v8185_v11  ;;  %v8769_v51 = vpop.f32.mrf.mxu1  ;;  %v9601_v9 = vpop.eup %9600  ;;  %v6501_v30 = vmul.f32 %v9599_v16, %v12686_v42  ;;  %v6541_v26 = vmul.f32 %v12713_v28, %v6502_v49 }
 0xcdc   :  { %v12734_v52 = vadd.f32 %v8769_v51, %v12677_v17  ;;  %v9603_v54 = vpop.eup %9602  ;;  %v6410_v58 = vadd.f32 1.0, %v9601_v9 }
 0xcdd   :  { %v6208_v37 = vpop.f32.mrf.mxu1  ;;  %v6409_v35 = vadd.f32 1.0, %v9603_v54  ;;  %v6579_v24 = vsel %vm465_vm6, %v6541_v26, 0.0  ;;  %v6540_v42 = vmul.f32 %v12713_v28, %v6501_v30 }
 0xcde   :  { %v8188_v40 = vmul.f32 -1.442695, %v12734_v52  ;;  %v12739_v32 = vadd.f32 %v12677_v17, %v6208_v37  ;;  %9616 = vrcp.f32 %v6410_v58  ;;  %6580 = vadd.xlane.f32.xlu0 %v6579_v24 }
 0xcdf   :  { %9618 = vrcp.f32 %v6409_v35  ;;  %v6576_v34 = vsel %vm465_vm6, %v6540_v42, 0.0 }
 0xce0   :  { %v9605_v38 = vpop.eup %9604  ;;  %v8187_v41 = vmul.f32 -1.442695, %v12739_v32  ;;  %9620 = vpow2.f32 %v8188_v40 }
 0xce1   :  { %v6412_v14 = vadd.f32 1.0, %v9605_v38 }
 0xce2   :  { %v9607_v21 = vpop.eup %9606  ;;  %9622 = vpow2.f32 %v8187_v41  ;;  %6577 = vadd.xlane.f32.xlu0 %v6576_v34 }
 0xce3   :  { %9624 = vrcp.f32 %v6412_v14  ;;  %v6411_v2 = vadd.f32 1.0, %v9607_v21  ;;  %v8772_v62 = vpop.f32.mrf.mxu1  ;;  %v9609_v15 = vpop.eup %9608 }
 0xce4   :  { %v12746_v23 = vadd.f32 %v8772_v62, %v12677_v17  ;;  %v9611_v25 = vpop.eup %9610  ;;  %v6504_v31 = vmul.f32 %v9609_v15, %v12690_v20 }
 0xce5   :  { %9626 = vrcp.f32 %v6411_v2  ;;  %v6218_v47 = vpop.f32.mrf.mxu1  ;;  %v6503_v19 = vmul.f32 %v9611_v25, %v12694_v39 }
 0xce6   :  { %v9613_v57 = vpop.eup %9612  ;;  %v8190_v18 = vmul.f32 -1.442695, %v12746_v23  ;;  %v12752_v60 = vadd.f32 %v12677_v17, %v6218_v47  ;;  %v6543_v29 = vmul.f32 %v12713_v28, %v6504_v31 }
 0xce7   :  { %v6414_v1 = vadd.f32 1.0, %v9613_v57  ;;  %v6542_v22 = vmul.f32 %v12713_v28, %v6503_v19 }
 0xce8   :  { %v9615_v5 = vpop.eup %9614  ;;  %9628 = vpow2.f32 %v8190_v18  ;;  %v8189_v0 = vmul.f32 -1.442695, %v12752_v60  ;;  %v6585_v48 = vsel %vm465_vm6, %v6543_v29, 0.0 }
 0xce9   :  { %9630 = vrcp.f32 %v6414_v1  ;;  %v6413_v20 = vadd.f32 1.0, %v9615_v5  ;;  %6586 = vadd.xlane.f32.xlu0 %v6585_v48  ;;  %v6582_v39 = vsel %vm465_vm6, %v6542_v22, 0.0 }
 0xcea   :  { %9632 = vpow2.f32 %v8189_v0  ;;  %6583 = vadd.xlane.f32.xlu1 %v6582_v39 }
 0xceb   :  { %9634 = vrcp.f32 %v6413_v20  ;;  %v9617_v27 = vpop.eup %9616 }
 0xcec   :  { %v9619_v56 = vpop.eup %9618  ;;  %v6506_v44 = vmul.f32 %v9617_v27, %v12698_v45 }
 0xced   :  { %v8775_v13 = vpop.f32.mrf.mxu1  ;;  %v9621_v33 = vpop.eup %9620  ;;  %v6505_v46 = vmul.f32 %v9619_v56, %v12702_v55 }
 0xcee   :  { %v12762_v12 = vadd.f32 %v8775_v13, %v12677_v17  ;;  %v6416_v53 = vadd.f32 1.0, %v9621_v33  ;;  %v6545_v11 = vmul.f32 %v12713_v28, %v6506_v44 }
 0xcef   :  { %v9623_v8 = vpop.eup %9622  ;;  %v6228_v50 = vpop.f32.mrf.mxu1  ;;  %v6544_v45 = vmul.f32 %v12713_v28, %v6505_v46 }
 0xcf0   :  { %v9625_v49 = vpop.eup %9624  ;;  %v6415_v16 = vadd.f32 1.0, %v9623_v8  ;;  %v8192_v51 = vmul.f32 -1.442695, %v12762_v12  ;;  %v12767_v9 = vadd.f32 %v12677_v17, %v6228_v50  ;;  %9636 = vrcp.f32 %v6416_v53 }
 0xcf1   :  { %v6508_v30 = vmul.f32 %v9625_v49, %v12706_v59  ;;  %v6591_v55 = vsel %vm465_vm6, %v6545_v11, 0.0  ;;  %v6588_v37 = vsel %vm465_vm6, %v6544_v45, 0.0 }
 0xcf2   :  { %v9627_v26 = vpop.eup %9626  ;;  %9638 = vrcp.f32 %v6415_v16  ;;  %v8191_v54 = vmul.f32 -1.442695, %v12767_v9  ;;  %6592 = vadd.xlane.f32.xlu0 %v6591_v55  ;;  %v8778_v58 = vpop.f32.mrf.mxu1  ;;  %6589 = vadd.xlane.f32.xlu1 %v6588_v37 }
 0xcf3   :  { %v6507_v35 = vmul.f32 %v9627_v26, %v12710_v6  ;;  %9640 = vpow2.f32 %v8192_v51  ;;  %v12776_v40 = vadd.f32 %v8778_v58, %v12677_v17  ;;  %v6547_v59 = vmul.f32 %v12713_v28, %v6508_v30 }
 0xcf4   :  { %9642 = vpow2.f32 %v8191_v54  ;;  %v6238_v24 = vpop.f32.mrf.mxu1 }
 0xcf5   :  { %v9629_v42 = vpop.eup %9628  ;;  %v8194_v38 = vmul.f32 -1.442695, %v12776_v40  ;;  %v12781_v41 = vadd.f32 %v12677_v17, %v6238_v24  ;;  %v6597_v14 = vsel %vm465_vm6, %v6547_v59, 0.0  ;;  %v6546_v21 = vmul.f32 %v12713_v28, %v6507_v35 }
 0xcf6   :  { %v9631_v6 = vpop.eup %9630  ;;  %v6418_v34 = vadd.f32 1.0, %v9629_v42  ;;  %v8781_v2 = vpop.f32.mrf.mxu1  ;;  %6598 = vadd.xlane.f32.xlu0 %v6597_v14 }
 0xcf7   :  { %v9633_v62 = vpop.eup %9632  ;;  %v6510_v15 = vmul.f32 %v9631_v6, %v12721_v4  ;;  %9644 = vpow2.f32 %v8194_v38  ;;  %v8193_v25 = vmul.f32 -1.442695, %v12781_v41  ;;  %v12788_v31 = vadd.f32 %v8781_v2, %v12677_v17 }
 0xcf8   :  { %v9635_v47 = vpop.eup %9634  ;;  %9646 = vrcp.f32 %v6418_v34  ;;  %v6417_v57 = vadd.f32 1.0, %v9633_v62  ;;  %v6248_v19 = vpop.f32.mrf.mxu1  ;;  %v6594_v18 = vsel %vm465_vm6, %v6546_v21, 0.0 }
 0xcf9   :  { %v6509_v1 = vmul.f32 %v9635_v47, %v12727_v10  ;;  %9648 = vpow2.f32 %v8193_v25  ;;  %v8196_v29 = vmul.f32 -1.442695, %v12788_v31  ;;  %v12794_v5 = vadd.f32 %v12677_v17, %v6248_v19  ;;  %6595 = vadd.xlane.f32.xlu1 %v6594_v18 }
 0xcfa   :  { %9650 = vrcp.f32 %v6417_v57  ;;  %v8784_v4 = vpop.f32.mrf.mxu1  ;;  %v6549_v0 = vmul.f32 %v12713_v28, %v6510_v15 }
 0xcfb   :  { %9652 = vpow2.f32 %v8196_v29  ;;  %v8195_v22 = vmul.f32 -1.442695, %v12794_v5  ;;  %v12799_v20 = vadd.f32 %v8784_v4, %v12677_v17  ;;  %v6548_v48 = vmul.f32 %v12713_v28, %v6509_v1 }
 0xcfc   :  { %v6258_v10 = vpop.f32.mrf.mxu1  ;;  %v6603_v39 = vsel %vm465_vm6, %v6549_v0, 0.0 }
 0xcfd   :  { %9654 = vpow2.f32 %v8195_v22  ;;  %v8198_v27 = vmul.f32 -1.442695, %v12799_v20  ;;  %v12805_v56 = vadd.f32 %v12677_v17, %v6258_v10  ;;  %6604 = vadd.xlane.f32.xlu0 %v6603_v39  ;;  %v6600_v44 = vsel %vm465_vm6, %v6548_v48, 0.0  ;;  %v9637_v13 = vpop.eup %9636 }
 0xcfe   :  { %v8787_v33 = vpop.f32.mrf.mxu1  ;;  %6601 = vadd.xlane.f32.xlu1 %v6600_v44  ;;  %v6512_v8 = vmul.f32 %v9637_v13, %v12734_v52 }
 0xcff   :  { %v9639_v46 = vpop.eup %9638  ;;  %9656 = vpow2.f32 %v8198_v27  ;;  %v8197_v53 = vmul.f32 -1.442695, %v12805_v56  ;;  %v12811_v50 = vadd.f32 %v8787_v33, %v12677_v17 }
 0xd00   :  { %v9641_v11 = vpop.eup %9640  ;;  %v6511_v49 = vmul.f32 %v9639_v46, %v12739_v32  ;;  %v6268_v16 = vpop.f32.mrf.mxu1  ;;  %v6551_v54 = vmul.f32 %v12713_v28, %v6512_v8 }
 0xd01   :  { %v9643_v51 = vpop.eup %9642  ;;  %v6420_v45 = vadd.f32 1.0, %v9641_v11  ;;  %9658 = vpow2.f32 %v8197_v53  ;;  %v8200_v30 = vmul.f32 -1.442695, %v12811_v50  ;;  %v12816_v55 = vadd.f32 %v12677_v17, %v6268_v16 }
 0xd02   :  { %v6419_v26 = vadd.f32 1.0, %v9643_v51  ;;  %v8790_v52 = vpop.f32.mrf.mxu1  ;;  %v6550_v58 = vmul.f32 %v12713_v28, %v6511_v49  ;;  %v6609_v24 = vsel %vm465_vm6, %v6551_v54, 0.0 }
 0xd03   :  { %9660 = vrcp.f32 %v6420_v45  ;;  %v8199_v37 = vmul.f32 -1.442695, %v12816_v55  ;;  %v12822_v32 = vadd.f32 %v8790_v52, %v12677_v17  ;;  %6610 = vadd.xlane.f32.xlu0 %v6609_v24 }
 0xd04   :  { %v9645_v35 = vpop.eup %9644  ;;  %9662 = vrcp.f32 %v6419_v26  ;;  %v6278_v59 = vpop.f32.mrf.mxu1  ;;  %v6606_v42 = vsel %vm465_vm6, %v6550_v58, 0.0 }
 0xd05   :  { %v9647_v38 = vpop.eup %9646  ;;  %v6422_v14 = vadd.f32 1.0, %v9645_v35  ;;  %9664 = vpow2.f32 %v8200_v30  ;;  %v8202_v21 = vmul.f32 -1.442695, %v12822_v32  ;;  %v12828_v6 = vadd.f32 %v12677_v17, %v6278_v59  ;;  %6607 = vadd.xlane.f32.xlu1 %v6606_v42 }
 0xd06   :  { %v9649_v34 = vpop.eup %9648  ;;  %v6514_v2 = vmul.f32 %v9647_v38, %v12746_v23  ;;  %9666 = vpow2.f32 %v8199_v37 }
 0xd07   :  { %v9651_v62 = vpop.eup %9650  ;;  %9668 = vrcp.f32 %v6422_v14  ;;  %v6421_v15 = vadd.f32 1.0, %v9649_v34  ;;  %v8201_v25 = vmul.f32 -1.442695, %v12828_v6 }
 0xd08   :  { %v9653_v47 = vpop.eup %9652  ;;  %v6513_v57 = vmul.f32 %v9651_v62, %v12752_v60  ;;  %9670 = vpow2.f32 %v8202_v21  ;;  %v6553_v19 = vmul.f32 %v12713_v28, %v6514_v2 }
 0xd09   :  { %9672 = vrcp.f32 %v6421_v15  ;;  %v6424_v18 = vadd.f32 1.0, %v9653_v47  ;;  %v8793_v1 = vpop.f32.mrf.mxu1 }
 0xd0a   :  { %v9655_v29 = vpop.eup %9654  ;;  %9674 = vpow2.f32 %v8201_v25  ;;  %v12835_v4 = vadd.f32 %v8793_v1, %v12677_v17  ;;  %v6615_v23 = vsel %vm465_vm6, %v6553_v19, 0.0  ;;  %v6552_v0 = vmul.f32 %v12713_v28, %v6513_v57 }
 0xd0b   :  { %9676 = vrcp.f32 %v6424_v18  ;;  %v6423_v22 = vadd.f32 1.0, %v9655_v29  ;;  %v6288_v48 = vpop.f32.mrf.mxu1  ;;  %6616 = vadd.xlane.f32.xlu0 %v6615_v23 }
 0xd0c   :  { %v9657_v60 = vpop.eup %9656  ;;  %v8204_v10 = vmul.f32 -1.442695, %v12835_v4  ;;  %v12841_v39 = vadd.f32 %v12677_v17, %v6288_v48  ;;  %v6612_v27 = vsel %vm465_vm6, %v6552_v0, 0.0 }
 0xd0d   :  { %9678 = vrcp.f32 %v6423_v22  ;;  %v6426_v44 = vadd.f32 1.0, %v9657_v60  ;;  %6613 = vadd.xlane.f32.xlu1 %v6612_v27  ;;  %v8796_v46 = vpop.f32.mrf.mxu1 }
 0xd0e   :  { %v9659_v13 = vpop.eup %9658  ;;  %9680 = vpow2.f32 %v8204_v10  ;;  %v8203_v33 = vmul.f32 -1.442695, %v12841_v39  ;;  %v12846_v53 = vadd.f32 %v8796_v46, %v12677_v17 }
 0xd0f   :  { %9682 = vrcp.f32 %v6426_v44  ;;  %v6425_v8 = vadd.f32 1.0, %v9659_v13  ;;  %v6298_v49 = vpop.f32.mrf.mxu1 }
 0xd10   :  { %v9661_v11 = vpop.eup %9660  ;;  %9684 = vpow2.f32 %v8203_v33  ;;  %v8206_v45 = vmul.f32 -1.442695, %v12846_v53  ;;  %v12851_v30 = vadd.f32 %v12677_v17, %v6298_v49 }
 0xd11   :  { %v9663_v16 = vpop.eup %9662  ;;  %v6516_v51 = vmul.f32 %v9661_v11, %v12762_v12  ;;  %9686 = vrcp.f32 %v6425_v8 }
 0xd12   :  { %v9665_v26 = vpop.eup %9664  ;;  %v6515_v52 = vmul.f32 %v9663_v16, %v12767_v9  ;;  %9688 = vpow2.f32 %v8206_v45  ;;  %v8205_v37 = vmul.f32 -1.442695, %v12851_v30 }
 0xd13   :  { %v9667_v54 = vpop.eup %9666  ;;  %v6428_v58 = vadd.f32 1.0, %v9665_v26  ;;  %v6555_v35 = vmul.f32 %v12713_v28, %v6516_v51 }
 0xd14   :  { %v9669_v59 = vpop.eup %9668  ;;  %v6427_v24 = vadd.f32 1.0, %v9667_v54  ;;  %v6554_v12 = vmul.f32 %v12713_v28, %v6515_v52 }
 0xd15   :  { %v9671_v42 = vpop.eup %9670  ;;  %v6518_v38 = vmul.f32 %v9669_v59, %v12776_v40  ;;  %9690 = vrcp.f32 %v6428_v58  ;;  %v6621_v17 = vsel %vm465_vm6, %v6555_v35, 0.0 }
 0xd16   :  { %v9673_v14 = vpop.eup %9672  ;;  %9692 = vrcp.f32 %v6427_v24  ;;  %v6430_v9 = vadd.f32 1.0, %v9671_v42  ;;  %6622 = vadd.xlane.f32.xlu0 %v6621_v17  ;;  %v6618_v21 = vsel %vm465_vm6, %v6554_v12, 0.0 }
 0xd17   :  { %v9675_v34 = vpop.eup %9674  ;;  %v6517_v2 = vmul.f32 %v9673_v14, %v12781_v41  ;;  %9694 = vpow2.f32 %v8205_v37  ;;  %6619 = vadd.xlane.f32.xlu1 %v6618_v21  ;;  %v6557_v62 = vmul.f32 %v12713_v28, %v6518_v38 }
 0xd18   :  { %v9677_v15 = vpop.eup %9676  ;;  %9696 = vrcp.f32 %v6430_v9  ;;  %v6429_v25 = vadd.f32 1.0, %v9675_v34 }
 0xd19   :  { %v6520_v40 = vmul.f32 %v9677_v15, %v12788_v31  ;;  %v6627_v47 = vsel %vm465_vm6, %v6557_v62, 0.0  ;;  %v6556_v57 = vmul.f32 %v12713_v28, %v6517_v2 }
 0xd1a   :  { %v9679_v19 = vpop.eup %9678  ;;  %9698 = vrcp.f32 %v6429_v25  ;;  %6628 = vadd.xlane.f32.xlu0 %v6627_v47 }
 0xd1b   :  { %v9681_v18 = vpop.eup %9680  ;;  %v6519_v1 = vmul.f32 %v9679_v19, %v12794_v5  ;;  %v6624_v41 = vsel %vm465_vm6, %v6556_v57, 0.0  ;;  %v6559_v29 = vmul.f32 %v12713_v28, %v6520_v40  ;;  %v12901_v19 = vpop.permute.xlu1 %6673 }
 0xd1c   :  { %v9683_v23 = vpop.eup %9682  ;;  %v6432_v0 = vadd.f32 1.0, %v9681_v18  ;;  %6625 = vadd.xlane.f32.xlu1 %v6624_v41 }
 0xd1d   :  { %v9685_v22 = vpop.eup %9684  ;;  %v6522_v31 = vmul.f32 %v9683_v23, %v12799_v20  ;;  %v6633_v48 = vsel %vm465_vm6, %v6559_v29, 0.0  ;;  %v6558_v60 = vmul.f32 %v12713_v28, %v6519_v1 }
 0xd1e   :  { %v9687_v10 = vpop.eup %9686  ;;  %9700 = vrcp.f32 %v6432_v0  ;;  %v6431_v27 = vadd.f32 1.0, %v9685_v22  ;;  %6634 = vadd.xlane.f32.xlu0 %v6633_v48 }
 0xd1f   :  { %v6521_v5 = vmul.f32 %v9687_v10, %v12805_v56  ;;  %v6630_v44 = vsel %vm465_vm6, %v6558_v60, 0.0  ;;  %v6561_v13 = vmul.f32 %v12713_v28, %v6522_v31  ;;  %v9689_v33 = vpop.eup %9688 }
 0xd20   :  { %9702 = vrcp.f32 %v6431_v27  ;;  %6631 = vadd.xlane.f32.xlu1 %v6630_v44  ;;  %v6434_v46 = vadd.f32 1.0, %v9689_v33  ;;  %v13375_v27 = vld [vmem:[#allocation76_spill] sm:$0xff]  ;;  %v13376_v44 = vld [vmem:[#allocation73_spill] sm:$0xff] }
 0xd21   :  { %v6639_v20 = vsel %vm465_vm6, %v6561_v13, 0.0  ;;  %v6560_v8 = vmul.f32 %v12713_v28, %v6521_v5 }
 0xd22   :  { %v9691_v11 = vpop.eup %9690  ;;  %6640 = vadd.xlane.f32.xlu0 %v6639_v20  ;;  %9704 = vrcp.f32 %v6434_v46 }
 0xd23   :  { %v9693_v49 = vpop.eup %9692  ;;  %v6524_v16 = vmul.f32 %v9691_v11, %v12811_v50  ;;  %v6636_v56 = vsel %vm465_vm6, %v6560_v8, 0.0  ;;  %v13378_v11 = vld [vmem:[#allocation101_spill] sm:$0xff] }
 0xd24   :  { %v9695_v51 = vpop.eup %9694  ;;  %v6523_v45 = vmul.f32 %v9693_v49, %v12816_v55  ;;  %6637 = vadd.xlane.f32.xlu1 %v6636_v56 }
 0xd25   :  { %v9697_v26 = vpop.eup %9696  ;;  %v6433_v52 = vadd.f32 1.0, %v9695_v51  ;;  %v6563_v54 = vmul.f32 %v12713_v28, %v6524_v16  ;;  %v13379_v51 = vld [vmem:[#allocation104_spill] sm:$0xff] }
 0xd26   :  { %v6526_v58 = vmul.f32 %v9697_v26, %v12822_v32  ;;  %v6562_v37 = vmul.f32 %v12713_v28, %v6523_v45 }
 0xd27   :  { %v9699_v35 = vpop.eup %9698  ;;  %9706 = vrcp.f32 %v6433_v52  ;;  %v6645_v59 = vsel %vm465_vm6, %v6563_v54, 0.0  ;;  %v13380_v54 = vld [vmem:[#allocation103_spill] sm:$0xff] }
 0xd28   :  { %v6525_v50 = vmul.f32 %v9699_v35, %v12828_v6  ;;  %6646 = vadd.xlane.f32.xlu0 %v6645_v59  ;;  %v6642_v24 = vsel %vm465_vm6, %v6562_v37, 0.0  ;;  %v6565_v55 = vmul.f32 %v12713_v28, %v6526_v58 }
 0xd29   :  { %6643 = vadd.xlane.f32.xlu1 %v6642_v24  ;;  %v13381_v24 = vld [vmem:[#allocation108_spill] sm:$0xff] }
 0xd2a   :  { %v6651_v12 = vsel %vm465_vm6, %v6565_v55, 0.0  ;;  %v6564_v42 = vmul.f32 %v12713_v28, %v6525_v50 }
 0xd2b   :  { %v9701_v38 = vpop.eup %9700 }
 0xd2c   :  { %v6528_v32 = vmul.f32 %v9701_v38, %v12835_v4  ;;  %6652 = vadd.xlane.f32.xlu0 %v6651_v12  ;;  %v6648_v17 = vsel %vm465_vm6, %v6564_v42, 0.0  ;;  %v13382_v12 = vld [vmem:[#allocation107_spill] sm:$0xff] }
 0xd2d   :  { %v9703_v14 = vpop.eup %9702  ;;  %6649 = vadd.xlane.f32.xlu1 %v6648_v17 }
 0xd2e   :  { %v6527_v6 = vmul.f32 %v9703_v14, %v12841_v39  ;;  %v6567_v9 = vmul.f32 %v12713_v28, %v6528_v32 }
 0xd2f   :  { %v9705_v21 = vpop.eup %9704 }
 0xd30   :  { %v6657_v34 = vsel %vm465_vm6, %v6567_v9, 0.0  ;;  %v6566_v2 = vmul.f32 %v12713_v28, %v6527_v6  ;;  %v6530_v62 = vmul.f32 %v9705_v21, %v12846_v53  ;;  %v13383_v6 = vld [vmem:[#allocation112_spill] sm:$0xff]  ;;  %v13384_v21 = vld [vmem:[#allocation111_spill] sm:$0xff] }
 0xd31   :  { %6658 = vadd.xlane.f32.xlu0 %v6657_v34 }
 0xd32   :  { %v6654_v15 = vsel %vm465_vm6, %v6566_v2, 0.0  ;;  %v6569_v4 = vmul.f32 %v12713_v28, %v6530_v62 }
 0xd33   :  { %6655 = vadd.xlane.f32.xlu1 %v6654_v15 }
 0xd34   :  { %v9707_v25 = vpop.eup %9706  ;;  %v6663_v39 = vsel %vm465_vm6, %v6569_v4, 0.0  ;;  %v13385_v4 = vld [vmem:[#allocation116_spill] sm:$0xff] }
 0xd35   :  { %v6529_v40 = vmul.f32 %v9707_v25, %v12851_v30  ;;  %6664 = vadd.xlane.f32.xlu0 %v6663_v39  ;;  %v13386_v39 = vld [vmem:[#allocation115_spill] sm:$0xff] }
 0xd37   :  { %v6568_v47 = vmul.f32 %v12713_v28, %v6529_v40 }
 0xd39   :  { %v6660_v57 = vsel %vm465_vm6, %v6568_v47, 0.0 }
 0xd3a   :  { %6661 = vadd.xlane.f32.xlu1 %v6660_v57 }
 0xd5f   :  { %v6575_v53 = vpop.xlane.xlu1 %6574 }
 0xd60   :  { %v6677_v18 = vadd.f32 %v12901_v19, %v6575_v53 }
 0xd62   :  { %v6572_v1 = vpop.xlane.xlu0 %6571  ;;  %v6709_v41 = vmul.f32 %v6677_v18, %v11486_v3 }
 0xd63   :  { %v6676_v29 = vadd.f32 %v12901_v19, %v6572_v1 }
 0xd64   :  { %6776 = vperm.xlu1 %8923, %v6709_v41   ;;  %v13387_v41 = vld [vmem:[#allocation77_spill] sm:$0xff] }
 0xd65   :  { %v6708_v30 = vmul.f32 %v6676_v29, %v11484_v63 }
 0xd67   :  { %6773 = vperm.xlu0 %8922, %v6708_v30   ;;  %v6581_v23 = vpop.xlane.xlu0 %6580  ;;  %v13388_v30 = vld [vmem:[#allocation99_spill] sm:$0xff] }
 0xd68   :  { %v6679_v28 = vadd.f32 %v12901_v19, %v6581_v23 }
 0xd6a   :  { %v6711_v0 = vmul.f32 %v6679_v28, %v11488_v36 }
 0xd6b   :  { %v6578_v22 = vpop.xlane.xlu0 %6577 }
 0xd6c   :  { %v6678_v31 = vadd.f32 %v12901_v19, %v6578_v22  ;;  %6782 = vperm.xlu0 %8922, %v6711_v0  }
 0xd6e   :  { %v6710_v48 = vmul.f32 %v6678_v31, %v11500_v61  ;;  %v13377_v61 = vld [vmem:[#allocation79_spill] sm:$0xff]  ;;  %v13389_v31 = vld [vmem:[#allocation78_spill] sm:$0xff] }
 0xd70   :  { %6779 = vperm.xlu1 %8923, %v6710_v48  }
 0xd72   :  { %v6587_v60 = vpop.xlane.xlu0 %6586 }
 0xd73   :  { %v6681_v3 = vadd.f32 %v12901_v19, %v6587_v60  ;;  %v6584_v10 = vpop.xlane.xlu1 %6583 }
 0xd74   :  { %v6680_v63 = vadd.f32 %v12901_v19, %v6584_v10  ;;  %v13390_v10 = vld [vmem:[#allocation100_spill] sm:$0xff] }
 0xd75   :  { %v6713_v5 = vmul.f32 %v6681_v3, %v13375_v27 }
 0xd76   :  { %v6712_v13 = vmul.f32 %v6680_v63, %v13376_v44  ;;  %v13391_v44 = vld [vmem:[#allocation74_spill] sm:$0xff] }
 0xd77   :  { %6788 = vperm.xlu0 %8922, %v6713_v5  }
 0xd78   :  { %6785 = vperm.xlu1 %8923, %v6712_v13  }
 0xd7b   :  { %v6593_v36 = vpop.xlane.xlu0 %6592  ;;  %v6590_v46 = vpop.xlane.xlu1 %6589 }
 0xd7c   :  { %v6683_v33 = vadd.f32 %v12901_v19, %v6593_v36  ;;  %v6682_v20 = vadd.f32 %v12901_v19, %v6590_v46  ;;  %v13392_v46 = vld [vmem:[#allocation102_spill] sm:$0xff] }
 0xd7e   :  { %v6715_v8 = vmul.f32 %v6683_v33, %v13377_v61  ;;  %v6714_v49 = vmul.f32 %v6682_v20, %v13378_v11  ;;  %v13393_v11 = vld [vmem:[#allocation106_spill] sm:$0xff] }
 0xd7f   :  { %v6599_v16 = vpop.xlane.xlu0 %6598 }
 0xd80   :  { %6794 = vperm.xlu0 %8922, %v6715_v8   ;;  %v6685_v56 = vadd.f32 %v12901_v19, %v6599_v16  ;;  %6791 = vperm.xlu1 %8923, %v6714_v49  }
 0xd82   :  { %v6717_v45 = vmul.f32 %v6685_v56, %v13379_v51  ;;  %v6596_v26 = vpop.xlane.xlu1 %6595  ;;  %v13394_v56 = vld [vmem:[#allocation105_spill] sm:$0xff] }
 0xd83   :  { %v6684_v52 = vadd.f32 %v12901_v19, %v6596_v26 }
 0xd84   :  { %6800 = vperm.xlu0 %8922, %v6717_v45  }
 0xd85   :  { %v6716_v58 = vmul.f32 %v6684_v52, %v13380_v54 }
 0xd86   :  { %v6605_v37 = vpop.xlane.xlu0 %6604 }
 0xd87   :  { %v6687_v35 = vadd.f32 %v12901_v19, %v6605_v37  ;;  %v6602_v59 = vpop.xlane.xlu1 %6601  ;;  %6797 = vperm.xlu1 %8923, %v6716_v58   ;;  %v13395_v58 = vld [vmem:[#allocation110_spill] sm:$0xff] }
 0xd88   :  { %v6686_v50 = vadd.f32 %v12901_v19, %v6602_v59 }
 0xd89   :  { %v6719_v55 = vmul.f32 %v6687_v35, %v13381_v24  ;;  %v13396_v35 = vld [vmem:[#allocation109_spill] sm:$0xff] }
 0xd8a   :  { %v6718_v42 = vmul.f32 %v6686_v50, %v13382_v12 }
 0xd8b   :  { %6806 = vperm.xlu0 %8922, %v6719_v55  }
 0xd8c   :  { %6803 = vperm.xlu1 %8923, %v6718_v42   ;;  %v6611_v38 = vpop.xlane.xlu0 %6610  ;;  %v13397_v42 = vld [vmem:[#allocation114_spill] sm:$0xff] }
 0xd8d   :  { %v6689_v17 = vadd.f32 %v12901_v19, %v6611_v38 }
 0xd8e   :  { %v6608_v32 = vpop.xlane.xlu1 %6607 }
 0xd8f   :  { %v6688_v14 = vadd.f32 %v12901_v19, %v6608_v32  ;;  %v6721_v9 = vmul.f32 %v6689_v17, %v13383_v6  ;;  %v13398_v32 = vld [vmem:[#allocation113_spill] sm:$0xff] }
 0xd91   :  { %v6720_v34 = vmul.f32 %v6688_v14, %v13384_v21  ;;  %6812 = vperm.xlu0 %8922, %v6721_v9   ;;  %v13399_v21 = vld [vmem:[#allocation118_spill] sm:$0xff] }
 0xd93   :  { %6809 = vperm.xlu1 %8923, %v6720_v34  }
 0xd94   :  { %v6617_v2 = vpop.xlane.xlu0 %6616 }
 0xd95   :  { %v6691_v62 = vadd.f32 %v12901_v19, %v6617_v2 }
 0xd96   :  { %v6614_v15 = vpop.xlane.xlu1 %6613 }
 0xd97   :  { %v6723_v25 = vmul.f32 %v6691_v62, %v13385_v4  ;;  %v6690_v40 = vadd.f32 %v12901_v19, %v6614_v15  ;;  %v13400_v62 = vld [vmem:[#allocation117_spill] sm:$0xff] }
 0xd99   :  { %v6722_v47 = vmul.f32 %v6690_v40, %v13386_v39  ;;  %6818 = vperm.xlu0 %8922, %v6723_v25   ;;  %v13401_v40 = vld [vmem:[#allocation120_spill] sm:$0xff] }
 0xd9b   :  { %6815 = vperm.xlu1 %8923, %v6722_v47  }
 0xd9f   :  { %v6623_v57 = vpop.xlane.xlu0 %6622 }
 0xda0   :  { %v6693_v53 = vadd.f32 %v12901_v19, %v6623_v57  ;;  %v6620_v18 = vpop.xlane.xlu1 %6619 }
 0xda1   :  { %v6692_v1 = vadd.f32 %v12901_v19, %v6620_v18 }
 0xda2   :  { %v6725_v29 = vmul.f32 %v6693_v53, %v13387_v41  ;;  %v13402_v53 = vld [vmem:[#allocation119_spill] sm:$0xff] }
 0xda3   :  { %v6724_v23 = vmul.f32 %v6692_v1, %v13388_v30  ;;  %v6629_v28 = vpop.xlane.xlu0 %6628  ;;  %v12968_v1 = vld [vmem:[%s10321_s19 + $0x18] sm:$0xff] }
 0xda4   :  { %6824 = vperm.xlu0 %8922, %v6725_v29   ;;  %v6695_v0 = vadd.f32 %v12901_v19, %v6629_v28  ;;  %8823 = vmatprep.subr.mxu0 %v12968_v1 }
 0xda5   :  { %v6626_v22 = vpop.xlane.xlu1 %6625  ;;  %6821 = vperm.xlu1 %8923, %v6724_v23  }
 0xda6   :  { %v6727_v48 = vmul.f32 %v6695_v0, %v13389_v31  ;;  %v6694_v60 = vadd.f32 %v12901_v19, %v6626_v22 }
 0xda7   :  { %v6635_v3 = vpop.xlane.xlu0 %6634 }
 0xda8   :  { %v6726_v63 = vmul.f32 %v6694_v60, %v13390_v10  ;;  %v6697_v27 = vadd.f32 %v12901_v19, %v6635_v3  ;;  %6830 = vperm.xlu0 %8922, %v6727_v48   ;;  %v13403_v10 = vld [vmem:[#allocation64_spill] sm:$0xff] }
 0xda9   :  { %v6632_v5 = vpop.xlane.xlu1 %6631 }
 0xdaa   :  { %v6729_v13 = vmul.f32 %v6697_v27, %v13391_v44  ;;  %v6696_v36 = vadd.f32 %v12901_v19, %v6632_v5  ;;  %6827 = vperm.xlu1 %8923, %v6726_v63   ;;  %v13404_v44 = vld [vmem:[#allocation121_spill] sm:$0xff] }
 0xdab   :  { %v6641_v33 = vpop.xlane.xlu0 %6640 }
 0xdac   :  { %v6728_v20 = vmul.f32 %v6696_v36, %v13392_v46  ;;  %v6699_v61 = vadd.f32 %v12901_v19, %v6641_v33  ;;  %6836 = vperm.xlu0 %8922, %v6729_v13  }
 0xdad   :  { %v6638_v8 = vpop.xlane.xlu1 %6637 }
 0xdae   :  { %v6731_v49 = vmul.f32 %v6699_v61, %v13393_v11  ;;  %v6698_v16 = vadd.f32 %v12901_v19, %v6638_v8  ;;  %6833 = vperm.xlu1 %8923, %v6728_v20  }
 0xdb0   :  { %v6730_v51 = vmul.f32 %v6698_v16, %v13394_v56  ;;  %6842 = vperm.xlu0 %8922, %v6731_v49  }
 0xdb1   :  { %v6647_v45 = vpop.xlane.xlu0 %6646 }
 0xdb2   :  { %v6701_v26 = vadd.f32 %v12901_v19, %v6647_v45  ;;  %v6644_v52 = vpop.xlane.xlu1 %6643  ;;  %6839 = vperm.xlu1 %8923, %v6730_v51  }
 0xdb3   :  { %v6700_v54 = vadd.f32 %v12901_v19, %v6644_v52 }
 0xdb4   :  { %v6733_v37 = vmul.f32 %v6701_v26, %v13395_v58  ;;  %v8822_v58 = vpop.f32.mrf.mxu1 }
 0xdb5   :  { %v6732_v59 = vmul.f32 %v6700_v54, %v13396_v35  ;;  %v6653_v50 = vpop.xlane.xlu0 %6652 }
 0xdb6   :  { %v6703_v24 = vadd.f32 %v12901_v19, %v6653_v50  ;;  %6848 = vperm.xlu0 %8922, %v6733_v37   ;;  %v6650_v55 = vpop.xlane.xlu1 %6649 }
 0xdb7   :  { %v6702_v12 = vadd.f32 %v12901_v19, %v6650_v55  ;;  %6845 = vperm.xlu1 %8923, %v6732_v59  }
 0xdb8   :  { %v6735_v38 = vmul.f32 %v6703_v24, %v13397_v42 }
 0xdb9   :  { %v6734_v17 = vmul.f32 %v6702_v12, %v13398_v32 }
 0xdba   :  { %v6659_v14 = vpop.xlane.xlu0 %6658  ;;  %6854 = vperm.xlu0 %8922, %v6735_v38  }
 0xdbb   :  { %v6705_v6 = vadd.f32 %v12901_v19, %v6659_v14  ;;  %6851 = vperm.xlu1 %8923, %v6734_v17  }
 0xdbc   :  { %v6656_v9 = vpop.xlane.xlu1 %6655 }
 0xdbd   :  { %v6737_v34 = vmul.f32 %v6705_v6, %v13399_v21  ;;  %v6704_v2 = vadd.f32 %v12901_v19, %v6656_v9  ;;  %v7422_v6 = vpop.f32.mrf.mxu1 }
 0xdbe   :  { %v6665_v4 = vpop.xlane.xlu0 %6664 }
 0xdbf   :  { %v6736_v15 = vmul.f32 %v6704_v2, %v13400_v62  ;;  %6860 = vperm.xlu0 %8922, %v6737_v34   ;;  %v6707_v25 = vadd.f32 %v12901_v19, %v6665_v4  ;;  %v8211_v2 = vld [vmem:[%s13405_s8] ss:$0 sm:$0xff] }
 0xdc1   :  { %6857 = vperm.xlu1 %8923, %v6736_v15   ;;  %v6739_v39 = vmul.f32 %v6707_v25, %v13401_v40  ;;  %v13003_v15 = vadd.f32 %v8211_v2, %v7422_v6 }
 0xdc3   :  { %v6662_v47 = vpop.xlane.xlu1 %6661  ;;  %6866 = vperm.xlu0 %8922, %v6739_v39   ;;  %v8214_v25 = vmul.f32 -1.442695, %v13003_v15 }
 0xdc4   :  { %v6706_v57 = vadd.f32 %v12901_v19, %v6662_v47  ;;  %v13008_v47 = vadd.f32 %v8822_v58, %v8211_v2 }
 0xdc5   :  { %9708 = vpow2.f32 %v8214_v25 }
 0xdc6   :  { %v6738_v18 = vmul.f32 %v6706_v57, %v13402_v53  ;;  %v8215_v53 = vmul.f32 -1.442695, %v13008_v47 }
 0xdc8   :  { %6863 = vperm.xlu1 %8923, %v6738_v18   ;;  %9710 = vpow2.f32 %v8215_v53 }
 0xddf   :  { %v6777_v41 = vpop.permute.xlu1 %6776 }
 0xde0   :  { %v6875_v8 = vrot.slane %v6777_v41, %v13404_v44 }
 0xde2   :  { %v6774_v29 = vpop.permute.xlu0 %6773 }
 0xde3   :  { %v6871_v5 = vrot.slane %v6774_v29, %v13403_v10 }
 0xde5   :  { %v6876_v26 = vsel %vm3613_vm13, %v6875_v8, %v6871_v5 }
 0xde7   :  { %v6783_v23 = vpop.permute.xlu0 %6782 }
 0xde8   :  { %v6884_v13 = vrot.slane %v6783_v23, %v13404_v44 }
 0xdeb   :  { %v6780_v30 = vpop.permute.xlu1 %6779 }
 0xdec   :  { %v6880_v63 = vrot.slane %v6780_v30, %v13403_v10 }
 0xdee   :  { %v6885_v11 = vsel %vm3613_vm13, %v6884_v13, %v6880_v63 }
 0xdef   :  { %v7012_v37 = vsel %vm3750_vm2, %v6885_v11, %v6876_v26 }
 0xdf2   :  { %v6789_v0 = vpop.permute.xlu0 %6788 }
 0xdf3   :  { %v6786_v28 = vpop.permute.xlu1 %6785  ;;  %v6893_v46 = vrot.slane %v6789_v0, %v13404_v44 }
 0xdf4   :  { %v6889_v27 = vrot.slane %v6786_v28, %v13403_v10  ;;  %v9709_v28 = vpop.eup %9708 }
 0xdf6   :  { %v6894_v56 = vsel %vm3613_vm13, %v6893_v46, %v6889_v27 }
 0xdf7   :  { %v7013_v24 = vsel %vm3752_vm4, %v6894_v56, %v7012_v37 }
 0xdfb   :  { %v6792_v22 = vpop.permute.xlu1 %6791  ;;  %v6795_v31 = vpop.permute.xlu0 %6794 }
 0xdfc   :  { %v6898_v36 = vrot.slane %v6792_v22, %v13403_v10  ;;  %v6902_v49 = vrot.slane %v6795_v31, %v13404_v44  ;;  %v7437_v31 = vadd.f32 1.0, %v9709_v28 }
 0xdfe   :  { %v6903_v52 = vsel %vm3613_vm13, %v6902_v49, %v6898_v36  ;;  %9712 = vrcp.f32 %v7437_v31 }
 0xdff   :  { %v6801_v60 = vpop.permute.xlu0 %6800  ;;  %v7014_v12 = vsel %vm3754_vm5, %v6903_v52, %v7013_v24 }
 0xe00   :  { %v6911_v51 = vrot.slane %v6801_v60, %v13404_v44  ;;  %v9711_v60 = vpop.eup %9710 }
 0xe02   :  { %v6798_v48 = vpop.permute.xlu1 %6797 }
 0xe03   :  { %v6907_v20 = vrot.slane %v6798_v48, %v13403_v10 }
 0xe05   :  { %v6912_v35 = vsel %vm3613_vm13, %v6911_v51, %v6907_v20 }
 0xe06   :  { %v6807_v19 = vpop.permute.xlu0 %6806  ;;  %v7015_v32 = vsel %vm3756_vm7, %v6912_v35, %v7014_v12 }
 0xe07   :  { %v6804_v3 = vpop.permute.xlu1 %6803  ;;  %v6920_v54 = vrot.slane %v6807_v19, %v13404_v44  ;;  %v7438_v19 = vadd.f32 1.0, %v9711_v60  ;;  %v13409_v60 = vld [vmem:[#allocation122_spill] sm:$0xff] }
 0xe08   :  { %v6916_v16 = vrot.slane %v6804_v3, %v13403_v10 }
 0xe09   :  { %9714 = vrcp.f32 %v7438_v19  ;;  %v9727_v19 = vld [vmem:[%s13235_s3 + $0x8] sm:$0xff] }
 0xe0a   :  { %v6921_v55 = vsel %vm3613_vm13, %v6920_v54, %v6916_v16 }
 0xe0b   :  { %v7016_v9 = vsel %vm3758_vm9, %v6921_v55, %v7015_v32 }
 0xe0c   :  { %v6813_v61 = vpop.permute.xlu0 %6812 }
 0xe0d   :  { %v6929_v59 = vrot.slane %v6813_v61, %v13404_v44 }
 0xe0e   :  { %v6810_v33 = vpop.permute.xlu1 %6809 }
 0xe0f   :  { %v6925_v45 = vrot.slane %v6810_v33, %v13403_v10 }
 0xe11   :  { %v6930_v42 = vsel %vm3613_vm13, %v6929_v59, %v6925_v45 }
 0xe12   :  { %v7017_v34 = vsel %vm3760_vm10, %v6930_v42, %v7016_v9 }
 0xe14   :  { %v6819_v50 = vpop.permute.xlu0 %6818 }
 0xe15   :  { %v6938_v17 = vrot.slane %v6819_v50, %v13404_v44 }
 0xe16   :  { %v6816_v38 = vpop.permute.xlu1 %6815 }
 0xe17   :  { %v6934_v14 = vrot.slane %v6816_v38, %v13403_v10  ;;  %v9713_v38 = vpop.eup %9712 }
 0xe19   :  { %v6939_v21 = vsel %vm3613_vm13, %v6938_v17, %v6934_v14 }
 0xe1a   :  { %v7018_v62 = vsel %vm3762_vm11, %v6939_v21, %v7017_v34  ;;  %v7443_v34 = vmul.f32 %v9713_v38, %v13003_v15  ;;  %v7445_v15 = vld [vmem:[%s10321_s19] sm:$0xff] }
 0xe1b   :  { %8801 = vmatprep.mubr.msk.f32.mxu0 %vm1039_vm8, %v7018_v62  ;;  %v7028_v4 = vsel %vm1039_vm8, %v7018_v62, 0.0  ;;  %v7447_v62 = vld [vmem:[%s10321_s19 + $0x10] sm:$0xff] }
 0xe1c   :  { %7029 = vadd.xlane.f32.xlu1 %v7028_v4 }
 0xe1f   :  { %v6825_v40 = vpop.permute.xlu0 %6824 }
 0xe20   :  { %v6822_v39 = vpop.permute.xlu1 %6821  ;;  %v6947_v8 = vrot.slane %v6825_v40, %v13404_v44  ;;  %v7543_v40 = vld [vmem:[%s13406_s13 + $0x10] sm:$0xff] }
 0xe21   :  { %v6943_v13 = vrot.slane %v6822_v39, %v13403_v10  ;;  %v7542_v39 = vld [vmem:[%s13406_s13 + $0x8] sm:$0xff] }
 0xe23   :  { %v6831_v57 = vpop.permute.xlu0 %6830  ;;  %v6948_v26 = vsel %vm3613_vm13, %v6947_v8, %v6943_v13  ;;  %v9728_v13 = vld [vmem:[%s13235_s3] sm:$0xff] }
 0xe24   :  { %v6956_v36 = vrot.slane %v6831_v57, %v13404_v44  ;;  %v7541_v57 = vld [vmem:[%s13406_s13] sm:$0xff] }
 0xe25   :  { %v6828_v18 = vpop.permute.xlu1 %6827  ;;  %v8218_v8 = vld [vmem:[%s10326_s10] ss:$0 sm:$0xff]  ;;  %s10094_s10 = smov 8  }
 0xe26   :  { %v6952_v63 = vrot.slane %v6828_v18, %v13403_v10  ;;  %v13407_v18 = vld [vmem:[#allocation123_spill] sm:$0xff] }
 0xe27   :  { %v6837_v41 = vpop.permute.xlu0 %6836 }
 0xe28   :  { %v6965_v20 = vrot.slane %v6837_v41, %v13404_v44  ;;  %v6957_v11 = vsel %vm3613_vm13, %v6956_v36, %v6952_v63 }
 0xe29   :  { %v6834_v29 = vpop.permute.xlu1 %6833  ;;  %v7019_v58 = vsel %vm3750_vm2, %v6957_v11, %v6948_v26 }
 0xe2a   :  { %v6961_v27 = vrot.slane %v6834_v29, %v13403_v10 }
 0xe2b   :  { %v6843_v30 = vpop.permute.xlu0 %6842 }
 0xe2c   :  { %v6974_v49 = vrot.slane %v6843_v30, %v13404_v44  ;;  %v6966_v56 = vsel %vm3613_vm13, %v6965_v20, %v6961_v27  ;;  %v13408_v30 = vld [vmem:[#allocation124_spill] sm:$0xff]  ;;  %v13411_v20 = vmov 0.0  }
 0xe2d   :  { %v6840_v23 = vpop.permute.xlu1 %6839  ;;  %v7020_v50 = vsel %vm3752_vm4, %v6966_v56, %v7019_v58  ;;  %vm13412_vm4 = vmmov %vm13334_vm0 }
 0xe2e   :  { %v6970_v33 = vrot.slane %v6840_v23, %v13403_v10 }
 0xe30   :  { %v6975_v52 = vsel %vm3613_vm13, %v6974_v49, %v6970_v33 }
 0xe31   :  { %v6849_v0 = vpop.permute.xlu0 %6848  ;;  %v7021_v55 = vsel %vm3754_vm5, %v6975_v52, %v7020_v50 }
 0xe32   :  { %v6846_v22 = vpop.permute.xlu1 %6845  ;;  %v6983_v51 = vrot.slane %v6849_v0, %v13404_v44 }
 0xe33   :  { %v6979_v61 = vrot.slane %v6846_v22, %v13403_v10 }
 0xe35   :  { %v6855_v48 = vpop.permute.xlu0 %6854  ;;  %v6984_v37 = vsel %vm3613_vm13, %v6983_v51, %v6979_v61 }
 0xe36   :  { %v6852_v3 = vpop.permute.xlu1 %6851  ;;  %v6992_v54 = vrot.slane %v6855_v48, %v13404_v44  ;;  %v7022_v32 = vsel %vm3756_vm7, %v6984_v37, %v7021_v55  ;;  %vm13413_vm7 = vmmov %vm13334_vm0 }
 0xe37   :  { %v6988_v16 = vrot.slane %v6852_v3, %v13403_v10 }
 0xe39   :  { %v6993_v24 = vsel %vm3613_vm13, %v6992_v54, %v6988_v16 }
 0xe3a   :  { %v6861_v5 = vpop.permute.xlu0 %6860  ;;  %v7023_v6 = vsel %vm3758_vm9, %v6993_v24, %v7022_v32 }
 0xe3b   :  { %v7001_v35 = vrot.slane %v6861_v5, %v13404_v44 }
 0xe3c   :  { %v6858_v46 = vpop.permute.xlu1 %6857 }
 0xe3d   :  { %v6997_v45 = vrot.slane %v6858_v46, %v13403_v10 }
 0xe3e   :  { %v6867_v59 = vpop.permute.xlu0 %6866 }
 0xe3f   :  { %v7002_v12 = vsel %vm3613_vm13, %v7001_v35, %v6997_v45  ;;  %v7010_v17 = vrot.slane %v6867_v59, %v13404_v44  ;;  %v9715_v44 = vpop.eup %9714 }
 0xe40   :  { %v7024_v9 = vsel %vm3760_vm10, %v7002_v12, %v7023_v6  ;;  %v7444_v25 = vmul.f32 %v9715_v44, %v13008_v47  ;;  %vm13415_vm10 = vmmov %vm13334_vm0 }
 0xe43   :  { %v6864_v42 = vpop.permute.xlu1 %6863 }
 0xe44   :  { %v7006_v14 = vrot.slane %v6864_v42, %v13403_v10  ;;  %v7446_v10 = vld [vmem:[%s10321_s19 + $0x8] sm:$0xff]  ;;  %s13410_s19 = sld [smem:[#allocation46_spill]]  ;;  %v8219_v42 = vld [vmem:[#allocation16] ss:$0 sm:$0xff] }
 0xe46   :  { %v7011_v21 = vsel %vm3613_vm13, %v7010_v17, %v7006_v14 }
 0xe47   :  { %v7025_v2 = vsel %vm3762_vm11, %v7011_v21, %v7024_v9 }
 0xe48   :  { %8802 = vmatmul.mubr.msk.f32.vlgmr.msra.gmra.mxu0 %vm1039_vm8, %v7025_v2  ;;  %v7031_v4 = vsel %vm1039_vm8, %v7025_v2, 0.0 }
 0xe49   :  { %8824 = vmatpush3.msra.mxu0 %v12968_v1  ;;  %8831 = vmatprep.mubr.msk.f32.mxu0 %vm465_vm6, %v7443_v34  ;;  %v7544_v1 = vld [vmem:[%s13406_s13 + $0x18] sm:$0xff] }
 0xe4a   :  { %8825 = vmatprep.subr.mxu0 %v7447_v62  ;;  %7032 = vadd.xlane.f32.xlu0 %v7031_v4  ;;  %v7647_v26 = vld [vmem:[%s13410_s19] sm:$0xff] }
 0xe4b   :  { %8826 = vmatpush3.msra.mxu0 %v7447_v62  ;;  %8834 = vmatprep.subr.mxu1 %v7544_v1 }
 0xe4c   :  { %8827 = vmatprep.subr.mxu0 %v7446_v10  ;;  %8835 = vmatpush3.msra.mxu1 %v7544_v1 }
 0xe4d   :  { %8828 = vmatpush3.msra.mxu0 %v7446_v10  ;;  %8836 = vmatprep.subr.mxu1 %v7543_v40 }
 0xe4e   :  { %8829 = vmatprep.subr.mxu0 %v7445_v15  ;;  %8837 = vmatpush3.msra.mxu1 %v7543_v40 }
 0xe4f   :  { %8830 = vmatpush3.msra.mxu0 %v7445_v15  ;;  %8838 = vmatprep.subr.mxu1 %v7542_v39 }
 0xe50   :  { %8832 = vmatmul.mubr.msk.f32.vlgmr.msra.gmra.mxu0 %vm465_vm6, %v7444_v25  ;;  %8839 = vmatpush3.msra.mxu1 %v7542_v39  ;;  %v8224_v25 = vld [vmem:[#allocation18] ss:$0 sm:$0xff] }
 0xe51   :  { %8840 = vmatprep.subr.mxu1 %v7541_v57 }
 0xe52   :  { %8841 = vmatpush3.msra.mxu1 %v7541_v57 }
 0xea5   :  { %v7030_v47 = vpop.xlane.xlu1 %7029 }
 0xea6   :  { %v7034_v23 = vmul.f32 %v7030_v47, %v13408_v30 }
 0xed3   :  { %v7033_v53 = vpop.xlane.xlu0 %7032 }
 0xed4   :  { %v7035_v41 = vmul.f32 %v7033_v53, %v13407_v18 }
 0xf08   :  { %v8803_v29 = vpop.f32.mrf.mxu0 }
 0xf09   :  { %v7116_v28 = vsub.f32 %v7035_v41, %v8803_v29 }
 0xf0a   :  { %v7106_v0 = vpop.f32.mrf.mxu0 }
 0xf0b   :  { %v7118_v22 = vmul.f32 0.0, %v7116_v28  ;;  %v7115_v31 = vsub.f32 %v7034_v23, %v7106_v0 }
 0xf0d   :  { %v7120_v48 = vadd.f32 %v7118_v22, %v13407_v18  ;;  %v7117_v3 = vmul.f32 %v7115_v31, %v13409_v60 }
 0xf0f   :  { %v7738_v63 = vsub.f32 %v7120_v48, %v9727_v19  ;;  %v7119_v27 = vadd.f32 %v7117_v3, %v13408_v30 }
 0xf10   :  { %v8833_v5 = vpop.f32.mrf.mxu0 }
 0xf11   :  { %vm7740_vm2 = vcmp.ne.f32.partialorder %v7738_v63, %v7738_v63  ;;  %v7737_v36 = vsub.f32 %v7119_v27, %v9728_v13  ;;  %v7531_v33 = vadd.f32 %v8833_v5, %v11971_v43  ;;  %v7648_v43 = vld [vmem:[%s13410_s19 + $0x8] sm:$0xff] }
 0xf12   :  { %v7521_v46 = vpop.f32.mrf.mxu0  ;;  %v8228_v61 = vsel %vm7740_vm2, 1.0, %v13411_v20  ;;  %8845 = vmatprep.subr.mxu0 %v7648_v43 }
 0xf13   :  { %v7530_v11 = vadd.f32 %v7521_v46, %v11969_v7  ;;  %v7748_v49 = vsel %vm13412_vm4, %v8228_v61, -inf  ;;  %vm7739_vm5 = vcmp.ne.f32.partialorder %v7737_v36, %v7737_v36  ;;  %v7540_v45 = vadd.f32 %v8218_v8, %v7531_v33  ;;  %8846 = vmatpush3.msra.mxu0 %v7648_v43 }
 0xf14   :  { %7749 = vmax.xlane.f32.xlu1 %v7748_v49  ;;  %v8227_v16 = vsel %vm7739_vm5, 1.0, %v13411_v20  ;;  %8847 = vmatprep.subr.mxu0 %v7647_v26 }
 0xf15   :  { %v7539_v56 = vadd.f32 %v8218_v8, %v7530_v11  ;;  %v7745_v51 = vsel %vm13413_vm7, %v8227_v16, -inf  ;;  %8848 = vmatpush3.msra.mxu0 %v7647_v26 }
 0xf16   :  { %7746 = vmax.xlane.f32.xlu0 %v7745_v51 }
 0xf17   :  { %8842 = vmatprep.mubr.msk.f32.mxu1 %vm465_vm6, %v7539_v56 }
 0xf18   :  { %8843 = vmatmul.mubr.msk.f32.vlgmr.msra.gmra.mxu1 %vm465_vm6, %v7540_v45  ;;  %vm13414_vm6 = vmmov %vm13334_vm0 }
 0xf9d   :  { %v7750_v7 = vpop.xlane.xlu1 %7749 }
 0xf9f   :  { %v7747_v52 = vpop.xlane.xlu0 %7746 }
 0xfa0   :  { %v7751_v54 = vmax.f32 %v7747_v52, %v7750_v7 }
 0xfa2   :  { %v7752_v58 = vrot.slane %v7751_v54, 4 }
 0xfa4   :  { %v7753_v37 = vmax.f32 %v7751_v54, %v7752_v58 }
 0xfa6   :  { %v7754_v35 = vrot.slane %v7753_v37, 2 }
 0xfa8   :  { %v7755_v59 = vmax.f32 %v7753_v37, %v7754_v35 }
 0xfaa   :  { %v7756_v50 = vrot.slane %v7755_v59, 1 }
 0xfac   :  { %v7757_v24 = vmax.f32 %v7755_v59, %v7756_v50 }
 0xfae   :  { %vm7758_vm9 = vcmp.gt.f32.partialorder %v7757_v24, 0.0 }
 0xfaf   :  { %v7762_v55 = vsel %vm7758_vm9, 0.0, %v7738_v63  ;;  %v7761_v12 = vsel %vm7758_vm9, 0.0, %v7737_v36 }
 0xfb0   :  { %7767 = vrot.lane.b32.xlu1 %v7762_v55, %s10094_s10  ;;  %7765 = vrot.lane.b32.xlu0 %v7761_v12, %s10094_s10 }
 0xfd8   :  { %v8844_v38 = vpop.f32.mrf.mxu1 }
 0xfd9   :  { %v7630_v32 = vadd.f32 %v8844_v38, %v8219_v42 }
 0xfda   :  { %v7624_v17 = vpop.f32.mrf.mxu1 }
 0xfdb   :  { %v8223_v14 = vmul.f32 -1.442695, %v7630_v32  ;;  %v7625_v6 = vadd.f32 %v8219_v42, %v7624_v17 }
 0xfdd   :  { %9716 = vpow2.f32 %v8223_v14  ;;  %v8222_v9 = vmul.f32 -1.442695, %v7625_v6 }
 0xfdf   :  { %9718 = vpow2.f32 %v8222_v9 }
 0xfea   :  { %v9717_v21 = vpop.eup %9716 }
 0xfeb   :  { %v7640_v34 = vadd.f32 1.0, %v9717_v21 }
 0xfec   :  { %v9719_v2 = vpop.eup %9718 }
 0xfed   :  { %v7639_v62 = vadd.f32 1.0, %v9719_v2  ;;  %9720 = vrcp.f32 %v7640_v34 }
 0xfef   :  { %9722 = vrcp.f32 %v7639_v62 }
 0xffa   :  { %v9721_v4 = vpop.eup %9720 }
 0xffb   :  { %v7646_v15 = vmul.f32 %v9721_v4, %v7630_v32 }
 0xffc   :  { %v9723_v10 = vpop.eup %9722 }
 0xffd   :  { %v7645_v44 = vmul.f32 %v9723_v10, %v7625_v6 }
 0xfff   :  { %8849 = vmatprep.mubr.msk.f32.mxu0 %vm1039_vm8, %v7645_v44 }
0x1000   :  { %8850 = vmatmul.mubr.msk.f32.vlgmr.msra.gmra.mxu0 %vm1039_vm8, %v7646_v15 }
0x1022   :  { %v7768_v39 = vpop.permute.xlu1 %7767  ;;  %v7766_v18 = vpop.permute.xlu0 %7765 }
0x10c0   :  { %v8851_v1 = vpop.f32.mrf.mxu0 }
0x10c1   :  { %v7734_v40 = vadd.f32 %v8851_v1, %v8224_v25 }
0x10c2   :  { %v7728_v57 = vpop.f32.mrf.mxu0 }
0x10c3   :  { %v7772_v53 = vsel %vm13414_vm6, %v7734_v40, %v7768_v39  ;;  %v7729_v47 = vadd.f32 %v8224_v25, %v7728_v57 }
0x10c4   :  { %v7774_v41 = vsel %vm1039_vm8, %v7772_v53, 0.0 }
0x10c5   :  { %7776 = vst [vmem:[%s10331_s16 + $0x8] sm:$0xff] %v7774_v41  ;;  %v7771_v29 = vsel %vm13415_vm10, %v7729_v47, %v7766_v18 }
0x10c6   :  { %v7773_v30 = vsel %vm1039_vm8, %v7771_v29, 0.0 }
0x10c7   :  { %7775 = vst [vmem:[%s10331_s16] sm:$0xff] %v7773_v30 }
0x10c8   :  { %7781 = vsyncpa [#allocation6], 1 }
0x10c9   :  { %7782 = vsyncpa [#allocation8], 1 }
0x10ca   :  { %7783 = vsyncpa [#allocation11], 1 }
0x10cb   :  { %7784 = vsyncpa [#allocation14], 1 }
0x10cc   :  { %7785 = vsyncpa [#allocation17], 1 }
0x10cd   :  { %7786 = vsyncpa [#allocation20], 1 }
0x10ce   :  { %7787 = vsyncpa [#allocation23], 1 }
0x10cf   :  { %7788 = vsyncpa [#allocation26], 1 }

</bundles_post_ra>
